<compile_context>
chip_gen: v7x
topology: tpu7x:2x2x1
jax: 0.10.0
libtpu: 0.0.40
codegen_flags: <defaults>
</compile_context>

<pallas_src>
import functools

import jax
import jax.numpy as jnp
from jax.experimental import pallas as pl
from jax.experimental.pallas import tpu as pltpu

# Feature sizes implied by the module definition.
D_POS = 60     # positional-encoded xyz
D_DIR = 24     # positional-encoded view direction (280 - 256)
D_HID = 256
D_HID2 = 128
D_PACK = 128   # packed input lanes: x in [0, 60), dir in [64, 88)
DIR_OFF = 64
D_XD_OUT = 2 * D_HID + D_HID2   # 640 = [linear1 | linear6-x | linear10-dir]


def _nerf_kernel(
    xd_ref,
    w_xd,                      # (128, 640) = [W1 | W6b | W10b], bf16
    b1, w2, b2, w3, b3, w4, b4, w5, b5,
    w6a, b6, w7, b7, w8, b8,
    w9a, b9a,                  # fused linear9 + linear_alpha: (256, 384)
    w10a, b10,
    w11, b11,                  # linear11 padded to 4 output lanes
    out_ref,
):
    f32 = jnp.float32
    bf16 = jnp.bfloat16

    xd = xd_ref[...]                                   # (T, 128) bf16

    def mm(h_bf16, w_ref):
        return jnp.dot(h_bf16, w_ref[...], preferred_element_type=f32)

    def lin(h_f32, w_ref, b_ref):
        return mm(h_f32.astype(bf16), w_ref) + b_ref[...]

    relu = lambda v: jnp.maximum(v, 0.0)

    # One fused MXU launch for every xd-consuming matmul. Column slices are at
    # 128-lane-aligned offsets (0 / 256 / 512), so they are clean layout-wise.
    xd_all = mm(xd, w_xd)                              # (T, 640) f32
    xd1 = xd_all[:, :D_HID]                            # linear1 partial
    xd6 = xd_all[:, D_HID:2 * D_HID]                   # linear6 x-partial
    xd10 = xd_all[:, 2 * D_HID:2 * D_HID + D_HID2]     # linear10 dir-partial

    x1 = relu(xd1 + b1[...])
    x2 = relu(lin(x1, w2, b2))
    x3 = relu(lin(x2, w3, b3))
    x4 = relu(lin(x3, w4, b4)) + x1
    x5 = relu(lin(x4, w5, b5))
    # linear6 over concat((x5, x), dim=1) -> x5 @ W6a + precomputed xd6 + b6.
    x6 = relu(mm(x5.astype(bf16), w6a) + xd6 + b6[...])
    x7 = relu(lin(x6, w7, b7))
    x8 = relu(lin(x7, w8, b8))
    # Fused linear9 + linear_alpha: cols [0,256) -> x9 pre-act, col 256 -> alpha.
    y9 = lin(x8, w9a, b9a)                             # (T, 384)
    alpha = y9[:, D_HID:D_HID + 1]                     # (T, 1), no relu / no sigmoid
    x9 = relu(y9[:, :D_HID])
    # linear10 over concat((x9, dir), dim=1) -> x9 @ W10a + precomputed xd10 + b10.
    x11 = relu(mm(x9.astype(bf16), w10a) + xd10 + b10[...])
    rgb4 = jax.nn.sigmoid(lin(x11, w11, b11))          # (T, 4); lane 3 unused (=0.5)
    # Merge rgb (lanes 0..2) and alpha (lane 3) into one lane-block store.
    lane = jax.lax.broadcasted_iota(jnp.int32, rgb4.shape, 1)
    out_ref[...] = jnp.where(
        lane < 3, rgb4, jnp.broadcast_to(alpha, rgb4.shape)
    ).astype(out_ref.dtype)


def init_params(key):
    """PyTorch-default-style init: U(-1/sqrt(in), 1/sqrt(in)); weights stored (out, in)."""
    dims = {
        "linear1": (D_HID, D_POS),
        "linear2": (D_HID, D_HID),
        "linear3": (D_HID, D_HID),
        "linear4": (D_HID, D_HID),
        "linear5": (D_HID, D_HID),
        "linear6": (D_HID, D_HID + D_POS),
        "linear7": (D_HID, D_HID),
        "linear8": (D_HID, D_HID),
        "linear_alpha": (1, D_HID),
        "linear9": (D_HID, D_HID),
        "linear10": (D_HID2, D_HID + D_DIR),
        "linear11": (3, D_HID2),
    }
    params = {}
    for name, (out_f, in_f) in dims.items():
        key, kw, kb = jax.random.split(key, 3)
        bound = 1.0 / jnp.sqrt(jnp.float32(in_f))
        params[name] = {
            "w": jax.random.uniform(kw, (out_f, in_f), jnp.float32, -bound, bound),
            "b": jax.random.uniform(kb, (out_f,), jnp.float32, -bound, bound),
        }
    return params


def _flatten_params_for_kernel(params):
    """Weights -> bf16 (in, out), biases -> f32 (1, out); pad/fuse for the kernel layout."""
    bf16 = jnp.bfloat16
    f32 = jnp.float32

    def wT(name):
        return jnp.transpose(params[name]["w"]).astype(bf16)    # (in, out) bf16

    def b2(name):
        return params[name]["b"][None, :].astype(f32)            # (1, out) f32

    # Combined xd weight (128, 640): cols [0,256) = linear1, [256,512) = the
    # x-columns of linear6, [512,640) = the dir-columns of linear10. Rows map
    # to xd's packed lanes (x in rows 0..59, dir in rows 64..87, rest zero).
    w6 = wT("linear6")                                           # (316, 256)
    w10 = wT("linear10")                                         # (280, 128)
    w_xd = jnp.zeros((D_PACK, D_XD_OUT), bf16)
    w_xd = w_xd.at[:D_POS, :D_HID].set(wT("linear1"))
    w_xd = w_xd.at[:D_POS, D_HID:2 * D_HID].set(w6[D_HID:, :])
    w_xd = w_xd.at[DIR_OFF:DIR_OFF + D_DIR, 2 * D_HID:].set(w10[D_HID:, :])

    w6a = w6[:D_HID, :]                                          # (256, 256)
    w10a = w10[:D_HID, :]                                        # (256, 128)

    # Fused linear9 + linear_alpha head: (256, 384); col 256 = alpha, 257.. = zero pad.
    w9a = jnp.zeros((D_HID, 3 * D_HID2), bf16)
    w9a = w9a.at[:, :D_HID].set(wT("linear9"))
    w9a = w9a.at[:, D_HID:D_HID + 1].set(wT("linear_alpha"))
    b9a = jnp.zeros((1, 3 * D_HID2), f32)
    b9a = b9a.at[:, :D_HID].set(b2("linear9"))
    b9a = b9a.at[:, D_HID:D_HID + 1].set(b2("linear_alpha"))

    # linear11 padded to 4 output lanes (rgb in 0..2).
    w11 = jnp.zeros((D_HID2, 4), bf16).at[:, :3].set(wT("linear11"))
    b11 = jnp.zeros((1, 4), f32).at[:, :3].set(b2("linear11"))

    return [
        w_xd,
        b2("linear1"),
        wT("linear2"), b2("linear2"),
        wT("linear3"), b2("linear3"),
        wT("linear4"), b2("linear4"),
        wT("linear5"), b2("linear5"),
        w6a, b2("linear6"),
        wT("linear7"), b2("linear7"),
        wT("linear8"), b2("linear8"),
        w9a, b9a,
        w10a, b2("linear10"),
        w11, b11,
    ]


def _round_up(v, m):
    return ((v + m - 1) // m) * m


def _choose_tile(n, tile_n):
    # Keep at least 2 grid steps when the batch allows (so both v7x TCs are
    # used under dimension_semantics=("parallel",)); tiles are multiples of 256.
    return min(tile_n, max(256, _round_up(pl.cdiv(n, 2), 256)))


def _vmem_limit_bytes():
    # ~3/4 of physical VMEM, capped at 96 MiB: 96 MiB on v5e/v6e (128 MiB
    # physical), 48 MiB on v7x (64 MiB physical). Fall back to the v7x-safe
    # budget if the hardware query is unavailable.
    try:
        cap = int(pltpu.get_tpu_info().vmem_capacity_bytes)
        return int(min(96 * 1024 * 1024, (cap * 3) // 4))
    except Exception:  # pragma: no cover - defensive fallback
        return 48 * 1024 * 1024


@functools.partial(jax.jit, static_argnames=("tile_n",))
def nerf_forward(x, direction, params, *, tile_n=2048):
    n = x.shape[0]
    tile = _choose_tile(n, tile_n)
    n_pad = _round_up(n, tile)
    grid = (n_pad // tile,)

    # Lane-dense packed input built directly in bf16:
    # x in lanes [0,60), dir in lanes [64,88), rest zero.
    xd = jnp.zeros((n_pad, D_PACK), jnp.bfloat16)
    xd = xd.at[:n, :D_POS].set(x.astype(jnp.bfloat16))
    xd = xd.at[:n, DIR_OFF:DIR_OFF + D_DIR].set(direction.astype(jnp.bfloat16))

    flat = _flatten_params_for_kernel(params)

    full_spec = lambda arr: pl.BlockSpec(arr.shape, lambda i: (0, 0))
    in_specs = [pl.BlockSpec((tile, D_PACK), lambda i: (i, 0))] + [
        full_spec(a) for a in flat
    ]
    out_specs = pl.BlockSpec((tile, 4), lambda i: (i, 0))
    out_shape = jax.ShapeDtypeStruct((n_pad, 4), jnp.float32)

    # Every bf16 array in `flat` is a matmul weight: flops/row = 2 * sum(K*N).
    flops_per_row = 2 * sum(
        int(a.size) for a in flat if a.dtype == jnp.bfloat16
    )
    weight_bytes = sum(int(a.size) * a.dtype.itemsize for a in flat)
    cost = pl.CostEstimate(
        flops=flops_per_row * n_pad,
        transcendentals=4 * n_pad,
        bytes_accessed=weight_bytes + n_pad * (D_PACK * 2 + 4 * 4),
    )

    out = pl.pallas_call(
        _nerf_kernel,
        out_shape=out_shape,
        grid=grid,
        in_specs=in_specs,
        out_specs=out_specs,
        compiler_params=pltpu.CompilerParams(
            dimension_semantics=("parallel",),
            vmem_limit_bytes=_vmem_limit_bytes(),
        ),
        cost_estimate=cost,
    )(xd, *flat)

    rgb = out[:n, 0:3]
    alpha = out[:n, 3:4]
    return rgb, alpha


def nerf_reference_f32(x, direction, params):
    """Pure-f32 JAX reference mirroring the PyTorch forward exactly."""
    def lin(h, name):
        p = params[name]
        return h @ p["w"].T + p["b"]

    relu = jax.nn.relu
    x1 = relu(lin(x, "linear1"))
    x2 = relu(lin(x1, "linear2"))
    x3 = relu(lin(x2, "linear3"))
    x4 = relu(lin(x3, "linear4")) + x1
    x5 = relu(lin(x4, "linear5"))
    x6 = relu(lin(jnp.concatenate((x5, x), axis=1), "linear6"))
    x7 = relu(lin(x6, "linear7"))
    x8 = relu(lin(x7, "linear8"))
    alpha = lin(x8, "linear_alpha")
    x9 = relu(lin(x8, "linear9"))
    x11 = relu(lin(jnp.concatenate((x9, direction), axis=1), "linear10"))
    rgb = jax.nn.sigmoid(lin(x11, "linear11"))
    return rgb, alpha


def nerf_reference_bf16(x, direction, params):
    """Reference matching the kernel precision: bf16 dot inputs, f32 accumulation."""
    bf16 = jnp.bfloat16
    f32 = jnp.float32

    def mm(h, w):
        return jnp.dot(h.astype(bf16), w.astype(bf16), preferred_element_type=f32)

    def lin(h, name):
        return mm(h, params[name]["w"].T) + params[name]["b"]

    relu = jax.nn.relu
    x1 = relu(lin(x, "linear1"))
    x2 = relu(lin(x1, "linear2"))
    x3 = relu(lin(x2, "linear3"))
    x4 = relu(lin(x3, "linear4")) + x1
    x5 = relu(lin(x4, "linear5"))
    w6 = params["linear6"]["w"].T
    x6 = relu(mm(x5, w6[:D_HID]) + mm(x, w6[D_HID:]) + params["linear6"]["b"])
    x7 = relu(lin(x6, "linear7"))
    x8 = relu(lin(x7, "linear8"))
    alpha = lin(x8, "linear_alpha")
    x9 = relu(lin(x8, "linear9"))
    w10 = params["linear10"]["w"].T
    x11 = relu(mm(x9, w10[:D_HID]) + mm(direction, w10[D_HID:]) + params["linear10"]["b"])
    rgb = jax.nn.sigmoid(lin(x11, "linear11"))
    return rgb, alpha


if __name__ == "__main__":
    key = jax.random.PRNGKey(0)
    kp, kx, kd = jax.random.split(key, 3)

    params = init_params(kp)

    N = 1024  # small test batch; effective tile = 512, grid = 2
    x = jax.random.normal(kx, (N, D_POS), jnp.float32)
    direction = jax.random.normal(kd, (N, D_DIR), jnp.float32)

    rgb, alpha = nerf_forward(x, direction, params)
    rgb, alpha = jax.block_until_ready((rgb, alpha))

    assert rgb.shape == (N, 3) and alpha.shape == (N, 1)

    # Tight check vs. a precision-matched (bf16-matmul) JAX reference.
    rgb_m, alpha_m = nerf_reference_bf16(x, direction, params)
    assert jnp.allclose(rgb, rgb_m, atol=5e-3, rtol=5e-3)
    assert jnp.allclose(alpha, alpha_m, atol=5e-3, rtol=5e-3)

    # Loose sanity check vs. the full-f32 PyTorch-equivalent reference
    # (bf16 matmuls drift slightly from f32 over 11 layers).
    rgb_f, alpha_f = nerf_reference_f32(x, direction, params)
    assert jnp.allclose(rgb, rgb_f, atol=0.1)
    assert jnp.allclose(alpha, alpha_f, atol=0.3)

    print("KERNEL_OK")
</pallas_src>

<mosaic_0001>
module attributes {stable_mosaic.version = 11 : i64} {
  func.func @_nerf_kernel(%arg0: i32, %arg1: memref<512x128xbf16, #tpu.memory_space<vmem>>, %arg2: memref<128x640xbf16, #tpu.memory_space<vmem>>, %arg3: memref<1x256xf32, #tpu.memory_space<vmem>>, %arg4: memref<256x256xbf16, #tpu.memory_space<vmem>>, %arg5: memref<1x256xf32, #tpu.memory_space<vmem>>, %arg6: memref<256x256xbf16, #tpu.memory_space<vmem>>, %arg7: memref<1x256xf32, #tpu.memory_space<vmem>>, %arg8: memref<256x256xbf16, #tpu.memory_space<vmem>>, %arg9: memref<1x256xf32, #tpu.memory_space<vmem>>, %arg10: memref<256x256xbf16, #tpu.memory_space<vmem>>, %arg11: memref<1x256xf32, #tpu.memory_space<vmem>>, %arg12: memref<256x256xbf16, #tpu.memory_space<vmem>>, %arg13: memref<1x256xf32, #tpu.memory_space<vmem>>, %arg14: memref<256x256xbf16, #tpu.memory_space<vmem>>, %arg15: memref<1x256xf32, #tpu.memory_space<vmem>>, %arg16: memref<256x256xbf16, #tpu.memory_space<vmem>>, %arg17: memref<1x256xf32, #tpu.memory_space<vmem>>, %arg18: memref<256x384xbf16, #tpu.memory_space<vmem>>, %arg19: memref<1x384xf32, #tpu.memory_space<vmem>>, %arg20: memref<256x128xbf16, #tpu.memory_space<vmem>>, %arg21: memref<1x128xf32, #tpu.memory_space<vmem>>, %arg22: memref<128x4xbf16, #tpu.memory_space<vmem>>, %arg23: memref<1x4xf32, #tpu.memory_space<vmem>>, %arg24: memref<512x4xf32, #tpu.memory_space<vmem>>) attributes {dimension_semantics = [#tpu.dimension_semantics<parallel>], iteration_bounds = array<i64: 2>, scalar_prefetch = 0 : i64, scratch_operands = 0 : i64, tpu.core_type = #tpu.core_type<tc>, window_params = [{transform_indices = @transform_0, window_bounds = array<i64: 512, 128>}, {pipeline_mode = #tpu.pipeline_mode<synchronous>, transform_indices = @transform_1, window_bounds = array<i64: 128, 640>}, {pipeline_mode = #tpu.pipeline_mode<synchronous>, transform_indices = @transform_2, window_bounds = array<i64: 1, 256>}, {pipeline_mode = #tpu.pipeline_mode<synchronous>, transform_indices = @transform_3, window_bounds = array<i64: 256, 256>}, {pipeline_mode = #tpu.pipeline_mode<synchronous>, transform_indices = @transform_4, window_bounds = array<i64: 1, 256>}, {pipeline_mode = #tpu.pipeline_mode<synchronous>, transform_indices = @transform_5, window_bounds = array<i64: 256, 256>}, {pipeline_mode = #tpu.pipeline_mode<synchronous>, transform_indices = @transform_6, window_bounds = array<i64: 1, 256>}, {pipeline_mode = #tpu.pipeline_mode<synchronous>, transform_indices = @transform_7, window_bounds = array<i64: 256, 256>}, {pipeline_mode = #tpu.pipeline_mode<synchronous>, transform_indices = @transform_8, window_bounds = array<i64: 1, 256>}, {pipeline_mode = #tpu.pipeline_mode<synchronous>, transform_indices = @transform_9, window_bounds = array<i64: 256, 256>}, {pipeline_mode = #tpu.pipeline_mode<synchronous>, transform_indices = @transform_10, window_bounds = array<i64: 1, 256>}, {pipeline_mode = #tpu.pipeline_mode<synchronous>, transform_indices = @transform_11, window_bounds = array<i64: 256, 256>}, {pipeline_mode = #tpu.pipeline_mode<synchronous>, transform_indices = @transform_12, window_bounds = array<i64: 1, 256>}, {pipeline_mode = #tpu.pipeline_mode<synchronous>, transform_indices = @transform_13, window_bounds = array<i64: 256, 256>}, {pipeline_mode = #tpu.pipeline_mode<synchronous>, transform_indices = @transform_14, window_bounds = array<i64: 1, 256>}, {pipeline_mode = #tpu.pipeline_mode<synchronous>, transform_indices = @transform_15, window_bounds = array<i64: 256, 256>}, {pipeline_mode = #tpu.pipeline_mode<synchronous>, transform_indices = @transform_16, window_bounds = array<i64: 1, 256>}, {pipeline_mode = #tpu.pipeline_mode<synchronous>, transform_indices = @transform_17, window_bounds = array<i64: 256, 384>}, {pipeline_mode = #tpu.pipeline_mode<synchronous>, transform_indices = @transform_18, window_bounds = array<i64: 1, 384>}, {pipeline_mode = #tpu.pipeline_mode<synchronous>, transform_indices = @transform_19, window_bounds = array<i64: 256, 128>}, {pipeline_mode = #tpu.pipeline_mode<synchronous>, transform_indices = @transform_20, window_bounds = array<i64: 1, 128>}, {pipeline_mode = #tpu.pipeline_mode<synchronous>, transform_indices = @transform_21, window_bounds = array<i64: 128, 4>}, {pipeline_mode = #tpu.pipeline_mode<synchronous>, transform_indices = @transform_22, window_bounds = array<i64: 1, 4>}, {transform_indices = @transform_23, window_bounds = array<i64: 512, 4>}]} {
    %c0 = arith.constant 0 : index
    %c0_0 = arith.constant 0 : index
    %0 = vector.load %arg1[%c0, %c0_0] : memref<512x128xbf16, #tpu.memory_space<vmem>>, vector<512x128xbf16>
    %c0_1 = arith.constant 0 : index
    %c0_2 = arith.constant 0 : index
    %1 = vector.load %arg2[%c0_1, %c0_2] : memref<128x640xbf16, #tpu.memory_space<vmem>>, vector<128x640xbf16>
    %cst = arith.constant dense<0.000000e+00> : vector<512x640xf32>
    %2 = tpu.matmul %0, %1, %cst {dimension_numbers = #tpu.dot_dimension_numbers<[1], [0], [0], [1], [0, 0, 1, 1], [], []>} : vector<512x128xbf16>, vector<128x640xbf16>, vector<512x640xf32> -> vector<512x640xf32>
    %3 = vector.extract_strided_slice %2 {offsets = [0, 0], sizes = [512, 256], strides = [1, 1]} : vector<512x640xf32> to vector<512x256xf32>
    %4 = vector.extract_strided_slice %2 {offsets = [0, 256], sizes = [512, 256], strides = [1, 1]} : vector<512x640xf32> to vector<512x256xf32>
    %5 = vector.extract_strided_slice %2 {offsets = [0, 512], sizes = [512, 128], strides = [1, 1]} : vector<512x640xf32> to vector<512x128xf32>
    %c0_3 = arith.constant 0 : index
    %c0_4 = arith.constant 0 : index
    %6 = vector.load %arg3[%c0_3, %c0_4] : memref<1x256xf32, #tpu.memory_space<vmem>>, vector<1x256xf32>
    %7 = vector.broadcast %6 : vector<1x256xf32> to vector<512x256xf32>
    %8 = arith.addf %3, %7 : vector<512x256xf32>
    %cst_5 = arith.constant 0.000000e+00 : f32
    %9 = vector.broadcast %cst_5 : f32 to vector<512x256xf32>
    %10 = arith.maximumf %8, %9 : vector<512x256xf32>
    %11 = arith.truncf %10 : vector<512x256xf32> to vector<512x256xbf16>
    %c0_6 = arith.constant 0 : index
    %c0_7 = arith.constant 0 : index
    %12 = vector.load %arg4[%c0_6, %c0_7] : memref<256x256xbf16, #tpu.memory_space<vmem>>, vector<256x256xbf16>
    %cst_8 = arith.constant dense<0.000000e+00> : vector<512x256xf32>
    %13 = tpu.matmul %11, %12, %cst_8 {dimension_numbers = #tpu.dot_dimension_numbers<[1], [0], [0], [1], [0, 0, 1, 1], [], []>} : vector<512x256xbf16>, vector<256x256xbf16>, vector<512x256xf32> -> vector<512x256xf32>
    %c0_9 = arith.constant 0 : index
    %c0_10 = arith.constant 0 : index
    %14 = vector.load %arg5[%c0_9, %c0_10] : memref<1x256xf32, #tpu.memory_space<vmem>>, vector<1x256xf32>
    %15 = vector.broadcast %14 : vector<1x256xf32> to vector<512x256xf32>
    %16 = arith.addf %13, %15 : vector<512x256xf32>
    %cst_11 = arith.constant 0.000000e+00 : f32
    %17 = vector.broadcast %cst_11 : f32 to vector<512x256xf32>
    %18 = arith.maximumf %16, %17 : vector<512x256xf32>
    %19 = arith.truncf %18 : vector<512x256xf32> to vector<512x256xbf16>
    %c0_12 = arith.constant 0 : index
    %c0_13 = arith.constant 0 : index
    %20 = vector.load %arg6[%c0_12, %c0_13] : memref<256x256xbf16, #tpu.memory_space<vmem>>, vector<256x256xbf16>
    %cst_14 = arith.constant dense<0.000000e+00> : vector<512x256xf32>
    %21 = tpu.matmul %19, %20, %cst_14 {dimension_numbers = #tpu.dot_dimension_numbers<[1], [0], [0], [1], [0, 0, 1, 1], [], []>} : vector<512x256xbf16>, vector<256x256xbf16>, vector<512x256xf32> -> vector<512x256xf32>
    %c0_15 = arith.constant 0 : index
    %c0_16 = arith.constant 0 : index
    %22 = vector.load %arg7[%c0_15, %c0_16] : memref<1x256xf32, #tpu.memory_space<vmem>>, vector<1x256xf32>
    %23 = vector.broadcast %22 : vector<1x256xf32> to vector<512x256xf32>
    %24 = arith.addf %21, %23 : vector<512x256xf32>
    %cst_17 = arith.constant 0.000000e+00 : f32
    %25 = vector.broadcast %cst_17 : f32 to vector<512x256xf32>
    %26 = arith.maximumf %24, %25 : vector<512x256xf32>
    %27 = arith.truncf %26 : vector<512x256xf32> to vector<512x256xbf16>
    %c0_18 = arith.constant 0 : index
    %c0_19 = arith.constant 0 : index
    %28 = vector.load %arg8[%c0_18, %c0_19] : memref<256x256xbf16, #tpu.memory_space<vmem>>, vector<256x256xbf16>
    %cst_20 = arith.constant dense<0.000000e+00> : vector<512x256xf32>
    %29 = tpu.matmul %27, %28, %cst_20 {dimension_numbers = #tpu.dot_dimension_numbers<[1], [0], [0], [1], [0, 0, 1, 1], [], []>} : vector<512x256xbf16>, vector<256x256xbf16>, vector<512x256xf32> -> vector<512x256xf32>
    %c0_21 = arith.constant 0 : index
    %c0_22 = arith.constant 0 : index
    %30 = vector.load %arg9[%c0_21, %c0_22] : memref<1x256xf32, #tpu.memory_space<vmem>>, vector<1x256xf32>
    %31 = vector.broadcast %30 : vector<1x256xf32> to vector<512x256xf32>
    %32 = arith.addf %29, %31 : vector<512x256xf32>
    %cst_23 = arith.constant 0.000000e+00 : f32
    %33 = vector.broadcast %cst_23 : f32 to vector<512x256xf32>
    %34 = arith.maximumf %32, %33 : vector<512x256xf32>
    %35 = arith.addf %34, %10 : vector<512x256xf32>
    %36 = arith.truncf %35 : vector<512x256xf32> to vector<512x256xbf16>
    %c0_24 = arith.constant 0 : index
    %c0_25 = arith.constant 0 : index
    %37 = vector.load %arg10[%c0_24, %c0_25] : memref<256x256xbf16, #tpu.memory_space<vmem>>, vector<256x256xbf16>
    %cst_26 = arith.constant dense<0.000000e+00> : vector<512x256xf32>
    %38 = tpu.matmul %36, %37, %cst_26 {dimension_numbers = #tpu.dot_dimension_numbers<[1], [0], [0], [1], [0, 0, 1, 1], [], []>} : vector<512x256xbf16>, vector<256x256xbf16>, vector<512x256xf32> -> vector<512x256xf32>
    %c0_27 = arith.constant 0 : index
    %c0_28 = arith.constant 0 : index
    %39 = vector.load %arg11[%c0_27, %c0_28] : memref<1x256xf32, #tpu.memory_space<vmem>>, vector<1x256xf32>
    %40 = vector.broadcast %39 : vector<1x256xf32> to vector<512x256xf32>
    %41 = arith.addf %38, %40 : vector<512x256xf32>
    %cst_29 = arith.constant 0.000000e+00 : f32
    %42 = vector.broadcast %cst_29 : f32 to vector<512x256xf32>
    %43 = arith.maximumf %41, %42 : vector<512x256xf32>
    %44 = arith.truncf %43 : vector<512x256xf32> to vector<512x256xbf16>
    %c0_30 = arith.constant 0 : index
    %c0_31 = arith.constant 0 : index
    %45 = vector.load %arg12[%c0_30, %c0_31] : memref<256x256xbf16, #tpu.memory_space<vmem>>, vector<256x256xbf16>
    %cst_32 = arith.constant dense<0.000000e+00> : vector<512x256xf32>
    %46 = tpu.matmul %44, %45, %cst_32 {dimension_numbers = #tpu.dot_dimension_numbers<[1], [0], [0], [1], [0, 0, 1, 1], [], []>} : vector<512x256xbf16>, vector<256x256xbf16>, vector<512x256xf32> -> vector<512x256xf32>
    %47 = arith.addf %46, %4 : vector<512x256xf32>
    %c0_33 = arith.constant 0 : index
    %c0_34 = arith.constant 0 : index
    %48 = vector.load %arg13[%c0_33, %c0_34] : memref<1x256xf32, #tpu.memory_space<vmem>>, vector<1x256xf32>
    %49 = vector.broadcast %48 : vector<1x256xf32> to vector<512x256xf32>
    %50 = arith.addf %47, %49 : vector<512x256xf32>
    %cst_35 = arith.constant 0.000000e+00 : f32
    %51 = vector.broadcast %cst_35 : f32 to vector<512x256xf32>
    %52 = arith.maximumf %50, %51 : vector<512x256xf32>
    %53 = arith.truncf %52 : vector<512x256xf32> to vector<512x256xbf16>
    %c0_36 = arith.constant 0 : index
    %c0_37 = arith.constant 0 : index
    %54 = vector.load %arg14[%c0_36, %c0_37] : memref<256x256xbf16, #tpu.memory_space<vmem>>, vector<256x256xbf16>
    %cst_38 = arith.constant dense<0.000000e+00> : vector<512x256xf32>
    %55 = tpu.matmul %53, %54, %cst_38 {dimension_numbers = #tpu.dot_dimension_numbers<[1], [0], [0], [1], [0, 0, 1, 1], [], []>} : vector<512x256xbf16>, vector<256x256xbf16>, vector<512x256xf32> -> vector<512x256xf32>
    %c0_39 = arith.constant 0 : index
    %c0_40 = arith.constant 0 : index
    %56 = vector.load %arg15[%c0_39, %c0_40] : memref<1x256xf32, #tpu.memory_space<vmem>>, vector<1x256xf32>
    %57 = vector.broadcast %56 : vector<1x256xf32> to vector<512x256xf32>
    %58 = arith.addf %55, %57 : vector<512x256xf32>
    %cst_41 = arith.constant 0.000000e+00 : f32
    %59 = vector.broadcast %cst_41 : f32 to vector<512x256xf32>
    %60 = arith.maximumf %58, %59 : vector<512x256xf32>
    %61 = arith.truncf %60 : vector<512x256xf32> to vector<512x256xbf16>
    %c0_42 = arith.constant 0 : index
    %c0_43 = arith.constant 0 : index
    %62 = vector.load %arg16[%c0_42, %c0_43] : memref<256x256xbf16, #tpu.memory_space<vmem>>, vector<256x256xbf16>
    %cst_44 = arith.constant dense<0.000000e+00> : vector<512x256xf32>
    %63 = tpu.matmul %61, %62, %cst_44 {dimension_numbers = #tpu.dot_dimension_numbers<[1], [0], [0], [1], [0, 0, 1, 1], [], []>} : vector<512x256xbf16>, vector<256x256xbf16>, vector<512x256xf32> -> vector<512x256xf32>
    %c0_45 = arith.constant 0 : index
    %c0_46 = arith.constant 0 : index
    %64 = vector.load %arg17[%c0_45, %c0_46] : memref<1x256xf32, #tpu.memory_space<vmem>>, vector<1x256xf32>
    %65 = vector.broadcast %64 : vector<1x256xf32> to vector<512x256xf32>
    %66 = arith.addf %63, %65 : vector<512x256xf32>
    %cst_47 = arith.constant 0.000000e+00 : f32
    %67 = vector.broadcast %cst_47 : f32 to vector<512x256xf32>
    %68 = arith.maximumf %66, %67 : vector<512x256xf32>
    %69 = arith.truncf %68 : vector<512x256xf32> to vector<512x256xbf16>
    %c0_48 = arith.constant 0 : index
    %c0_49 = arith.constant 0 : index
    %70 = vector.load %arg18[%c0_48, %c0_49] : memref<256x384xbf16, #tpu.memory_space<vmem>>, vector<256x384xbf16>
    %cst_50 = arith.constant dense<0.000000e+00> : vector<512x384xf32>
    %71 = tpu.matmul %69, %70, %cst_50 {dimension_numbers = #tpu.dot_dimension_numbers<[1], [0], [0], [1], [0, 0, 1, 1], [], []>} : vector<512x256xbf16>, vector<256x384xbf16>, vector<512x384xf32> -> vector<512x384xf32>
    %c0_51 = arith.constant 0 : index
    %c0_52 = arith.constant 0 : index
    %72 = vector.load %arg19[%c0_51, %c0_52] : memref<1x384xf32, #tpu.memory_space<vmem>>, vector<1x384xf32>
    %73 = vector.broadcast %72 : vector<1x384xf32> to vector<512x384xf32>
    %74 = arith.addf %71, %73 : vector<512x384xf32>
    %75 = vector.extract_strided_slice %74 {offsets = [0, 256], sizes = [512, 1], strides = [1, 1]} : vector<512x384xf32> to vector<512x1xf32>
    %76 = vector.extract_strided_slice %74 {offsets = [0, 0], sizes = [512, 256], strides = [1, 1]} : vector<512x384xf32> to vector<512x256xf32>
    %cst_53 = arith.constant 0.000000e+00 : f32
    %77 = vector.broadcast %cst_53 : f32 to vector<512x256xf32>
    %78 = arith.maximumf %76, %77 : vector<512x256xf32>
    %79 = arith.truncf %78 : vector<512x256xf32> to vector<512x256xbf16>
    %c0_54 = arith.constant 0 : index
    %c0_55 = arith.constant 0 : index
    %80 = vector.load %arg20[%c0_54, %c0_55] : memref<256x128xbf16, #tpu.memory_space<vmem>>, vector<256x128xbf16>
    %cst_56 = arith.constant dense<0.000000e+00> : vector<512x128xf32>
    %81 = tpu.matmul %79, %80, %cst_56 {dimension_numbers = #tpu.dot_dimension_numbers<[1], [0], [0], [1], [0, 0, 1, 1], [], []>} : vector<512x256xbf16>, vector<256x128xbf16>, vector<512x128xf32> -> vector<512x128xf32>
    %82 = arith.addf %81, %5 : vector<512x128xf32>
    %c0_57 = arith.constant 0 : index
    %c0_58 = arith.constant 0 : index
    %83 = vector.load %arg21[%c0_57, %c0_58] : memref<1x128xf32, #tpu.memory_space<vmem>>, vector<1x128xf32>
    %84 = vector.broadcast %83 : vector<1x128xf32> to vector<512x128xf32>
    %85 = arith.addf %82, %84 : vector<512x128xf32>
    %cst_59 = arith.constant 0.000000e+00 : f32
    %86 = vector.broadcast %cst_59 : f32 to vector<512x128xf32>
    %87 = arith.maximumf %85, %86 : vector<512x128xf32>
    %88 = arith.truncf %87 : vector<512x128xf32> to vector<512x128xbf16>
    %c0_60 = arith.constant 0 : index
    %c0_61 = arith.constant 0 : index
    %89 = vector.load %arg22[%c0_60, %c0_61] : memref<128x4xbf16, #tpu.memory_space<vmem>>, vector<128x4xbf16>
    %cst_62 = arith.constant dense<0.000000e+00> : vector<512x4xf32>
    %90 = tpu.matmul %88, %89, %cst_62 {dimension_numbers = #tpu.dot_dimension_numbers<[1], [0], [0], [1], [0, 0, 1, 1], [], []>} : vector<512x128xbf16>, vector<128x4xbf16>, vector<512x4xf32> -> vector<512x4xf32>
    %c0_63 = arith.constant 0 : index
    %c0_64 = arith.constant 0 : index
    %91 = vector.load %arg23[%c0_63, %c0_64] : memref<1x4xf32, #tpu.memory_space<vmem>>, vector<1x4xf32>
    %92 = vector.broadcast %91 : vector<1x4xf32> to vector<512x4xf32>
    %93 = arith.addf %90, %92 : vector<512x4xf32>
    %94 = arith.negf %93 : vector<512x4xf32>
    %95 = math.exp %94 : vector<512x4xf32>
    %cst_65 = arith.constant 1.000000e+00 : f32
    %96 = vector.broadcast %cst_65 : f32 to vector<512x4xf32>
    %97 = arith.addf %96, %95 : vector<512x4xf32>
    %98 = arith.divf %96, %97 : vector<512x4xf32>
    %99 = tpu.iota {dimensions = array<i32: 1>} : vector<512x4xi32>
    %c3_i32 = arith.constant 3 : i32
    %100 = vector.broadcast %c3_i32 : i32 to vector<512x4xi32>
    %101 = arith.cmpi slt, %99, %100 : vector<512x4xi32>
    %102 = vector.shape_cast %75 : vector<512x1xf32> to vector<512x1xf32>
    %103 = vector.broadcast %102 : vector<512x1xf32> to vector<512x4xf32>
    %104 = arith.select %101, %98, %103 : vector<512x4xi1>, vector<512x4xf32>
    %c0_66 = arith.constant 0 : index
    %c0_67 = arith.constant 0 : index
    %105 = vector.load %arg24[%c0_66, %c0_67] : memref<512x4xf32, #tpu.memory_space<vmem>>, vector<512x4xf32>
    tpu.vector_store %arg24[%c0_66, %c0_67], %104 {strides = array<i32>} : memref<512x4xf32, #tpu.memory_space<vmem>>, vector<512x4xf32>,
    return
  }
  func.func @transform_0(%arg0: i32) -> (i32, i32) {
    %c0_i32 = arith.constant 0 : i32
    %c0_i32_0 = arith.constant 0 : i32
    return %arg0, %c0_i32 : i32, i32
  }
  func.func @transform_1(%arg0: i32) -> (i32, i32) {
    %c0_i32 = arith.constant 0 : i32
    %c0_i32_0 = arith.constant 0 : i32
    %c0_i32_1 = arith.constant 0 : i32
    return %c0_i32, %c0_i32_0 : i32, i32
  }
  func.func @transform_2(%arg0: i32) -> (i32, i32) {
    %c0_i32 = arith.constant 0 : i32
    %c0_i32_0 = arith.constant 0 : i32
    %c0_i32_1 = arith.constant 0 : i32
    return %c0_i32, %c0_i32_0 : i32, i32
  }
  func.func @transform_3(%arg0: i32) -> (i32, i32) {
    %c0_i32 = arith.constant 0 : i32
    %c0_i32_0 = arith.constant 0 : i32
    %c0_i32_1 = arith.constant 0 : i32
    return %c0_i32, %c0_i32_0 : i32, i32
  }
  func.func @transform_4(%arg0: i32) -> (i32, i32) {
    %c0_i32 = arith.constant 0 : i32
    %c0_i32_0 = arith.constant 0 : i32
    %c0_i32_1 = arith.constant 0 : i32
    return %c0_i32, %c0_i32_0 : i32, i32
  }
  func.func @transform_5(%arg0: i32) -> (i32, i32) {
    %c0_i32 = arith.constant 0 : i32
    %c0_i32_0 = arith.constant 0 : i32
    %c0_i32_1 = arith.constant 0 : i32
    return %c0_i32, %c0_i32_0 : i32, i32
  }
  func.func @transform_6(%arg0: i32) -> (i32, i32) {
    %c0_i32 = arith.constant 0 : i32
    %c0_i32_0 = arith.constant 0 : i32
    %c0_i32_1 = arith.constant 0 : i32
    return %c0_i32, %c0_i32_0 : i32, i32
  }
  func.func @transform_7(%arg0: i32) -> (i32, i32) {
    %c0_i32 = arith.constant 0 : i32
    %c0_i32_0 = arith.constant 0 : i32
    %c0_i32_1 = arith.constant 0 : i32
    return %c0_i32, %c0_i32_0 : i32, i32
  }
  func.func @transform_8(%arg0: i32) -> (i32, i32) {
    %c0_i32 = arith.constant 0 : i32
    %c0_i32_0 = arith.constant 0 : i32
    %c0_i32_1 = arith.constant 0 : i32
    return %c0_i32, %c0_i32_0 : i32, i32
  }
  func.func @transform_9(%arg0: i32) -> (i32, i32) {
    %c0_i32 = arith.constant 0 : i32
    %c0_i32_0 = arith.constant 0 : i32
    %c0_i32_1 = arith.constant 0 : i32
    return %c0_i32, %c0_i32_0 : i32, i32
  }
  func.func @transform_10(%arg0: i32) -> (i32, i32) {
    %c0_i32 = arith.constant 0 : i32
    %c0_i32_0 = arith.constant 0 : i32
    %c0_i32_1 = arith.constant 0 : i32
    return %c0_i32, %c0_i32_0 : i32, i32
  }
  func.func @transform_11(%arg0: i32) -> (i32, i32) {
    %c0_i32 = arith.constant 0 : i32
    %c0_i32_0 = arith.constant 0 : i32
    %c0_i32_1 = arith.constant 0 : i32
    return %c0_i32, %c0_i32_0 : i32, i32
  }
  func.func @transform_12(%arg0: i32) -> (i32, i32) {
    %c0_i32 = arith.constant 0 : i32
    %c0_i32_0 = arith.constant 0 : i32
    %c0_i32_1 = arith.constant 0 : i32
    return %c0_i32, %c0_i32_0 : i32, i32
  }
  func.func @transform_13(%arg0: i32) -> (i32, i32) {
    %c0_i32 = arith.constant 0 : i32
    %c0_i32_0 = arith.constant 0 : i32
    %c0_i32_1 = arith.constant 0 : i32
    return %c0_i32, %c0_i32_0 : i32, i32
  }
  func.func @transform_14(%arg0: i32) -> (i32, i32) {
    %c0_i32 = arith.constant 0 : i32
    %c0_i32_0 = arith.constant 0 : i32
    %c0_i32_1 = arith.constant 0 : i32
    return %c0_i32, %c0_i32_0 : i32, i32
  }
  func.func @transform_15(%arg0: i32) -> (i32, i32) {
    %c0_i32 = arith.constant 0 : i32
    %c0_i32_0 = arith.constant 0 : i32
    %c0_i32_1 = arith.constant 0 : i32
    return %c0_i32, %c0_i32_0 : i32, i32
  }
  func.func @transform_16(%arg0: i32) -> (i32, i32) {
    %c0_i32 = arith.constant 0 : i32
    %c0_i32_0 = arith.constant 0 : i32
    %c0_i32_1 = arith.constant 0 : i32
    return %c0_i32, %c0_i32_0 : i32, i32
  }
  func.func @transform_17(%arg0: i32) -> (i32, i32) {
    %c0_i32 = arith.constant 0 : i32
    %c0_i32_0 = arith.constant 0 : i32
    %c0_i32_1 = arith.constant 0 : i32
    return %c0_i32, %c0_i32_0 : i32, i32
  }
  func.func @transform_18(%arg0: i32) -> (i32, i32) {
    %c0_i32 = arith.constant 0 : i32
    %c0_i32_0 = arith.constant 0 : i32
    %c0_i32_1 = arith.constant 0 : i32
    return %c0_i32, %c0_i32_0 : i32, i32
  }
  func.func @transform_19(%arg0: i32) -> (i32, i32) {
    %c0_i32 = arith.constant 0 : i32
    %c0_i32_0 = arith.constant 0 : i32
    %c0_i32_1 = arith.constant 0 : i32
    return %c0_i32, %c0_i32_0 : i32, i32
  }
  func.func @transform_20(%arg0: i32) -> (i32, i32) {
    %c0_i32 = arith.constant 0 : i32
    %c0_i32_0 = arith.constant 0 : i32
    %c0_i32_1 = arith.constant 0 : i32
    return %c0_i32, %c0_i32_0 : i32, i32
  }
  func.func @transform_21(%arg0: i32) -> (i32, i32) {
    %c0_i32 = arith.constant 0 : i32
    %c0_i32_0 = arith.constant 0 : i32
    %c0_i32_1 = arith.constant 0 : i32
    return %c0_i32, %c0_i32_0 : i32, i32
  }
  func.func @transform_22(%arg0: i32) -> (i32, i32) {
    %c0_i32 = arith.constant 0 : i32
    %c0_i32_0 = arith.constant 0 : i32
    %c0_i32_1 = arith.constant 0 : i32
    return %c0_i32, %c0_i32_0 : i32, i32
  }
  func.func @transform_23(%arg0: i32) -> (i32, i32) {
    %c0_i32 = arith.constant 0 : i32
    %c0_i32_0 = arith.constant 0 : i32
    return %arg0, %c0_i32 : i32, i32
  }
}

</mosaic_0001>

<bundles_post_ra>
// kernel: nerf_forward.1
= control target key start
LH: loop header
LB: loop body
LE: loop exit
PB: predicated region body
PF: predicated region fallthrough
CT: control target
= control target key end

     0   :  { %s17382_s0 = inlined_call_operand.vmem [shape: bf16[1024,128], index: 0, kind: input, shape index: {}]   ;;  %s17383_s1 = inlined_call_operand.vmem [shape: bf16[128,640], index: 1, kind: input, shape index: {}]   ;;  %s17384_s2 = inlined_call_operand.vmem [shape: f32[1,256], index: 2, kind: input, shape index: {}]   ;;  %s17385_s3 = inlined_call_operand.vmem [shape: bf16[256,256], index: 3, kind: input, shape index: {}]   ;;  %s17386_s4 = inlined_call_operand.vmem [shape: f32[1,256], index: 4, kind: input, shape index: {}]   ;;  %s17387_s5 = inlined_call_operand.vmem [shape: bf16[256,256], index: 5, kind: input, shape index: {}]   ;;  %s17388_s6 = inlined_call_operand.vmem [shape: f32[1,256], index: 6, kind: input, shape index: {}]   ;;  %s17389_s7 = inlined_call_operand.vmem [shape: bf16[256,256], index: 7, kind: input, shape index: {}]   ;;  %s17390_s8 = inlined_call_operand.vmem [shape: f32[1,256], index: 8, kind: input, shape index: {}]   ;;  %s17391_s9 = inlined_call_operand.vmem [shape: bf16[256,256], index: 9, kind: input, shape index: {}]   ;;  %s17392_s10 = inlined_call_operand.vmem [shape: f32[1,256], index: 10, kind: input, shape index: {}]   ;;  %s17393_s11 = inlined_call_operand.vmem [shape: bf16[256,256], index: 11, kind: input, shape index: {}]   ;;  %s17394_s12 = inlined_call_operand.vmem [shape: f32[1,256], index: 12, kind: input, shape index: {}]   ;;  %s17395_s13 = inlined_call_operand.vmem [shape: bf16[256,256], index: 13, kind: input, shape index: {}]   ;;  %s17396_s14 = inlined_call_operand.vmem [shape: f32[1,256], index: 14, kind: input, shape index: {}]   ;;  %s17397_s15 = inlined_call_operand.vmem [shape: bf16[256,256], index: 15, kind: input, shape index: {}]   ;;  %s17398_s16 = inlined_call_operand.vmem [shape: f32[1,256], index: 16, kind: input, shape index: {}]   ;;  %s17399_s17 = inlined_call_operand.vmem [shape: bf16[256,384], index: 17, kind: input, shape index: {}]   ;;  %s17400_s18 = inlined_call_operand.vmem [shape: f32[1,384], index: 18, kind: input, shape index: {}]   ;;  %s17401_s19 = inlined_call_operand.vmem [shape: bf16[256,128], index: 19, kind: input, shape index: {}]   ;;  %s17402_s20 = inlined_call_operand.vmem [shape: f32[1,128], index: 20, kind: input, shape index: {}]   ;;  %s17403_s21 = inlined_call_operand.vmem [shape: bf16[128,4], index: 21, kind: input, shape index: {}]   ;;  %s17404_s22 = inlined_call_operand.vmem [shape: f32[1,4], index: 22, kind: input, shape index: {}]   ;;  %s17405_s23 = inlined_call_operand.vmem [shape: f32[1024,4], index: 23, kind: output, shape index: {}]  }
   0x1   :  { %17600 = sst [smem:[#allocation163_spill]] %s17382_s0 }
   0x2   :  { %17601 = sst [smem:[#allocation164_spill]] %s17383_s1 }
   0x3   :  { %17602 = sst [smem:[#allocation165_spill]] %s17384_s2 }
   0x4   :  { %17603 = sst [smem:[#allocation166_spill]] %s17385_s3 }
   0x5   :  { %17604 = sst [smem:[#allocation167_spill]] %s17386_s4  ;;  %s12794_s4 = smov 0  }
   0x6   :  { %17605 = sst [smem:[#allocation168_spill]] %s17387_s5 }
   0x7   :  { %17606 = sst [smem:[#allocation169_spill]] %s17388_s6 }
   0x8   :  { %17607 = sst [smem:[#allocation170_spill]] %s17389_s7 }
   0x9 LB: > { %17608 = sst [smem:[#allocation2_spill]] %s12671_s4  ;;  %s11060_s30 = sadd.s32 4294967295, %s12671_s4   ;;  %s12671_s4 = sphi %s12794_s4, %s33_s4  }
   0xa   : > { %p11064_p0 = scmp.ge.s32.totalorder %s12671_s4, 1  ;;  %p638_p1 = scmp.lt.s32.totalorder %s12671_s4, 3 }
   0xc   : > { %p639_p2 = pnand %p11064_p0, %p638_p1 }
   0xe   : > { %642 = sbr.rel (%p639_p2) target bundleno = 2847 (0xb1f), region = 112 }
  0x15   : > { %s17609_s5 = sld [smem:[#allocation164_spill]]  ;;  %s11065_s1 = sshll.u32 %s11060_s30, 6  ;;  %v17412_v2 = vmov 0   ;;  %vm10939_vm1 = vcmask 31744  }
  0x16   : > { %1612 = vmatprep.mubr.bf16.mxu1 %v17412_v2  ;;  %p703_p3 = scmp.lt.s32.totalorder %s11065_s1, 127  ;;  %1259 = vmatprep.mubr.bf16.mxu0 %v17412_v2  ;;  %s17610_s28 = sld [smem:[#allocation163_spill]] }
  0x17   : > { %11882 = vset.pattern.permute.xlu0 %v17412_v2  ;;  %11883 = vset.pattern.permute.xlu1 %v17412_v2  ;;  %s17612_s6 = sld [smem:[#allocation168_spill]]  ;;  %s17614_s4 = sld [smem:[#allocation165_spill]] }
  0x18   : > { %s18107_s1 = smov (!%p703_p3, %s11065_s1), 127  ;;  %s17721_s7 = sld [smem:[#allocation167_spill]] }
  0x19   : > { %s11066_s24 = sshll.u32 %s18107_s1, 2  ;;  %s17814_s2 = sld [smem:[#allocation169_spill]] }
  0x1a   : > { %s11068_s27 = sshll.u32 %s18107_s1, 3 }
  0x1b   : > { %v11884_v0 = vld [vmem:[%s17609_s5 + $0xc] ss:$20 sps:$4 sm:$0xff]   ;;  %v11886_v1 = vld [vmem:[%s17609_s5 + $0x8] ss:$20 sps:$4 sm:$0xff]   ;;  %v11889_v4 = vld [vmem:[%s17609_s5 + $0x30] ss:$20 sps:$4 sm:$0xff]   ;;  %s17060_s3 = scalar_lea.vmem %s17405_s23, %s11068_s27 }
  0x1c   : > { %1580 = vmatprep.subr.bf16.mxu1 %v11884_v0  ;;  %v11887_v3 = vld [vmem:[%s17609_s5 + $0x34] ss:$20 sps:$4 sm:$0xff]   ;;  %v11890_v5 = vld [vmem:[%s17609_s5 + $0x5c] ss:$20 sps:$4 sm:$0xff]   ;;  %v11892_v6 = vld [vmem:[%s17609_s5 + $0x58] ss:$20 sps:$4 sm:$0xff]   ;;  %s12836_s29 = scalar_lea.vmem %s17610_s28, %s11066_s24 }
  0x1d   : > { %1581 = vmatpush1.bf16.msra.mxu1 %v11886_v1  ;;  %v11893_v7 = vld [vmem:[%s17609_s5 + $0x84] ss:$20 sps:$4 sm:$0xff]   ;;  %v11895_v8 = vld [vmem:[%s17609_s5 + $0x80] ss:$20 sps:$4 sm:$0xff]   ;;  %v11898_v11 = vld [vmem:[%s17609_s5 + $0xa8] ss:$20 sps:$4 sm:$0xff]  }
  0x1e   : > { %1582 = vmatprep.subr.bf16.mxu1 %v11887_v3  ;;  %v11908_v9 = vld [vmem:[%s17609_s5 + $0x4] ss:$20 sps:$4 sm:$0xff]   ;;  %v11896_v10 = vld [vmem:[%s17609_s5 + $0xac] ss:$20 sps:$4 sm:$0xff]   ;;  %v11899_v13 = vld [vmem:[%s17609_s5 + $0xd4] ss:$20 sps:$4 sm:$0xff]  }
  0x1f   : > { %1227 = vmatprep.subr.bf16.mxu0 %v11908_v9  ;;  %v11914_v12 = vld [vmem:[%s17609_s5] ss:$20 sps:$4 sm:$0xff]   ;;  %v11917_v15 = vld [vmem:[%s17609_s5 + $0x28] ss:$20 sps:$4 sm:$0xff]   ;;  %v11901_v17 = vld [vmem:[%s17609_s5 + $0xd0] ss:$20 sps:$4 sm:$0xff]  }
  0x20   : > { %v11915_v14 = vld [vmem:[%s17609_s5 + $0x2c] ss:$20 sps:$4 sm:$0xff]   ;;  %1228 = vmatpush1.bf16.msra.mxu0 %v11914_v12  ;;  %v11918_v16 = vld [vmem:[%s17609_s5 + $0x54] ss:$20 sps:$4 sm:$0xff]   ;;  %v11902_v18 = vld [vmem:[%s17609_s5 + $0xfc] ss:$20 sps:$4 sm:$0xff]  }
  0x21   : > { %1583 = vmatpush1.bf16.msra.mxu1 %v11889_v4  ;;  %1229 = vmatprep.subr.bf16.mxu0 %v11915_v14  ;;  %v11921_v19 = vld [vmem:[%s17609_s5 + $0x50] ss:$20 sps:$4 sm:$0xff]   ;;  %v11904_v21 = vld [vmem:[%s17609_s5 + $0xf8] ss:$20 sps:$4 sm:$0xff]   ;;  %v11907_v25 = vld [vmem:[%s17609_s5 + $0x120] ss:$20 sps:$4 sm:$0xff]  }
  0x22   : > { %1584 = vmatprep.subr.bf16.mxu1 %v11890_v5  ;;  %v11922_v20 = vld [vmem:[%s17609_s5 + $0x7c] ss:$20 sps:$4 sm:$0xff]   ;;  %v11905_v22 = vld [vmem:[%s17609_s5 + $0x124] ss:$20 sps:$4 sm:$0xff]   ;;  %s17611_s28 = sld [smem:[#allocation166_spill]]  ;;  %v11920_v35 = vld [vmem:[%s12836_s29 + $0x8] sm:$0xff]  }
  0x23   : > { %v11924_v23 = vld [vmem:[%s17609_s5 + $0x78] ss:$20 sps:$4 sm:$0xff]   ;;  %v11910_v27 = vld [vmem:[%s12836_s29] sm:$0xff]   ;;  %v11934_v32 = vld [vmem:[%s17609_s5 + $0xc8] ss:$20 sps:$4 sm:$0xff]   ;;  %s17643_s24 = sld [smem:[#allocation170_spill]] }
  0x24   : > { %1230 = vmatpush1.bf16.msra.mxu0 %v11917_v15  ;;  %v11925_v24 = vld [vmem:[%s17609_s5 + $0xa4] ss:$20 sps:$4 sm:$0xff]   ;;  %v11931_v28 = vld [vmem:[%s17609_s5 + $0xa0] ss:$20 sps:$4 sm:$0xff]   ;;  %v11939_v38 = vld [vmem:[%s17609_s5 + $0x11c] ss:$20 sps:$4 sm:$0xff]  }
  0x25   : > { %1585 = vmatpush1.bf16.msra.mxu1 %v11892_v6  ;;  %1231 = vmatprep.subr.bf16.mxu0 %v11918_v16  ;;  %v11932_v29 = vld [vmem:[%s17609_s5 + $0xcc] ss:$20 sps:$4 sm:$0xff]   ;;  %v11935_v33 = vld [vmem:[%s17609_s5 + $0xf4] ss:$20 sps:$4 sm:$0xff]   ;;  %v11938_v36 = vld [vmem:[%s17609_s5 + $0xf0] ss:$20 sps:$4 sm:$0xff]  }
  0x26   : > { %1586 = vmatprep.subr.bf16.mxu1 %v11893_v7  ;;  %v11941_v39 = vld [vmem:[%s17609_s5 + $0x118] ss:$20 sps:$4 sm:$0xff]   ;;  %v11962_v42 = vld [vmem:[%s17609_s5 + $0x10] ss:$20 sps:$4 sm:$0xff]   ;;  %v11984_v55 = vld [vmem:[%s17609_s5 + $0x60] ss:$20 sps:$4 sm:$0xff]  }
  0x27   : > { %v11927_v45 = vld [vmem:[%s12836_s29 + $0x10] sm:$0xff]   ;;  %v11973_v48 = vld [vmem:[%s17609_s5 + $0x38] ss:$20 sps:$4 sm:$0xff]   ;;  %v11942_v57 = vld [vmem:[%s12836_s29 + $0x20] sm:$0xff]  }
  0x28   : > { %1232 = vmatpush1.bf16.msra.mxu0 %v11921_v19  ;;  %v11913_v26 = vld [vmem:[%s17611_s28 + $0x4] ss:$8 sps:$4 sm:$0xff]   ;;  %v11911_v30 = vld [vmem:[%s17611_s28] ss:$8 sps:$4 sm:$0xff]   ;;  %v11930_v31 = vld [vmem:[%s17611_s28 + $0x14] ss:$8 sps:$4 sm:$0xff]  }
  0x29   : > { %1587 = vmatpush1.bf16.msra.mxu1 %v11895_v8  ;;  %1233 = vmatprep.subr.bf16.mxu0 %v11922_v20  ;;  %v11928_v34 = vld [vmem:[%s17611_s28 + $0x10] ss:$8 sps:$4 sm:$0xff]   ;;  %v11945_v37 = vld [vmem:[%s17611_s28 + $0x24] ss:$8 sps:$4 sm:$0xff]   ;;  %v11943_v40 = vld [vmem:[%s17611_s28 + $0x20] ss:$8 sps:$4 sm:$0xff]  }
  0x2a   : > { %1588 = vmatprep.subr.bf16.mxu1 %v11896_v10  ;;  %v11950_v41 = vld [vmem:[%s17611_s28 + $0x34] ss:$8 sps:$4 sm:$0xff]   ;;  %v11948_v43 = vld [vmem:[%s17611_s28 + $0x30] ss:$8 sps:$4 sm:$0xff]   ;;  %v11955_v44 = vld [vmem:[%s17611_s28 + $0x44] ss:$8 sps:$4 sm:$0xff]  }
  0x2b   : > { %v11953_v46 = vld [vmem:[%s17611_s28 + $0x40] ss:$8 sps:$4 sm:$0xff]   ;;  %v11960_v47 = vld [vmem:[%s17611_s28 + $0x54] ss:$8 sps:$4 sm:$0xff]   ;;  %v11958_v49 = vld [vmem:[%s17611_s28 + $0x50] ss:$8 sps:$4 sm:$0xff]  }
  0x2c   : > { %1234 = vmatpush1.bf16.msra.mxu0 %v11924_v23  ;;  %v11966_v50 = vld [vmem:[%s17611_s28 + $0x64] ss:$8 sps:$4 sm:$0xff]   ;;  %v11937_v51 = vld [vmem:[%s12836_s29 + $0x18] sm:$0xff]   ;;  %v11964_v52 = vld [vmem:[%s17611_s28 + $0x60] ss:$8 sps:$4 sm:$0xff]  }
  0x2d   : > { %1589 = vmatpush1.bf16.msra.mxu1 %v11898_v11  ;;  %1235 = vmatprep.subr.bf16.mxu0 %v11925_v24  ;;  %v11971_v53 = vld [vmem:[%s17611_s28 + $0x74] ss:$8 sps:$4 sm:$0xff]   ;;  %v11969_v54 = vld [vmem:[%s17611_s28 + $0x70] ss:$8 sps:$4 sm:$0xff]   ;;  %v11977_v56 = vld [vmem:[%s17611_s28 + $0x84] ss:$8 sps:$4 sm:$0xff]  }
  0x2e   : > { %1590 = vmatprep.subr.bf16.mxu1 %v11899_v13  ;;  %v11975_v58 = vld [vmem:[%s17611_s28 + $0x80] ss:$8 sps:$4 sm:$0xff]   ;;  %v11982_v59 = vld [vmem:[%s17611_s28 + $0x94] ss:$8 sps:$4 sm:$0xff]   ;;  %v11980_v60 = vld [vmem:[%s17611_s28 + $0x90] ss:$8 sps:$4 sm:$0xff]  }
  0x2f   : > { %v11988_v61 = vld [vmem:[%s17611_s28 + $0xa4] ss:$8 sps:$4 sm:$0xff]   ;;  %v11986_v63 = vld [vmem:[%s17611_s28 + $0xa0] ss:$8 sps:$4 sm:$0xff]   ;;  %v11947_v0 = vld [vmem:[%s12836_s29 + $0x30] sm:$0xff]  }
  0x30   : > { %1236 = vmatpush1.bf16.msra.mxu0 %v11931_v28  ;;  %v11946_v62 = vld [vmem:[%s12836_s29 + $0x28] sm:$0xff]   ;;  %v11991_v1 = vld [vmem:[%s17611_s28 + $0xb0] ss:$8 sps:$4 sm:$0xff]   ;;  %v11993_v3 = vld [vmem:[%s17611_s28 + $0xb4] ss:$8 sps:$4 sm:$0xff]  }
  0x31   : > { %1591 = vmatpush1.bf16.msra.mxu1 %v11901_v17  ;;  %1237 = vmatprep.subr.bf16.mxu0 %v11932_v29  ;;  %v11951_v4 = vld [vmem:[%s12836_s29 + $0x38] sm:$0xff]   ;;  %v11952_v6 = vld [vmem:[%s12836_s29 + $0x40] sm:$0xff]   ;;  %v11956_v9 = vld [vmem:[%s12836_s29 + $0x48] sm:$0xff]  }
  0x32   : > { %1592 = vmatprep.subr.bf16.mxu1 %v11902_v18  ;;  %v11995_v5 = vld [vmem:[%s17609_s5 + $0x88] ss:$20 sps:$4 sm:$0xff]   ;;  %v11999_v8 = vld [vmem:[%s17611_s28 + $0xc4] ss:$8 sps:$4 sm:$0xff]   ;;  %v11957_v10 = vld [vmem:[%s12836_s29 + $0x50] sm:$0xff]  }
  0x33   : > { %v11997_v7 = vld [vmem:[%s17611_s28 + $0xc0] ss:$8 sps:$4 sm:$0xff]   ;;  %v12002_v11 = vld [vmem:[%s17611_s28 + $0xd0] ss:$8 sps:$4 sm:$0xff]   ;;  %v12004_v12 = vld [vmem:[%s17611_s28 + $0xd4] ss:$8 sps:$4 sm:$0xff]  }
  0x34   : > { %1238 = vmatpush1.bf16.msra.mxu0 %v11934_v32  ;;  %v11961_v13 = vld [vmem:[%s12836_s29 + $0x58] sm:$0xff]   ;;  %v12006_v14 = vld [vmem:[%s17609_s5 + $0xb0] ss:$20 sps:$4 sm:$0xff]   ;;  %v12008_v16 = vld [vmem:[%s17611_s28 + $0xe0] ss:$8 sps:$4 sm:$0xff]  }
  0x35   : > { %1593 = vmatpush1.bf16.msra.mxu1 %v11904_v21  ;;  %1239 = vmatprep.subr.bf16.mxu0 %v11935_v33  ;;  %v13044_v15 = vld [vmem:[%s12836_s29 + $0x60] sm:$0xff]   ;;  %v13056_v18 = vld [vmem:[%s12836_s29 + $0x68] sm:$0xff]   ;;  %v13062_v19 = vld [vmem:[%s12836_s29 + $0x70] sm:$0xff]  }
  0x36   : > { %1594 = vmatprep.subr.bf16.mxu1 %v11905_v22  ;;  %v12010_v17 = vld [vmem:[%s17611_s28 + $0xe4] ss:$8 sps:$4 sm:$0xff]   ;;  %v12013_v20 = vld [vmem:[%s17611_s28 + $0xf0] ss:$8 sps:$4 sm:$0xff]   ;;  %v12015_v21 = vld [vmem:[%s17611_s28 + $0xf4] ss:$8 sps:$4 sm:$0xff]  }
  0x37   : > { %v13075_v22 = vld [vmem:[%s12836_s29 + $0x78] sm:$0xff]   ;;  %v13085_v24 = vld [vmem:[%s12836_s29 + $0x80] sm:$0xff]  }
  0x38   : > { %1240 = vmatpush1.bf16.msra.mxu0 %v11938_v36  ;;  %v12017_v23 = vld [vmem:[%s17609_s5 + $0xd8] ss:$20 sps:$4 sm:$0xff]   ;;  %v12018_v28 = vld [vmem:[%s17609_s5 + $0x100] ss:$20 sps:$4 sm:$0xff]   ;;  %v12019_v33 = vld [vmem:[%s17609_s5 + $0x128] ss:$20 sps:$4 sm:$0xff]  }
  0x39   : > { %1595 = vmatpush1.bf16.msra.mxu1 %v11907_v25  ;;  %1241 = vmatprep.subr.bf16.mxu0 %v11939_v38  ;;  %v13092_v25 = vld [vmem:[%s12836_s29 + $0x88] sm:$0xff]   ;;  %v13116_v29 = vld [vmem:[%s12836_s29 + $0xa0] sm:$0xff]   ;;  %v13137_v32 = vld [vmem:[%s12836_s29 + $0xb8] sm:$0xff]  }
  0x3a   : > { %2758 = vmatprep.subr.bf16.mxu1 %v11913_v26  ;;  %v13099_v26 = vld [vmem:[%s12836_s29 + $0x90] sm:$0xff]   ;;  %v12022_v38 = vld [vmem:[%s17612_s6 + $0x4] ss:$8 sps:$4 sm:$0xff]  }
  0x3b   : > { %v13161_v36 = vld [vmem:[%s12836_s29 + $0xd0] sm:$0xff]  }
  0x3c   : > { %1613 = vmatmul.mubr.bf16.vlgmr.msra.gmra.mrb[0].mxu1 %v11910_v27  ;;  %1242 = vmatpush1.bf16.msra.mxu0 %v11941_v39  ;;  %v13178_v39 = vld [vmem:[%s12836_s29 + $0xe0] sm:$0xff]  }
  0x3d   : > { %2759 = vmatpush1.bf16.msra.mxu1 %v11911_v30  ;;  %1622 = vmatprep.mubr.bf16.mxu1 %v17412_v2  ;;  %v13123_v30 = vld [vmem:[%s12836_s29 + $0xa8] sm:$0xff]  }
  0x3e   : > { %2760 = vmatprep.subr.bf16.mxu1 %v11930_v31  ;;  %11585 = vmatprep.subr.bf16.mxu0 %v11962_v42  ;;  %v13130_v31 = vld [vmem:[%s12836_s29 + $0xb0] sm:$0xff]  }
  0x3f   : > { %1260 = vmatmul.mubr.bf16.vlgmr.msra.gmra.mrb[0].mxu0 %v11910_v27  ;;  %v13106_v27 = vld [vmem:[%s12836_s29 + $0x98] sm:$0xff]  }
  0x40   : > { %1269 = vmatprep.mubr.bf16.mxu0 %v17412_v2  ;;  %11586 = vmatpush3.bf16.msra.mxu0 %v11962_v42 }
  0x41   : > { %2761 = vmatpush1.bf16.msra.mxu1 %v11928_v34  ;;  %11587 = vmatprep.subr.bf16.mxu0 %v11973_v48  ;;  %v13147_v34 = vld [vmem:[%s12836_s29 + $0xc0] sm:$0xff]  }
  0x42   : > { %2762 = vmatprep.subr.bf16.mxu1 %v11945_v37  ;;  %v13168_v37 = vld [vmem:[%s12836_s29 + $0xd8] sm:$0xff]  }
  0x44   : > { %1623 = vmatmul.mubr.bf16.gmra.mrb[4].mxu1 %v11920_v35  ;;  %11588 = vmatpush3.bf16.msra.mxu0 %v11973_v48  ;;  %v2222_v48 = vld [vmem:[%s17614_s4] sm:$0x3] }
  0x45   : > { %1632 = vmatprep.mubr.bf16.mxu1 %v17412_v2  ;;  %2763 = vmatpush1.bf16.msra.mxu1 %v11943_v40  ;;  %v17411_v40 = vlaneseq }
  0x46   : > { %2764 = vmatprep.subr.bf16.mxu1 %v11950_v41  ;;  %11589 = vmatprep.subr.bf16.mxu0 %v11984_v55 }
  0x47   : > { %1270 = vmatmul.mubr.bf16.gmra.mrb[4].mxu0 %v11920_v35  ;;  %v13154_v35 = vld [vmem:[%s12836_s29 + $0xc8] sm:$0xff]   ;;  %v13185_v42 = vshrl.u32 %v17411_v40, 7 }
  0x48   : > { %1279 = vmatprep.mubr.bf16.mxu0 %v17412_v2  ;;  %11590 = vmatpush3.bf16.msra.mxu0 %v11984_v55 }
  0x49   : > { %2765 = vmatpush1.bf16.msra.mxu1 %v11948_v43  ;;  %11591 = vmatprep.subr.bf16.mxu0 %v11995_v5  ;;  %17613 = vst [vmem:[#allocation3_spill] sm:$0xff] %v13185_v42 }
  0x4a   : > { %2766 = vmatprep.subr.bf16.mxu1 %v11955_v44 }
  0x4c   : > { %1633 = vmatmul.mubr.bf16.gmra.mrb[8].mxu1 %v11927_v45  ;;  %11592 = vmatpush3.bf16.msra.mxu0 %v11995_v5 }
  0x4d   : > { %1642 = vmatprep.mubr.bf16.mxu1 %v17412_v2  ;;  %2767 = vmatpush1.bf16.msra.mxu1 %v11953_v46  ;;  %v13188_v46 = vld [vmem:[%s12836_s29 + $0xe8] sm:$0xff]  }
  0x4e   : > { %2768 = vmatprep.subr.bf16.mxu1 %v11960_v47  ;;  %11593 = vmatprep.subr.bf16.mxu0 %v12006_v14  ;;  %v13191_v47 = vsub.s32 1, %v13185_v42 }
  0x4f   : > { %1280 = vmatmul.mubr.bf16.gmra.mrb[8].mxu0 %v11927_v45 }
  0x50   : > { %1289 = vmatprep.mubr.bf16.mxu0 %v17412_v2  ;;  %11594 = vmatpush3.bf16.msra.mxu0 %v12006_v14 }
  0x51   : > { %2769 = vmatpush1.bf16.msra.mxu1 %v11958_v49  ;;  %11595 = vmatprep.subr.bf16.mxu0 %v12017_v23 }
  0x52   : > { %2770 = vmatprep.subr.bf16.mxu1 %v11966_v50  ;;  %v13201_v50 = vrot.slane %v2222_v48, %v13191_v47 }
  0x54   : > { %1643 = vmatmul.mubr.bf16.gmra.mrb[12].mxu1 %v11937_v51  ;;  %11596 = vmatpush3.bf16.msra.mxu0 %v12017_v23 }
  0x55   : > { %1652 = vmatprep.mubr.bf16.mxu1 %v17412_v2  ;;  %2771 = vmatpush1.bf16.msra.mxu1 %v11964_v52 }
  0x56   : > { %2772 = vmatprep.subr.bf16.mxu1 %v11971_v53  ;;  %11597 = vmatprep.subr.bf16.mxu0 %v12018_v28 }
  0x57   : > { %1290 = vmatmul.mubr.bf16.gmra.mrb[12].mxu0 %v11937_v51 }
  0x58   : > { %1299 = vmatprep.mubr.bf16.mxu0 %v17412_v2  ;;  %11598 = vmatpush3.bf16.msra.mxu0 %v12018_v28 }
  0x59   : > { %2773 = vmatpush1.bf16.msra.mxu1 %v11969_v54  ;;  %11599 = vmatprep.subr.bf16.mxu0 %v12019_v33  ;;  %v13204_v54 = vld [vmem:[%s12836_s29 + $0xf0] sm:$0xff]  }
  0x5a   : > { %2774 = vmatprep.subr.bf16.mxu1 %v11977_v56 }
  0x5c   : > { %1653 = vmatmul.mubr.bf16.gmra.mrb[16].mxu1 %v11942_v57  ;;  %11600 = vmatpush3.bf16.msra.mxu0 %v12019_v33 }
  0x5d   : > { %1662 = vmatprep.mubr.bf16.mxu1 %v17412_v2  ;;  %2775 = vmatpush1.bf16.msra.mxu1 %v11975_v58 }
  0x5e   : > { %2776 = vmatprep.subr.bf16.mxu1 %v11982_v59  ;;  %3507 = vmatprep.subr.bf16.mxu0 %v12022_v38 }
  0x5f   : > { %1300 = vmatmul.mubr.bf16.gmra.mrb[16].mxu0 %v11942_v57  ;;  %v13214_v57 = vsub.s32 0, %v13185_v42 }
  0x60   : > { %1309 = vmatprep.mubr.bf16.mxu0 %v17412_v2 }
  0x61   : > { %2777 = vmatpush1.bf16.msra.mxu1 %v11980_v60 }
  0x62   : > { %2778 = vmatprep.subr.bf16.mxu1 %v11988_v61 }
  0x64   : > { %1663 = vmatmul.mubr.bf16.gmra.mrb[20].mxu1 %v11946_v62 }
  0x65   : > { %1672 = vmatprep.mubr.bf16.mxu1 %v17412_v2  ;;  %2779 = vmatpush1.bf16.msra.mxu1 %v11986_v63 }
  0x66   : > { %2780 = vmatprep.subr.bf16.mxu1 %v11993_v3 }
  0x67   : > { %1310 = vmatmul.mubr.bf16.gmra.mrb[20].mxu0 %v11946_v62  ;;  %v13222_v62 = vrot.slane %v2222_v48, %v13214_v57 }
  0x68   : > { %1319 = vmatprep.mubr.bf16.mxu0 %v17412_v2 }
  0x69   : > { %2781 = vmatpush1.bf16.msra.mxu1 %v11991_v1  ;;  %v13225_v1 = vld [vmem:[%s12836_s29 + $0xf8] sm:$0xff]  }
  0x6a   : > { %2782 = vmatprep.subr.bf16.mxu1 %v11999_v8 }
  0x6c   : > { %1673 = vmatmul.mubr.bf16.gmra.mrb[24].mxu1 %v11947_v0 }
  0x6d   : > { %1682 = vmatprep.mubr.bf16.mxu1 %v17412_v2  ;;  %2783 = vmatpush1.bf16.msra.mxu1 %v11997_v7 }
  0x6e   : > { %2784 = vmatprep.subr.bf16.mxu1 %v12004_v12 }
  0x6f   : > { %1320 = vmatmul.mubr.bf16.gmra.mrb[24].mxu0 %v11947_v0 }
  0x70   : > { %1329 = vmatprep.mubr.bf16.mxu0 %v17412_v2 }
  0x71   : > { %2785 = vmatpush1.bf16.msra.mxu1 %v12002_v11 }
  0x72   : > { %2786 = vmatprep.subr.bf16.mxu1 %v12010_v17 }
  0x74   : > { %1683 = vmatmul.mubr.bf16.gmra.mrb[28].mxu1 %v11951_v4 }
  0x75   : > { %1692 = vmatprep.mubr.bf16.mxu1 %v17412_v2  ;;  %2787 = vmatpush1.bf16.msra.mxu1 %v12008_v16 }
  0x76   : > { %2788 = vmatprep.subr.bf16.mxu1 %v12015_v21 }
  0x77   : > { %1330 = vmatmul.mubr.bf16.gmra.mrb[28].mxu0 %v11951_v4 }
  0x78   : > { %1339 = vmatprep.mubr.bf16.mxu0 %v17412_v2 }
  0x79   : > { %2789 = vmatpush1.bf16.msra.mxu1 %v12013_v20 }
  0x7c   : > { %1693 = vmatmul.mubr.bf16.gmra.mrb[32].mxu1 %v11952_v6 }
  0x7d   : > { %1702 = vmatprep.mubr.bf16.mxu1 %v17412_v2 }
  0x7f   : > { %1340 = vmatmul.mubr.bf16.gmra.mrb[32].mxu0 %v11952_v6 }
  0x80   : > { %1349 = vmatprep.mubr.bf16.mxu0 %v17412_v2 }
  0x84   : > { %1703 = vmatmul.mubr.bf16.gmra.mrb[36].mxu1 %v11956_v9 }
  0x85   : > { %1712 = vmatprep.mubr.bf16.mxu1 %v17412_v2 }
  0x87   : > { %1350 = vmatmul.mubr.bf16.gmra.mrb[36].mxu0 %v11956_v9 }
  0x88   : > { %1359 = vmatprep.mubr.bf16.mxu0 %v17412_v2 }
  0x8c   : > { %1713 = vmatmul.mubr.bf16.gmra.mrb[40].mxu1 %v11957_v10 }
  0x8d   : > { %1722 = vmatprep.mubr.bf16.mxu1 %v17412_v2 }
  0x8f   : > { %1360 = vmatmul.mubr.bf16.gmra.mrb[40].mxu0 %v11957_v10 }
  0x90   : > { %1369 = vmatprep.mubr.bf16.mxu0 %v17412_v2 }
  0x94   : > { %1723 = vmatmul.mubr.bf16.gmra.mrb[44].mxu1 %v11961_v13 }
  0x95   : > { %1732 = vmatprep.mubr.bf16.mxu1 %v17412_v2 }
  0x97   : > { %1370 = vmatmul.mubr.bf16.gmra.mrb[44].mxu0 %v11961_v13 }
  0x98   : > { %1379 = vmatprep.mubr.bf16.mxu0 %v17412_v2 }
  0x9c   : > { %1733 = vmatmul.mubr.bf16.gmra.mrb[48].mxu1 %v13044_v15 }
  0x9d   : > { %1742 = vmatprep.mubr.bf16.mxu1 %v17412_v2 }
  0x9f   : > { %1380 = vmatmul.mubr.bf16.gmra.mrb[48].mxu0 %v13044_v15 }
  0xa0   : > { %1389 = vmatprep.mubr.bf16.mxu0 %v17412_v2 }
  0xa4   : > { %1743 = vmatmul.mubr.bf16.gmra.mrb[52].mxu1 %v13056_v18 }
  0xa5   : > { %1752 = vmatprep.mubr.bf16.mxu1 %v17412_v2 }
  0xa7   : > { %1390 = vmatmul.mubr.bf16.gmra.mrb[52].mxu0 %v13056_v18 }
  0xa8   : > { %1399 = vmatprep.mubr.bf16.mxu0 %v17412_v2 }
  0xac   : > { %1753 = vmatmul.mubr.bf16.gmra.mrb[56].mxu1 %v13062_v19 }
  0xad   : > { %1762 = vmatprep.mubr.bf16.mxu1 %v17412_v2 }
  0xaf   : > { %1400 = vmatmul.mubr.bf16.gmra.mrb[56].mxu0 %v13062_v19 }
  0xb0   : > { %1409 = vmatprep.mubr.bf16.mxu0 %v17412_v2 }
  0xb4   : > { %1763 = vmatmul.mubr.bf16.gmra.mrb[60].mxu1 %v13075_v22 }
  0xb5   : > { %1772 = vmatprep.mubr.bf16.mxu1 %v17412_v2 }
  0xb7   : > { %1410 = vmatmul.mubr.bf16.gmra.mrb[60].mxu0 %v13075_v22 }
  0xb8   : > { %1419 = vmatprep.mubr.bf16.mxu0 %v17412_v2 }
  0xbc   : > { %1773 = vmatmul.mubr.bf16.gmra.mrb[64].mxu1 %v13085_v24 }
  0xbd   : > { %1782 = vmatprep.mubr.bf16.mxu1 %v17412_v2 }
  0xbf   : > { %1420 = vmatmul.mubr.bf16.gmra.mrb[64].mxu0 %v13085_v24 }
  0xc0   : > { %1429 = vmatprep.mubr.bf16.mxu0 %v17412_v2 }
  0xc4   : > { %1783 = vmatmul.mubr.bf16.gmra.mrb[68].mxu1 %v13092_v25 }
  0xc5   : > { %1792 = vmatprep.mubr.bf16.mxu1 %v17412_v2 }
  0xc7   : > { %1430 = vmatmul.mubr.bf16.gmra.mrb[68].mxu0 %v13092_v25 }
  0xc8   : > { %1439 = vmatprep.mubr.bf16.mxu0 %v17412_v2 }
  0xcc   : > { %1793 = vmatmul.mubr.bf16.gmra.mrb[72].mxu1 %v13099_v26 }
  0xcd   : > { %1802 = vmatprep.mubr.bf16.mxu1 %v17412_v2 }
  0xcf   : > { %1440 = vmatmul.mubr.bf16.gmra.mrb[72].mxu0 %v13099_v26 }
  0xd0   : > { %1449 = vmatprep.mubr.bf16.mxu0 %v17412_v2 }
  0xd4   : > { %1803 = vmatmul.mubr.bf16.gmra.mrb[76].mxu1 %v13106_v27 }
  0xd5   : > { %1812 = vmatprep.mubr.bf16.mxu1 %v17412_v2 }
  0xd7   : > { %1450 = vmatmul.mubr.bf16.gmra.mrb[76].mxu0 %v13106_v27 }
  0xd8   : > { %1459 = vmatprep.mubr.bf16.mxu0 %v17412_v2 }
  0xdc   : > { %1813 = vmatmul.mubr.bf16.gmra.mrb[80].mxu1 %v13116_v29 }
  0xdd   : > { %1822 = vmatprep.mubr.bf16.mxu1 %v17412_v2 }
  0xdf   : > { %1460 = vmatmul.mubr.bf16.gmra.mrb[80].mxu0 %v13116_v29 }
  0xe0   : > { %1469 = vmatprep.mubr.bf16.mxu0 %v17412_v2 }
  0xe4   : > { %1823 = vmatmul.mubr.bf16.gmra.mrb[84].mxu1 %v13123_v30 }
  0xe5   : > { %1832 = vmatprep.mubr.bf16.mxu1 %v17412_v2 }
  0xe7   : > { %1470 = vmatmul.mubr.bf16.gmra.mrb[84].mxu0 %v13123_v30 }
  0xe8   : > { %1479 = vmatprep.mubr.bf16.mxu0 %v17412_v2 }
  0xec   : > { %1833 = vmatmul.mubr.bf16.gmra.mrb[88].mxu1 %v13130_v31 }
  0xed   : > { %1842 = vmatprep.mubr.bf16.mxu1 %v17412_v2 }
  0xef   : > { %1480 = vmatmul.mubr.bf16.gmra.mrb[88].mxu0 %v13130_v31 }
  0xf0   : > { %1489 = vmatprep.mubr.bf16.mxu0 %v17412_v2 }
  0xf4   : > { %1843 = vmatmul.mubr.bf16.gmra.mrb[92].mxu1 %v13137_v32 }
  0xf5   : > { %1852 = vmatprep.mubr.bf16.mxu1 %v17412_v2 }
  0xf7   : > { %1490 = vmatmul.mubr.bf16.gmra.mrb[92].mxu0 %v13137_v32 }
  0xf8   : > { %1499 = vmatprep.mubr.bf16.mxu0 %v17412_v2 }
  0xfc   : > { %1853 = vmatmul.mubr.bf16.gmra.mrb[96].mxu1 %v13147_v34 }
  0xfd   : > { %1862 = vmatprep.mubr.bf16.mxu1 %v17412_v2 }
  0xff   : > { %1500 = vmatmul.mubr.bf16.gmra.mrb[96].mxu0 %v13147_v34 }
 0x100   : > { %1509 = vmatprep.mubr.bf16.mxu0 %v17412_v2 }
 0x104   : > { %1863 = vmatmul.mubr.bf16.gmra.mrb[100].mxu1 %v13154_v35 }
 0x105   : > { %1872 = vmatprep.mubr.bf16.mxu1 %v17412_v2 }
 0x107   : > { %1510 = vmatmul.mubr.bf16.gmra.mrb[100].mxu0 %v13154_v35 }
 0x108   : > { %1519 = vmatprep.mubr.bf16.mxu0 %v17412_v2 }
 0x10c   : > { %1873 = vmatmul.mubr.bf16.gmra.mrb[104].mxu1 %v13161_v36 }
 0x10d   : > { %1882 = vmatprep.mubr.bf16.mxu1 %v17412_v2 }
 0x10f   : > { %1520 = vmatmul.mubr.bf16.gmra.mrb[104].mxu0 %v13161_v36 }
 0x110   : > { %1529 = vmatprep.mubr.bf16.mxu0 %v17412_v2 }
 0x112   : > { %v1261_v41 = vpop.f32.mrb[0].mxu0 }
 0x113   : > { %v1263_v43 = vpop.f32.mrb[1].mxu0  ;;  %v13239_v6 = vadd.f32 %v13222_v62, %v1261_v41 }
 0x114   : > { %1883 = vmatmul.mubr.bf16.gmra.mrb[108].mxu1 %v13168_v37  ;;  %v1265_v44 = vpop.f32.mrb[2].mxu0  ;;  %v13207_v55 = vadd.f32 %v13201_v50, %v1263_v43 }
 0x115   : > { %1892 = vmatprep.mubr.bf16.mxu1 %v17412_v2  ;;  %v1267_v45 = vpop.f32.mrb[3].mxu0  ;;  %v13242_v7 = vadd.f32 %v13222_v62, %v1265_v44  ;;  %v17427_v12 = vmax.f32 %v13239_v6, 0.0 }
 0x116   : > { %v13210_v56 = vadd.f32 %v13201_v50, %v1267_v45  ;;  %v17421_v59 = vmax.f32 %v13207_v55, 0.0 }
 0x117   : > { %1530 = vmatmul.mubr.bf16.gmra.mrb[108].mxu0 %v13168_v37  ;;  %v17426_v13 = vmax.f32 %v13242_v7, 0.0 }
 0x118   : > { %1539 = vmatprep.mubr.bf16.mxu0 %v17412_v2  ;;  %v17420_v60 = vmax.f32 %v13210_v56, 0.0 }
 0x119   : > { %v2490_v23 = vpack.c.bf16 %v17426_v13, %v17427_v12  ;;  %v12655_v12 = vld [vmem:[%s12836_s29 + $0x18] sm:$0xff]  }
 0x11a   : > { %v1271_v49 = vpop.f32.mrb[4].mxu0  ;;  %v2491_v4 = vpack.c.bf16 %v17420_v60, %v17421_v59  ;;  %v12654_v59 = vld [vmem:[%s12836_s29 + $0x10] sm:$0xff]  }
 0x11b   : > { %v1273_v51 = vpop.f32.mrb[5].mxu0  ;;  %v13266_v28 = vadd.f32 %v13222_v62, %v1271_v49 }
 0x11c   : > { %1893 = vmatmul.mubr.bf16.gmra.mrb[112].mxu1 %v13178_v39  ;;  %v1275_v52 = vpop.f32.mrb[6].mxu0  ;;  %v13228_v3 = vadd.f32 %v13201_v50, %v1273_v51 }
 0x11d   : > { %1902 = vmatprep.mubr.bf16.mxu1 %v17412_v2  ;;  %v1277_v53 = vpop.f32.mrb[7].mxu0  ;;  %v13269_v33 = vadd.f32 %v13222_v62, %v1275_v52  ;;  %v17419_v45 = vmax.f32 %v13266_v28, 0.0 }
 0x11e   : > { %v13235_v5 = vadd.f32 %v13201_v50, %v1277_v53  ;;  %v17417_v9 = vmax.f32 %v13228_v3, 0.0 }
 0x11f   : > { %1540 = vmatmul.mubr.bf16.gmra.mrb[112].mxu0 %v13178_v39  ;;  %v17418_v48 = vmax.f32 %v13269_v33, 0.0 }
 0x120   : > { %1549 = vmatprep.mubr.bf16.mxu0 %v17412_v2  ;;  %v17416_v10 = vmax.f32 %v13235_v5, 0.0 }
 0x122   : > { %v1281_v58 = vpop.f32.mrb[8].mxu0  ;;  %v2493_v20 = vpack.c.bf16 %v17416_v10, %v17417_v9 }
 0x123   : > { %v1283_v61 = vpop.f32.mrb[9].mxu0 }
 0x124   : > { %1903 = vmatmul.mubr.bf16.gmra.mrb[116].mxu1 %v13188_v46  ;;  %v1285_v63 = vpop.f32.mrb[10].mxu0  ;;  %v13251_v17 = vadd.f32 %v13201_v50, %v1283_v61 }
 0x125   : > { %1912 = vmatprep.mubr.bf16.mxu1 %v17412_v2  ;;  %v1287_v0 = vpop.f32.mrb[11].mxu0 }
 0x126   : > { %v13258_v21 = vadd.f32 %v13201_v50, %v1287_v0  ;;  %v17415_v41 = vmax.f32 %v13251_v17, 0.0  ;;  %v13290_v0 = vadd.f32 %v13222_v62, %v1281_v58 }
 0x127   : > { %1550 = vmatmul.mubr.bf16.gmra.mrb[116].mxu0 %v13188_v46 }
 0x128   : > { %1559 = vmatprep.mubr.bf16.mxu0 %v17412_v2  ;;  %v17414_v43 = vmax.f32 %v13258_v21, 0.0 }
 0x12a   : > { %v1291_v8 = vpop.f32.mrb[12].mxu0  ;;  %v2495_v53 = vpack.c.bf16 %v17414_v43, %v17415_v41  ;;  %v12025_v41 = vld [vmem:[%s17612_s6 + $0x14] ss:$8 sps:$4 sm:$0xff]  }
 0x12b   : > { %v1293_v11 = vpop.f32.mrb[13].mxu0 }
 0x12c   : > { %1913 = vmatmul.mubr.bf16.gmra.mrb[120].mxu1 %v13204_v54  ;;  %v1295_v14 = vpop.f32.mrb[14].mxu0  ;;  %v13279_v52 = vadd.f32 %v13201_v50, %v1293_v11  ;;  %v2492_v11 = vpack.c.bf16 %v17418_v48, %v17419_v45  ;;  %v12653_v48 = vld [vmem:[%s12836_s29 + $0x8] sm:$0xff]   ;;  %v13326_v45 = vadd.f32 %v13222_v62, %v1291_v8 }
 0x12d   : > { %1922 = vmatprep.mubr.bf16.mxu1 %v17412_v2  ;;  %v1297_v16 = vpop.f32.mrb[15].mxu0  ;;  %v13329_v60 = vadd.f32 %v13222_v62, %v1295_v14  ;;  %v12028_v8 = vld [vmem:[%s17612_s6 + $0x24] ss:$8 sps:$4 sm:$0xff]  }
 0x12e   : > { %v13286_v61 = vadd.f32 %v13201_v50, %v1297_v16  ;;  %v17423_v16 = vmax.f32 %v13279_v52, 0.0 }
 0x12f   : > { %1560 = vmatmul.mubr.bf16.gmra.mrb[120].mxu0 %v13204_v54 }
 0x130   : > { %1569 = vmatprep.mubr.bf16.mxu0 %v17412_v2  ;;  %17615 = vst [vmem:[#allocation4_spill] sm:$0xff] %v13286_v61  ;;  %v17422_v58 = vmax.f32 %v13286_v61, 0.0 }
 0x132   : > { %v13272_v38 = vpop.f32.mrb[16].mxu0  ;;  %v2497_v10 = vpack.c.bf16 %v17422_v58, %v17423_v16 }
 0x133   : > { %v1303_v44 = vpop.f32.mrb[17].mxu0 }
 0x134   : > { %1923 = vmatmul.mubr.bf16.gmra.mrb[124].mxu1 %v13225_v1  ;;  %v1305_v49 = vpop.f32.mrb[18].mxu0 }
 0x135   : > { %2790 = vmatprep.mubr.bf16.mxu1 %v2491_v4  ;;  %v1307_v51 = vpop.f32.mrb[19].mxu0  ;;  %v13293_v4 = vadd.f32 %v13222_v62, %v1285_v63  ;;  %v17425_v63 = vmax.f32 %v13290_v0, 0.0  ;;  %v13372_v16 = vadd.f32 %v13222_v62, %v1305_v49 }
 0x136   : > { %v13322_v9 = vadd.f32 %v13201_v50, %v1307_v51  ;;  %v12023_v51 = vld [vmem:[%s17612_s6 + $0x10] ss:$8 sps:$4 sm:$0xff]  }
 0x137   : > { %1570 = vmatmul.mubr.bf16.gmra.mrb[124].mxu0 %v13225_v1  ;;  %v17424_v2 = vmax.f32 %v13293_v4, 0.0  ;;  %17621 = vst [vmem:[#allocation10_spill] sm:$0xff] %v13372_v16 }
 0x138   : > { %17617 = vst [vmem:[#allocation6_spill] sm:$0xff] %v13322_v9 }
 0x13c   : > { %2791 = vmatmul.mubr.bf16.vlgmr.msra.gmra.mrb[128].mxu1 %v2490_v23  ;;  %v13300_v23 = vpop.f32.mrb[20].mxu0 }
 0x13d   : > { %2800 = vmatprep.mubr.bf16.mxu1 %v2493_v20  ;;  %v12652_v20 = vld [vmem:[%s12836_s29] sm:$0xff]   ;;  %v1313_v40 = vpop.f32.mrb[21].mxu0 }
 0x13e   : > { %11601 = vmatprep.mubr.bf16.mxu0 %v12652_v20  ;;  %v13306_v43 = vpop.f32.mrb[22].mxu0  ;;  %v12020_v20 = vld [vmem:[%s17612_s6] ss:$8 sps:$4 sm:$0xff]  }
 0x13f   : > { %11602 = vmatmul.mubr.bf16.vlgmr.msra.gmra.mrb[128].mxu0 %v12653_v48 }
 0x140   : > { %3508 = vmatpush1.bf16.msra.mxu0 %v12020_v20  ;;  %11605 = vmatprep.mubr.bf16.mxu0 %v12654_v59  ;;  %v17430_v20 = vmax.f32 %v13322_v9, 0.0  ;;  %v17432_v59 = vmax.f32 %v13326_v45, 0.0  ;;  %v13416_v9 = vadd.f32 %v13222_v62, %v13306_v43 }
 0x141   : > { %3509 = vmatprep.subr.bf16.mxu0 %v12025_v41 }
 0x142   : > { %17626 = vst [vmem:[#allocation14_spill] sm:$0xff] %v13416_v9 }
 0x144   : > { %2801 = vmatmul.mubr.bf16.gmra.mrb[132].mxu1 %v2492_v11  ;;  %v1317_v11 = vpop.f32.mrb[23].mxu0  ;;  %3510 = vmatpush1.bf16.msra.mxu0 %v12023_v51 }
 0x145   : > { %2810 = vmatprep.mubr.bf16.mxu1 %v2495_v53  ;;  %v13315_v53 = vadd.f32 %v13201_v50, %v1303_v44  ;;  %v2494_v44 = vpack.c.bf16 %v17424_v2, %v17425_v63  ;;  %v13342_v14 = vpop.f32.mrb[24].mxu0  ;;  %3511 = vmatprep.subr.bf16.mxu0 %v12028_v8  ;;  %v13357_v63 = vadd.f32 %v13201_v50, %v1313_v40  ;;  %v17622_v40 = vmax.f32 %v13329_v60, 0.0 }
 0x146   : > { %v1323_v58 = vpop.f32.mrb[25].mxu0  ;;  %v13364_v51 = vadd.f32 %v13201_v50, %v1317_v11  ;;  %v13369_v8 = vadd.f32 %v13222_v62, %v13272_v38  ;;  %v12029_v11 = vld [vmem:[%s17612_s6 + $0x30] ss:$8 sps:$4 sm:$0xff]  }
 0x147   : > { %17616 = vst [vmem:[#allocation5_spill] sm:$0xff] %v13315_v53  ;;  %v17431_v48 = vmax.f32 %v13315_v53, 0.0  ;;  %v13348_v41 = vpop.f32.mrb[26].mxu0  ;;  %17618 = vst [vmem:[#allocation7_spill] sm:$0xff] %v13357_v63  ;;  %11606 = vmatmul.mubr.bf16.gmra.mrb[132].mxu0 %v12655_v12  ;;  %v2496_v42 = vpack.c.bf16 %v17622_v40, %v17432_v59  ;;  %v12656_v53 = vld [vmem:[%s12836_s29 + $0x20] sm:$0xff]   ;;  %v17438_v49 = vmax.f32 %v13357_v63, 0.0  ;;  %v13400_v59 = vadd.f32 %v13201_v50, %v1323_v58 }
 0x148   : > { %v1327_v2 = vpop.f32.mrb[27].mxu0  ;;  %17619 = vst [vmem:[#allocation8_spill] sm:$0xff] %v13364_v51  ;;  %17620 = vst [vmem:[#allocation9_spill] sm:$0xff] %v13369_v8  ;;  %11609 = vmatprep.mubr.bf16.mxu0 %v12656_v53  ;;  %v12034_v12 = vld [vmem:[%s17612_s6 + $0x44] ss:$8 sps:$4 sm:$0xff]   ;;  %v17437_v40 = vmax.f32 %v13364_v51, 0.0 }
 0x149   : > { %v2499_v13 = vpack.c.bf16 %v17430_v20, %v17431_v48  ;;  %17623 = vst [vmem:[#allocation11_spill] sm:$0xff] %v13400_v59  ;;  %v17627_v58 = vmax.f32 %v13369_v8, 0.0  ;;  %v17628_v63 = vmax.f32 %v13372_v16, 0.0  ;;  %v12658_v51 = vld [vmem:[%s12836_s29 + $0x30] sm:$0xff]   ;;  %v13460_v16 = vadd.f32 %v13222_v62, %v13348_v41 }
 0x14a   : > { %v13385_v38 = vpop.f32.mrb[28].mxu0  ;;  %v2501_v20 = vpack.c.bf16 %v17437_v40, %v17438_v49 }
 0x14b   : > { %v1333_v53 = vpop.f32.mrb[29].mxu0  ;;  %v2498_v61 = vpack.c.bf16 %v17628_v63, %v17627_v58  ;;  %17632 = vst [vmem:[#allocation18_spill] sm:$0xff] %v13460_v16 }
 0x14c   : > { %2811 = vmatmul.mubr.bf16.gmra.mrb[136].mxu1 %v2494_v44  ;;  %v12026_v44 = vld [vmem:[%s17612_s6 + $0x20] ss:$8 sps:$4 sm:$0xff]   ;;  %v13444_v49 = vadd.f32 %v13201_v50, %v1333_v53 }
 0x14d   : > { %2820 = vmatprep.mubr.bf16.mxu1 %v2497_v10  ;;  %v12031_v10 = vld [vmem:[%s17612_s6 + $0x34] ss:$8 sps:$4 sm:$0xff]   ;;  %3512 = vmatpush1.bf16.msra.mxu0 %v12026_v44  ;;  %v12657_v44 = vld [vmem:[%s12836_s29 + $0x28] sm:$0xff]  }
 0x14e   : > { %3513 = vmatprep.subr.bf16.mxu0 %v12031_v10  ;;  %v13391_v10 = vpop.f32.mrb[30].mxu0  ;;  %17629 = vst [vmem:[#allocation15_spill] sm:$0xff] %v13444_v49 }
 0x14f   : > { %v1337_v48 = vpop.f32.mrb[31].mxu0  ;;  %11610 = vmatmul.mubr.bf16.gmra.mrb[136].mxu0 %v12657_v44  ;;  %v17444_v44 = vmax.f32 %v13400_v59, 0.0  ;;  %v17634_v59 = vmax.f32 %v13416_v9, 0.0  ;;  %v13504_v9 = vadd.f32 %v13222_v62, %v13391_v10 }
 0x150   : > { %11613 = vmatprep.mubr.bf16.mxu0 %v12658_v51 }
 0x151   : > { %3514 = vmatpush1.bf16.msra.mxu0 %v12029_v11  ;;  %v13407_v11 = vadd.f32 %v13201_v50, %v1327_v2  ;;  %v12035_v2 = vld [vmem:[%s17612_s6 + $0x50] ss:$8 sps:$4 sm:$0xff]  }
 0x152   : > { %3515 = vmatprep.subr.bf16.mxu0 %v12034_v12  ;;  %v13412_v12 = vadd.f32 %v13222_v62, %v13300_v23  ;;  %v12040_v23 = vld [vmem:[%s17612_s6 + $0x64] ss:$8 sps:$4 sm:$0xff]   ;;  %v13429_v43 = vpop.f32.mrb[32].mxu0 }
 0x153   : > { %17624 = vst [vmem:[#allocation12_spill] sm:$0xff] %v13407_v11  ;;  %v17443_v63 = vmax.f32 %v13407_v11, 0.0  ;;  %v1343_v51 = vpop.f32.mrb[33].mxu0  ;;  %v12660_v11 = vld [vmem:[%s12836_s29 + $0x40] sm:$0xff]  }
 0x154   : > { %2821 = vmatmul.mubr.bf16.gmra.mrb[140].mxu1 %v2496_v42  ;;  %v12032_v42 = vld [vmem:[%s17612_s6 + $0x40] ss:$8 sps:$4 sm:$0xff]   ;;  %17625 = vst [vmem:[#allocation13_spill] sm:$0xff] %v13412_v12  ;;  %v17633_v53 = vmax.f32 %v13412_v12, 0.0 }
 0x155   : > { %2830 = vmatprep.mubr.bf16.mxu1 %v2499_v13  ;;  %v12037_v13 = vld [vmem:[%s17612_s6 + $0x54] ss:$8 sps:$4 sm:$0xff]   ;;  %3516 = vmatpush1.bf16.msra.mxu0 %v12032_v42  ;;  %v2503_v58 = vpack.c.bf16 %v17443_v63, %v17444_v44  ;;  %v13488_v44 = vadd.f32 %v13201_v50, %v1343_v51 }
 0x156   : > { %3517 = vmatprep.subr.bf16.mxu0 %v12037_v13  ;;  %v13435_v13 = vpop.f32.mrb[34].mxu0  ;;  %v12659_v42 = vld [vmem:[%s12836_s29 + $0x38] sm:$0xff]   ;;  %v2500_v8 = vpack.c.bf16 %v17634_v59, %v17633_v53 }
 0x157   : > { %v1347_v40 = vpop.f32.mrb[35].mxu0  ;;  %11614 = vmatmul.mubr.bf16.gmra.mrb[140].mxu0 %v12659_v42  ;;  %v17450_v42 = vmax.f32 %v13444_v49, 0.0  ;;  %17635 = vst [vmem:[#allocation19_spill] sm:$0xff] %v13488_v44  ;;  %v17638_v49 = vmax.f32 %v13460_v16, 0.0  ;;  %v13548_v16 = vadd.f32 %v13222_v62, %v13435_v13  ;;  %v12056_v13 = vld [vmem:[%s17643_s24] ss:$8 sps:$4 sm:$0xff]  }
 0x158   : > { %11617 = vmatprep.mubr.bf16.mxu0 %v12660_v11 }
 0x159   : > { %3518 = vmatpush1.bf16.msra.mxu0 %v12035_v2  ;;  %v13451_v2 = vadd.f32 %v13201_v50, %v1337_v48  ;;  %v12041_v48 = vld [vmem:[%s17612_s6 + $0x70] ss:$8 sps:$4 sm:$0xff]  }
 0x15a   : > { %3519 = vmatprep.subr.bf16.mxu0 %v12040_v23  ;;  %v13456_v23 = vadd.f32 %v13222_v62, %v13342_v14  ;;  %v12046_v14 = vld [vmem:[%s17612_s6 + $0x84] ss:$8 sps:$4 sm:$0xff]   ;;  %v13473_v41 = vpop.f32.mrb[36].mxu0 }
 0x15b   : > { %17630 = vst [vmem:[#allocation16_spill] sm:$0xff] %v13451_v2  ;;  %v17449_v59 = vmax.f32 %v13451_v2, 0.0  ;;  %v1353_v11 = vpop.f32.mrb[37].mxu0  ;;  %v12662_v2 = vld [vmem:[%s12836_s29 + $0x50] sm:$0xff]  }
 0x15c   : > { %2831 = vmatmul.mubr.bf16.gmra.mrb[144].mxu1 %v2498_v61  ;;  %v12038_v61 = vld [vmem:[%s17612_s6 + $0x60] ss:$8 sps:$4 sm:$0xff]   ;;  %17631 = vst [vmem:[#allocation17_spill] sm:$0xff] %v13456_v23  ;;  %v17637_v51 = vmax.f32 %v13456_v23, 0.0 }
 0x15d   : > { %2840 = vmatprep.mubr.bf16.mxu1 %v2501_v20  ;;  %v12043_v20 = vld [vmem:[%s17612_s6 + $0x74] ss:$8 sps:$4 sm:$0xff]   ;;  %3520 = vmatpush1.bf16.msra.mxu0 %v12038_v61  ;;  %v2505_v53 = vpack.c.bf16 %v17449_v59, %v17450_v42  ;;  %v12661_v61 = vld [vmem:[%s12836_s29 + $0x48] sm:$0xff]   ;;  %v13532_v42 = vadd.f32 %v13201_v50, %v1353_v11 }
 0x15e   : > { %3521 = vmatprep.subr.bf16.mxu0 %v12043_v20  ;;  %v13479_v20 = vpop.f32.mrb[38].mxu0  ;;  %v2502_v12 = vpack.c.bf16 %v17638_v49, %v17637_v51 }
 0x15f   : > { %v1357_v63 = vpop.f32.mrb[39].mxu0  ;;  %11618 = vmatmul.mubr.bf16.gmra.mrb[144].mxu0 %v12661_v61  ;;  %v17455_v61 = vmax.f32 %v13488_v44, 0.0  ;;  %17639 = vst [vmem:[#allocation21_spill] sm:$0xff] %v13532_v42  ;;  %v17642_v44 = vmax.f32 %v13504_v9, 0.0 }
 0x160   : > { %11621 = vmatprep.mubr.bf16.mxu0 %v12662_v2 }
 0x161   : > { %3522 = vmatpush1.bf16.msra.mxu0 %v12041_v48  ;;  %v13495_v48 = vadd.f32 %v13201_v50, %v1347_v40  ;;  %v12047_v40 = vld [vmem:[%s17612_s6 + $0x90] ss:$8 sps:$4 sm:$0xff]  }
 0x162   : > { %3523 = vmatprep.subr.bf16.mxu0 %v12046_v14  ;;  %v13500_v14 = vadd.f32 %v13222_v62, %v13385_v38  ;;  %v12052_v38 = vld [vmem:[%s17612_s6 + $0xa4] ss:$8 sps:$4 sm:$0xff]   ;;  %v13517_v10 = vpop.f32.mrb[40].mxu0 }
 0x163   : > { %17636 = vst [vmem:[#allocation20_spill] sm:$0xff] %v13495_v48  ;;  %v17454_v49 = vmax.f32 %v13495_v48, 0.0  ;;  %v1363_v2 = vpop.f32.mrb[41].mxu0 }
 0x164   : > { %2841 = vmatmul.mubr.bf16.gmra.mrb[148].mxu1 %v2500_v8  ;;  %v12044_v8 = vld [vmem:[%s17612_s6 + $0x80] ss:$8 sps:$4 sm:$0xff]   ;;  %v13523_v59 = vpop.f32.mrb[42].mxu0  ;;  %v17641_v11 = vmax.f32 %v13500_v14, 0.0 }
 0x165   : > { %2850 = vmatprep.mubr.bf16.mxu1 %v2503_v58  ;;  %v12049_v58 = vld [vmem:[%s17612_s6 + $0x94] ss:$8 sps:$4 sm:$0xff]   ;;  %3524 = vmatpush1.bf16.msra.mxu0 %v12044_v8  ;;  %v2507_v51 = vpack.c.bf16 %v17454_v49, %v17455_v61  ;;  %v12059_v61 = vld [vmem:[%s17612_s6 + $0xc0] ss:$8 sps:$4 sm:$0xff]  }
 0x166   : > { %3525 = vmatprep.subr.bf16.mxu0 %v12049_v58  ;;  %v1367_v58 = vpop.f32.mrb[43].mxu0  ;;  %v12663_v8 = vld [vmem:[%s12836_s29 + $0x58] sm:$0xff]   ;;  %v2504_v23 = vpack.c.bf16 %v17642_v44, %v17641_v11 }
 0x167   : > { %11622 = vmatmul.mubr.bf16.gmra.mrb[148].mxu0 %v12663_v8  ;;  %v12058_v8 = vld [vmem:[%s17643_s24 + $0x4] ss:$8 sps:$4 sm:$0xff]   ;;  %v13584_v11 = vadd.f32 %v13201_v50, %v1367_v58 }
 0x168   : > { %11625 = vmatprep.mubr.bf16.mxu0 %v13044_v15  ;;  %4256 = vmatprep.subr.bf16.mxu1 %v12058_v8  ;;  %v17645_v15 = vmax.f32 %v13532_v42, 0.0  ;;  %v17650_v8 = vmax.f32 %v13548_v16, 0.0 }
 0x169   : > { %3526 = vmatpush1.bf16.msra.mxu0 %v12047_v40  ;;  %v13539_v40 = vadd.f32 %v13201_v50, %v1357_v63  ;;  %v12053_v63 = vld [vmem:[%s17612_s6 + $0xb0] ss:$8 sps:$4 sm:$0xff]   ;;  %4257 = vmatpush1.bf16.msra.mxu1 %v12056_v13  ;;  %17647 = vst [vmem:[#allocation24_spill] sm:$0xff] %v13584_v11  ;;  %v13593_v13 = vadd.f32 %v13222_v62, %v13479_v20 }
 0x16a   : > { %3527 = vmatprep.subr.bf16.mxu0 %v12052_v38  ;;  %v13544_v38 = vadd.f32 %v13222_v62, %v13429_v43  ;;  %v13558_v43 = vpop.f32.mrb[44].mxu0  ;;  %v12062_v20 = vld [vmem:[%s17612_s6 + $0xd0] ss:$8 sps:$4 sm:$0xff]  }
 0x16b   : > { %17640 = vst [vmem:[#allocation22_spill] sm:$0xff] %v13539_v40  ;;  %v17646_v48 = vmax.f32 %v13539_v40, 0.0  ;;  %17648 = vst [vmem:[#allocation25_spill] sm:$0xff] %v13593_v13 }
 0x16c   : > { %2851 = vmatmul.mubr.bf16.gmra.mrb[152].mxu1 %v2502_v12  ;;  %v12050_v12 = vld [vmem:[%s17612_s6 + $0xa0] ss:$8 sps:$4 sm:$0xff]  }
 0x16d   : > { %2860 = vmatprep.mubr.bf16.mxu1 %v2505_v53  ;;  %v12055_v53 = vld [vmem:[%s17612_s6 + $0xb4] ss:$8 sps:$4 sm:$0xff]   ;;  %3528 = vmatpush1.bf16.msra.mxu0 %v12050_v12  ;;  %v1373_v12 = vpop.f32.mrb[45].mxu0 }
 0x16e   : > { %3529 = vmatprep.subr.bf16.mxu0 %v12055_v53  ;;  %v1375_v49 = vpop.f32.mrb[46].mxu0  ;;  %v2509_v53 = vpack.c.bf16 %v17646_v48, %v17645_v15  ;;  %v12064_v15 = vld [vmem:[%s17612_s6 + $0xd4] ss:$8 sps:$4 sm:$0xff]  }
 0x16f   : > { %v1377_v44 = vpop.f32.mrb[47].mxu0  ;;  %11626 = vmatmul.mubr.bf16.gmra.mrb[152].mxu0 %v13056_v18 }
 0x170   : > { %11629 = vmatprep.mubr.bf16.mxu0 %v13062_v19  ;;  %v13618_v40 = vadd.f32 %v13201_v50, %v1377_v44  ;;  %v13623_v19 = vadd.f32 %v13222_v62, %v13517_v10 }
 0x171   : > { %3530 = vmatpush1.bf16.msra.mxu0 %v12053_v63  ;;  %v13589_v63 = vadd.f32 %v13222_v62, %v13473_v41  ;;  %v17458_v41 = vmax.f32 %v13584_v11, 0.0 }
 0x172   : > { %v1381_v18 = vpop.f32.mrb[48].mxu0  ;;  %17651 = vst [vmem:[#allocation26_spill] sm:$0xff] %v13618_v40 }
 0x173   : > { %v1383_v58 = vpop.f32.mrb[49].mxu0 }
 0x174   : > { %2861 = vmatmul.mubr.bf16.gmra.mrb[156].mxu1 %v2504_v23  ;;  %v12061_v23 = vld [vmem:[%s17612_s6 + $0xc4] ss:$8 sps:$4 sm:$0xff]  }
 0x175   : > { %2870 = vmatprep.mubr.bf16.mxu1 %v2507_v51  ;;  %3531 = vmatprep.subr.bf16.mxu0 %v12061_v23  ;;  %v13577_v51 = vadd.f32 %v13201_v50, %v1363_v2  ;;  %v17649_v2 = vmax.f32 %v13544_v38, 0.0 }
 0x176   : > { %3532 = vmatpush1.bf16.msra.mxu0 %v12059_v61  ;;  %v1385_v61 = vpop.f32.mrb[50].mxu0 }
 0x177   : > { %17644 = vst [vmem:[#allocation23_spill] sm:$0xff] %v13577_v51  ;;  %v2506_v23 = vpack.c.bf16 %v17650_v8, %v17649_v2  ;;  %v17459_v48 = vmax.f32 %v13577_v51, 0.0  ;;  %v17460_v2 = vmax.f32 %v13589_v63, 0.0  ;;  %v1387_v8 = vpop.f32.mrb[51].mxu0  ;;  %3533 = vmatprep.subr.bf16.mxu0 %v12064_v15  ;;  %11630 = vmatmul.mubr.bf16.gmra.mrb[156].mxu0 %v13075_v22  ;;  %v13627_v15 = vadd.f32 %v13222_v62, %v13523_v59  ;;  %v12065_v22 = vld [vmem:[%s17643_s24 + $0x10] ss:$8 sps:$4 sm:$0xff]  }
 0x178   : > { %11633 = vmatprep.mubr.bf16.mxu0 %v13085_v24  ;;  %v12067_v59 = vld [vmem:[%s17643_s24 + $0x14] ss:$8 sps:$4 sm:$0xff]   ;;  %v12068_v24 = vld [vmem:[%s17612_s6 + $0xe0] ss:$8 sps:$4 sm:$0xff]   ;;  %v17654_v51 = vmax.f32 %v13618_v40, 0.0 }
 0x179   : > { %4258 = vmatprep.subr.bf16.mxu1 %v12067_v59  ;;  %v13663_v59 = vadd.f32 %v13222_v62, %v13558_v43 }
 0x17a   : > { %3534 = vmatpush1.bf16.msra.mxu0 %v12062_v20  ;;  %4259 = vmatpush1.bf16.msra.mxu1 %v12065_v22  ;;  %v13666_v22 = vadd.f32 %v13222_v62, %v1375_v49 }
 0x17b   : > { %v17470_v43 = vmax.f32 %v13663_v59, 0.0 }
 0x17c   : > { %2871 = vmatmul.mubr.bf16.gmra.mrb[160].mxu1 %v2506_v23  ;;  %v2511_v23 = vpack.c.bf16 %v17458_v41, %v17459_v48  ;;  %v1391_v41 = vpop.f32.mrb[52].mxu0  ;;  %v17469_v49 = vmax.f32 %v13666_v22, 0.0 }
 0x17d   : > { %2880 = vmatprep.mubr.bf16.mxu1 %v2509_v53  ;;  %v13611_v53 = vadd.f32 %v13201_v50, %v1373_v12  ;;  %v17652_v12 = vmax.f32 %v13593_v13, 0.0  ;;  %v1393_v48 = vpop.f32.mrb[53].mxu0  ;;  %v13658_v13 = vadd.f32 %v13201_v50, %v1387_v8 }
 0x17e   : > { %v1395_v44 = vpop.f32.mrb[54].mxu0  ;;  %v13678_v40 = vadd.f32 %v13201_v50, %v1393_v48  ;;  %v2512_v48 = vpack.c.bf16 %v17469_v49, %v17470_v43  ;;  %v13721_v49 = vadd.f32 %v13222_v62, %v1391_v41 }
 0x17f   : > { %v2508_v20 = vpack.c.bf16 %v17652_v12, %v17460_v2  ;;  %v12070_v12 = vld [vmem:[%s17612_s6 + $0xe4] ss:$8 sps:$4 sm:$0xff]   ;;  %v17466_v2 = vmax.f32 %v13627_v15, 0.0  ;;  %v1397_v11 = vpop.f32.mrb[55].mxu0  ;;  %v17653_v10 = vmax.f32 %v13611_v53, 0.0  ;;  %17655 = vst [vmem:[#allocation27_spill] sm:$0xff] %v13658_v13  ;;  %11634 = vmatmul.mubr.bf16.gmra.mrb[160].mxu0 %v13092_v25 }
 0x180   : > { %3535 = vmatprep.subr.bf16.mxu0 %v12070_v12  ;;  %11637 = vmatprep.mubr.bf16.mxu0 %v13099_v26  ;;  %v17467_v25 = vmax.f32 %v13658_v13, 0.0  ;;  %17656 = vst [vmem:[#allocation28_spill] sm:$0xff] %v13678_v40  ;;  %17660 = vst [vmem:[#allocation32_spill] sm:$0xff] %v13721_v49 }
 0x181   : > { %3536 = vmatpush1.bf16.msra.mxu0 %v12068_v24  ;;  %v2513_v42 = vpack.c.bf16 %v17654_v51, %v17653_v10 }
 0x182   : > { %v1401_v51 = vpop.f32.mrb[56].mxu0 }
 0x183   : > { %v1403_v10 = vpop.f32.mrb[57].mxu0 }
 0x184   : > { %2881 = vmatmul.mubr.bf16.gmra.mrb[164].mxu1 %v2508_v20  ;;  %v17471_v20 = vmax.f32 %v13623_v19, 0.0  ;;  %v1405_v24 = vpop.f32.mrb[58].mxu0 }
 0x185   : > { %2890 = vmatprep.mubr.bf16.mxu1 %v2511_v23  ;;  %v13651_v23 = vadd.f32 %v13201_v50, %v1383_v58  ;;  %v1407_v12 = vpop.f32.mrb[59].mxu0 }
 0x186   : > { %v2510_v58 = vpack.c.bf16 %v17466_v2, %v17471_v20  ;;  %v13692_v2 = vadd.f32 %v13222_v62, %v1385_v61  ;;  %v13710_v20 = vadd.f32 %v13201_v50, %v1403_v10  ;;  %v13717_v13 = vadd.f32 %v13201_v50, %v1407_v12  ;;  %v12074_v12 = vld [vmem:[%s17643_s24 + $0x20] ss:$8 sps:$4 sm:$0xff]  }
 0x187   : > { %v17468_v8 = vmax.f32 %v13651_v23, 0.0  ;;  %11638 = vmatmul.mubr.bf16.gmra.mrb[164].mxu0 %v13106_v27  ;;  %v17474_v27 = vmax.f32 %v13678_v40, 0.0 }
 0x188   : > { %11641 = vmatprep.mubr.bf16.mxu0 %v13116_v29  ;;  %v17475_v29 = vmax.f32 %v13692_v2, 0.0  ;;  %17658 = vst [vmem:[#allocation30_spill] sm:$0xff] %v13710_v20  ;;  %17659 = vst [vmem:[#allocation31_spill] sm:$0xff] %v13717_v13 }
 0x189   : > { %v2515_v26 = vpack.c.bf16 %v17467_v25, %v17468_v8  ;;  %v12071_v8 = vld [vmem:[%s17612_s6 + $0xf0] ss:$8 sps:$4 sm:$0xff]  }
 0x18a   : > { %v1411_v25 = vpop.f32.mrb[60].mxu0 }
 0x18b   : > { %v1413_v61 = vpop.f32.mrb[61].mxu0 }
 0x18c   : > { %2891 = vmatmul.mubr.bf16.gmra.mrb[168].mxu1 %v2510_v58  ;;  %v13685_v58 = vadd.f32 %v13201_v50, %v1397_v11  ;;  %v12073_v11 = vld [vmem:[%s17612_s6 + $0xf4] ss:$8 sps:$4 sm:$0xff]   ;;  %v13742_v40 = vadd.f32 %v13201_v50, %v1413_v61 }
 0x18d   : > { %2900 = vmatprep.mubr.bf16.mxu1 %v2513_v42  ;;  %v13689_v42 = vadd.f32 %v13222_v62, %v1381_v18  ;;  %3537 = vmatprep.subr.bf16.mxu0 %v12073_v11  ;;  %v13724_v11 = vadd.f32 %v13222_v62, %v1395_v44  ;;  %v17479_v44 = vmax.f32 %v13710_v20, 0.0 }
 0x18e   : > { %17657 = vst [vmem:[#allocation29_spill] sm:$0xff] %v13685_v58  ;;  %v17473_v18 = vmax.f32 %v13685_v58, 0.0  ;;  %3538 = vmatpush1.bf16.msra.mxu0 %v12071_v8  ;;  %17662 = vst [vmem:[#allocation33_spill] sm:$0xff] %v13742_v40 }
 0x18f   : > { %11642 = vmatmul.mubr.bf16.gmra.mrb[168].mxu0 %v13123_v30  ;;  %v17661_v8 = vmax.f32 %v13689_v42, 0.0  ;;  %v12076_v30 = vld [vmem:[%s17643_s24 + $0x24] ss:$8 sps:$4 sm:$0xff]   ;;  %v17666_v61 = vmax.f32 %v13724_v11, 0.0 }
 0x190   : > { %11645 = vmatprep.mubr.bf16.mxu0 %v13130_v31  ;;  %4260 = vmatprep.subr.bf16.mxu1 %v12076_v30  ;;  %v13753_v30 = vadd.f32 %v13222_v62, %v1401_v51  ;;  %v13756_v31 = vadd.f32 %v13222_v62, %v1405_v24 }
 0x191   : > { %v2514_v10 = vpack.c.bf16 %v17475_v29, %v17661_v8  ;;  %v17487_v8 = vmax.f32 %v13721_v49, 0.0  ;;  %4261 = vmatpush1.bf16.msra.mxu1 %v12074_v12 }
 0x192   : > { %17664 = vst [vmem:[#allocation35_spill] sm:$0xff] %v13753_v30  ;;  %17665 = vst [vmem:[#allocation36_spill] sm:$0xff] %v13756_v31  ;;  %v17486_v51 = vmax.f32 %v13753_v30, 0.0  ;;  %v17485_v24 = vmax.f32 %v13756_v31, 0.0 }
 0x193   : > { %v2516_v12 = vpack.c.bf16 %v17666_v61, %v17487_v8 }
 0x194   : > { %2901 = vmatmul.mubr.bf16.gmra.mrb[172].mxu1 %v2512_v48  ;;  %v1415_v48 = vpop.f32.mrb[62].mxu0 }
 0x195   : > { %2910 = vmatprep.mubr.bf16.mxu1 %v2515_v26  ;;  %v1417_v43 = vpop.f32.mrb[63].mxu0  ;;  %v2517_v26 = vpack.c.bf16 %v17473_v18, %v17474_v27  ;;  %v17478_v18 = vmax.f32 %v13717_v13, 0.0 }
 0x196   : > { %v1421_v41 = vpop.f32.mrb[64].mxu0 }
 0x197   : > { %v1423_v27 = vpop.f32.mrb[65].mxu0  ;;  %11646 = vmatmul.mubr.bf16.gmra.mrb[172].mxu0 %v13137_v32 }
 0x198   : > { %v1425_v29 = vpop.f32.mrb[66].mxu0  ;;  %11649 = vmatprep.mubr.bf16.mxu0 %v13147_v34  ;;  %v13768_v49 = vadd.f32 %v13201_v50, %v1423_v27  ;;  %v2518_v27 = vpack.c.bf16 %v17485_v24, %v17486_v51 }
 0x199   : > { %v1427_v58 = vpop.f32.mrb[67].mxu0 }
 0x19a   : > { %17667 = vst [vmem:[#allocation37_spill] sm:$0xff] %v13768_v49  ;;  %v13775_v61 = vadd.f32 %v13201_v50, %v1427_v58  ;;  %v12077_v58 = vld [vmem:[%s17643_s24 + $0x30] ss:$8 sps:$4 sm:$0xff]  }
 0x19c   : > { %2911 = vmatmul.mubr.bf16.gmra.mrb[176].mxu1 %v2514_v10  ;;  %v2519_v10 = vpack.c.bf16 %v17478_v18, %v17479_v44  ;;  %v1431_v18 = vpop.f32.mrb[68].mxu0  ;;  %17668 = vst [vmem:[#allocation38_spill] sm:$0xff] %v13775_v61 }
 0x19d   : > { %2920 = vmatprep.mubr.bf16.mxu1 %v2517_v26  ;;  %v13749_v26 = vadd.f32 %v13201_v50, %v1417_v43  ;;  %v17484_v43 = vmax.f32 %v13742_v40, 0.0  ;;  %v1433_v44 = vpop.f32.mrb[69].mxu0 }
 0x19e   : > { %v1435_v13 = vpop.f32.mrb[70].mxu0 }
 0x19f   : > { %17663 = vst [vmem:[#allocation34_spill] sm:$0xff] %v13749_v26  ;;  %v17483_v32 = vmax.f32 %v13749_v26, 0.0  ;;  %v1437_v20 = vpop.f32.mrb[71].mxu0  ;;  %11650 = vmatmul.mubr.bf16.gmra.mrb[176].mxu0 %v13154_v35  ;;  %v12079_v35 = vld [vmem:[%s17643_s24 + $0x34] ss:$8 sps:$4 sm:$0xff]   ;;  %v13800_v26 = vadd.f32 %v13201_v50, %v1433_v44 }
 0x1a0   : > { %11653 = vmatprep.mubr.bf16.mxu0 %v13161_v36  ;;  %4262 = vmatprep.subr.bf16.mxu1 %v12079_v35  ;;  %v13811_v35 = vadd.f32 %v13222_v62, %v1421_v41  ;;  %v13814_v36 = vadd.f32 %v13222_v62, %v1425_v29 }
 0x1a1   : > { %v2521_v34 = vpack.c.bf16 %v17483_v32, %v17484_v43  ;;  %v17489_v32 = vmax.f32 %v13775_v61, 0.0  ;;  %4263 = vmatpush1.bf16.msra.mxu1 %v12077_v58  ;;  %17671 = vst [vmem:[#allocation41_spill] sm:$0xff] %v13800_v26 }
 0x1a2   : > { %17673 = vst [vmem:[#allocation43_spill] sm:$0xff] %v13811_v35  ;;  %17674 = vst [vmem:[#allocation44_spill] sm:$0xff] %v13814_v36  ;;  %v17497_v41 = vmax.f32 %v13811_v35, 0.0  ;;  %v17496_v29 = vmax.f32 %v13814_v36, 0.0 }
 0x1a4   : > { %2921 = vmatmul.mubr.bf16.gmra.mrb[180].mxu1 %v2516_v12  ;;  %v13782_v12 = vadd.f32 %v13222_v62, %v1415_v48  ;;  %v17490_v48 = vmax.f32 %v13768_v49, 0.0 }
 0x1a5   : > { %2930 = vmatprep.mubr.bf16.mxu1 %v2519_v10  ;;  %v13779_v10 = vadd.f32 %v13222_v62, %v1411_v25  ;;  %v1441_v25 = vpop.f32.mrb[72].mxu0 }
 0x1a6   : > { %17670 = vst [vmem:[#allocation40_spill] sm:$0xff] %v13782_v12  ;;  %v1443_v43 = vpop.f32.mrb[73].mxu0  ;;  %v17675_v44 = vmax.f32 %v13782_v12, 0.0 }
 0x1a7   : > { %17669 = vst [vmem:[#allocation39_spill] sm:$0xff] %v13779_v10  ;;  %v17498_v24 = vmax.f32 %v13779_v10, 0.0  ;;  %v1445_v51 = vpop.f32.mrb[74].mxu0  ;;  %11654 = vmatmul.mubr.bf16.gmra.mrb[180].mxu0 %v13168_v37  ;;  %v13826_v40 = vadd.f32 %v13201_v50, %v1443_v43  ;;  %v2522_v43 = vpack.c.bf16 %v17496_v29, %v17497_v41 }
 0x1a8   : > { %v1447_v8 = vpop.f32.mrb[75].mxu0  ;;  %11657 = vmatprep.mubr.bf16.mxu0 %v13178_v39 }
 0x1a9   : > { %v2520_v58 = vpack.c.bf16 %v17675_v44, %v17498_v24  ;;  %17676 = vst [vmem:[#allocation45_spill] sm:$0xff] %v13826_v40  ;;  %v13833_v44 = vadd.f32 %v13201_v50, %v1447_v8  ;;  %v12080_v8 = vld [vmem:[%s17643_s24 + $0x40] ss:$8 sps:$4 sm:$0xff]  }
 0x1ab   : > { %17677 = vst [vmem:[#allocation46_spill] sm:$0xff] %v13833_v44 }
 0x1ac   : > { %2931 = vmatmul.mubr.bf16.gmra.mrb[184].mxu1 %v2518_v27  ;;  %v2523_v27 = vpack.c.bf16 %v17489_v32, %v17490_v48  ;;  %v1451_v32 = vpop.f32.mrb[76].mxu0 }
 0x1ad   : > { %2940 = vmatprep.mubr.bf16.mxu1 %v2521_v34  ;;  %v13807_v34 = vadd.f32 %v13201_v50, %v1437_v20  ;;  %v17495_v20 = vmax.f32 %v13800_v26, 0.0  ;;  %v1453_v48 = vpop.f32.mrb[77].mxu0 }
 0x1ae   : > { %v1455_v61 = vpop.f32.mrb[78].mxu0 }
 0x1af   : > { %17672 = vst [vmem:[#allocation42_spill] sm:$0xff] %v13807_v34  ;;  %v17494_v37 = vmax.f32 %v13807_v34, 0.0  ;;  %v1457_v49 = vpop.f32.mrb[79].mxu0  ;;  %11658 = vmatmul.mubr.bf16.gmra.mrb[184].mxu0 %v13188_v46  ;;  %v12082_v46 = vld [vmem:[%s17643_s24 + $0x44] ss:$8 sps:$4 sm:$0xff]   ;;  %v13858_v34 = vadd.f32 %v13201_v50, %v1453_v48 }
 0x1b0   : > { %11661 = vmatprep.mubr.bf16.mxu0 %v13204_v54  ;;  %4264 = vmatprep.subr.bf16.mxu1 %v12082_v46  ;;  %v13869_v46 = vadd.f32 %v13222_v62, %v1441_v25  ;;  %v13872_v54 = vadd.f32 %v13222_v62, %v1445_v51 }
 0x1b1   : > { %v2525_v39 = vpack.c.bf16 %v17494_v37, %v17495_v20  ;;  %v17501_v37 = vmax.f32 %v13833_v44, 0.0  ;;  %4265 = vmatpush1.bf16.msra.mxu1 %v12080_v8  ;;  %17680 = vst [vmem:[#allocation49_spill] sm:$0xff] %v13858_v34 }
 0x1b2   : > { %17682 = vst [vmem:[#allocation51_spill] sm:$0xff] %v13869_v46  ;;  %17683 = vst [vmem:[#allocation52_spill] sm:$0xff] %v13872_v54  ;;  %v17510_v25 = vmax.f32 %v13872_v54, 0.0 }
 0x1b4   : > { %2941 = vmatmul.mubr.bf16.gmra.mrb[188].mxu1 %v2520_v58  ;;  %v13840_v58 = vadd.f32 %v13222_v62, %v1435_v13  ;;  %v17502_v13 = vmax.f32 %v13826_v40, 0.0 }
 0x1b5   : > { %2950 = vmatprep.mubr.bf16.mxu1 %v2523_v27  ;;  %v13837_v27 = vadd.f32 %v13222_v62, %v1431_v18  ;;  %v1461_v18 = vpop.f32.mrb[80].mxu0 }
 0x1b6   : > { %17679 = vst [vmem:[#allocation48_spill] sm:$0xff] %v13840_v58  ;;  %v1463_v20 = vpop.f32.mrb[81].mxu0  ;;  %v17684_v48 = vmax.f32 %v13840_v58, 0.0 }
 0x1b7   : > { %17678 = vst [vmem:[#allocation47_spill] sm:$0xff] %v13837_v27  ;;  %v17505_v29 = vmax.f32 %v13837_v27, 0.0  ;;  %v1465_v41 = vpop.f32.mrb[82].mxu0  ;;  %11662 = vmatmul.mubr.bf16.gmra.mrb[188].mxu0 %v13225_v1  ;;  %v17511_v1 = vmax.f32 %v13869_v46, 0.0  ;;  %v13883_v26 = vadd.f32 %v13201_v50, %v1463_v20 }
 0x1b8   : > { %v1467_v24 = vpop.f32.mrb[83].mxu0 }
 0x1b9   : > { %v2524_v8 = vpack.c.bf16 %v17684_v48, %v17505_v29  ;;  %17685 = vst [vmem:[#allocation53_spill] sm:$0xff] %v13883_v26  ;;  %v13896_v29 = vadd.f32 %v13222_v62, %v1455_v61  ;;  %v2526_v20 = vpack.c.bf16 %v17510_v25, %v17511_v1 }
 0x1ba   : > { %v1471_v40 = vpop.f32.mrb[84].mxu0 }
 0x1bb   : > { %17688 = vst [vmem:[#allocation56_spill] sm:$0xff] %v13896_v29  ;;  %v17520_v25 = vmax.f32 %v13896_v29, 0.0 }
 0x1bc   : > { %2951 = vmatmul.mubr.bf16.gmra.mrb[192].mxu1 %v2522_v43  ;;  %v2527_v43 = vpack.c.bf16 %v17501_v37, %v17502_v13  ;;  %v17508_v37 = vmax.f32 %v13858_v34, 0.0  ;;  %v1473_v13 = vpop.f32.mrb[85].mxu0  ;;  %v12083_v34 = vld [vmem:[%s17643_s24 + $0x50] ss:$8 sps:$4 sm:$0xff]  }
 0x1bd   : > { %2960 = vmatprep.mubr.bf16.mxu1 %v2525_v39  ;;  %v13865_v39 = vadd.f32 %v13201_v50, %v1457_v49  ;;  %v1475_v44 = vpop.f32.mrb[86].mxu0  ;;  %v13913_v46 = vadd.f32 %v13201_v50, %v1473_v13 }
 0x1be   : > { %v1477_v51 = vpop.f32.mrb[87].mxu0 }
 0x1bf   : > { %17681 = vst [vmem:[#allocation50_spill] sm:$0xff] %v13865_v39  ;;  %v17507_v49 = vmax.f32 %v13865_v39, 0.0  ;;  %17689 = vst [vmem:[#allocation57_spill] sm:$0xff] %v13913_v46  ;;  %v13926_v39 = vadd.f32 %v13222_v62, %v1465_v41 }
 0x1c1   : > { %v2529_v48 = vpack.c.bf16 %v17507_v49, %v17508_v37  ;;  %17692 = vst [vmem:[#allocation60_spill] sm:$0xff] %v13926_v39 }
 0x1c2   : > { %v1481_v49 = vpop.f32.mrb[88].mxu0 }
 0x1c3   : > { %v1483_v37 = vpop.f32.mrb[89].mxu0 }
 0x1c4   : > { %2961 = vmatmul.mubr.bf16.gmra.mrb[196].mxu1 %v2524_v8  ;;  %v13890_v8 = vadd.f32 %v13201_v50, %v1467_v24  ;;  %v12085_v24 = vld [vmem:[%s17643_s24 + $0x54] ss:$8 sps:$4 sm:$0xff]   ;;  %v1485_v1 = vpop.f32.mrb[90].mxu0  ;;  %v13937_v27 = vadd.f32 %v13201_v50, %v1483_v37 }
 0x1c5   : > { %2970 = vmatprep.mubr.bf16.mxu1 %v2527_v43  ;;  %v13893_v43 = vadd.f32 %v13222_v62, %v1451_v32  ;;  %v17517_v32 = vmax.f32 %v13883_v26, 0.0  ;;  %4266 = vmatprep.subr.bf16.mxu1 %v12085_v24  ;;  %v1487_v54 = vpop.f32.mrb[91].mxu0  ;;  %v13923_v24 = vadd.f32 %v13222_v62, %v1461_v18  ;;  %v17523_v26 = vmax.f32 %v13913_v46, 0.0  ;;  %v12086_v46 = vld [vmem:[%s17643_s24 + $0x60] ss:$8 sps:$4 sm:$0xff]  }
 0x1c6   : > { %17686 = vst [vmem:[#allocation54_spill] sm:$0xff] %v13890_v8  ;;  %v17516_v61 = vmax.f32 %v13890_v8, 0.0  ;;  %4267 = vmatpush1.bf16.msra.mxu1 %v12083_v34  ;;  %v17525_v18 = vmax.f32 %v13926_v39, 0.0  ;;  %17694 = vst [vmem:[#allocation61_spill] sm:$0xff] %v13937_v27 }
 0x1c7   : > { %17687 = vst [vmem:[#allocation55_spill] sm:$0xff] %v13893_v43  ;;  %17691 = vst [vmem:[#allocation59_spill] sm:$0xff] %v13923_v24  ;;  %v17693_v34 = vmax.f32 %v13893_v43, 0.0 }
 0x1c9   : > { %v2528_v13 = vpack.c.bf16 %v17520_v25, %v17693_v34  ;;  %v13950_v25 = vadd.f32 %v13222_v62, %v1475_v44 }
 0x1ca   : > { %v1491_v58 = vpop.f32.mrb[92].mxu0 }
 0x1cb   : > { %17697 = vst [vmem:[#allocation64_spill] sm:$0xff] %v13950_v25 }
 0x1cc   : > { %2971 = vmatmul.mubr.bf16.gmra.mrb[200].mxu1 %v2526_v20  ;;  %v2531_v20 = vpack.c.bf16 %v17516_v61, %v17517_v32  ;;  %v17526_v32 = vmax.f32 %v13923_v24, 0.0 }
 0x1cd   : > { %2980 = vmatprep.mubr.bf16.mxu1 %v2529_v48  ;;  %v13920_v48 = vadd.f32 %v13201_v50, %v1477_v51  ;;  %v1493_v51 = vpop.f32.mrb[93].mxu0 }
 0x1ce   : > { %v1495_v8 = vpop.f32.mrb[94].mxu0  ;;  %v2530_v37 = vpack.c.bf16 %v17525_v18, %v17526_v32  ;;  %v17535_v18 = vmax.f32 %v13950_v25, 0.0  ;;  %v13967_v24 = vadd.f32 %v13201_v50, %v1493_v51 }
 0x1cf   : > { %17690 = vst [vmem:[#allocation58_spill] sm:$0xff] %v13920_v48  ;;  %v17522_v61 = vmax.f32 %v13920_v48, 0.0  ;;  %v1497_v41 = vpop.f32.mrb[95].mxu0  ;;  %v13980_v48 = vadd.f32 %v13222_v62, %v1485_v1 }
 0x1d0   : > { %17698 = vst [vmem:[#allocation65_spill] sm:$0xff] %v13967_v24 }
 0x1d1   : > { %v2533_v34 = vpack.c.bf16 %v17522_v61, %v17523_v26  ;;  %17701 = vst [vmem:[#allocation68_spill] sm:$0xff] %v13980_v48 }
 0x1d2   : > { %v1501_v61 = vpop.f32.mrb[96].mxu0 }
 0x1d3   : > { %v1503_v26 = vpop.f32.mrb[97].mxu0 }
 0x1d4   : > { %2981 = vmatmul.mubr.bf16.gmra.mrb[204].mxu1 %v2528_v13  ;;  %v13944_v13 = vadd.f32 %v13201_v50, %v1487_v54  ;;  %v12088_v54 = vld [vmem:[%s17643_s24 + $0x64] ss:$8 sps:$4 sm:$0xff]   ;;  %v1505_v32 = vpop.f32.mrb[98].mxu0  ;;  %v13991_v43 = vadd.f32 %v13201_v50, %v1503_v26 }
 0x1d5   : > { %2990 = vmatprep.mubr.bf16.mxu1 %v2531_v20  ;;  %v13947_v20 = vadd.f32 %v13222_v62, %v1471_v40  ;;  %v17532_v40 = vmax.f32 %v13937_v27, 0.0  ;;  %4268 = vmatprep.subr.bf16.mxu1 %v12088_v54  ;;  %v1507_v39 = vpop.f32.mrb[99].mxu0  ;;  %v13977_v54 = vadd.f32 %v13222_v62, %v1481_v49  ;;  %v17538_v27 = vmax.f32 %v13967_v24, 0.0  ;;  %v12089_v24 = vld [vmem:[%s17643_s24 + $0x70] ss:$8 sps:$4 sm:$0xff]  }
 0x1d6   : > { %17695 = vst [vmem:[#allocation62_spill] sm:$0xff] %v13944_v13  ;;  %v17531_v44 = vmax.f32 %v13944_v13, 0.0  ;;  %4269 = vmatpush1.bf16.msra.mxu1 %v12086_v46  ;;  %v17540_v49 = vmax.f32 %v13980_v48, 0.0  ;;  %17703 = vst [vmem:[#allocation69_spill] sm:$0xff] %v13991_v43 }
 0x1d7   : > { %17696 = vst [vmem:[#allocation63_spill] sm:$0xff] %v13947_v20  ;;  %17700 = vst [vmem:[#allocation67_spill] sm:$0xff] %v13977_v54  ;;  %v17702_v46 = vmax.f32 %v13947_v20, 0.0 }
 0x1d9   : > { %v2532_v51 = vpack.c.bf16 %v17535_v18, %v17702_v46  ;;  %v14004_v18 = vadd.f32 %v13222_v62, %v1495_v8 }
 0x1da   : > { %v1511_v29 = vpop.f32.mrb[100].mxu0 }
 0x1db   : > { %17706 = vst [vmem:[#allocation72_spill] sm:$0xff] %v14004_v18 }
 0x1dc   : > { %2991 = vmatmul.mubr.bf16.gmra.mrb[208].mxu1 %v2530_v37  ;;  %v2535_v37 = vpack.c.bf16 %v17531_v44, %v17532_v40  ;;  %v17541_v40 = vmax.f32 %v13977_v54, 0.0 }
 0x1dd   : > { %3000 = vmatprep.mubr.bf16.mxu1 %v2533_v34  ;;  %v13974_v34 = vadd.f32 %v13201_v50, %v1497_v41  ;;  %v1513_v41 = vpop.f32.mrb[101].mxu0 }
 0x1de   : > { %v1515_v13 = vpop.f32.mrb[102].mxu0  ;;  %v2534_v26 = vpack.c.bf16 %v17540_v49, %v17541_v40  ;;  %v17550_v49 = vmax.f32 %v14004_v18, 0.0  ;;  %v14021_v54 = vadd.f32 %v13201_v50, %v1513_v41 }
 0x1df   : > { %17699 = vst [vmem:[#allocation66_spill] sm:$0xff] %v13974_v34  ;;  %v17537_v44 = vmax.f32 %v13974_v34, 0.0  ;;  %v1517_v1 = vpop.f32.mrb[103].mxu0  ;;  %v14034_v34 = vadd.f32 %v13222_v62, %v1505_v32 }
 0x1e0   : > { %17707 = vst [vmem:[#allocation73_spill] sm:$0xff] %v14021_v54 }
 0x1e1   : > { %v2537_v46 = vpack.c.bf16 %v17537_v44, %v17538_v27  ;;  %17710 = vst [vmem:[#allocation76_spill] sm:$0xff] %v14034_v34 }
 0x1e2   : > { %v1521_v44 = vpop.f32.mrb[104].mxu0 }
 0x1e3   : > { %v1523_v27 = vpop.f32.mrb[105].mxu0 }
 0x1e4   : > { %3001 = vmatmul.mubr.bf16.gmra.mrb[212].mxu1 %v2532_v51  ;;  %v13998_v51 = vadd.f32 %v13201_v50, %v1507_v39  ;;  %v12091_v39 = vld [vmem:[%s17643_s24 + $0x74] ss:$8 sps:$4 sm:$0xff]   ;;  %v1525_v40 = vpop.f32.mrb[106].mxu0  ;;  %v14045_v20 = vadd.f32 %v13201_v50, %v1523_v27 }
 0x1e5   : > { %3010 = vmatprep.mubr.bf16.mxu1 %v2535_v37  ;;  %v14001_v37 = vadd.f32 %v13222_v62, %v1491_v58  ;;  %v17547_v58 = vmax.f32 %v13991_v43, 0.0  ;;  %4270 = vmatprep.subr.bf16.mxu1 %v12091_v39  ;;  %v1527_v48 = vpop.f32.mrb[107].mxu0  ;;  %v14031_v39 = vadd.f32 %v13222_v62, %v1501_v61  ;;  %v17553_v43 = vmax.f32 %v14021_v54, 0.0  ;;  %v12092_v54 = vld [vmem:[%s17643_s24 + $0x80] ss:$8 sps:$4 sm:$0xff]  }
 0x1e6   : > { %17704 = vst [vmem:[#allocation70_spill] sm:$0xff] %v13998_v51  ;;  %v17546_v8 = vmax.f32 %v13998_v51, 0.0  ;;  %4271 = vmatpush1.bf16.msra.mxu1 %v12089_v24  ;;  %v17555_v61 = vmax.f32 %v14034_v34, 0.0  ;;  %17712 = vst [vmem:[#allocation77_spill] sm:$0xff] %v14045_v20 }
 0x1e7   : > { %17705 = vst [vmem:[#allocation71_spill] sm:$0xff] %v14001_v37  ;;  %17709 = vst [vmem:[#allocation75_spill] sm:$0xff] %v14031_v39  ;;  %v17711_v24 = vmax.f32 %v14001_v37, 0.0 }
 0x1e9   : > { %v2536_v41 = vpack.c.bf16 %v17550_v49, %v17711_v24  ;;  %v14058_v49 = vadd.f32 %v13222_v62, %v1515_v13 }
 0x1ea   : > { %v1531_v25 = vpop.f32.mrb[108].mxu0 }
 0x1eb   : > { %17715 = vst [vmem:[#allocation80_spill] sm:$0xff] %v14058_v49 }
 0x1ec   : > { %3011 = vmatmul.mubr.bf16.gmra.mrb[216].mxu1 %v2534_v26  ;;  %v2539_v26 = vpack.c.bf16 %v17546_v8, %v17547_v58  ;;  %v17556_v58 = vmax.f32 %v14031_v39, 0.0 }
 0x1ed   : > { %3020 = vmatprep.mubr.bf16.mxu1 %v2537_v46  ;;  %v14028_v46 = vadd.f32 %v13201_v50, %v1517_v1  ;;  %v1533_v1 = vpop.f32.mrb[109].mxu0 }
 0x1ee   : > { %v1535_v51 = vpop.f32.mrb[110].mxu0  ;;  %v2538_v27 = vpack.c.bf16 %v17555_v61, %v17556_v58  ;;  %v17564_v61 = vmax.f32 %v14058_v49, 0.0  ;;  %v14075_v39 = vadd.f32 %v13201_v50, %v1533_v1 }
 0x1ef   : > { %17708 = vst [vmem:[#allocation74_spill] sm:$0xff] %v14028_v46  ;;  %v17552_v8 = vmax.f32 %v14028_v46, 0.0  ;;  %v1537_v32 = vpop.f32.mrb[111].mxu0  ;;  %v14088_v46 = vadd.f32 %v13222_v62, %v1525_v40 }
 0x1f0   : > { %17716 = vst [vmem:[#allocation81_spill] sm:$0xff] %v14075_v39 }
 0x1f1   : > { %v2541_v24 = vpack.c.bf16 %v17552_v8, %v17553_v43  ;;  %17719 = vst [vmem:[#allocation84_spill] sm:$0xff] %v14088_v46 }
 0x1f2   : > { %v1541_v8 = vpop.f32.mrb[112].mxu0 }
 0x1f3   : > { %v1543_v43 = vpop.f32.mrb[113].mxu0 }
 0x1f4   : > { %3021 = vmatmul.mubr.bf16.gmra.mrb[220].mxu1 %v2536_v41  ;;  %v14052_v41 = vadd.f32 %v13201_v50, %v1527_v48  ;;  %v12094_v48 = vld [vmem:[%s17643_s24 + $0x84] ss:$8 sps:$4 sm:$0xff]   ;;  %v1545_v58 = vpop.f32.mrb[114].mxu0 }
 0x1f5   : > { %3030 = vmatprep.mubr.bf16.mxu1 %v2539_v26  ;;  %v14055_v26 = vadd.f32 %v13222_v62, %v1511_v29  ;;  %v17562_v29 = vmax.f32 %v14045_v20, 0.0  ;;  %4272 = vmatprep.subr.bf16.mxu1 %v12094_v48  ;;  %v1547_v34 = vpop.f32.mrb[115].mxu0  ;;  %v14085_v48 = vadd.f32 %v13222_v62, %v1521_v44  ;;  %v14119_v44 = vadd.f32 %v13222_v62, %v1535_v51 }
 0x1f6   : > { %17713 = vst [vmem:[#allocation78_spill] sm:$0xff] %v14052_v41  ;;  %v17561_v13 = vmax.f32 %v14052_v41, 0.0  ;;  %4273 = vmatpush1.bf16.msra.mxu1 %v12092_v54  ;;  %v17569_v41 = vmax.f32 %v14075_v39, 0.0  ;;  %v12095_v39 = vld [vmem:[%s17643_s24 + $0x90] ss:$8 sps:$4 sm:$0xff]  }
 0x1f7   : > { %17714 = vst [vmem:[#allocation79_spill] sm:$0xff] %v14055_v26  ;;  %17718 = vst [vmem:[#allocation83_spill] sm:$0xff] %v14085_v48  ;;  %v17720_v54 = vmax.f32 %v14055_v26, 0.0  ;;  %v17726_v49 = vmax.f32 %v14085_v48, 0.0  ;;  %v17727_v26 = vmax.f32 %v14088_v46, 0.0  ;;  %v17734_v10 = vmax.f32 %v14119_v44, 0.0 }
 0x1f8   : > { %17725 = vst [vmem:[#allocation88_spill] sm:$0xff] %v14119_v44 }
 0x1f9   : > { %v2540_v1 = vpack.c.bf16 %v17564_v61, %v17720_v54  ;;  %v2586_v54 = vld [vmem:[%s17721_s7] sm:$0x3]  ;;  %v14113_v61 = vadd.f32 %v13201_v50, %v1547_v34  ;;  %v12097_v34 = vld [vmem:[%s17643_s24 + $0x94] ss:$8 sps:$4 sm:$0xff]  }
 0x1fa   : > { %v14094_v18 = vpop.f32.mrb[116].mxu0  ;;  %4274 = vmatprep.subr.bf16.mxu1 %v12097_v34 }
 0x1fb   : > { %17723 = vst [vmem:[#allocation86_spill] sm:$0xff] %v14113_v61  ;;  %4275 = vmatpush1.bf16.msra.mxu1 %v12095_v39  ;;  %v14158_v39 = vadd.f32 %v13222_v62, %v1541_v8 }
 0x1fc   : > { %3031 = vmatmul.mubr.bf16.gmra.mrb[224].mxu1 %v2538_v27  ;;  %v2543_v27 = vpack.c.bf16 %v17561_v13, %v17562_v29  ;;  %v1553_v13 = vpop.f32.mrb[117].mxu0  ;;  %v14116_v29 = vadd.f32 %v13222_v62, %v1531_v25  ;;  %v14132_v25 = vrot.slane %v2586_v54, %v13214_v57 }
 0x1fd   : > { %3040 = vmatprep.mubr.bf16.mxu1 %v2541_v24  ;;  %v14082_v24 = vadd.f32 %v13201_v50, %v1537_v32  ;;  %v14100_v40 = vpop.f32.mrb[118].mxu0  ;;  %17731 = vst [vmem:[#allocation91_spill] sm:$0xff] %v14158_v39 }
 0x1fe   : > { %v1557_v20 = vpop.f32.mrb[119].mxu0  ;;  %17724 = vst [vmem:[#allocation87_spill] sm:$0xff] %v14116_v29 }
 0x1ff   : > { %17717 = vst [vmem:[#allocation82_spill] sm:$0xff] %v14082_v24  ;;  %v17568_v32 = vmax.f32 %v14082_v24, 0.0  ;;  %v14155_v46 = vadd.f32 %v13201_v50, %v1557_v20 }
 0x201   : > { %17730 = vst [vmem:[#allocation90_spill] sm:$0xff] %v14155_v46 }
 0x204   : > { %3041 = vmatmul.mubr.bf16.gmra.mrb[228].mxu1 %v2540_v1  ;;  %v14106_v1 = vadd.f32 %v13201_v50, %v1543_v43  ;;  %v2542_v43 = vpack.c.bf16 %v17727_v26, %v17726_v49  ;;  %v17580_v49 = vmax.f32 %v14113_v61, 0.0 }
 0x205   : > { %3050 = vmatprep.mubr.bf16.mxu1 %v2543_v27  ;;  %v2545_v27 = vpack.c.bf16 %v17568_v32, %v17569_v41  ;;  %v14134_v32 = vpop.f32.mrb[120].mxu0  ;;  %v14138_v41 = vrot.slane %v2586_v54, %v13191_v47 }
 0x206   : > { %17722 = vst [vmem:[#allocation85_spill] sm:$0xff] %v14106_v1  ;;  %v1563_v26 = vpop.f32.mrb[121].mxu0  ;;  %v17729_v34 = vmax.f32 %v14106_v1, 0.0 }
 0x208   : > { %v2547_v24 = vpack.c.bf16 %v17580_v49, %v17729_v34 }
 0x20c   : > { %3051 = vmatmul.mubr.bf16.gmra.mrb[232].mxu1 %v2542_v43  ;;  %v14143_v43 = vpop.f32.mrb[122].mxu0 }
 0x20d   : > { %3060 = vmatprep.mubr.bf16.mxu1 %v2545_v27  ;;  %v1567_v37 = vpop.f32.mrb[123].mxu0  ;;  %v14148_v27 = vadd.f32 %v13201_v50, %v1553_v13  ;;  %v17733_v13 = vmax.f32 %v14116_v29, 0.0 }
 0x20e   : > { %v14169_v20 = vpop.f32.mrb[124].mxu0 }
 0x20f   : > { %v2792_v48 = vpop.f32.mrb[128].mxu1  ;;  %17728 = vst [vmem:[#allocation89_spill] sm:$0xff] %v14148_v27  ;;  %v2544_v1 = vpack.c.bf16 %v17734_v10, %v17733_v13  ;;  %v1573_v30 = vpop.f32.mrb[125].mxu0  ;;  %v17736_v29 = vmax.f32 %v14148_v27, 0.0 }
 0x210   : > { %v2793_v36 = vadd.f32 %v2792_v48, %v14132_v25  ;;  %v2794_v51 = vpop.f32.mrb[129].mxu1  ;;  %v14161_v48 = vadd.f32 %v13222_v62, %v1545_v58  ;;  %v14175_v13 = vpop.f32.mrb[126].mxu0 }
 0x211   : > { %v2795_v54 = vadd.f32 %v2794_v51, %v14138_v41  ;;  %v2796_v35 = vpop.f32.mrb[130].mxu1 }
 0x212   : > { %17732 = vst [vmem:[#allocation92_spill] sm:$0xff] %v14161_v48  ;;  %v2797_v51 = vadd.f32 %v2796_v35, %v14132_v25  ;;  %v2798_v12 = vpop.f32.mrb[131].mxu1  ;;  %v3111_v34 = vmax.f32 %v2793_v36, 0.0  ;;  %v17585_v35 = vmax.f32 %v14155_v46, 0.0  ;;  %v17588_v44 = vmax.f32 %v14161_v48, 0.0 }
 0x213   : > { %v2799_v61 = vadd.f32 %v2798_v12, %v14138_v41  ;;  %v3112_v8 = vmax.f32 %v2795_v54, 0.0 }
 0x214   : > { %v3113_v49 = vmax.f32 %v2797_v51, 0.0  ;;  %3061 = vmatmul.mubr.bf16.gmra.mrb[236].mxu1 %v2544_v1  ;;  %v1577_v1 = vpop.f32.mrb[127].mxu0 }
 0x215   : > { %v3114_v31 = vmax.f32 %v2799_v61, 0.0  ;;  %3070 = vmatprep.mubr.bf16.mxu1 %v2547_v24  ;;  %v14180_v24 = vadd.f32 %v13201_v50, %v1563_v26 }
 0x216   : > { %v3239_v10 = vpack.c.bf16 %v3113_v49, %v3111_v34  ;;  %v2549_v49 = vpack.c.bf16 %v17585_v35, %v17736_v29  ;;  %v14187_v34 = vadd.f32 %v13201_v50, %v1567_v37 }
 0x217   : > { %v2802_v12 = vpop.f32.mrb[132].mxu1  ;;  %v3240_v36 = vpack.c.bf16 %v3114_v31, %v3112_v8  ;;  %17735 = vst [vmem:[#allocation93_spill] sm:$0xff] %v14180_v24  ;;  %v14191_v31 = vadd.f32 %v13222_v62, %v14094_v18  ;;  %v14195_v8 = vadd.f32 %v13222_v62, %v14100_v40  ;;  %v12098_v18 = vld [vmem:[%s17643_s24 + $0xa0] ss:$8 sps:$4 sm:$0xff]   ;;  %v12100_v40 = vld [vmem:[%s17643_s24 + $0xa4] ss:$8 sps:$4 sm:$0xff]  }
 0x218   : > { %v2803_v51 = vadd.f32 %v2802_v12, %v14132_v25  ;;  %v2804_v54 = vpop.f32.mrb[133].mxu1  ;;  %17737 = vst [vmem:[#allocation94_spill] sm:$0xff] %v14187_v34  ;;  %4276 = vmatprep.subr.bf16.mxu1 %v12100_v40  ;;  %v14224_v40 = vadd.f32 %v13201_v50, %v1573_v30  ;;  %v17744_v48 = vmax.f32 %v14180_v24, 0.0 }
 0x219   : > { %v2805_v61 = vadd.f32 %v2804_v54, %v14138_v41  ;;  %v2806_v58 = vpop.f32.mrb[134].mxu1  ;;  %3539 = vmatprep.mubr.bf16.mxu0 %v3240_v36  ;;  %v17738_v36 = vmax.f32 %v14158_v39, 0.0  ;;  %4277 = vmatpush1.bf16.msra.mxu1 %v12098_v18  ;;  %v14231_v18 = vadd.f32 %v13201_v50, %v1577_v1 }
 0x21a   : > { %v2807_v12 = vadd.f32 %v2806_v58, %v14132_v25  ;;  %v2808_v26 = vpop.f32.mrb[135].mxu1  ;;  %3540 = vmatmul.mubr.bf16.vlgmr.msra.gmra.mrb[192].mxu0 %v3239_v10  ;;  %v3115_v54 = vmax.f32 %v2803_v51, 0.0  ;;  %v14209_v58 = vpop.f32.mrb[128].mxu0  ;;  %17743 = vst [vmem:[#allocation99_spill] sm:$0xff] %v14224_v40 }
 0x21b   : > { %v2546_v29 = vpack.c.bf16 %v17588_v44, %v17738_v36  ;;  %v2809_v37 = vadd.f32 %v2808_v26, %v14138_v41  ;;  %17739 = vst [vmem:[#allocation95_spill] sm:$0xff] %v14209_v58  ;;  %v3116_v10 = vmax.f32 %v2805_v61, 0.0  ;;  %v14213_v36 = vpop.f32.mrb[129].mxu0  ;;  %v17591_v44 = vmax.f32 %v14191_v31, 0.0  ;;  %17746 = vst [vmem:[#allocation100_spill] sm:$0xff] %v14231_v18 }
 0x21c   : > { %v3117_v35 = vmax.f32 %v2807_v12, 0.0  ;;  %17740 = vst [vmem:[#allocation96_spill] sm:$0xff] %v14213_v36  ;;  %v14217_v51 = vpop.f32.mrb[130].mxu0  ;;  %v17753_v58 = vmax.f32 %v14231_v18, 0.0 }
 0x21d   : > { %3071 = vmatmul.mubr.bf16.gmra.mrb[240].mxu1 %v2546_v29  ;;  %v3118_v46 = vmax.f32 %v2809_v37, 0.0  ;;  %17741 = vst [vmem:[#allocation97_spill] sm:$0xff] %v14217_v51  ;;  %v14219_v61 = vpop.f32.mrb[131].mxu0 }
 0x21e   : > { %3080 = vmatprep.mubr.bf16.mxu1 %v2549_v49  ;;  %v3241_v39 = vpack.c.bf16 %v3117_v35, %v3115_v54  ;;  %17742 = vst [vmem:[#allocation98_spill] sm:$0xff] %v14219_v61  ;;  %v17745_v35 = vmax.f32 %v14187_v34, 0.0 }
 0x21f   : > { %v2812_v12 = vpop.f32.mrb[136].mxu1  ;;  %v3242_v29 = vpack.c.bf16 %v3118_v46, %v3116_v10  ;;  %v14235_v46 = vadd.f32 %v13222_v62, %v14134_v32  ;;  %v14239_v10 = vadd.f32 %v13222_v62, %v14143_v43  ;;  %v14247_v32 = vpop.f32.mrb[132].mxu0 }
 0x220   : > { %v2813_v37 = vadd.f32 %v2812_v12, %v14132_v25  ;;  %v2814_v49 = vpop.f32.mrb[137].mxu1  ;;  %v2551_v54 = vpack.c.bf16 %v17745_v35, %v17744_v48  ;;  %17748 = vst [vmem:[#allocation101_spill] sm:$0xff] %v14247_v32 }
 0x221   : > { %v2815_v26 = vadd.f32 %v2814_v49, %v14138_v41  ;;  %v2816_v27 = vpop.f32.mrb[138].mxu1  ;;  %3549 = vmatprep.mubr.bf16.mxu0 %v3242_v29  ;;  %v17747_v29 = vmax.f32 %v14195_v8, 0.0 }
 0x222   : > { %v2817_v12 = vadd.f32 %v2816_v27, %v14132_v25  ;;  %v2818_v30 = vpop.f32.mrb[139].mxu1  ;;  %3550 = vmatmul.mubr.bf16.gmra.mrb[196].mxu0 %v3241_v39  ;;  %v3119_v1 = vmax.f32 %v2813_v37, 0.0  ;;  %v14251_v39 = vpop.f32.mrb[133].mxu0  ;;  %v17752_v27 = vmax.f32 %v14224_v40, 0.0 }
 0x223   : > { %v2548_v48 = vpack.c.bf16 %v17747_v29, %v17591_v44  ;;  %v2819_v50 = vadd.f32 %v2818_v30, %v14138_v41  ;;  %v3120_v35 = vmax.f32 %v2815_v26, 0.0  ;;  %17749 = vst [vmem:[#allocation102_spill] sm:$0xff] %v14251_v39  ;;  %v17592_v29 = vmax.f32 %v14239_v10, 0.0  ;;  %v14255_v30 = vpop.f32.mrb[134].mxu0 }
 0x224   : > { %v3121_v49 = vmax.f32 %v2817_v12, 0.0  ;;  %17750 = vst [vmem:[#allocation103_spill] sm:$0xff] %v14255_v30  ;;  %v2553_v32 = vpack.c.bf16 %v17753_v58, %v17752_v27 }
 0x225   : > { %3081 = vmatmul.mubr.bf16.gmra.mrb[244].mxu1 %v2548_v48  ;;  %v3122_v51 = vmax.f32 %v2819_v50, 0.0  ;;  %v14257_v48 = vpop.f32.mrb[135].mxu0 }
 0x226   : > { %3090 = vmatprep.mubr.bf16.mxu1 %v2551_v54  ;;  %v3243_v44 = vpack.c.bf16 %v3121_v49, %v3119_v1  ;;  %17751 = vst [vmem:[#allocation104_spill] sm:$0xff] %v14257_v48  ;;  %v14267_v1 = vadd.f32 %v13222_v62, %v14169_v20  ;;  %v12101_v20 = vld [vmem:[%s17643_s24 + $0xb0] ss:$8 sps:$4 sm:$0xff]  }
 0x227   : > { %v2822_v37 = vpop.f32.mrb[140].mxu1  ;;  %v3244_v12 = vpack.c.bf16 %v3122_v51, %v3120_v35  ;;  %v14271_v51 = vadd.f32 %v13222_v62, %v14175_v13  ;;  %v12103_v62 = vld [vmem:[%s17643_s24 + $0xb4] ss:$8 sps:$4 sm:$0xff]  }
 0x228   : > { %v2823_v26 = vadd.f32 %v2822_v37, %v14132_v25  ;;  %v2824_v50 = vpop.f32.mrb[141].mxu1  ;;  %17754 = vst [vmem:[#allocation105_spill] sm:$0xff] %v14267_v1  ;;  %v17756_v37 = vmax.f32 %v14235_v46, 0.0  ;;  %4278 = vmatprep.subr.bf16.mxu1 %v12103_v62 }
 0x229   : > { %v2825_v54 = vadd.f32 %v2824_v50, %v14138_v41  ;;  %v2826_v43 = vpop.f32.mrb[142].mxu1  ;;  %3559 = vmatprep.mubr.bf16.mxu0 %v3244_v12  ;;  %17755 = vst [vmem:[#allocation106_spill] sm:$0xff] %v14271_v51  ;;  %4279 = vmatpush1.bf16.msra.mxu1 %v12101_v20 }
 0x22a   : > { %v2827_v49 = vadd.f32 %v2826_v43, %v14132_v25  ;;  %v2828_v35 = vpop.f32.mrb[143].mxu1  ;;  %3560 = vmatmul.mubr.bf16.gmra.mrb[200].mxu0 %v3243_v44  ;;  %v2550_v12 = vpack.c.bf16 %v17592_v29, %v17756_v37  ;;  %v3123_v13 = vmax.f32 %v2823_v26, 0.0  ;;  %v14285_v43 = vpop.f32.mrb[136].mxu0  ;;  %v17593_v37 = vmax.f32 %v14271_v51, 0.0 }
 0x22b   : > { %v2829_v50 = vadd.f32 %v2828_v35, %v14138_v41  ;;  %17757 = vst [vmem:[#allocation107_spill] sm:$0xff] %v14285_v43  ;;  %v3124_v44 = vmax.f32 %v2825_v54, 0.0  ;;  %v14287_v30 = vpop.f32.mrb[137].mxu0 }
 0x22c   : > { %v3125_v58 = vmax.f32 %v2827_v49, 0.0  ;;  %17758 = vst [vmem:[#allocation108_spill] sm:$0xff] %v14287_v30  ;;  %v14291_v48 = vpop.f32.mrb[138].mxu0 }
 0x22d   : > { %3091 = vmatmul.mubr.bf16.gmra.mrb[248].mxu1 %v2550_v12  ;;  %v3126_v27 = vmax.f32 %v2829_v50, 0.0  ;;  %17759 = vst [vmem:[#allocation109_spill] sm:$0xff] %v14291_v48  ;;  %v14293_v49 = vpop.f32.mrb[139].mxu0 }
 0x22e   : > { %3100 = vmatprep.mubr.bf16.mxu1 %v2553_v32  ;;  %v3245_v29 = vpack.c.bf16 %v3125_v58, %v3123_v13  ;;  %17760 = vst [vmem:[#allocation110_spill] sm:$0xff] %v14293_v49  ;;  %v17761_v13 = vmax.f32 %v14267_v1, 0.0 }
 0x22f   : > { %v2832_v39 = vpop.f32.mrb[144].mxu1  ;;  %v3246_v26 = vpack.c.bf16 %v3126_v27, %v3124_v44 }
 0x230   : > { %v2833_v12 = vadd.f32 %v2832_v39, %v14132_v25  ;;  %v2834_v54 = vpop.f32.mrb[145].mxu1  ;;  %v2552_v20 = vpack.c.bf16 %v17593_v37, %v17761_v13  ;;  %v14303_v39 = vpop.f32.mrb[140].mxu0 }
 0x231   : > { %v2835_v32 = vadd.f32 %v2834_v54, %v14138_v41  ;;  %v2836_v50 = vpop.f32.mrb[146].mxu1  ;;  %3569 = vmatprep.mubr.bf16.mxu0 %v3246_v26  ;;  %17762 = vst [vmem:[#allocation111_spill] sm:$0xff] %v14303_v39  ;;  %v14305_v43 = vpop.f32.mrb[141].mxu0 }
 0x232   : > { %v2837_v62 = vadd.f32 %v2836_v50, %v14132_v25  ;;  %v2838_v35 = vpop.f32.mrb[147].mxu1  ;;  %3570 = vmatmul.mubr.bf16.gmra.mrb[204].mxu0 %v3245_v29  ;;  %v3127_v44 = vmax.f32 %v2833_v12, 0.0  ;;  %17763 = vst [vmem:[#allocation112_spill] sm:$0xff] %v14305_v43  ;;  %v14307_v50 = vpop.f32.mrb[142].mxu0 }
 0x233   : > { %v2839_v58 = vadd.f32 %v2838_v35, %v14138_v41  ;;  %v3128_v48 = vmax.f32 %v2835_v32, 0.0  ;;  %17764 = vst [vmem:[#allocation113_spill] sm:$0xff] %v14307_v50  ;;  %v14309_v30 = vpop.f32.mrb[143].mxu0 }
 0x234   : > { %v3129_v27 = vmax.f32 %v2837_v62, 0.0  ;;  %17765 = vst [vmem:[#allocation114_spill] sm:$0xff] %v14309_v30 }
 0x235   : > { %3101 = vmatmul.mubr.bf16.gmra.mrb[252].mxu1 %v2552_v20  ;;  %v3130_v54 = vmax.f32 %v2839_v58, 0.0  ;;  %v12104_v58 = vld [vmem:[%s17643_s24 + $0xc0] ss:$8 sps:$4 sm:$0xff]  }
 0x236   : > { %v3247_v26 = vpack.c.bf16 %v3129_v27, %v3127_v44 }
 0x237   : > { %v2842_v29 = vpop.f32.mrb[148].mxu1  ;;  %v3248_v49 = vpack.c.bf16 %v3130_v54, %v3128_v48  ;;  %v12106_v48 = vld [vmem:[%s17643_s24 + $0xc4] ss:$8 sps:$4 sm:$0xff]   ;;  %v14321_v54 = vpop.f32.mrb[144].mxu0 }
 0x238   : > { %v2843_v13 = vadd.f32 %v2842_v29, %v14132_v25  ;;  %v2844_v37 = vpop.f32.mrb[149].mxu1  ;;  %17766 = vst [vmem:[#allocation115_spill] sm:$0xff] %v14321_v54  ;;  %v14323_v29 = vpop.f32.mrb[145].mxu0  ;;  %4280 = vmatprep.subr.bf16.mxu1 %v12106_v48 }
 0x239   : > { %v2845_v35 = vadd.f32 %v2844_v37, %v14138_v41  ;;  %v2846_v12 = vpop.f32.mrb[150].mxu1  ;;  %3579 = vmatprep.mubr.bf16.mxu0 %v3248_v49  ;;  %17767 = vst [vmem:[#allocation116_spill] sm:$0xff] %v14323_v29  ;;  %4281 = vmatpush1.bf16.msra.mxu1 %v12104_v58 }
 0x23a   : > { %v2847_v62 = vadd.f32 %v2846_v12, %v14132_v25  ;;  %v2848_v32 = vpop.f32.mrb[151].mxu1  ;;  %3580 = vmatmul.mubr.bf16.gmra.mrb[208].mxu0 %v3247_v26  ;;  %v3131_v44 = vmax.f32 %v2843_v13, 0.0  ;;  %v14325_v12 = vpop.f32.mrb[146].mxu0 }
 0x23b   : > { %v2849_v20 = vadd.f32 %v2848_v32, %v14138_v41  ;;  %v3132_v37 = vmax.f32 %v2845_v35, 0.0  ;;  %17768 = vst [vmem:[#allocation117_spill] sm:$0xff] %v14325_v12  ;;  %v14327_v39 = vpop.f32.mrb[147].mxu0 }
 0x23c   : > { %v3133_v27 = vmax.f32 %v2847_v62, 0.0  ;;  %17769 = vst [vmem:[#allocation118_spill] sm:$0xff] %v14327_v39  ;;  %v14333_v58 = vpop.f32.mrb[148].mxu0 }
 0x23d   : > { %v3134_v49 = vmax.f32 %v2849_v20, 0.0  ;;  %17770 = vst [vmem:[#allocation119_spill] sm:$0xff] %v14333_v58  ;;  %v14335_v12 = vpop.f32.mrb[149].mxu0 }
 0x23e   : > { %v3249_v26 = vpack.c.bf16 %v3133_v27, %v3131_v44  ;;  %17771 = vst [vmem:[#allocation120_spill] sm:$0xff] %v14335_v12  ;;  %v14337_v54 = vpop.f32.mrb[150].mxu0 }
 0x23f   : > { %v2852_v32 = vpop.f32.mrb[152].mxu1  ;;  %v3250_v50 = vpack.c.bf16 %v3134_v49, %v3132_v37  ;;  %17772 = vst [vmem:[#allocation121_spill] sm:$0xff] %v14337_v54 }
 0x240   : > { %v2853_v30 = vadd.f32 %v2852_v32, %v14132_v25  ;;  %v2854_v43 = vpop.f32.mrb[153].mxu1 }
 0x241   : > { %v2855_v13 = vadd.f32 %v2854_v43, %v14138_v41  ;;  %v2856_v62 = vpop.f32.mrb[154].mxu1  ;;  %3589 = vmatprep.mubr.bf16.mxu0 %v3250_v50  ;;  %v14339_v50 = vpop.f32.mrb[151].mxu0 }
 0x242   : > { %v2857_v35 = vadd.f32 %v2856_v62, %v14132_v25  ;;  %v2858_v20 = vpop.f32.mrb[155].mxu1  ;;  %3590 = vmatmul.mubr.bf16.gmra.mrb[212].mxu0 %v3249_v26  ;;  %v3135_v44 = vmax.f32 %v2853_v30, 0.0  ;;  %17773 = vst [vmem:[#allocation122_spill] sm:$0xff] %v14339_v50 }
 0x243   : > { %v2859_v48 = vadd.f32 %v2858_v20, %v14138_v41  ;;  %v3136_v37 = vmax.f32 %v2855_v13, 0.0 }
 0x244   : > { %v3137_v27 = vmax.f32 %v2857_v35, 0.0 }
 0x245   : > { %v3138_v49 = vmax.f32 %v2859_v48, 0.0 }
 0x246   : > { %v3251_v32 = vpack.c.bf16 %v3137_v27, %v3135_v44  ;;  %v12107_v44 = vld [vmem:[%s17643_s24 + $0xd0] ss:$8 sps:$4 sm:$0xff]   ;;  %v12109_v27 = vld [vmem:[%s17643_s24 + $0xd4] ss:$8 sps:$4 sm:$0xff]  }
 0x247   : > { %v2862_v43 = vpop.f32.mrb[156].mxu1  ;;  %v3252_v39 = vpack.c.bf16 %v3138_v49, %v3136_v37  ;;  %4282 = vmatprep.subr.bf16.mxu1 %v12109_v27 }
 0x248   : > { %v2863_v62 = vadd.f32 %v2862_v43, %v14132_v25  ;;  %v2864_v26 = vpop.f32.mrb[157].mxu1  ;;  %v14351_v43 = vpop.f32.mrb[152].mxu0  ;;  %4283 = vmatpush1.bf16.msra.mxu1 %v12107_v44 }
 0x249   : > { %v2865_v20 = vadd.f32 %v2864_v26, %v14138_v41  ;;  %v2866_v30 = vpop.f32.mrb[158].mxu1  ;;  %3599 = vmatprep.mubr.bf16.mxu0 %v3252_v39  ;;  %17774 = vst [vmem:[#allocation123_spill] sm:$0xff] %v14351_v43  ;;  %v14353_v54 = vpop.f32.mrb[153].mxu0 }
 0x24a   : > { %v2867_v35 = vadd.f32 %v2866_v30, %v14132_v25  ;;  %v2868_v13 = vpop.f32.mrb[159].mxu1  ;;  %3600 = vmatmul.mubr.bf16.gmra.mrb[216].mxu0 %v3251_v32  ;;  %v3139_v37 = vmax.f32 %v2863_v62, 0.0  ;;  %17775 = vst [vmem:[#allocation124_spill] sm:$0xff] %v14353_v54  ;;  %v14355_v30 = vpop.f32.mrb[154].mxu0 }
 0x24b   : > { %v2869_v48 = vadd.f32 %v2868_v13, %v14138_v41  ;;  %v3140_v26 = vmax.f32 %v2865_v20, 0.0  ;;  %17776 = vst [vmem:[#allocation125_spill] sm:$0xff] %v14355_v30  ;;  %v14357_v50 = vpop.f32.mrb[155].mxu0 }
 0x24c   : > { %v3141_v49 = vmax.f32 %v2867_v35, 0.0  ;;  %17777 = vst [vmem:[#allocation126_spill] sm:$0xff] %v14357_v50  ;;  %v14363_v44 = vpop.f32.mrb[156].mxu0 }
 0x24d   : > { %v3142_v39 = vmax.f32 %v2869_v48, 0.0  ;;  %17778 = vst [vmem:[#allocation127_spill] sm:$0xff] %v14363_v44  ;;  %v14365_v30 = vpop.f32.mrb[157].mxu0 }
 0x24e   : > { %v3253_v32 = vpack.c.bf16 %v3141_v49, %v3139_v37  ;;  %17779 = vst [vmem:[#allocation128_spill] sm:$0xff] %v14365_v30  ;;  %v14367_v43 = vpop.f32.mrb[158].mxu0 }
 0x24f   : > { %v2872_v13 = vpop.f32.mrb[160].mxu1  ;;  %v3254_v58 = vpack.c.bf16 %v3142_v39, %v3140_v26  ;;  %17780 = vst [vmem:[#allocation129_spill] sm:$0xff] %v14367_v43 }
 0x250   : > { %v2873_v12 = vadd.f32 %v2872_v13, %v14132_v25  ;;  %v2874_v29 = vpop.f32.mrb[161].mxu1 }
 0x251   : > { %v2875_v62 = vadd.f32 %v2874_v29, %v14138_v41  ;;  %v2876_v35 = vpop.f32.mrb[162].mxu1  ;;  %3609 = vmatprep.mubr.bf16.mxu0 %v3254_v58  ;;  %v14369_v58 = vpop.f32.mrb[159].mxu0 }
 0x252   : > { %v2877_v20 = vadd.f32 %v2876_v35, %v14132_v25  ;;  %v2878_v48 = vpop.f32.mrb[163].mxu1  ;;  %3610 = vmatmul.mubr.bf16.gmra.mrb[220].mxu0 %v3253_v32  ;;  %v3143_v37 = vmax.f32 %v2873_v12, 0.0  ;;  %17781 = vst [vmem:[#allocation130_spill] sm:$0xff] %v14369_v58 }
 0x253   : > { %v2879_v27 = vadd.f32 %v2878_v48, %v14138_v41  ;;  %v3144_v26 = vmax.f32 %v2875_v62, 0.0 }
 0x254   : > { %v3145_v49 = vmax.f32 %v2877_v20, 0.0 }
 0x255   : > { %v3146_v39 = vmax.f32 %v2879_v27, 0.0 }
 0x256   : > { %v3255_v13 = vpack.c.bf16 %v3145_v49, %v3143_v37  ;;  %v12110_v49 = vld [vmem:[%s17643_s24 + $0xe0] ss:$8 sps:$4 sm:$0xff]  }
 0x257   : > { %v2882_v29 = vpop.f32.mrb[164].mxu1  ;;  %v3256_v50 = vpack.c.bf16 %v3146_v39, %v3144_v26  ;;  %v12112_v26 = vld [vmem:[%s17643_s24 + $0xe4] ss:$8 sps:$4 sm:$0xff]  }
 0x258   : > { %v2883_v35 = vadd.f32 %v2882_v29, %v14132_v25  ;;  %v2884_v32 = vpop.f32.mrb[165].mxu1  ;;  %v14381_v29 = vpop.f32.mrb[160].mxu0  ;;  %4284 = vmatprep.subr.bf16.mxu1 %v12112_v26 }
 0x259   : > { %v2885_v48 = vadd.f32 %v2884_v32, %v14138_v41  ;;  %v2886_v12 = vpop.f32.mrb[166].mxu1  ;;  %3619 = vmatprep.mubr.bf16.mxu0 %v3256_v50  ;;  %17782 = vst [vmem:[#allocation131_spill] sm:$0xff] %v14381_v29  ;;  %v12113_v50 = vld [vmem:[%s17391_s9] ss:$8 sps:$4 sm:$0xff]   ;;  %4285 = vmatpush1.bf16.msra.mxu1 %v12110_v49 }
 0x25a   : > { %v2887_v20 = vadd.f32 %v2886_v12, %v14132_v25  ;;  %v2888_v62 = vpop.f32.mrb[167].mxu1  ;;  %3620 = vmatmul.mubr.bf16.gmra.mrb[224].mxu0 %v3255_v13  ;;  %v3147_v27 = vmax.f32 %v2883_v35, 0.0  ;;  %v12115_v13 = vld [vmem:[%s17391_s9 + $0x4] ss:$8 sps:$4 sm:$0xff]   ;;  %v14389_v12 = vpop.f32.mrb[161].mxu0 }
 0x25b   : > { %v2889_v37 = vadd.f32 %v2888_v62, %v14138_v41  ;;  %v3148_v35 = vmax.f32 %v2885_v48, 0.0  ;;  %17783 = vst [vmem:[#allocation132_spill] sm:$0xff] %v14389_v12  ;;  %v14391_v43 = vpop.f32.mrb[162].mxu0  ;;  %5133 = vmatprep.subr.bf16.mxu0 %v12115_v13 }
 0x25c   : > { %v3149_v39 = vmax.f32 %v2887_v20, 0.0  ;;  %17784 = vst [vmem:[#allocation133_spill] sm:$0xff] %v14391_v43  ;;  %v14393_v44 = vpop.f32.mrb[163].mxu0  ;;  %5134 = vmatpush1.bf16.msra.mxu0 %v12113_v50 }
 0x25d   : > { %v3150_v32 = vmax.f32 %v2889_v37, 0.0  ;;  %17785 = vst [vmem:[#allocation134_spill] sm:$0xff] %v14393_v44  ;;  %v14399_v13 = vpop.f32.mrb[164].mxu0 }
 0x25e   : > { %v3257_v62 = vpack.c.bf16 %v3149_v39, %v3147_v27  ;;  %17786 = vst [vmem:[#allocation135_spill] sm:$0xff] %v14399_v13  ;;  %v14401_v50 = vpop.f32.mrb[165].mxu0 }
 0x25f   : > { %v2892_v20 = vpop.f32.mrb[168].mxu1  ;;  %v3258_v29 = vpack.c.bf16 %v3150_v32, %v3148_v35  ;;  %17787 = vst [vmem:[#allocation136_spill] sm:$0xff] %v14401_v50  ;;  %v14403_v43 = vpop.f32.mrb[166].mxu0 }
 0x260   : > { %v2893_v58 = vadd.f32 %v2892_v20, %v14132_v25  ;;  %v2894_v30 = vpop.f32.mrb[169].mxu1  ;;  %17788 = vst [vmem:[#allocation137_spill] sm:$0xff] %v14403_v43 }
 0x261   : > { %v2895_v54 = vadd.f32 %v2894_v30, %v14138_v41  ;;  %v2896_v48 = vpop.f32.mrb[170].mxu1  ;;  %3629 = vmatprep.mubr.bf16.mxu0 %v3258_v29  ;;  %v14405_v29 = vpop.f32.mrb[167].mxu0 }
 0x262   : > { %v2897_v37 = vadd.f32 %v2896_v48, %v14132_v25  ;;  %v2898_v26 = vpop.f32.mrb[171].mxu1  ;;  %3630 = vmatmul.mubr.bf16.gmra.mrb[228].mxu0 %v3257_v62  ;;  %v3151_v39 = vmax.f32 %v2893_v58, 0.0  ;;  %17789 = vst [vmem:[#allocation138_spill] sm:$0xff] %v14405_v29 }
 0x263   : > { %v2899_v27 = vadd.f32 %v2898_v26, %v14138_v41  ;;  %v3152_v35 = vmax.f32 %v2895_v54, 0.0 }
 0x264   : > { %v3153_v49 = vmax.f32 %v2897_v37, 0.0 }
 0x265   : > { %v3154_v32 = vmax.f32 %v2899_v27, 0.0 }
 0x266   : > { %v3259_v20 = vpack.c.bf16 %v3153_v49, %v3151_v39  ;;  %v12116_v49 = vld [vmem:[%s17643_s24 + $0xf0] ss:$8 sps:$4 sm:$0xff]  }
 0x267   : > { %v2902_v30 = vpop.f32.mrb[172].mxu1  ;;  %v3260_v44 = vpack.c.bf16 %v3154_v32, %v3152_v35  ;;  %v12118_v35 = vld [vmem:[%s17643_s24 + $0xf4] ss:$8 sps:$4 sm:$0xff]  }
 0x268   : > { %v2903_v48 = vadd.f32 %v2902_v30, %v14132_v25  ;;  %v2904_v62 = vpop.f32.mrb[173].mxu1  ;;  %v14417_v30 = vpop.f32.mrb[168].mxu0  ;;  %4286 = vmatprep.subr.bf16.mxu1 %v12118_v35 }
 0x269   : > { %v2905_v26 = vadd.f32 %v2904_v62, %v14138_v41  ;;  %v2906_v58 = vpop.f32.mrb[174].mxu1  ;;  %3639 = vmatprep.mubr.bf16.mxu0 %v3260_v44  ;;  %17790 = vst [vmem:[#allocation139_spill] sm:$0xff] %v14417_v30  ;;  %v12119_v44 = vld [vmem:[%s17391_s9 + $0x10] ss:$8 sps:$4 sm:$0xff]   ;;  %4287 = vmatpush1.bf16.msra.mxu1 %v12116_v49 }
 0x26a   : > { %v2907_v37 = vadd.f32 %v2906_v58, %v14132_v25  ;;  %v2908_v54 = vpop.f32.mrb[175].mxu1  ;;  %3640 = vmatmul.mubr.bf16.gmra.mrb[232].mxu0 %v3259_v20  ;;  %v3155_v27 = vmax.f32 %v2903_v48, 0.0  ;;  %v12121_v20 = vld [vmem:[%s17391_s9 + $0x14] ss:$8 sps:$4 sm:$0xff]   ;;  %v14425_v58 = vpop.f32.mrb[169].mxu0 }
 0x26b   : > { %v2909_v39 = vadd.f32 %v2908_v54, %v14138_v41  ;;  %v3156_v48 = vmax.f32 %v2905_v26, 0.0  ;;  %17791 = vst [vmem:[#allocation140_spill] sm:$0xff] %v14425_v58  ;;  %v14427_v43 = vpop.f32.mrb[170].mxu0  ;;  %5135 = vmatprep.subr.bf16.mxu0 %v12121_v20 }
 0x26c   : > { %v3157_v32 = vmax.f32 %v2907_v37, 0.0  ;;  %17792 = vst [vmem:[#allocation141_spill] sm:$0xff] %v14427_v43  ;;  %v14429_v13 = vpop.f32.mrb[171].mxu0  ;;  %5136 = vmatpush1.bf16.msra.mxu0 %v12119_v44 }
 0x26d   : > { %v3158_v62 = vmax.f32 %v2909_v39, 0.0  ;;  %17793 = vst [vmem:[#allocation142_spill] sm:$0xff] %v14429_v13  ;;  %v14435_v20 = vpop.f32.mrb[172].mxu0 }
 0x26e   : > { %v3261_v54 = vpack.c.bf16 %v3157_v32, %v3155_v27  ;;  %17794 = vst [vmem:[#allocation143_spill] sm:$0xff] %v14435_v20  ;;  %v14437_v44 = vpop.f32.mrb[173].mxu0 }
 0x26f   : > { %v2912_v37 = vpop.f32.mrb[176].mxu1  ;;  %v3262_v30 = vpack.c.bf16 %v3158_v62, %v3156_v48  ;;  %17795 = vst [vmem:[#allocation144_spill] sm:$0xff] %v14437_v44  ;;  %v14439_v43 = vpop.f32.mrb[174].mxu0 }
 0x270   : > { %v2913_v29 = vadd.f32 %v2912_v37, %v14132_v25  ;;  %v2914_v50 = vpop.f32.mrb[177].mxu1  ;;  %17796 = vst [vmem:[#allocation145_spill] sm:$0xff] %v14439_v43 }
 0x271   : > { %v2915_v12 = vadd.f32 %v2914_v50, %v14138_v41  ;;  %v2916_v26 = vpop.f32.mrb[178].mxu1  ;;  %3649 = vmatprep.mubr.bf16.mxu0 %v3262_v30  ;;  %v14441_v30 = vpop.f32.mrb[175].mxu0 }
 0x272   : > { %v2917_v39 = vadd.f32 %v2916_v26, %v14132_v25  ;;  %v2918_v35 = vpop.f32.mrb[179].mxu1  ;;  %3650 = vmatmul.mubr.bf16.gmra.mrb[236].mxu0 %v3261_v54  ;;  %v3159_v32 = vmax.f32 %v2913_v29, 0.0  ;;  %17797 = vst [vmem:[#allocation146_spill] sm:$0xff] %v14441_v30  ;;  %v14447_v43 = vpop.f32.mrb[176].mxu0 }
 0x273   : > { %v2919_v27 = vadd.f32 %v2918_v35, %v14138_v41  ;;  %v3160_v48 = vmax.f32 %v2915_v12, 0.0  ;;  %17798 = vst [vmem:[#allocation147_spill] sm:$0xff] %v14447_v43 }
 0x274   : > { %v3161_v49 = vmax.f32 %v2917_v39, 0.0 }
 0x275   : > { %v3162_v62 = vmax.f32 %v2919_v27, 0.0 }
 0x276   : > { %v3263_v37 = vpack.c.bf16 %v3161_v49, %v3159_v32 }
 0x277   : > { %v2922_v50 = vpop.f32.mrb[180].mxu1  ;;  %v3264_v13 = vpack.c.bf16 %v3162_v62, %v3160_v48  ;;  %v12122_v48 = vld [vmem:[%s17391_s9 + $0x20] ss:$8 sps:$4 sm:$0xff]   ;;  %v12124_v62 = vld [vmem:[%s17391_s9 + $0x24] ss:$8 sps:$4 sm:$0xff]  }
 0x278   : > { %v2923_v26 = vadd.f32 %v2922_v50, %v14132_v25  ;;  %v2924_v54 = vpop.f32.mrb[181].mxu1  ;;  %5137 = vmatprep.subr.bf16.mxu0 %v12124_v62 }
 0x279   : > { %v2925_v35 = vadd.f32 %v2924_v54, %v14138_v41  ;;  %v2926_v29 = vpop.f32.mrb[182].mxu1  ;;  %3659 = vmatprep.mubr.bf16.mxu0 %v3264_v13  ;;  %v14455_v54 = vpop.f32.mrb[177].mxu0  ;;  %5138 = vmatpush1.bf16.msra.mxu0 %v12122_v48 }
 0x27a   : > { %v2927_v39 = vadd.f32 %v2926_v29, %v14132_v25  ;;  %v2928_v12 = vpop.f32.mrb[183].mxu1  ;;  %3660 = vmatmul.mubr.bf16.gmra.mrb[240].mxu0 %v3263_v37  ;;  %v3163_v27 = vmax.f32 %v2923_v26, 0.0  ;;  %17799 = vst [vmem:[#allocation148_spill] sm:$0xff] %v14455_v54  ;;  %v14457_v37 = vpop.f32.mrb[178].mxu0 }
 0x27b   : > { %v2929_v32 = vadd.f32 %v2928_v12, %v14138_v41  ;;  %v3164_v50 = vmax.f32 %v2925_v35, 0.0  ;;  %17800 = vst [vmem:[#allocation149_spill] sm:$0xff] %v14457_v37  ;;  %v14459_v12 = vpop.f32.mrb[179].mxu0 }
 0x27c   : > { %v3165_v49 = vmax.f32 %v2927_v39, 0.0  ;;  %17801 = vst [vmem:[#allocation150_spill] sm:$0xff] %v14459_v12  ;;  %v14465_v37 = vpop.f32.mrb[180].mxu0 }
 0x27d   : > { %v3166_v13 = vmax.f32 %v2929_v32, 0.0  ;;  %17802 = vst [vmem:[#allocation151_spill] sm:$0xff] %v14465_v37  ;;  %v14467_v48 = vpop.f32.mrb[181].mxu0 }
 0x27e   : > { %v3265_v29 = vpack.c.bf16 %v3165_v49, %v3163_v27  ;;  %17803 = vst [vmem:[#allocation152_spill] sm:$0xff] %v14467_v48  ;;  %v14469_v12 = vpop.f32.mrb[182].mxu0 }
 0x27f   : > { %v2932_v26 = vpop.f32.mrb[184].mxu1  ;;  %v3266_v39 = vpack.c.bf16 %v3166_v13, %v3164_v50  ;;  %17804 = vst [vmem:[#allocation153_spill] sm:$0xff] %v14469_v12 }
 0x280   : > { %v2933_v43 = vadd.f32 %v2932_v26, %v14132_v25  ;;  %v2934_v20 = vpop.f32.mrb[185].mxu1 }
 0x281   : > { %v2935_v30 = vadd.f32 %v2934_v20, %v14138_v41  ;;  %v2936_v44 = vpop.f32.mrb[186].mxu1  ;;  %3669 = vmatprep.mubr.bf16.mxu0 %v3266_v39  ;;  %v14471_v39 = vpop.f32.mrb[183].mxu0 }
 0x282   : > { %v2937_v35 = vadd.f32 %v2936_v44, %v14132_v25  ;;  %v2938_v32 = vpop.f32.mrb[187].mxu1  ;;  %3670 = vmatmul.mubr.bf16.gmra.mrb[244].mxu0 %v3265_v29  ;;  %v3167_v49 = vmax.f32 %v2933_v43, 0.0  ;;  %17805 = vst [vmem:[#allocation154_spill] sm:$0xff] %v14471_v39  ;;  %v14477_v12 = vpop.f32.mrb[184].mxu0 }
 0x283   : > { %v2939_v27 = vadd.f32 %v2938_v32, %v14138_v41  ;;  %v3168_v50 = vmax.f32 %v2935_v30, 0.0  ;;  %17806 = vst [vmem:[#allocation155_spill] sm:$0xff] %v14477_v12 }
 0x284   : > { %v3169_v62 = vmax.f32 %v2937_v35, 0.0 }
 0x285   : > { %v3170_v13 = vmax.f32 %v2939_v27, 0.0 }
 0x286   : > { %v3267_v26 = vpack.c.bf16 %v3169_v62, %v3167_v49 }
 0x287   : > { %v2942_v20 = vpop.f32.mrb[188].mxu1  ;;  %v3268_v54 = vpack.c.bf16 %v3170_v13, %v3168_v50  ;;  %v12125_v50 = vld [vmem:[%s17391_s9 + $0x30] ss:$8 sps:$4 sm:$0xff]   ;;  %v12127_v13 = vld [vmem:[%s17391_s9 + $0x34] ss:$8 sps:$4 sm:$0xff]  }
 0x288   : > { %v2943_v44 = vadd.f32 %v2942_v20, %v14132_v25  ;;  %v2944_v29 = vpop.f32.mrb[189].mxu1  ;;  %5139 = vmatprep.subr.bf16.mxu0 %v12127_v13 }
 0x289   : > { %v2945_v32 = vadd.f32 %v2944_v29, %v14138_v41  ;;  %v2946_v43 = vpop.f32.mrb[190].mxu1  ;;  %3679 = vmatprep.mubr.bf16.mxu0 %v3268_v54  ;;  %v14485_v29 = vpop.f32.mrb[185].mxu0  ;;  %5140 = vmatpush1.bf16.msra.mxu0 %v12125_v50 }
 0x28a   : > { %v2947_v35 = vadd.f32 %v2946_v43, %v14132_v25  ;;  %v2948_v30 = vpop.f32.mrb[191].mxu1  ;;  %3680 = vmatmul.mubr.bf16.gmra.mrb[248].mxu0 %v3267_v26  ;;  %v3171_v27 = vmax.f32 %v2943_v44, 0.0  ;;  %17807 = vst [vmem:[#allocation156_spill] sm:$0xff] %v14485_v29  ;;  %v14487_v26 = vpop.f32.mrb[186].mxu0 }
 0x28b   : > { %v2949_v49 = vadd.f32 %v2948_v30, %v14138_v41  ;;  %v3172_v20 = vmax.f32 %v2945_v32, 0.0  ;;  %17808 = vst [vmem:[#allocation157_spill] sm:$0xff] %v14487_v26  ;;  %v14489_v30 = vpop.f32.mrb[187].mxu0 }
 0x28c   : > { %v3173_v62 = vmax.f32 %v2947_v35, 0.0  ;;  %17809 = vst [vmem:[#allocation158_spill] sm:$0xff] %v14489_v30  ;;  %v14495_v26 = vpop.f32.mrb[188].mxu0 }
 0x28d   : > { %v3174_v54 = vmax.f32 %v2949_v49, 0.0  ;;  %17810 = vst [vmem:[#allocation159_spill] sm:$0xff] %v14495_v26  ;;  %v14497_v50 = vpop.f32.mrb[189].mxu0 }
 0x28e   : > { %v3269_v43 = vpack.c.bf16 %v3173_v62, %v3171_v27  ;;  %17811 = vst [vmem:[#allocation160_spill] sm:$0xff] %v14497_v50  ;;  %v14499_v30 = vpop.f32.mrb[190].mxu0 }
 0x28f   : > { %v2952_v44 = vpop.f32.mrb[192].mxu1  ;;  %v3270_v35 = vpack.c.bf16 %v3174_v54, %v3172_v20  ;;  %17812 = vst [vmem:[#allocation161_spill] sm:$0xff] %v14499_v30 }
 0x290   : > { %v2953_v12 = vadd.f32 %v2952_v44, %v14132_v25  ;;  %v2954_v37 = vpop.f32.mrb[193].mxu1 }
 0x291   : > { %v2955_v39 = vadd.f32 %v2954_v37, %v14138_v41  ;;  %v2956_v48 = vpop.f32.mrb[194].mxu1  ;;  %3689 = vmatprep.mubr.bf16.mxu0 %v3270_v35  ;;  %v14501_v35 = vpop.f32.mrb[191].mxu0 }
 0x292   : > { %v2957_v32 = vadd.f32 %v2956_v48, %v14132_v25  ;;  %v2958_v49 = vpop.f32.mrb[195].mxu1  ;;  %3690 = vmatmul.mubr.bf16.gmra.mrb[252].mxu0 %v3269_v43  ;;  %v3175_v62 = vmax.f32 %v2953_v12, 0.0  ;;  %17813 = vst [vmem:[#allocation162_spill] sm:$0xff] %v14501_v35 }
 0x293   : > { %v2959_v27 = vadd.f32 %v2958_v49, %v14138_v41  ;;  %v3176_v20 = vmax.f32 %v2955_v39, 0.0 }
 0x294   : > { %v3177_v13 = vmax.f32 %v2957_v32, 0.0 }
 0x295   : > { %v3178_v54 = vmax.f32 %v2959_v27, 0.0 }
 0x296   : > { %v3271_v44 = vpack.c.bf16 %v3177_v13, %v3175_v62 }
 0x297   : > { %v2962_v37 = vpop.f32.mrb[196].mxu1  ;;  %v3272_v29 = vpack.c.bf16 %v3178_v54, %v3176_v20  ;;  %v12128_v20 = vld [vmem:[%s17391_s9 + $0x40] ss:$8 sps:$4 sm:$0xff]   ;;  %v12130_v54 = vld [vmem:[%s17391_s9 + $0x44] ss:$8 sps:$4 sm:$0xff]  }
 0x298   : > { %v2963_v48 = vadd.f32 %v2962_v37, %v14132_v25  ;;  %v2964_v43 = vpop.f32.mrb[197].mxu1  ;;  %5141 = vmatprep.subr.bf16.mxu0 %v12130_v54 }
 0x299   : > { %v2965_v49 = vadd.f32 %v2964_v43, %v14138_v41  ;;  %v2966_v12 = vpop.f32.mrb[198].mxu1  ;;  %3699 = vmatprep.mubr.bf16.mxu0 %v3272_v29  ;;  %5142 = vmatpush1.bf16.msra.mxu0 %v12128_v20 }
 0x29a   : > { %v2967_v32 = vadd.f32 %v2966_v12, %v14132_v25  ;;  %v2968_v39 = vpop.f32.mrb[199].mxu1  ;;  %3700 = vmatmul.mubr.bf16.gmra.mrb[0].mxu0 %v3271_v44  ;;  %v3179_v62 = vmax.f32 %v2963_v48, 0.0 }
 0x29b   : > { %v2969_v27 = vadd.f32 %v2968_v39, %v14138_v41  ;;  %v3180_v37 = vmax.f32 %v2965_v49, 0.0 }
 0x29c   : > { %v3181_v13 = vmax.f32 %v2967_v32, 0.0 }
 0x29d   : > { %v3182_v43 = vmax.f32 %v2969_v27, 0.0 }
 0x29e   : > { %v3273_v30 = vpack.c.bf16 %v3181_v13, %v3179_v62 }
 0x29f   : > { %v2972_v29 = vpop.f32.mrb[200].mxu1  ;;  %v3274_v12 = vpack.c.bf16 %v3182_v43, %v3180_v37 }
 0x2a0   : > { %v2973_v44 = vadd.f32 %v2972_v29, %v14132_v25  ;;  %v2974_v39 = vpop.f32.mrb[201].mxu1 }
 0x2a1   : > { %v2975_v48 = vadd.f32 %v2974_v39, %v14138_v41  ;;  %v2976_v32 = vpop.f32.mrb[202].mxu1  ;;  %3709 = vmatprep.mubr.bf16.mxu0 %v3274_v12 }
 0x2a2   : > { %v2977_v26 = vadd.f32 %v2976_v32, %v14132_v25  ;;  %v2978_v35 = vpop.f32.mrb[203].mxu1  ;;  %3710 = vmatmul.mubr.bf16.gmra.mrb[4].mxu0 %v3273_v30  ;;  %v3183_v49 = vmax.f32 %v2973_v44, 0.0  ;;  %v12133_v44 = vld [vmem:[%s17391_s9 + $0x54] ss:$8 sps:$4 sm:$0xff]  }
 0x2a3   : > { %v2979_v50 = vadd.f32 %v2978_v35, %v14138_v41  ;;  %v3184_v62 = vmax.f32 %v2975_v48, 0.0  ;;  %5143 = vmatprep.subr.bf16.mxu0 %v12133_v44 }
 0x2a4   : > { %v3185_v27 = vmax.f32 %v2977_v26, 0.0 }
 0x2a5   : > { %v3186_v13 = vmax.f32 %v2979_v50, 0.0  ;;  %v12131_v50 = vld [vmem:[%s17391_s9 + $0x50] ss:$8 sps:$4 sm:$0xff]  }
 0x2a6   : > { %v3275_v54 = vpack.c.bf16 %v3185_v27, %v3183_v49  ;;  %5144 = vmatpush1.bf16.msra.mxu0 %v12131_v50 }
 0x2a7   : > { %v2982_v37 = vpop.f32.mrb[204].mxu1  ;;  %v3276_v20 = vpack.c.bf16 %v3186_v13, %v3184_v62 }
 0x2a8   : > { %v2983_v43 = vadd.f32 %v2982_v37, %v14132_v25  ;;  %v2984_v29 = vpop.f32.mrb[205].mxu1 }
 0x2a9   : > { %v2985_v39 = vadd.f32 %v2984_v29, %v14138_v41  ;;  %v2986_v58 = vpop.f32.mrb[206].mxu1  ;;  %3719 = vmatprep.mubr.bf16.mxu0 %v3276_v20 }
 0x2aa   : > { %v2987_v12 = vadd.f32 %v2986_v58, %v14132_v25  ;;  %v2988_v32 = vpop.f32.mrb[207].mxu1  ;;  %3720 = vmatmul.mubr.bf16.gmra.mrb[8].mxu0 %v3275_v54  ;;  %v3187_v35 = vmax.f32 %v2983_v43, 0.0 }
 0x2ab   : > { %v2989_v30 = vadd.f32 %v2988_v32, %v14138_v41  ;;  %v3188_v48 = vmax.f32 %v2985_v39, 0.0 }
 0x2ac   : > { %v3189_v26 = vmax.f32 %v2987_v12, 0.0 }
 0x2ad   : > { %v3190_v49 = vmax.f32 %v2989_v30, 0.0 }
 0x2ae   : > { %v3277_v27 = vpack.c.bf16 %v3189_v26, %v3187_v35 }
 0x2af   : > { %v2992_v62 = vpop.f32.mrb[208].mxu1  ;;  %v3278_v58 = vpack.c.bf16 %v3190_v49, %v3188_v48 }
 0x2b0   : > { %v2993_v13 = vadd.f32 %v2992_v62, %v14132_v25  ;;  %v2994_v54 = vpop.f32.mrb[209].mxu1 }
 0x2b1   : > { %v2995_v37 = vadd.f32 %v2994_v54, %v14138_v41  ;;  %v2996_v20 = vpop.f32.mrb[210].mxu1  ;;  %3729 = vmatprep.mubr.bf16.mxu0 %v3278_v58 }
 0x2b2   : > { %v2997_v43 = vadd.f32 %v2996_v20, %v14132_v25  ;;  %v2998_v29 = vpop.f32.mrb[211].mxu1  ;;  %3730 = vmatmul.mubr.bf16.gmra.mrb[12].mxu0 %v3277_v27  ;;  %v3191_v39 = vmax.f32 %v2993_v13, 0.0 }
 0x2b3   : > { %v2999_v12 = vadd.f32 %v2998_v29, %v14138_v41  ;;  %v3192_v30 = vmax.f32 %v2995_v37, 0.0  ;;  %v12134_v37 = vld [vmem:[%s17391_s9 + $0x60] ss:$8 sps:$4 sm:$0xff]   ;;  %v12136_v29 = vld [vmem:[%s17391_s9 + $0x64] ss:$8 sps:$4 sm:$0xff]  }
 0x2b4   : > { %v3193_v32 = vmax.f32 %v2997_v43, 0.0  ;;  %5145 = vmatprep.subr.bf16.mxu0 %v12136_v29 }
 0x2b5   : > { %v3194_v35 = vmax.f32 %v2999_v12, 0.0  ;;  %5146 = vmatpush1.bf16.msra.mxu0 %v12134_v37 }
 0x2b6   : > { %v3279_v26 = vpack.c.bf16 %v3193_v32, %v3191_v39 }
 0x2b7   : > { %v3002_v44 = vpop.f32.mrb[212].mxu1  ;;  %v3280_v50 = vpack.c.bf16 %v3194_v35, %v3192_v30 }
 0x2b8   : > { %v3003_v48 = vadd.f32 %v3002_v44, %v14132_v25  ;;  %v3004_v49 = vpop.f32.mrb[213].mxu1 }
 0x2b9   : > { %v3005_v62 = vadd.f32 %v3004_v49, %v14138_v41  ;;  %v3006_v54 = vpop.f32.mrb[214].mxu1  ;;  %3739 = vmatprep.mubr.bf16.mxu0 %v3280_v50 }
 0x2ba   : > { %v3007_v58 = vadd.f32 %v3006_v54, %v14132_v25  ;;  %v3008_v20 = vpop.f32.mrb[215].mxu1  ;;  %3740 = vmatmul.mubr.bf16.gmra.mrb[16].mxu0 %v3279_v26  ;;  %v3195_v13 = vmax.f32 %v3003_v48, 0.0 }
 0x2bb   : > { %v3009_v27 = vadd.f32 %v3008_v20, %v14138_v41  ;;  %v3196_v12 = vmax.f32 %v3005_v62, 0.0 }
 0x2bc   : > { %v3197_v43 = vmax.f32 %v3007_v58, 0.0 }
 0x2bd   : > { %v3198_v39 = vmax.f32 %v3009_v27, 0.0 }
 0x2be   : > { %v3281_v32 = vpack.c.bf16 %v3197_v43, %v3195_v13 }
 0x2bf   : > { %v3012_v30 = vpop.f32.mrb[216].mxu1  ;;  %v3282_v35 = vpack.c.bf16 %v3198_v39, %v3196_v12 }
 0x2c0   : > { %v3013_v26 = vadd.f32 %v3012_v30, %v14132_v25  ;;  %v3014_v44 = vpop.f32.mrb[217].mxu1 }
 0x2c1   : > { %v3015_v50 = vadd.f32 %v3014_v44, %v14138_v41  ;;  %v3016_v48 = vpop.f32.mrb[218].mxu1  ;;  %3749 = vmatprep.mubr.bf16.mxu0 %v3282_v35 }
 0x2c2   : > { %v3017_v49 = vadd.f32 %v3016_v48, %v14132_v25  ;;  %v3018_v54 = vpop.f32.mrb[219].mxu1  ;;  %3750 = vmatmul.mubr.bf16.gmra.mrb[20].mxu0 %v3281_v32  ;;  %v3199_v62 = vmax.f32 %v3013_v26, 0.0 }
 0x2c3   : > { %v3019_v58 = vadd.f32 %v3018_v54, %v14138_v41  ;;  %v3200_v27 = vmax.f32 %v3015_v50, 0.0  ;;  %v12137_v50 = vld [vmem:[%s17391_s9 + $0x70] ss:$8 sps:$4 sm:$0xff]   ;;  %v12139_v54 = vld [vmem:[%s17391_s9 + $0x74] ss:$8 sps:$4 sm:$0xff]  }
 0x2c4   : > { %v3201_v20 = vmax.f32 %v3017_v49, 0.0  ;;  %5147 = vmatprep.subr.bf16.mxu0 %v12139_v54 }
 0x2c5   : > { %v3202_v13 = vmax.f32 %v3019_v58, 0.0  ;;  %5148 = vmatpush1.bf16.msra.mxu0 %v12137_v50 }
 0x2c6   : > { %v3283_v43 = vpack.c.bf16 %v3201_v20, %v3199_v62 }
 0x2c7   : > { %v3022_v29 = vpop.f32.mrb[220].mxu1  ;;  %v3284_v37 = vpack.c.bf16 %v3202_v13, %v3200_v27 }
 0x2c8   : > { %v3023_v12 = vadd.f32 %v3022_v29, %v14132_v25  ;;  %v3024_v39 = vpop.f32.mrb[221].mxu1 }
 0x2c9   : > { %v3025_v30 = vadd.f32 %v3024_v39, %v14138_v41  ;;  %v3026_v44 = vpop.f32.mrb[222].mxu1  ;;  %3759 = vmatprep.mubr.bf16.mxu0 %v3284_v37 }
 0x2ca   : > { %v3027_v35 = vadd.f32 %v3026_v44, %v14132_v25  ;;  %v3028_v48 = vpop.f32.mrb[223].mxu1  ;;  %3760 = vmatmul.mubr.bf16.gmra.mrb[24].mxu0 %v3283_v43  ;;  %v3203_v26 = vmax.f32 %v3023_v12, 0.0 }
 0x2cb   : > { %v3029_v32 = vadd.f32 %v3028_v48, %v14138_v41  ;;  %v3204_v58 = vmax.f32 %v3025_v30, 0.0 }
 0x2cc   : > { %v3205_v49 = vmax.f32 %v3027_v35, 0.0 }
 0x2cd   : > { %v3206_v62 = vmax.f32 %v3029_v32, 0.0 }
 0x2ce   : > { %v3285_v20 = vpack.c.bf16 %v3205_v49, %v3203_v26 }
 0x2cf   : > { %v3032_v27 = vpop.f32.mrb[224].mxu1  ;;  %v3286_v13 = vpack.c.bf16 %v3206_v62, %v3204_v58 }
 0x2d0   : > { %v3033_v43 = vadd.f32 %v3032_v27, %v14132_v25  ;;  %v3034_v29 = vpop.f32.mrb[225].mxu1 }
 0x2d1   : > { %v3035_v37 = vadd.f32 %v3034_v29, %v14138_v41  ;;  %v3036_v12 = vpop.f32.mrb[226].mxu1  ;;  %3769 = vmatprep.mubr.bf16.mxu0 %v3286_v13 }
 0x2d2   : > { %v3037_v39 = vadd.f32 %v3036_v12, %v14132_v25  ;;  %v3038_v44 = vpop.f32.mrb[227].mxu1  ;;  %3770 = vmatmul.mubr.bf16.gmra.mrb[28].mxu0 %v3285_v20  ;;  %v3207_v30 = vmax.f32 %v3033_v43, 0.0 }
 0x2d3   : > { %v3039_v35 = vadd.f32 %v3038_v44, %v14138_v41  ;;  %v3208_v32 = vmax.f32 %v3035_v37, 0.0  ;;  %v12140_v37 = vld [vmem:[%s17391_s9 + $0x80] ss:$8 sps:$4 sm:$0xff]   ;;  %v12142_v44 = vld [vmem:[%s17391_s9 + $0x84] ss:$8 sps:$4 sm:$0xff]  }
 0x2d4   : > { %v3209_v48 = vmax.f32 %v3037_v39, 0.0  ;;  %5149 = vmatprep.subr.bf16.mxu0 %v12142_v44 }
 0x2d5   : > { %v3210_v26 = vmax.f32 %v3039_v35, 0.0  ;;  %5150 = vmatpush1.bf16.msra.mxu0 %v12140_v37 }
 0x2d6   : > { %v3287_v49 = vpack.c.bf16 %v3209_v48, %v3207_v30 }
 0x2d7   : > { %v3042_v54 = vpop.f32.mrb[228].mxu1  ;;  %v3288_v50 = vpack.c.bf16 %v3210_v26, %v3208_v32 }
 0x2d8   : > { %v3043_v58 = vadd.f32 %v3042_v54, %v14132_v25  ;;  %v3044_v62 = vpop.f32.mrb[229].mxu1 }
 0x2d9   : > { %v3045_v27 = vadd.f32 %v3044_v62, %v14138_v41  ;;  %v3046_v29 = vpop.f32.mrb[230].mxu1  ;;  %3779 = vmatprep.mubr.bf16.mxu0 %v3288_v50 }
 0x2da   : > { %v3047_v13 = vadd.f32 %v3046_v29, %v14132_v25  ;;  %v3048_v12 = vpop.f32.mrb[231].mxu1  ;;  %3780 = vmatmul.mubr.bf16.gmra.mrb[32].mxu0 %v3287_v49  ;;  %v3211_v43 = vmax.f32 %v3043_v58, 0.0 }
 0x2db   : > { %v3049_v20 = vadd.f32 %v3048_v12, %v14138_v41  ;;  %v3212_v35 = vmax.f32 %v3045_v27, 0.0 }
 0x2dc   : > { %v3213_v39 = vmax.f32 %v3047_v13, 0.0 }
 0x2dd   : > { %v3214_v30 = vmax.f32 %v3049_v20, 0.0 }
 0x2de   : > { %v3289_v48 = vpack.c.bf16 %v3213_v39, %v3211_v43 }
 0x2df   : > { %v3052_v32 = vpop.f32.mrb[232].mxu1  ;;  %v3290_v26 = vpack.c.bf16 %v3214_v30, %v3212_v35  ;;  %v3335_v35 = vld [vmem:[%s17814_s2] sm:$0x3] }
 0x2e0   : > { %v3053_v49 = vadd.f32 %v3052_v32, %v14132_v25  ;;  %v3054_v54 = vpop.f32.mrb[233].mxu1 }
 0x2e1   : > { %v3055_v50 = vadd.f32 %v3054_v54, %v14138_v41  ;;  %v3056_v58 = vpop.f32.mrb[234].mxu1  ;;  %3789 = vmatprep.mubr.bf16.mxu0 %v3290_v26 }
 0x2e2   : > { %v3057_v62 = vadd.f32 %v3056_v58, %v14132_v25  ;;  %v3058_v29 = vpop.f32.mrb[235].mxu1  ;;  %3790 = vmatmul.mubr.bf16.gmra.mrb[36].mxu0 %v3289_v48  ;;  %v3215_v27 = vmax.f32 %v3053_v49, 0.0 }
 0x2e3   : > { %v3059_v13 = vadd.f32 %v3058_v29, %v14138_v41  ;;  %v3216_v20 = vmax.f32 %v3055_v50, 0.0  ;;  %v14580_v50 = vrot.slane %v3335_v35, %v13214_v57 }
 0x2e4   : > { %v3217_v12 = vmax.f32 %v3057_v62, 0.0  ;;  %v14584_v62 = vrot.slane %v3335_v35, %v13191_v47 }
 0x2e5   : > { %v3218_v43 = vmax.f32 %v3059_v13, 0.0 }
 0x2e6   : > { %v3291_v39 = vpack.c.bf16 %v3217_v12, %v3215_v27  ;;  %v12143_v27 = vld [vmem:[%s17391_s9 + $0x90] ss:$8 sps:$4 sm:$0xff]   ;;  %v12145_v12 = vld [vmem:[%s17391_s9 + $0x94] ss:$8 sps:$4 sm:$0xff]  }
 0x2e7   : > { %v3062_v44 = vpop.f32.mrb[236].mxu1  ;;  %v3292_v37 = vpack.c.bf16 %v3218_v43, %v3216_v20  ;;  %5151 = vmatprep.subr.bf16.mxu0 %v12145_v12 }
 0x2e8   : > { %v3063_v30 = vadd.f32 %v3062_v44, %v14132_v25  ;;  %v3064_v32 = vpop.f32.mrb[237].mxu1  ;;  %5152 = vmatpush1.bf16.msra.mxu0 %v12143_v27 }
 0x2e9   : > { %v3065_v26 = vadd.f32 %v3064_v32, %v14138_v41  ;;  %v3066_v54 = vpop.f32.mrb[238].mxu1  ;;  %3799 = vmatprep.mubr.bf16.mxu0 %v3292_v37 }
 0x2ea   : > { %v3067_v48 = vadd.f32 %v3066_v54, %v14132_v25  ;;  %v3068_v49 = vpop.f32.mrb[239].mxu1  ;;  %3800 = vmatmul.mubr.bf16.gmra.mrb[40].mxu0 %v3291_v39  ;;  %v3219_v29 = vmax.f32 %v3063_v30, 0.0 }
 0x2eb   : > { %v3069_v58 = vadd.f32 %v3068_v49, %v14138_v41  ;;  %v3220_v20 = vmax.f32 %v3065_v26, 0.0 }
 0x2ec   : > { %v3221_v13 = vmax.f32 %v3067_v48, 0.0 }
 0x2ed   : > { %v3222_v43 = vmax.f32 %v3069_v58, 0.0  ;;  %v3541_v39 = vpop.f32.mrb[192].mxu0 }
 0x2ee   : > { %v3293_v44 = vpack.c.bf16 %v3221_v13, %v3219_v29  ;;  %v3542_v37 = vadd.f32 %v3541_v39, %v14580_v50  ;;  %v3543_v32 = vpop.f32.mrb[193].mxu0 }
 0x2ef   : > { %v3544_v35 = vadd.f32 %v3543_v32, %v14584_v62  ;;  %v3545_v54 = vpop.f32.mrb[194].mxu0  ;;  %v3294_v48 = vpack.c.bf16 %v3222_v43, %v3220_v20 }
 0x2f0   : > { %v3072_v30 = vpop.f32.mrb[240].mxu1  ;;  %v3546_v61 = vadd.f32 %v3545_v54, %v14580_v50  ;;  %v3547_v18 = vpop.f32.mrb[195].mxu0  ;;  %v3860_v13 = vmax.f32 %v3542_v37, 0.0 }
 0x2f1   : > { %v3073_v49 = vadd.f32 %v3072_v30, %v14132_v25  ;;  %v3074_v36 = vpop.f32.mrb[241].mxu1  ;;  %v3548_v58 = vadd.f32 %v3547_v18, %v14584_v62  ;;  %3809 = vmatprep.mubr.bf16.mxu0 %v3294_v48  ;;  %v3861_v20 = vmax.f32 %v3544_v35, 0.0 }
 0x2f2   : > { %v3075_v26 = vadd.f32 %v3074_v36, %v14138_v41  ;;  %v3076_v29 = vpop.f32.mrb[242].mxu1  ;;  %v3862_v12 = vmax.f32 %v3546_v61, 0.0  ;;  %3810 = vmatmul.mubr.bf16.gmra.mrb[44].mxu0 %v3293_v44 }
 0x2f3   : > { %v3077_v39 = vadd.f32 %v3076_v29, %v14132_v25  ;;  %v3078_v32 = vpop.f32.mrb[243].mxu1  ;;  %v3863_v27 = vmax.f32 %v3548_v58, 0.0  ;;  %v3223_v30 = vmax.f32 %v3073_v49, 0.0 }
 0x2f4   : > { %v3079_v43 = vadd.f32 %v3078_v32, %v14138_v41  ;;  %v3988_v54 = vpack.c.bf16 %v3862_v12, %v3860_v13  ;;  %v3224_v51 = vmax.f32 %v3075_v26, 0.0 }
 0x2f5   : > { %v3225_v40 = vmax.f32 %v3077_v39, 0.0  ;;  %v3551_v36 = vpop.f32.mrb[196].mxu0  ;;  %v3989_v34 = vpack.c.bf16 %v3863_v27, %v3861_v20 }
 0x2f6   : > { %v3226_v1 = vmax.f32 %v3079_v43, 0.0  ;;  %v3552_v48 = vadd.f32 %v3551_v36, %v14580_v50  ;;  %v3553_v37 = vpop.f32.mrb[197].mxu0  ;;  %v12148_v36 = vld [vmem:[%s17391_s9 + $0xa4] ss:$8 sps:$4 sm:$0xff]  }
 0x2f7   : > { %v3295_v18 = vpack.c.bf16 %v3225_v40, %v3223_v30  ;;  %v3554_v61 = vadd.f32 %v3553_v37, %v14584_v62  ;;  %v3555_v24 = vpop.f32.mrb[198].mxu0  ;;  %4288 = vmatprep.mubr.bf16.mxu1 %v3989_v34  ;;  %5153 = vmatprep.subr.bf16.mxu0 %v12148_v36 }
 0x2f8   : > { %v3082_v29 = vpop.f32.mrb[244].mxu1  ;;  %v3296_v44 = vpack.c.bf16 %v3226_v1, %v3224_v51  ;;  %v3556_v49 = vadd.f32 %v3555_v24, %v14580_v50  ;;  %v3557_v13 = vpop.f32.mrb[199].mxu0  ;;  %4289 = vmatmul.mubr.bf16.vlgmr.msra.gmra.mrb[128].mxu1 %v3988_v54  ;;  %v3864_v39 = vmax.f32 %v3552_v48, 0.0  ;;  %v12146_v54 = vld [vmem:[%s17391_s9 + $0xa0] ss:$8 sps:$4 sm:$0xff]  }
 0x2f9   : > { %v3083_v35 = vadd.f32 %v3082_v29, %v14132_v25  ;;  %v3084_v58 = vpop.f32.mrb[245].mxu1  ;;  %v3558_v40 = vadd.f32 %v3557_v13, %v14584_v62  ;;  %v3865_v34 = vmax.f32 %v3554_v61, 0.0  ;;  %5154 = vmatpush1.bf16.msra.mxu0 %v12146_v54 }
 0x2fa   : > { %v3085_v26 = vadd.f32 %v3084_v58, %v14138_v41  ;;  %v3086_v12 = vpop.f32.mrb[246].mxu1  ;;  %3819 = vmatprep.mubr.bf16.mxu0 %v3296_v44  ;;  %v3866_v32 = vmax.f32 %v3556_v49, 0.0 }
 0x2fb   : > { %v3087_v20 = vadd.f32 %v3086_v12, %v14132_v25  ;;  %v3088_v27 = vpop.f32.mrb[247].mxu1  ;;  %3820 = vmatmul.mubr.bf16.gmra.mrb[48].mxu0 %v3295_v18  ;;  %v3867_v1 = vmax.f32 %v3558_v40, 0.0  ;;  %v3227_v24 = vmax.f32 %v3083_v35, 0.0 }
 0x2fc   : > { %v3089_v51 = vadd.f32 %v3088_v27, %v14138_v41  ;;  %v3990_v43 = vpack.c.bf16 %v3866_v32, %v3864_v39  ;;  %v3228_v48 = vmax.f32 %v3085_v26, 0.0 }
 0x2fd   : > { %v3229_v30 = vmax.f32 %v3087_v20, 0.0  ;;  %v3561_v29 = vpop.f32.mrb[200].mxu0  ;;  %v3991_v44 = vpack.c.bf16 %v3867_v1, %v3865_v34 }
 0x2fe   : > { %v3230_v37 = vmax.f32 %v3089_v51, 0.0  ;;  %v3562_v61 = vadd.f32 %v3561_v29, %v14580_v50  ;;  %v3563_v49 = vpop.f32.mrb[201].mxu0 }
 0x2ff   : > { %v3297_v18 = vpack.c.bf16 %v3229_v30, %v3227_v24  ;;  %v3564_v35 = vadd.f32 %v3563_v49, %v14584_v62  ;;  %v3565_v13 = vpop.f32.mrb[202].mxu0  ;;  %4298 = vmatprep.mubr.bf16.mxu1 %v3991_v44 }
 0x300   : > { %v3092_v58 = vpop.f32.mrb[248].mxu1  ;;  %v3298_v40 = vpack.c.bf16 %v3230_v37, %v3228_v48  ;;  %v3566_v39 = vadd.f32 %v3565_v13, %v14580_v50  ;;  %v3567_v32 = vpop.f32.mrb[203].mxu0  ;;  %4299 = vmatmul.mubr.bf16.gmra.mrb[132].mxu1 %v3990_v43  ;;  %v3868_v1 = vmax.f32 %v3562_v61, 0.0 }
 0x301   : > { %v3093_v12 = vadd.f32 %v3092_v58, %v14132_v25  ;;  %v3094_v26 = vpop.f32.mrb[249].mxu1  ;;  %v3568_v27 = vadd.f32 %v3567_v32, %v14584_v62  ;;  %v3869_v54 = vmax.f32 %v3564_v35, 0.0 }
 0x302   : > { %v3095_v20 = vadd.f32 %v3094_v26, %v14138_v41  ;;  %v3096_v34 = vpop.f32.mrb[250].mxu1  ;;  %3829 = vmatprep.mubr.bf16.mxu0 %v3298_v40  ;;  %v3870_v51 = vmax.f32 %v3566_v39, 0.0 }
 0x303   : > { %v3097_v24 = vadd.f32 %v3096_v34, %v14132_v25  ;;  %v3098_v30 = vpop.f32.mrb[251].mxu1  ;;  %3830 = vmatmul.mubr.bf16.gmra.mrb[52].mxu0 %v3297_v18  ;;  %v3871_v36 = vmax.f32 %v3568_v27, 0.0  ;;  %v3231_v37 = vmax.f32 %v3093_v12, 0.0 }
 0x304   : > { %v3099_v48 = vadd.f32 %v3098_v30, %v14138_v41  ;;  %v3992_v29 = vpack.c.bf16 %v3870_v51, %v3868_v1  ;;  %v3232_v43 = vmax.f32 %v3095_v20, 0.0 }
 0x305   : > { %v3233_v44 = vmax.f32 %v3097_v24, 0.0  ;;  %v3571_v58 = vpop.f32.mrb[204].mxu0  ;;  %v3993_v13 = vpack.c.bf16 %v3871_v36, %v3869_v54 }
 0x306   : > { %v3234_v49 = vmax.f32 %v3099_v48, 0.0  ;;  %v3572_v40 = vadd.f32 %v3571_v58, %v14580_v50  ;;  %v3573_v61 = vpop.f32.mrb[205].mxu0 }
 0x307   : > { %v3299_v26 = vpack.c.bf16 %v3233_v44, %v3231_v37  ;;  %v3574_v39 = vadd.f32 %v3573_v61, %v14584_v62  ;;  %v3575_v34 = vpop.f32.mrb[206].mxu0  ;;  %4308 = vmatprep.mubr.bf16.mxu1 %v3993_v13 }
 0x308   : > { %v3102_v32 = vpop.f32.mrb[252].mxu1  ;;  %v3300_v18 = vpack.c.bf16 %v3234_v49, %v3232_v43  ;;  %v3576_v12 = vadd.f32 %v3575_v34, %v14580_v50  ;;  %v3577_v1 = vpop.f32.mrb[207].mxu0  ;;  %4309 = vmatmul.mubr.bf16.gmra.mrb[136].mxu1 %v3992_v29  ;;  %v3872_v30 = vmax.f32 %v3572_v40, 0.0  ;;  %v12149_v29 = vld [vmem:[%s17391_s9 + $0xb0] ss:$8 sps:$4 sm:$0xff]  }
 0x309   : > { %v3103_v35 = vadd.f32 %v3102_v32, %v14132_v25  ;;  %v3104_v27 = vpop.f32.mrb[253].mxu1  ;;  %v3578_v51 = vadd.f32 %v3577_v1, %v14584_v62  ;;  %v3873_v37 = vmax.f32 %v3574_v39, 0.0  ;;  %v12151_v40 = vld [vmem:[%s17391_s9 + $0xb4] ss:$8 sps:$4 sm:$0xff]  }
 0x30a   : > { %v3105_v20 = vadd.f32 %v3104_v27, %v14138_v41  ;;  %v3106_v24 = vpop.f32.mrb[254].mxu1  ;;  %3839 = vmatprep.mubr.bf16.mxu0 %v3300_v18  ;;  %v3874_v54 = vmax.f32 %v3576_v12, 0.0  ;;  %5155 = vmatprep.subr.bf16.mxu0 %v12151_v40 }
 0x30b   : > { %v3107_v36 = vadd.f32 %v3106_v24, %v14132_v25  ;;  %v3108_v48 = vpop.f32.mrb[255].mxu1  ;;  %3840 = vmatmul.mubr.bf16.gmra.mrb[56].mxu0 %v3299_v26  ;;  %v3875_v44 = vmax.f32 %v3578_v51, 0.0  ;;  %v3235_v49 = vmax.f32 %v3103_v35, 0.0 }
 0x30c   : > { %v3109_v43 = vadd.f32 %v3108_v48, %v14138_v41  ;;  %v3994_v58 = vpack.c.bf16 %v3874_v54, %v3872_v30  ;;  %v3236_v61 = vmax.f32 %v3105_v20, 0.0  ;;  %5156 = vmatpush1.bf16.msra.mxu0 %v12149_v29 }
 0x30d   : > { %v3237_v13 = vmax.f32 %v3107_v36, 0.0  ;;  %v3581_v25 = vpop.f32.mrb[208].mxu0  ;;  %v3995_v34 = vpack.c.bf16 %v3875_v44, %v3873_v37 }
 0x30e   : > { %v3238_v32 = vmax.f32 %v3109_v43, 0.0  ;;  %v3582_v39 = vadd.f32 %v3581_v25, %v14580_v50  ;;  %v3583_v18 = vpop.f32.mrb[209].mxu0 }
 0x30f   : > { %v3301_v26 = vpack.c.bf16 %v3237_v13, %v3235_v49  ;;  %v3584_v41 = vadd.f32 %v3583_v18, %v14584_v62  ;;  %v3585_v35 = vpop.f32.mrb[210].mxu0  ;;  %4318 = vmatprep.mubr.bf16.mxu1 %v3995_v34  ;;  %v12154_v18 = vld [vmem:[%s17391_s9 + $0xc4] ss:$8 sps:$4 sm:$0xff]  }
 0x310   : > { %v3302_v12 = vpack.c.bf16 %v3238_v32, %v3236_v61  ;;  %v3586_v27 = vadd.f32 %v3585_v35, %v14580_v50  ;;  %v3587_v1 = vpop.f32.mrb[211].mxu0  ;;  %4319 = vmatmul.mubr.bf16.gmra.mrb[140].mxu1 %v3994_v58  ;;  %v3876_v51 = vmax.f32 %v3582_v39, 0.0  ;;  %v12152_v39 = vld [vmem:[%s17391_s9 + $0xc0] ss:$8 sps:$4 sm:$0xff]   ;;  %5157 = vmatprep.subr.bf16.mxu0 %v12154_v18 }
 0x311   : > { %v3588_v20 = vadd.f32 %v3587_v1, %v14584_v62  ;;  %v3877_v30 = vmax.f32 %v3584_v41, 0.0  ;;  %5158 = vmatpush1.bf16.msra.mxu0 %v12152_v39 }
 0x312   : > { %3849 = vmatprep.mubr.bf16.mxu0 %v3302_v12  ;;  %v3878_v24 = vmax.f32 %v3586_v27, 0.0 }
 0x313   : > { %3850 = vmatmul.mubr.bf16.gmra.mrb[60].mxu0 %v3301_v26  ;;  %v3879_v54 = vmax.f32 %v3588_v20, 0.0 }
 0x314   : > { %v3996_v36 = vpack.c.bf16 %v3878_v24, %v3876_v51 }
 0x315   : > { %v3591_v48 = vpop.f32.mrb[212].mxu0  ;;  %v3997_v37 = vpack.c.bf16 %v3879_v54, %v3877_v30 }
 0x316   : > { %v3592_v44 = vadd.f32 %v3591_v48, %v14580_v50  ;;  %v3593_v43 = vpop.f32.mrb[213].mxu0 }
 0x317   : > { %v3594_v49 = vadd.f32 %v3593_v43, %v14584_v62  ;;  %v3595_v13 = vpop.f32.mrb[214].mxu0  ;;  %4328 = vmatprep.mubr.bf16.mxu1 %v3997_v37 }
 0x318   : > { %v3596_v58 = vadd.f32 %v3595_v13, %v14580_v50  ;;  %v3597_v29 = vpop.f32.mrb[215].mxu0  ;;  %4329 = vmatmul.mubr.bf16.gmra.mrb[144].mxu1 %v3996_v36  ;;  %v3880_v61 = vmax.f32 %v3592_v44, 0.0 }
 0x319   : > { %v3598_v40 = vadd.f32 %v3597_v29, %v14584_v62  ;;  %v3881_v25 = vmax.f32 %v3594_v49, 0.0 }
 0x31a   : > { %v3882_v32 = vmax.f32 %v3596_v58, 0.0 }
 0x31b   : > { %v3883_v34 = vmax.f32 %v3598_v40, 0.0 }
 0x31c   : > { %v3998_v26 = vpack.c.bf16 %v3882_v32, %v3880_v61 }
 0x31d   : > { %v3601_v41 = vpop.f32.mrb[216].mxu0  ;;  %v3999_v35 = vpack.c.bf16 %v3883_v34, %v3881_v25 }
 0x31e   : > { %v3602_v12 = vadd.f32 %v3601_v41, %v14580_v50  ;;  %v3603_v27 = vpop.f32.mrb[217].mxu0 }
 0x31f   : > { %v3604_v1 = vadd.f32 %v3603_v27, %v14584_v62  ;;  %v3605_v20 = vpop.f32.mrb[218].mxu0  ;;  %4338 = vmatprep.mubr.bf16.mxu1 %v3999_v35  ;;  %v12155_v35 = vld [vmem:[%s17391_s9 + $0xd0] ss:$8 sps:$4 sm:$0xff]  }
 0x320   : > { %v3606_v51 = vadd.f32 %v3605_v20, %v14580_v50  ;;  %v3607_v24 = vpop.f32.mrb[219].mxu0  ;;  %4339 = vmatmul.mubr.bf16.gmra.mrb[148].mxu1 %v3998_v26  ;;  %v3884_v54 = vmax.f32 %v3602_v12, 0.0  ;;  %v12157_v12 = vld [vmem:[%s17391_s9 + $0xd4] ss:$8 sps:$4 sm:$0xff]  }
 0x321   : > { %v3608_v30 = vadd.f32 %v3607_v24, %v14584_v62  ;;  %v3885_v48 = vmax.f32 %v3604_v1, 0.0  ;;  %5159 = vmatprep.subr.bf16.mxu0 %v12157_v12 }
 0x322   : > { %v3886_v36 = vmax.f32 %v3606_v51, 0.0  ;;  %5160 = vmatpush1.bf16.msra.mxu0 %v12155_v35 }
 0x323   : > { %v3887_v37 = vmax.f32 %v3608_v30, 0.0 }
 0x324   : > { %v4000_v44 = vpack.c.bf16 %v3886_v36, %v3884_v54 }
 0x325   : > { %v3611_v43 = vpop.f32.mrb[220].mxu0  ;;  %v4001_v49 = vpack.c.bf16 %v3887_v37, %v3885_v48 }
 0x326   : > { %v3612_v13 = vadd.f32 %v3611_v43, %v14580_v50  ;;  %v3613_v58 = vpop.f32.mrb[221].mxu0 }
 0x327   : > { %v3614_v29 = vadd.f32 %v3613_v58, %v14584_v62  ;;  %v3615_v40 = vpop.f32.mrb[222].mxu0  ;;  %4348 = vmatprep.mubr.bf16.mxu1 %v4001_v49 }
 0x328   : > { %v3616_v61 = vadd.f32 %v3615_v40, %v14580_v50  ;;  %v3617_v32 = vpop.f32.mrb[223].mxu0  ;;  %4349 = vmatmul.mubr.bf16.gmra.mrb[152].mxu1 %v4000_v44  ;;  %v3888_v34 = vmax.f32 %v3612_v13, 0.0 }
 0x329   : > { %v3618_v25 = vadd.f32 %v3617_v32, %v14584_v62  ;;  %v3889_v39 = vmax.f32 %v3614_v29, 0.0 }
 0x32a   : > { %v3890_v26 = vmax.f32 %v3616_v61, 0.0 }
 0x32b   : > { %v3891_v18 = vmax.f32 %v3618_v25, 0.0 }
 0x32c   : > { %v4002_v41 = vpack.c.bf16 %v3890_v26, %v3888_v34 }
 0x32d   : > { %v3621_v27 = vpop.f32.mrb[224].mxu0  ;;  %v4003_v1 = vpack.c.bf16 %v3891_v18, %v3889_v39  ;;  %v12158_v18 = vld [vmem:[%s17393_s11] ss:$8 sps:$4 sm:$0xff]  }
 0x32e   : > { %v3622_v20 = vadd.f32 %v3621_v27, %v14580_v50  ;;  %v3623_v51 = vpop.f32.mrb[225].mxu0 }
 0x32f   : > { %v3624_v24 = vadd.f32 %v3623_v51, %v14584_v62  ;;  %v3625_v30 = vpop.f32.mrb[226].mxu0  ;;  %4358 = vmatprep.mubr.bf16.mxu1 %v4003_v1  ;;  %v12161_v51 = vld [vmem:[%s17391_s9 + $0xe0] ss:$8 sps:$4 sm:$0xff]  }
 0x330   : > { %v3626_v54 = vadd.f32 %v3625_v30, %v14580_v50  ;;  %v3627_v36 = vpop.f32.mrb[227].mxu0  ;;  %4359 = vmatmul.mubr.bf16.gmra.mrb[156].mxu1 %v4002_v41  ;;  %v3892_v37 = vmax.f32 %v3622_v20, 0.0  ;;  %v12160_v41 = vld [vmem:[%s17393_s11 + $0x4] ss:$8 sps:$4 sm:$0xff]  }
 0x331   : > { %v3628_v48 = vadd.f32 %v3627_v36, %v14584_v62  ;;  %v3893_v43 = vmax.f32 %v3624_v24, 0.0  ;;  %5870 = vmatprep.subr.bf16.mxu1 %v12160_v41  ;;  %v12163_v24 = vld [vmem:[%s17391_s9 + $0xe4] ss:$8 sps:$4 sm:$0xff]  }
 0x332   : > { %v3894_v44 = vmax.f32 %v3626_v54, 0.0  ;;  %5871 = vmatpush1.bf16.msra.mxu1 %v12158_v18  ;;  %5161 = vmatprep.subr.bf16.mxu0 %v12163_v24 }
 0x333   : > { %v3895_v49 = vmax.f32 %v3628_v48, 0.0  ;;  %5162 = vmatpush1.bf16.msra.mxu0 %v12161_v51 }
 0x334   : > { %v4004_v13 = vpack.c.bf16 %v3894_v44, %v3892_v37 }
 0x335   : > { %v3631_v58 = vpop.f32.mrb[228].mxu0  ;;  %v4005_v29 = vpack.c.bf16 %v3895_v49, %v3893_v43 }
 0x336   : > { %v3632_v40 = vadd.f32 %v3631_v58, %v14580_v50  ;;  %v3633_v61 = vpop.f32.mrb[229].mxu0 }
 0x337   : > { %v3634_v32 = vadd.f32 %v3633_v61, %v14584_v62  ;;  %v3635_v25 = vpop.f32.mrb[230].mxu0  ;;  %4368 = vmatprep.mubr.bf16.mxu1 %v4005_v29 }
 0x338   : > { %v3636_v34 = vadd.f32 %v3635_v25, %v14580_v50  ;;  %v3637_v26 = vpop.f32.mrb[231].mxu0  ;;  %4369 = vmatmul.mubr.bf16.gmra.mrb[160].mxu1 %v4004_v13  ;;  %v3896_v35 = vmax.f32 %v3632_v40, 0.0 }
 0x339   : > { %v3638_v39 = vadd.f32 %v3637_v26, %v14584_v62  ;;  %v3897_v27 = vmax.f32 %v3634_v32, 0.0 }
 0x33a   : > { %v3898_v12 = vmax.f32 %v3636_v34, 0.0 }
 0x33b   : > { %v3899_v1 = vmax.f32 %v3638_v39, 0.0 }
 0x33c   : > { %v4006_v20 = vpack.c.bf16 %v3898_v12, %v3896_v35 }
 0x33d   : > { %v3641_v30 = vpop.f32.mrb[232].mxu0  ;;  %v4007_v54 = vpack.c.bf16 %v3899_v1, %v3897_v27  ;;  %v12164_v1 = vld [vmem:[%s17393_s11 + $0x10] ss:$8 sps:$4 sm:$0xff]  }
 0x33e   : > { %v3642_v36 = vadd.f32 %v3641_v30, %v14580_v50  ;;  %v3643_v48 = vpop.f32.mrb[233].mxu0 }
 0x33f   : > { %v3644_v37 = vadd.f32 %v3643_v48, %v14584_v62  ;;  %v3645_v44 = vpop.f32.mrb[234].mxu0  ;;  %4378 = vmatprep.mubr.bf16.mxu1 %v4007_v54  ;;  %v12167_v48 = vld [vmem:[%s17391_s9 + $0xf0] ss:$8 sps:$4 sm:$0xff]  }
 0x340   : > { %v3646_v43 = vadd.f32 %v3645_v44, %v14580_v50  ;;  %v3647_v49 = vpop.f32.mrb[235].mxu0  ;;  %4379 = vmatmul.mubr.bf16.gmra.mrb[164].mxu1 %v4006_v20  ;;  %v3900_v58 = vmax.f32 %v3642_v36, 0.0  ;;  %v12166_v20 = vld [vmem:[%s17393_s11 + $0x14] ss:$8 sps:$4 sm:$0xff]  }
 0x341   : > { %v3648_v13 = vadd.f32 %v3647_v49, %v14584_v62  ;;  %v3901_v40 = vmax.f32 %v3644_v37, 0.0  ;;  %5872 = vmatprep.subr.bf16.mxu1 %v12166_v20  ;;  %v12169_v37 = vld [vmem:[%s17391_s9 + $0xf4] ss:$8 sps:$4 sm:$0xff]  }
 0x342   : > { %v3902_v29 = vmax.f32 %v3646_v43, 0.0  ;;  %5873 = vmatpush1.bf16.msra.mxu1 %v12164_v1  ;;  %5163 = vmatprep.subr.bf16.mxu0 %v12169_v37 }
 0x343   : > { %v3903_v61 = vmax.f32 %v3648_v13, 0.0  ;;  %5164 = vmatpush1.bf16.msra.mxu0 %v12167_v48 }
 0x344   : > { %v4008_v32 = vpack.c.bf16 %v3902_v29, %v3900_v58 }
 0x345   : > { %v3651_v25 = vpop.f32.mrb[236].mxu0  ;;  %v4009_v34 = vpack.c.bf16 %v3903_v61, %v3901_v40 }
 0x346   : > { %v3652_v26 = vadd.f32 %v3651_v25, %v14580_v50  ;;  %v3653_v39 = vpop.f32.mrb[237].mxu0 }
 0x347   : > { %v3654_v18 = vadd.f32 %v3653_v39, %v14584_v62  ;;  %v3655_v41 = vpop.f32.mrb[238].mxu0  ;;  %4388 = vmatprep.mubr.bf16.mxu1 %v4009_v34 }
 0x348   : > { %v3656_v35 = vadd.f32 %v3655_v41, %v14580_v50  ;;  %v3657_v12 = vpop.f32.mrb[239].mxu0  ;;  %4389 = vmatmul.mubr.bf16.gmra.mrb[168].mxu1 %v4008_v32  ;;  %v3904_v51 = vmax.f32 %v3652_v26, 0.0 }
 0x349   : > { %v3658_v27 = vadd.f32 %v3657_v12, %v14584_v62  ;;  %v3905_v30 = vmax.f32 %v3654_v18, 0.0 }
 0x34a   : > { %v3906_v24 = vmax.f32 %v3656_v35, 0.0 }
 0x34b   : > { %v3907_v54 = vmax.f32 %v3658_v27, 0.0 }
 0x34c   : > { %v4010_v36 = vpack.c.bf16 %v3906_v24, %v3904_v51 }
 0x34d   : > { %v3661_v44 = vpop.f32.mrb[240].mxu0  ;;  %v4011_v43 = vpack.c.bf16 %v3907_v54, %v3905_v30 }
 0x34e   : > { %v3662_v49 = vadd.f32 %v3661_v44, %v14580_v50  ;;  %v3663_v13 = vpop.f32.mrb[241].mxu0 }
 0x34f   : > { %v3664_v58 = vadd.f32 %v3663_v13, %v14584_v62  ;;  %v3665_v29 = vpop.f32.mrb[242].mxu0  ;;  %4398 = vmatprep.mubr.bf16.mxu1 %v4011_v43  ;;  %v12170_v43 = vld [vmem:[%s17393_s11 + $0x20] ss:$8 sps:$4 sm:$0xff]  }
 0x350   : > { %v3666_v40 = vadd.f32 %v3665_v29, %v14580_v50  ;;  %v3667_v61 = vpop.f32.mrb[243].mxu0  ;;  %4399 = vmatmul.mubr.bf16.gmra.mrb[172].mxu1 %v4010_v36  ;;  %v3908_v25 = vmax.f32 %v3662_v49, 0.0  ;;  %v12172_v49 = vld [vmem:[%s17393_s11 + $0x24] ss:$8 sps:$4 sm:$0xff]  }
 0x351   : > { %v3668_v32 = vadd.f32 %v3667_v61, %v14584_v62  ;;  %v3909_v26 = vmax.f32 %v3664_v58, 0.0  ;;  %5874 = vmatprep.subr.bf16.mxu1 %v12172_v49 }
 0x352   : > { %v3910_v34 = vmax.f32 %v3666_v40, 0.0  ;;  %5875 = vmatpush1.bf16.msra.mxu1 %v12170_v43 }
 0x353   : > { %v3911_v39 = vmax.f32 %v3668_v32, 0.0 }
 0x354   : > { %v4012_v18 = vpack.c.bf16 %v3910_v34, %v3908_v25 }
 0x355   : > { %v3671_v41 = vpop.f32.mrb[244].mxu0  ;;  %v4013_v35 = vpack.c.bf16 %v3911_v39, %v3909_v26 }
 0x356   : > { %v3672_v12 = vadd.f32 %v3671_v41, %v14580_v50  ;;  %v3673_v27 = vpop.f32.mrb[245].mxu0 }
 0x357   : > { %v3674_v1 = vadd.f32 %v3673_v27, %v14584_v62  ;;  %v3675_v20 = vpop.f32.mrb[246].mxu0  ;;  %4408 = vmatprep.mubr.bf16.mxu1 %v4013_v35 }
 0x358   : > { %v3676_v51 = vadd.f32 %v3675_v20, %v14580_v50  ;;  %v3677_v24 = vpop.f32.mrb[247].mxu0  ;;  %4409 = vmatmul.mubr.bf16.gmra.mrb[176].mxu1 %v4012_v18  ;;  %v3912_v54 = vmax.f32 %v3672_v12, 0.0 }
 0x359   : > { %v3678_v30 = vadd.f32 %v3677_v24, %v14584_v62  ;;  %v3913_v48 = vmax.f32 %v3674_v1, 0.0 }
 0x35a   : > { %v3914_v36 = vmax.f32 %v3676_v51, 0.0 }
 0x35b   : > { %v3915_v37 = vmax.f32 %v3678_v30, 0.0 }
 0x35c   : > { %v4014_v44 = vpack.c.bf16 %v3914_v36, %v3912_v54 }
 0x35d   : > { %v3681_v13 = vpop.f32.mrb[248].mxu0  ;;  %v4015_v58 = vpack.c.bf16 %v3915_v37, %v3913_v48 }
 0x35e   : > { %v3682_v29 = vadd.f32 %v3681_v13, %v14580_v50  ;;  %v3683_v40 = vpop.f32.mrb[249].mxu0 }
 0x35f   : > { %v3684_v61 = vadd.f32 %v3683_v40, %v14584_v62  ;;  %v3685_v32 = vpop.f32.mrb[250].mxu0  ;;  %4418 = vmatprep.mubr.bf16.mxu1 %v4015_v58  ;;  %v12173_v58 = vld [vmem:[%s17393_s11 + $0x30] ss:$8 sps:$4 sm:$0xff]  }
 0x360   : > { %v3686_v25 = vadd.f32 %v3685_v32, %v14580_v50  ;;  %v3687_v34 = vpop.f32.mrb[251].mxu0  ;;  %4419 = vmatmul.mubr.bf16.gmra.mrb[180].mxu1 %v4014_v44  ;;  %v3916_v39 = vmax.f32 %v3682_v29, 0.0  ;;  %v12175_v29 = vld [vmem:[%s17393_s11 + $0x34] ss:$8 sps:$4 sm:$0xff]  }
 0x361   : > { %v3688_v26 = vadd.f32 %v3687_v34, %v14584_v62  ;;  %v3917_v41 = vmax.f32 %v3684_v61, 0.0  ;;  %5876 = vmatprep.subr.bf16.mxu1 %v12175_v29 }
 0x362   : > { %v3918_v18 = vmax.f32 %v3686_v25, 0.0  ;;  %5877 = vmatpush1.bf16.msra.mxu1 %v12173_v58 }
 0x363   : > { %v3919_v35 = vmax.f32 %v3688_v26, 0.0 }
 0x364   : > { %v4016_v12 = vpack.c.bf16 %v3918_v18, %v3916_v39 }
 0x365   : > { %v3691_v27 = vpop.f32.mrb[252].mxu0  ;;  %v4017_v1 = vpack.c.bf16 %v3919_v35, %v3917_v41 }
 0x366   : > { %v3692_v20 = vadd.f32 %v3691_v27, %v14580_v50  ;;  %v3693_v51 = vpop.f32.mrb[253].mxu0 }
 0x367   : > { %v3694_v24 = vadd.f32 %v3693_v51, %v14584_v62  ;;  %v3695_v30 = vpop.f32.mrb[254].mxu0  ;;  %4428 = vmatprep.mubr.bf16.mxu1 %v4017_v1 }
 0x368   : > { %v3696_v54 = vadd.f32 %v3695_v30, %v14580_v50  ;;  %v3697_v36 = vpop.f32.mrb[255].mxu0  ;;  %4429 = vmatmul.mubr.bf16.gmra.mrb[184].mxu1 %v4016_v12  ;;  %v3920_v37 = vmax.f32 %v3692_v20, 0.0 }
 0x369   : > { %v3698_v48 = vadd.f32 %v3697_v36, %v14584_v62  ;;  %v3921_v43 = vmax.f32 %v3694_v24, 0.0 }
 0x36a   : > { %v3922_v44 = vmax.f32 %v3696_v54, 0.0 }
 0x36b   : > { %v3923_v49 = vmax.f32 %v3698_v48, 0.0 }
 0x36c   : > { %v4018_v13 = vpack.c.bf16 %v3922_v44, %v3920_v37 }
 0x36d   : > { %v3701_v40 = vpop.f32.mrb[0].mxu0  ;;  %v4019_v61 = vpack.c.bf16 %v3923_v49, %v3921_v43 }
 0x36e   : > { %v3702_v32 = vadd.f32 %v3701_v40, %v14580_v50  ;;  %v3703_v25 = vpop.f32.mrb[1].mxu0 }
 0x36f   : > { %v3704_v34 = vadd.f32 %v3703_v25, %v14584_v62  ;;  %v3705_v26 = vpop.f32.mrb[2].mxu0  ;;  %4438 = vmatprep.mubr.bf16.mxu1 %v4019_v61  ;;  %v12176_v61 = vld [vmem:[%s17393_s11 + $0x40] ss:$8 sps:$4 sm:$0xff]  }
 0x370   : > { %v3706_v39 = vadd.f32 %v3705_v26, %v14580_v50  ;;  %v3707_v18 = vpop.f32.mrb[3].mxu0  ;;  %4439 = vmatmul.mubr.bf16.gmra.mrb[188].mxu1 %v4018_v13  ;;  %v3924_v35 = vmax.f32 %v3702_v32, 0.0  ;;  %v12178_v32 = vld [vmem:[%s17393_s11 + $0x44] ss:$8 sps:$4 sm:$0xff]  }
 0x371   : > { %v3708_v41 = vadd.f32 %v3707_v18, %v14584_v62  ;;  %v3925_v27 = vmax.f32 %v3704_v34, 0.0  ;;  %5878 = vmatprep.subr.bf16.mxu1 %v12178_v32 }
 0x372   : > { %v3926_v12 = vmax.f32 %v3706_v39, 0.0  ;;  %5879 = vmatpush1.bf16.msra.mxu1 %v12176_v61 }
 0x373   : > { %v3927_v1 = vmax.f32 %v3708_v41, 0.0 }
 0x374   : > { %v4020_v20 = vpack.c.bf16 %v3926_v12, %v3924_v35 }
 0x375   : > { %v3711_v51 = vpop.f32.mrb[4].mxu0  ;;  %v4021_v24 = vpack.c.bf16 %v3927_v1, %v3925_v27 }
 0x376   : > { %v3712_v30 = vadd.f32 %v3711_v51, %v14580_v50  ;;  %v3713_v54 = vpop.f32.mrb[5].mxu0 }
 0x377   : > { %v3714_v36 = vadd.f32 %v3713_v54, %v14584_v62  ;;  %v3715_v48 = vpop.f32.mrb[6].mxu0  ;;  %4448 = vmatprep.mubr.bf16.mxu1 %v4021_v24 }
 0x378   : > { %v3716_v37 = vadd.f32 %v3715_v48, %v14580_v50  ;;  %v3717_v44 = vpop.f32.mrb[7].mxu0  ;;  %4449 = vmatmul.mubr.bf16.gmra.mrb[192].mxu1 %v4020_v20  ;;  %v3928_v49 = vmax.f32 %v3712_v30, 0.0 }
 0x379   : > { %v3718_v43 = vadd.f32 %v3717_v44, %v14584_v62  ;;  %v3929_v58 = vmax.f32 %v3714_v36, 0.0 }
 0x37a   : > { %v3930_v13 = vmax.f32 %v3716_v37, 0.0 }
 0x37b   : > { %v3931_v29 = vmax.f32 %v3718_v43, 0.0 }
 0x37c   : > { %v4022_v40 = vpack.c.bf16 %v3930_v13, %v3928_v49 }
 0x37d   : > { %v3721_v25 = vpop.f32.mrb[8].mxu0  ;;  %v4023_v34 = vpack.c.bf16 %v3931_v29, %v3929_v58 }
 0x37e   : > { %v3722_v26 = vadd.f32 %v3721_v25, %v14580_v50  ;;  %v3723_v39 = vpop.f32.mrb[9].mxu0 }
 0x37f   : > { %v3724_v18 = vadd.f32 %v3723_v39, %v14584_v62  ;;  %v3725_v41 = vpop.f32.mrb[10].mxu0  ;;  %4458 = vmatprep.mubr.bf16.mxu1 %v4023_v34  ;;  %v12179_v34 = vld [vmem:[%s17393_s11 + $0x50] ss:$8 sps:$4 sm:$0xff]  }
 0x380   : > { %v3726_v35 = vadd.f32 %v3725_v41, %v14580_v50  ;;  %v3727_v12 = vpop.f32.mrb[11].mxu0  ;;  %4459 = vmatmul.mubr.bf16.gmra.mrb[196].mxu1 %v4022_v40  ;;  %v3932_v1 = vmax.f32 %v3722_v26, 0.0  ;;  %v12181_v26 = vld [vmem:[%s17393_s11 + $0x54] ss:$8 sps:$4 sm:$0xff]  }
 0x381   : > { %v3728_v27 = vadd.f32 %v3727_v12, %v14584_v62  ;;  %v3933_v51 = vmax.f32 %v3724_v18, 0.0  ;;  %5880 = vmatprep.subr.bf16.mxu1 %v12181_v26 }
 0x382   : > { %v3934_v20 = vmax.f32 %v3726_v35, 0.0  ;;  %5881 = vmatpush1.bf16.msra.mxu1 %v12179_v34 }
 0x383   : > { %v3935_v24 = vmax.f32 %v3728_v27, 0.0 }
 0x384   : > { %v4024_v30 = vpack.c.bf16 %v3934_v20, %v3932_v1 }
 0x385   : > { %v3731_v54 = vpop.f32.mrb[12].mxu0  ;;  %v4025_v36 = vpack.c.bf16 %v3935_v24, %v3933_v51 }
 0x386   : > { %v3732_v48 = vadd.f32 %v3731_v54, %v14580_v50  ;;  %v3733_v37 = vpop.f32.mrb[13].mxu0 }
 0x387   : > { %v3734_v44 = vadd.f32 %v3733_v37, %v14584_v62  ;;  %v3735_v43 = vpop.f32.mrb[14].mxu0  ;;  %4468 = vmatprep.mubr.bf16.mxu1 %v4025_v36 }
 0x388   : > { %v3736_v49 = vadd.f32 %v3735_v43, %v14580_v50  ;;  %v3737_v13 = vpop.f32.mrb[15].mxu0  ;;  %4469 = vmatmul.mubr.bf16.gmra.mrb[200].mxu1 %v4024_v30  ;;  %v3936_v29 = vmax.f32 %v3732_v48, 0.0 }
 0x389   : > { %v3738_v58 = vadd.f32 %v3737_v13, %v14584_v62  ;;  %v3937_v61 = vmax.f32 %v3734_v44, 0.0 }
 0x38a   : > { %v3938_v40 = vmax.f32 %v3736_v49, 0.0 }
 0x38b   : > { %v3939_v32 = vmax.f32 %v3738_v58, 0.0 }
 0x38c   : > { %v4026_v25 = vpack.c.bf16 %v3938_v40, %v3936_v29 }
 0x38d   : > { %v3741_v39 = vpop.f32.mrb[16].mxu0  ;;  %v4027_v18 = vpack.c.bf16 %v3939_v32, %v3937_v61 }
 0x38e   : > { %v3742_v41 = vadd.f32 %v3741_v39, %v14580_v50  ;;  %v3743_v35 = vpop.f32.mrb[17].mxu0 }
 0x38f   : > { %v3744_v12 = vadd.f32 %v3743_v35, %v14584_v62  ;;  %v3745_v27 = vpop.f32.mrb[18].mxu0  ;;  %4478 = vmatprep.mubr.bf16.mxu1 %v4027_v18  ;;  %v12182_v18 = vld [vmem:[%s17393_s11 + $0x60] ss:$8 sps:$4 sm:$0xff]  }
 0x390   : > { %v3746_v1 = vadd.f32 %v3745_v27, %v14580_v50  ;;  %v3747_v20 = vpop.f32.mrb[19].mxu0  ;;  %4479 = vmatmul.mubr.bf16.gmra.mrb[204].mxu1 %v4026_v25  ;;  %v3940_v24 = vmax.f32 %v3742_v41, 0.0  ;;  %v12184_v41 = vld [vmem:[%s17393_s11 + $0x64] ss:$8 sps:$4 sm:$0xff]  }
 0x391   : > { %v3748_v51 = vadd.f32 %v3747_v20, %v14584_v62  ;;  %v3941_v54 = vmax.f32 %v3744_v12, 0.0  ;;  %5882 = vmatprep.subr.bf16.mxu1 %v12184_v41 }
 0x392   : > { %v3942_v30 = vmax.f32 %v3746_v1, 0.0  ;;  %5883 = vmatpush1.bf16.msra.mxu1 %v12182_v18 }
 0x393   : > { %v3943_v36 = vmax.f32 %v3748_v51, 0.0 }
 0x394   : > { %v4028_v48 = vpack.c.bf16 %v3942_v30, %v3940_v24 }
 0x395   : > { %v3751_v37 = vpop.f32.mrb[20].mxu0  ;;  %v4029_v44 = vpack.c.bf16 %v3943_v36, %v3941_v54 }
 0x396   : > { %v3752_v43 = vadd.f32 %v3751_v37, %v14580_v50  ;;  %v3753_v49 = vpop.f32.mrb[21].mxu0 }
 0x397   : > { %v3754_v13 = vadd.f32 %v3753_v49, %v14584_v62  ;;  %v3755_v58 = vpop.f32.mrb[22].mxu0  ;;  %4488 = vmatprep.mubr.bf16.mxu1 %v4029_v44 }
 0x398   : > { %v3756_v29 = vadd.f32 %v3755_v58, %v14580_v50  ;;  %v3757_v40 = vpop.f32.mrb[23].mxu0  ;;  %4489 = vmatmul.mubr.bf16.gmra.mrb[208].mxu1 %v4028_v48  ;;  %v3944_v32 = vmax.f32 %v3752_v43, 0.0 }
 0x399   : > { %v3758_v61 = vadd.f32 %v3757_v40, %v14584_v62  ;;  %v3945_v34 = vmax.f32 %v3754_v13, 0.0 }
 0x39a   : > { %v3946_v25 = vmax.f32 %v3756_v29, 0.0 }
 0x39b   : > { %v3947_v26 = vmax.f32 %v3758_v61, 0.0 }
 0x39c   : > { %v4030_v39 = vpack.c.bf16 %v3946_v25, %v3944_v32 }
 0x39d   : > { %v3761_v35 = vpop.f32.mrb[24].mxu0  ;;  %v4031_v12 = vpack.c.bf16 %v3947_v26, %v3945_v34 }
 0x39e   : > { %v3762_v27 = vadd.f32 %v3761_v35, %v14580_v50  ;;  %v3763_v1 = vpop.f32.mrb[25].mxu0 }
 0x39f   : > { %v3764_v20 = vadd.f32 %v3763_v1, %v14584_v62  ;;  %v3765_v51 = vpop.f32.mrb[26].mxu0  ;;  %4498 = vmatprep.mubr.bf16.mxu1 %v4031_v12  ;;  %v12185_v12 = vld [vmem:[%s17393_s11 + $0x70] ss:$8 sps:$4 sm:$0xff]  }
 0x3a0   : > { %v3766_v24 = vadd.f32 %v3765_v51, %v14580_v50  ;;  %v3767_v30 = vpop.f32.mrb[27].mxu0  ;;  %4499 = vmatmul.mubr.bf16.gmra.mrb[212].mxu1 %v4030_v39  ;;  %v3948_v36 = vmax.f32 %v3762_v27, 0.0  ;;  %v12187_v27 = vld [vmem:[%s17393_s11 + $0x74] ss:$8 sps:$4 sm:$0xff]  }
 0x3a1   : > { %v3768_v54 = vadd.f32 %v3767_v30, %v14584_v62  ;;  %v3949_v37 = vmax.f32 %v3764_v20, 0.0  ;;  %5884 = vmatprep.subr.bf16.mxu1 %v12187_v27 }
 0x3a2   : > { %v3950_v48 = vmax.f32 %v3766_v24, 0.0  ;;  %5885 = vmatpush1.bf16.msra.mxu1 %v12185_v12 }
 0x3a3   : > { %v3951_v44 = vmax.f32 %v3768_v54, 0.0 }
 0x3a4   : > { %v4032_v43 = vpack.c.bf16 %v3950_v48, %v3948_v36 }
 0x3a5   : > { %v3771_v49 = vpop.f32.mrb[28].mxu0  ;;  %v4033_v13 = vpack.c.bf16 %v3951_v44, %v3949_v37 }
 0x3a6   : > { %v3772_v58 = vadd.f32 %v3771_v49, %v14580_v50  ;;  %v3773_v29 = vpop.f32.mrb[29].mxu0 }
 0x3a7   : > { %v3774_v40 = vadd.f32 %v3773_v29, %v14584_v62  ;;  %v3775_v61 = vpop.f32.mrb[30].mxu0  ;;  %4508 = vmatprep.mubr.bf16.mxu1 %v4033_v13 }
 0x3a8   : > { %v3776_v32 = vadd.f32 %v3775_v61, %v14580_v50  ;;  %v3777_v25 = vpop.f32.mrb[31].mxu0  ;;  %4509 = vmatmul.mubr.bf16.gmra.mrb[216].mxu1 %v4032_v43  ;;  %v3952_v26 = vmax.f32 %v3772_v58, 0.0 }
 0x3a9   : > { %v3778_v34 = vadd.f32 %v3777_v25, %v14584_v62  ;;  %v3953_v18 = vmax.f32 %v3774_v40, 0.0 }
 0x3aa   : > { %v3954_v39 = vmax.f32 %v3776_v32, 0.0 }
 0x3ab   : > { %v3955_v41 = vmax.f32 %v3778_v34, 0.0 }
 0x3ac   : > { %v4034_v35 = vpack.c.bf16 %v3954_v39, %v3952_v26 }
 0x3ad   : > { %v3781_v1 = vpop.f32.mrb[32].mxu0  ;;  %v4035_v20 = vpack.c.bf16 %v3955_v41, %v3953_v18 }
 0x3ae   : > { %v3782_v51 = vadd.f32 %v3781_v1, %v14580_v50  ;;  %v3783_v24 = vpop.f32.mrb[33].mxu0 }
 0x3af   : > { %v3784_v30 = vadd.f32 %v3783_v24, %v14584_v62  ;;  %v3785_v54 = vpop.f32.mrb[34].mxu0  ;;  %4518 = vmatprep.mubr.bf16.mxu1 %v4035_v20  ;;  %v12188_v20 = vld [vmem:[%s17393_s11 + $0x80] ss:$8 sps:$4 sm:$0xff]  }
 0x3b0   : > { %v3786_v36 = vadd.f32 %v3785_v54, %v14580_v50  ;;  %v3787_v48 = vpop.f32.mrb[35].mxu0  ;;  %4519 = vmatmul.mubr.bf16.gmra.mrb[220].mxu1 %v4034_v35  ;;  %v3956_v44 = vmax.f32 %v3782_v51, 0.0  ;;  %v12190_v51 = vld [vmem:[%s17393_s11 + $0x84] ss:$8 sps:$4 sm:$0xff]  }
 0x3b1   : > { %v3788_v37 = vadd.f32 %v3787_v48, %v14584_v62  ;;  %v3957_v49 = vmax.f32 %v3784_v30, 0.0  ;;  %5886 = vmatprep.subr.bf16.mxu1 %v12190_v51 }
 0x3b2   : > { %v3958_v43 = vmax.f32 %v3786_v36, 0.0  ;;  %5887 = vmatpush1.bf16.msra.mxu1 %v12188_v20 }
 0x3b3   : > { %v3959_v13 = vmax.f32 %v3788_v37, 0.0 }
 0x3b4   : > { %v4036_v58 = vpack.c.bf16 %v3958_v43, %v3956_v44 }
 0x3b5   : > { %v3791_v29 = vpop.f32.mrb[36].mxu0  ;;  %v4037_v40 = vpack.c.bf16 %v3959_v13, %v3957_v49 }
 0x3b6   : > { %v3792_v61 = vadd.f32 %v3791_v29, %v14580_v50  ;;  %v3793_v32 = vpop.f32.mrb[37].mxu0 }
 0x3b7   : > { %v3794_v25 = vadd.f32 %v3793_v32, %v14584_v62  ;;  %v3795_v34 = vpop.f32.mrb[38].mxu0  ;;  %4528 = vmatprep.mubr.bf16.mxu1 %v4037_v40 }
 0x3b8   : > { %v3796_v26 = vadd.f32 %v3795_v34, %v14580_v50  ;;  %v3797_v39 = vpop.f32.mrb[39].mxu0  ;;  %4529 = vmatmul.mubr.bf16.gmra.mrb[224].mxu1 %v4036_v58  ;;  %v3960_v41 = vmax.f32 %v3792_v61, 0.0  ;;  %v4084_v34 = vld [vmem:[%s17390_s8] sm:$0x3] }
 0x3b9   : > { %v3798_v18 = vadd.f32 %v3797_v39, %v14584_v62  ;;  %v3961_v12 = vmax.f32 %v3794_v25, 0.0  ;;  %v14817_v20 = vrot.slane %v4084_v34, %v13191_v47 }
 0x3ba   : > { %v3962_v35 = vmax.f32 %v3796_v26, 0.0 }
 0x3bb   : > { %v3963_v27 = vmax.f32 %v3798_v18, 0.0 }
 0x3bc   : > { %v4038_v1 = vpack.c.bf16 %v3962_v35, %v3960_v41 }
 0x3bd   : > { %v3801_v24 = vpop.f32.mrb[40].mxu0  ;;  %v4039_v30 = vpack.c.bf16 %v3963_v27, %v3961_v12  ;;  %v14813_v27 = vrot.slane %v4084_v34, %v13214_v57 }
 0x3be   : > { %v3802_v54 = vadd.f32 %v3801_v24, %v14580_v50  ;;  %v3803_v36 = vpop.f32.mrb[41].mxu0 }
 0x3bf   : > { %v3804_v48 = vadd.f32 %v3803_v36, %v14584_v62  ;;  %v3805_v37 = vpop.f32.mrb[42].mxu0  ;;  %4538 = vmatprep.mubr.bf16.mxu1 %v4039_v30 }
 0x3c0   : > { %v3806_v44 = vadd.f32 %v3805_v37, %v14580_v50  ;;  %v3807_v43 = vpop.f32.mrb[43].mxu0  ;;  %4539 = vmatmul.mubr.bf16.gmra.mrb[228].mxu1 %v4038_v1  ;;  %v3964_v13 = vmax.f32 %v3802_v54, 0.0 }
 0x3c1   : > { %v3808_v49 = vadd.f32 %v3807_v43, %v14584_v62  ;;  %v3965_v29 = vmax.f32 %v3804_v48, 0.0  ;;  %v12191_v43 = vld [vmem:[%s17393_s11 + $0x90] ss:$8 sps:$4 sm:$0xff]  }
 0x3c2   : > { %v3966_v58 = vmax.f32 %v3806_v44, 0.0 }
 0x3c3   : > { %v3967_v40 = vmax.f32 %v3808_v49, 0.0  ;;  %v12193_v49 = vld [vmem:[%s17393_s11 + $0x94] ss:$8 sps:$4 sm:$0xff]  }
 0x3c4   : > { %v4040_v61 = vpack.c.bf16 %v3966_v58, %v3964_v13  ;;  %5888 = vmatprep.subr.bf16.mxu1 %v12193_v49 }
 0x3c5   : > { %v3811_v32 = vpop.f32.mrb[44].mxu0  ;;  %v4041_v25 = vpack.c.bf16 %v3967_v40, %v3965_v29  ;;  %5889 = vmatpush1.bf16.msra.mxu1 %v12191_v43  ;;  %v17817_v43 = vmax.f32 %v13207_v55, 0.0 }
 0x3c6   : > { %v3812_v26 = vadd.f32 %v3811_v32, %v14580_v50  ;;  %v3813_v39 = vpop.f32.mrb[45].mxu0 }
 0x3c7   : > { %v3814_v18 = vadd.f32 %v3813_v39, %v14584_v62  ;;  %v3815_v41 = vpop.f32.mrb[46].mxu0  ;;  %4548 = vmatprep.mubr.bf16.mxu1 %v4041_v25 }
 0x3c8   : > { %v3816_v35 = vadd.f32 %v3815_v41, %v14580_v50  ;;  %v3817_v12 = vpop.f32.mrb[47].mxu0  ;;  %4549 = vmatmul.mubr.bf16.gmra.mrb[232].mxu1 %v4040_v61  ;;  %v3968_v51 = vmax.f32 %v3812_v26, 0.0 }
 0x3c9   : > { %v3818_v1 = vadd.f32 %v3817_v12, %v14584_v62  ;;  %v3969_v30 = vmax.f32 %v3814_v18, 0.0 }
 0x3ca   : > { %v3970_v24 = vmax.f32 %v3816_v35, 0.0 }
 0x3cb   : > { %v3971_v54 = vmax.f32 %v3818_v1, 0.0  ;;  %v4290_v36 = vpop.f32.mrb[128].mxu1 }
 0x3cc   : > { %v4042_v48 = vpack.c.bf16 %v3970_v24, %v3968_v51  ;;  %v4291_v37 = vadd.f32 %v4290_v36, %v14813_v27  ;;  %v4292_v44 = vpop.f32.mrb[129].mxu1 }
 0x3cd   : > { %v4293_v13 = vadd.f32 %v4292_v44, %v14817_v20  ;;  %v4294_v29 = vpop.f32.mrb[130].mxu1  ;;  %v4043_v40 = vpack.c.bf16 %v3971_v54, %v3969_v30  ;;  %v17815_v54 = vmax.f32 %v13239_v6, 0.0  ;;  %v17816_v44 = vmax.f32 %v13242_v7, 0.0 }
 0x3ce   : > { %v3821_v58 = vpop.f32.mrb[48].mxu0  ;;  %v4609_v61 = vmax.f32 %v4291_v37, 0.0  ;;  %v4295_v25 = vadd.f32 %v4294_v29, %v14813_v27  ;;  %v4296_v26 = vpop.f32.mrb[131].mxu1 }
 0x3cf   : > { %v3822_v32 = vadd.f32 %v3821_v58, %v14580_v50  ;;  %v3823_v34 = vpop.f32.mrb[49].mxu0  ;;  %v4610_v39 = vmax.f32 %v4293_v13, 0.0  ;;  %v4297_v41 = vadd.f32 %v4296_v26, %v14817_v20  ;;  %4558 = vmatprep.mubr.bf16.mxu1 %v4043_v40 }
 0x3d0   : > { %v3824_v18 = vadd.f32 %v3823_v34, %v14584_v62  ;;  %v3825_v35 = vpop.f32.mrb[50].mxu0  ;;  %v4611_v12 = vmax.f32 %v4295_v25, 0.0  ;;  %4559 = vmatmul.mubr.bf16.gmra.mrb[236].mxu1 %v4042_v48  ;;  %v4737_v36 = vadd.f32 %v4609_v61, %v17815_v54  ;;  %v17818_v34 = vmax.f32 %v13210_v56, 0.0 }
 0x3d1   : > { %v3826_v1 = vadd.f32 %v3825_v35, %v14580_v50  ;;  %v3827_v51 = vpop.f32.mrb[51].mxu0  ;;  %v4612_v24 = vmax.f32 %v4297_v41, 0.0  ;;  %v3972_v37 = vmax.f32 %v3822_v32, 0.0  ;;  %v4738_v25 = vadd.f32 %v4610_v39, %v17817_v43 }
 0x3d2   : > { %v3828_v30 = vadd.f32 %v3827_v51, %v14584_v62  ;;  %v4739_v49 = vadd.f32 %v4611_v12, %v17816_v44  ;;  %v3973_v58 = vmax.f32 %v3824_v18, 0.0 }
 0x3d3   : > { %v3974_v13 = vmax.f32 %v3826_v1, 0.0  ;;  %v4300_v40 = vpop.f32.mrb[132].mxu1  ;;  %v4740_v48 = vadd.f32 %v4612_v24, %v17818_v34 }
 0x3d4   : > { %v3975_v29 = vmax.f32 %v3828_v30, 0.0  ;;  %v4865_v26 = vpack.c.bf16 %v4739_v49, %v4737_v36  ;;  %v4301_v35 = vadd.f32 %v4300_v40, %v14813_v27  ;;  %v4302_v6 = vpop.f32.mrb[133].mxu1 }
 0x3d5   : > { %v4044_v41 = vpack.c.bf16 %v3974_v13, %v3972_v37  ;;  %v4303_v61 = vadd.f32 %v4302_v6, %v14817_v20  ;;  %v4304_v7 = vpop.f32.mrb[134].mxu1  ;;  %v4866_v1 = vpack.c.bf16 %v4740_v48, %v4738_v25  ;;  %v17820_v25 = vmax.f32 %v13269_v33, 0.0  ;;  %v12196_v33 = vld [vmem:[%s17393_s11 + $0xa4] ss:$8 sps:$4 sm:$0xff]  }
 0x3d6   : > { %v3831_v32 = vpop.f32.mrb[52].mxu0  ;;  %v4045_v12 = vpack.c.bf16 %v3975_v29, %v3973_v58  ;;  %v4613_v18 = vmax.f32 %v4301_v35, 0.0  ;;  %v4305_v55 = vadd.f32 %v4304_v7, %v14813_v27  ;;  %v4306_v30 = vpop.f32.mrb[135].mxu1  ;;  %v17819_v29 = vmax.f32 %v13266_v28, 0.0  ;;  %5890 = vmatprep.subr.bf16.mxu1 %v12196_v33 }
 0x3d7   : > { %v3832_v51 = vadd.f32 %v3831_v32, %v14580_v50  ;;  %v3833_v39 = vpop.f32.mrb[53].mxu0  ;;  %v4614_v56 = vmax.f32 %v4303_v61, 0.0  ;;  %v4307_v54 = vadd.f32 %v4306_v30, %v14817_v20  ;;  %5165 = vmatprep.mubr.bf16.mxu0 %v4866_v1  ;;  %v17821_v32 = vmax.f32 %v13228_v3, 0.0  ;;  %v12194_v3 = vld [vmem:[%s17393_s11 + $0xa0] ss:$8 sps:$4 sm:$0xff]  }
 0x3d8   : > { %v3834_v24 = vadd.f32 %v3833_v39, %v14584_v62  ;;  %v3835_v36 = vpop.f32.mrb[54].mxu0  ;;  %4568 = vmatprep.mubr.bf16.mxu1 %v4045_v12  ;;  %v4615_v37 = vmax.f32 %v4305_v55, 0.0  ;;  %5166 = vmatmul.mubr.bf16.vlgmr.msra.gmra.mrb[64].mxu0 %v4865_v26  ;;  %v4741_v40 = vadd.f32 %v4613_v18, %v17819_v29 }
 0x3d9   : > { %v3836_v44 = vadd.f32 %v3835_v36, %v14580_v50  ;;  %v3837_v49 = vpop.f32.mrb[55].mxu0  ;;  %4569 = vmatmul.mubr.bf16.gmra.mrb[240].mxu1 %v4044_v41  ;;  %v4616_v13 = vmax.f32 %v4307_v54, 0.0  ;;  %v3976_v43 = vmax.f32 %v3832_v51, 0.0  ;;  %v4742_v7 = vadd.f32 %v4614_v56, %v17821_v32 }
 0x3da   : > { %v3838_v58 = vadd.f32 %v3837_v49, %v14584_v62  ;;  %v4743_v34 = vadd.f32 %v4615_v37, %v17820_v25  ;;  %v3977_v35 = vmax.f32 %v3834_v24, 0.0  ;;  %v17822_v41 = vmax.f32 %v13235_v5, 0.0  ;;  %5891 = vmatpush1.bf16.msra.mxu1 %v12194_v3 }
 0x3db   : > { %v3978_v48 = vmax.f32 %v3836_v44, 0.0  ;;  %v4310_v61 = vpop.f32.mrb[136].mxu1 }
 0x3dc   : > { %v3979_v6 = vmax.f32 %v3838_v58, 0.0  ;;  %v4744_v26 = vadd.f32 %v4616_v13, %v17822_v41  ;;  %v4867_v12 = vpack.c.bf16 %v4743_v34, %v4741_v40  ;;  %v4311_v55 = vadd.f32 %v4310_v61, %v14813_v27  ;;  %v4312_v28 = vpop.f32.mrb[137].mxu1 }
 0x3dd   : > { %v4046_v1 = vpack.c.bf16 %v3978_v48, %v3976_v43  ;;  %v4313_v18 = vadd.f32 %v4312_v28, %v14817_v20  ;;  %v4314_v39 = vpop.f32.mrb[138].mxu1  ;;  %v17823_v48 = vmax.f32 %v13290_v0, 0.0  ;;  %v17824_v61 = vmax.f32 %v13293_v4, 0.0 }
 0x3de   : > { %v3841_v51 = vpop.f32.mrb[56].mxu0  ;;  %v4047_v30 = vpack.c.bf16 %v3979_v6, %v3977_v35  ;;  %v4868_v24 = vpack.c.bf16 %v4744_v26, %v4742_v7  ;;  %v4617_v5 = vmax.f32 %v4311_v55, 0.0  ;;  %v4315_v54 = vadd.f32 %v4314_v39, %v14813_v27  ;;  %v4316_v37 = vpop.f32.mrb[139].mxu1 }
 0x3df   : > { %v3842_v56 = vadd.f32 %v3841_v51, %v14580_v50  ;;  %v3843_v36 = vpop.f32.mrb[57].mxu0  ;;  %v4618_v44 = vmax.f32 %v4313_v18, 0.0  ;;  %v4317_v13 = vadd.f32 %v4316_v37, %v14817_v20  ;;  %v17825_v28 = vmax.f32 %v13251_v17, 0.0 }
 0x3e0   : > { %v3844_v49 = vadd.f32 %v3843_v36, %v14584_v62  ;;  %v3845_v58 = vpop.f32.mrb[58].mxu0  ;;  %4578 = vmatprep.mubr.bf16.mxu1 %v4047_v30  ;;  %5175 = vmatprep.mubr.bf16.mxu0 %v4868_v24  ;;  %v4619_v29 = vmax.f32 %v4315_v54, 0.0  ;;  %v4745_v35 = vadd.f32 %v4617_v5, %v17823_v48 }
 0x3e1   : > { %v3846_v40 = vadd.f32 %v3845_v58, %v14580_v50  ;;  %v3847_v43 = vpop.f32.mrb[59].mxu0  ;;  %4579 = vmatmul.mubr.bf16.gmra.mrb[244].mxu1 %v4046_v1  ;;  %5176 = vmatmul.mubr.bf16.gmra.mrb[68].mxu0 %v4867_v12  ;;  %v4620_v25 = vmax.f32 %v4317_v13, 0.0  ;;  %v3980_v6 = vmax.f32 %v3842_v56, 0.0  ;;  %v4746_v33 = vadd.f32 %v4618_v44, %v17825_v28  ;;  %v17830_v28 = vld [vmem:[#allocation4_spill] sm:$0xff] }
 0x3e2   : > { %v3848_v34 = vadd.f32 %v3847_v43, %v14584_v62  ;;  %v4747_v32 = vadd.f32 %v4619_v29, %v17824_v61  ;;  %v3981_v41 = vmax.f32 %v3844_v49, 0.0  ;;  %v17826_v12 = vmax.f32 %v13258_v21, 0.0 }
 0x3e3   : > { %v3982_v7 = vmax.f32 %v3846_v40, 0.0  ;;  %v4320_v55 = vpop.f32.mrb[140].mxu1 }
 0x3e4   : > { %v3983_v26 = vmax.f32 %v3848_v34, 0.0  ;;  %v4748_v1 = vadd.f32 %v4620_v25, %v17826_v12  ;;  %v4869_v18 = vpack.c.bf16 %v4747_v32, %v4745_v35  ;;  %v4321_v39 = vadd.f32 %v4320_v55, %v14813_v27  ;;  %v4322_v0 = vpop.f32.mrb[141].mxu1 }
 0x3e5   : > { %v4048_v51 = vpack.c.bf16 %v3982_v7, %v3980_v6  ;;  %v4323_v30 = vadd.f32 %v4322_v0, %v14817_v20  ;;  %v4324_v4 = vpop.f32.mrb[142].mxu1  ;;  %v17827_v34 = vmax.f32 %v13326_v45, 0.0  ;;  %v17828_v6 = vmax.f32 %v13329_v60, 0.0  ;;  %v12199_v60 = vld [vmem:[%s17393_s11 + $0xb4] ss:$8 sps:$4 sm:$0xff]  }
 0x3e6   : > { %v3851_v24 = vpop.f32.mrb[60].mxu0  ;;  %v4049_v3 = vpack.c.bf16 %v3983_v26, %v3981_v41  ;;  %v4870_v5 = vpack.c.bf16 %v4748_v1, %v4746_v33  ;;  %v4621_v56 = vmax.f32 %v4321_v39, 0.0  ;;  %v4325_v17 = vadd.f32 %v4324_v4, %v14813_v27  ;;  %v4326_v37 = vpop.f32.mrb[143].mxu1  ;;  %5892 = vmatprep.subr.bf16.mxu1 %v12199_v60  ;;  %v17842_v60 = vld [vmem:[#allocation14_spill] sm:$0xff] }
 0x3e7   : > { %v3852_v54 = vadd.f32 %v3851_v24, %v14580_v50  ;;  %v3853_v36 = vpop.f32.mrb[61].mxu0  ;;  %v4622_v21 = vmax.f32 %v4323_v30, 0.0  ;;  %v4327_v49 = vadd.f32 %v4326_v37, %v14817_v20  ;;  %v17829_v55 = vmax.f32 %v13279_v52, 0.0  ;;  %v12197_v52 = vld [vmem:[%s17393_s11 + $0xb0] ss:$8 sps:$4 sm:$0xff]  }
 0x3e8   : > { %v3854_v44 = vadd.f32 %v3853_v36, %v14584_v62  ;;  %v3855_v13 = vpop.f32.mrb[62].mxu0  ;;  %4588 = vmatprep.mubr.bf16.mxu1 %v4049_v3  ;;  %5185 = vmatprep.mubr.bf16.mxu0 %v4870_v5  ;;  %v4623_v58 = vmax.f32 %v4325_v17, 0.0  ;;  %v4749_v48 = vadd.f32 %v4621_v56, %v17827_v34  ;;  %v17831_v33 = vmax.f32 %v17830_v28, 0.0  ;;  %v17832_v36 = vld [vmem:[#allocation9_spill] sm:$0xff] }
 0x3e9   : > { %v3856_v29 = vadd.f32 %v3855_v13, %v14580_v50  ;;  %v3857_v40 = vpop.f32.mrb[63].mxu0  ;;  %4589 = vmatmul.mubr.bf16.gmra.mrb[248].mxu1 %v4048_v51  ;;  %5186 = vmatmul.mubr.bf16.gmra.mrb[72].mxu0 %v4869_v18  ;;  %v4624_v43 = vmax.f32 %v4327_v49, 0.0  ;;  %v3984_v35 = vmax.f32 %v3852_v54, 0.0  ;;  %v4750_v50 = vadd.f32 %v4622_v21, %v17829_v55 }
 0x3ea   : > { %v3858_v25 = vadd.f32 %v3857_v40, %v14584_v62  ;;  %v4751_v61 = vadd.f32 %v4623_v58, %v17828_v6  ;;  %v3985_v7 = vmax.f32 %v3854_v44, 0.0  ;;  %5893 = vmatpush1.bf16.msra.mxu1 %v12197_v52  ;;  %v17833_v37 = vmax.f32 %v17832_v36, 0.0  ;;  %v17834_v44 = vld [vmem:[#allocation10_spill] sm:$0xff]  ;;  %v12200_v36 = vld [vmem:[%s17393_s11 + $0xc0] ss:$8 sps:$4 sm:$0xff]  }
 0x3eb   : > { %v3986_v32 = vmax.f32 %v3856_v29, 0.0  ;;  %v4330_v26 = vpop.f32.mrb[144].mxu1  ;;  %v4752_v12 = vadd.f32 %v4624_v43, %v17831_v33  ;;  %v17835_v49 = vmax.f32 %v17834_v44, 0.0  ;;  %v17836_v29 = vld [vmem:[#allocation5_spill] sm:$0xff] }
 0x3ec   : > { %v3987_v41 = vmax.f32 %v3858_v25, 0.0  ;;  %v4871_v1 = vpack.c.bf16 %v4751_v61, %v4749_v48  ;;  %v4331_v62 = vadd.f32 %v4330_v26, %v14813_v27  ;;  %v4332_v45 = vpop.f32.mrb[145].mxu1  ;;  %v17837_v40 = vmax.f32 %v17836_v29, 0.0  ;;  %v17838_v25 = vld [vmem:[#allocation6_spill] sm:$0xff] }
 0x3ed   : > { %v4050_v18 = vpack.c.bf16 %v3986_v32, %v3984_v35  ;;  %v4333_v51 = vadd.f32 %v4332_v45, %v14817_v20  ;;  %v4334_v39 = vpop.f32.mrb[146].mxu1  ;;  %v4872_v30 = vpack.c.bf16 %v4752_v12, %v4750_v50  ;;  %v17839_v34 = vmax.f32 %v17838_v25, 0.0 }
 0x3ee   : > { %v4051_v0 = vpack.c.bf16 %v3987_v41, %v3985_v7  ;;  %v4625_v24 = vmax.f32 %v4331_v62, 0.0  ;;  %v4335_v4 = vadd.f32 %v4334_v39, %v14813_v27  ;;  %v4336_v3 = vpop.f32.mrb[147].mxu1 }
 0x3ef   : > { %v4626_v5 = vmax.f32 %v4333_v51, 0.0  ;;  %v4337_v56 = vadd.f32 %v4336_v3, %v14817_v20  ;;  %5195 = vmatprep.mubr.bf16.mxu0 %v4872_v30  ;;  %v17843_v51 = vmax.f32 %v17842_v60, 0.0  ;;  %v17844_v30 = vld [vmem:[#allocation7_spill] sm:$0xff] }
 0x3f0   : > { %4598 = vmatprep.mubr.bf16.mxu1 %v4051_v0  ;;  %v4627_v54 = vmax.f32 %v4335_v4, 0.0  ;;  %v4753_v21 = vadd.f32 %v4625_v24, %v17833_v37  ;;  %v17845_v52 = vmax.f32 %v17844_v30, 0.0  ;;  %v17846_v4 = vld [vmem:[#allocation8_spill] sm:$0xff] }
 0x3f1   : > { %4599 = vmatmul.mubr.bf16.gmra.mrb[252].mxu1 %v4050_v18  ;;  %5196 = vmatmul.mubr.bf16.gmra.mrb[76].mxu0 %v4871_v1  ;;  %v4628_v17 = vmax.f32 %v4337_v56, 0.0  ;;  %v4754_v43 = vadd.f32 %v4626_v5, %v17837_v40  ;;  %v17840_v18 = vld [vmem:[#allocation13_spill] sm:$0xff]  ;;  %v17847_v3 = vmax.f32 %v17846_v4, 0.0  ;;  %v12202_v37 = vld [vmem:[%s17393_s11 + $0xc4] ss:$8 sps:$4 sm:$0xff]  }
 0x3f2   : > { %v4755_v13 = vadd.f32 %v4627_v54, %v17835_v49  ;;  %v17841_v62 = vmax.f32 %v17840_v18, 0.0  ;;  %5894 = vmatprep.subr.bf16.mxu1 %v12202_v37  ;;  %v17858_v37 = vld [vmem:[#allocation15_spill] sm:$0xff] }
 0x3f3   : > { %v4340_v58 = vpop.f32.mrb[148].mxu1  ;;  %v4756_v48 = vadd.f32 %v4628_v17, %v17839_v34  ;;  %5895 = vmatpush1.bf16.msra.mxu1 %v12200_v36 }
 0x3f4   : > { %v4873_v35 = vpack.c.bf16 %v4755_v13, %v4753_v21  ;;  %v4341_v6 = vadd.f32 %v4340_v58, %v14813_v27  ;;  %v4342_v61 = vpop.f32.mrb[149].mxu1 }
 0x3f5   : > { %v4343_v32 = vadd.f32 %v4342_v61, %v14817_v20  ;;  %v4344_v7 = vpop.f32.mrb[150].mxu1  ;;  %v4874_v41 = vpack.c.bf16 %v4756_v48, %v4754_v43  ;;  %v17848_v48 = vld [vmem:[#allocation17_spill] sm:$0xff]  ;;  %v17850_v61 = vld [vmem:[#allocation18_spill] sm:$0xff] }
 0x3f6   : > { %v4629_v26 = vmax.f32 %v4341_v6, 0.0  ;;  %v4345_v55 = vadd.f32 %v4344_v7, %v14813_v27  ;;  %v4346_v50 = vpop.f32.mrb[151].mxu1 }
 0x3f7   : > { %v4630_v28 = vmax.f32 %v4343_v32, 0.0  ;;  %v4347_v33 = vadd.f32 %v4346_v50, %v14817_v20  ;;  %5205 = vmatprep.mubr.bf16.mxu0 %v4874_v41  ;;  %v17851_v32 = vmax.f32 %v17850_v61, 0.0 }
 0x3f8   : > { %v4631_v12 = vmax.f32 %v4345_v55, 0.0  ;;  %v4757_v45 = vadd.f32 %v4629_v26, %v17841_v62  ;;  %v17852_v26 = vld [vmem:[#allocation11_spill] sm:$0xff] }
 0x3f9   : > { %5206 = vmatmul.mubr.bf16.gmra.mrb[80].mxu0 %v4873_v35  ;;  %v4632_v1 = vmax.f32 %v4347_v33, 0.0  ;;  %v4758_v24 = vadd.f32 %v4630_v28, %v17845_v52  ;;  %v17849_v35 = vmax.f32 %v17848_v48, 0.0  ;;  %v17853_v55 = vmax.f32 %v17852_v26, 0.0  ;;  %v17854_v28 = vld [vmem:[#allocation12_spill] sm:$0xff] }
 0x3fa   : > { %v4759_v39 = vadd.f32 %v4631_v12, %v17843_v51  ;;  %v17855_v33 = vmax.f32 %v17854_v28, 0.0  ;;  %v17863_v28 = vmax.f32 %v13548_v16, 0.0 }
 0x3fb   : > { %v4350_v0 = vpop.f32.mrb[152].mxu1  ;;  %v4760_v5 = vadd.f32 %v4632_v1, %v17847_v3 }
 0x3fc   : > { %v4875_v56 = vpack.c.bf16 %v4759_v39, %v4757_v45  ;;  %v4351_v54 = vadd.f32 %v4350_v0, %v14813_v27  ;;  %v4352_v17 = vpop.f32.mrb[153].mxu1 }
 0x3fd   : > { %v4353_v21 = vadd.f32 %v4352_v17, %v14817_v20  ;;  %v4354_v44 = vpop.f32.mrb[154].mxu1  ;;  %v4876_v49 = vpack.c.bf16 %v4760_v5, %v4758_v24  ;;  %v17856_v5 = vmax.f32 %v13500_v14, 0.0 }
 0x3fe   : > { %v4633_v13 = vmax.f32 %v4351_v54, 0.0  ;;  %v4355_v58 = vadd.f32 %v4354_v44, %v14813_v27  ;;  %v4356_v29 = vpop.f32.mrb[155].mxu1  ;;  %v17857_v54 = vmax.f32 %v13504_v9, 0.0  ;;  %v12205_v9 = vld [vmem:[%s17393_s11 + $0xd4] ss:$8 sps:$4 sm:$0xff]  }
 0x3ff   : > { %v4634_v40 = vmax.f32 %v4353_v21, 0.0  ;;  %v4357_v43 = vadd.f32 %v4356_v29, %v14817_v20  ;;  %5215 = vmatprep.mubr.bf16.mxu0 %v4876_v49  ;;  %v17859_v21 = vmax.f32 %v17858_v37, 0.0  ;;  %v17860_v49 = vld [vmem:[#allocation16_spill] sm:$0xff]  ;;  %5896 = vmatprep.subr.bf16.mxu1 %v12205_v9  ;;  %v17873_v9 = vld [vmem:[#allocation22_spill] sm:$0xff] }
 0x400   : > { %v4635_v25 = vmax.f32 %v4355_v58, 0.0  ;;  %v4761_v6 = vadd.f32 %v4633_v13, %v17849_v35  ;;  %v17861_v13 = vmax.f32 %v17860_v49, 0.0  ;;  %v17869_v49 = vld [vmem:[#allocation25_spill] sm:$0xff] }
 0x401   : > { %5216 = vmatmul.mubr.bf16.gmra.mrb[84].mxu0 %v4875_v56  ;;  %v4636_v34 = vmax.f32 %v4357_v43, 0.0  ;;  %v4762_v50 = vadd.f32 %v4634_v40, %v17853_v55  ;;  %v17862_v55 = vmax.f32 %v13544_v38, 0.0 }
 0x402   : > { %v4763_v7 = vadd.f32 %v4635_v25, %v17851_v32  ;;  %v12203_v25 = vld [vmem:[%s17393_s11 + $0xd0] ss:$8 sps:$4 sm:$0xff]  }
 0x403   : > { %v4360_v41 = vpop.f32.mrb[156].mxu1  ;;  %v4764_v12 = vadd.f32 %v4636_v34, %v17855_v33  ;;  %5897 = vmatpush1.bf16.msra.mxu1 %v12203_v25 }
 0x404   : > { %v4877_v1 = vpack.c.bf16 %v4763_v7, %v4761_v6  ;;  %v4361_v18 = vadd.f32 %v4360_v41, %v14813_v27  ;;  %v4362_v62 = vpop.f32.mrb[157].mxu1 }
 0x405   : > { %v4363_v45 = vadd.f32 %v4362_v62, %v14817_v20  ;;  %v4364_v60 = vpop.f32.mrb[158].mxu1  ;;  %v4878_v51 = vpack.c.bf16 %v4764_v12, %v4762_v50 }
 0x406   : > { %v4637_v39 = vmax.f32 %v4361_v18, 0.0  ;;  %v4365_v0 = vadd.f32 %v4364_v60, %v14813_v27  ;;  %v4366_v30 = vpop.f32.mrb[159].mxu1 }
 0x407   : > { %v4638_v52 = vmax.f32 %v4363_v45, 0.0  ;;  %v4367_v24 = vadd.f32 %v4366_v30, %v14817_v20  ;;  %5225 = vmatprep.mubr.bf16.mxu0 %v4878_v51  ;;  %v17866_v45 = vld [vmem:[#allocation20_spill] sm:$0xff] }
 0x408   : > { %v4639_v4 = vmax.f32 %v4365_v0, 0.0  ;;  %v4765_v56 = vadd.f32 %v4637_v39, %v17856_v5  ;;  %v17867_v60 = vmax.f32 %v17866_v45, 0.0  ;;  %v17876_v45 = vmax.f32 %v13627_v15, 0.0 }
 0x409   : > { %5226 = vmatmul.mubr.bf16.gmra.mrb[88].mxu0 %v4877_v1  ;;  %v4640_v3 = vmax.f32 %v4367_v24, 0.0  ;;  %v4766_v44 = vadd.f32 %v4638_v52, %v17859_v21  ;;  %v17864_v1 = vld [vmem:[#allocation19_spill] sm:$0xff]  ;;  %v17868_v21 = vmax.f32 %v13589_v63, 0.0 }
 0x40a   : > { %v4767_v17 = vadd.f32 %v4639_v4, %v17857_v54  ;;  %v17865_v18 = vmax.f32 %v17864_v1, 0.0  ;;  %v12209_v63 = vld [vmem:[%s17393_s11 + $0xe0] ss:$8 sps:$4 sm:$0xff]  }
 0x40b   : > { %v4370_v36 = vpop.f32.mrb[160].mxu1  ;;  %v4768_v58 = vadd.f32 %v4640_v3, %v17861_v13  ;;  %v17870_v13 = vmax.f32 %v17869_v49, 0.0  ;;  %v12214_v49 = vld [vmem:[%s17395_s13 + $0x14] ss:$8 sps:$4 sm:$0xff]  }
 0x40c   : > { %v4879_v29 = vpack.c.bf16 %v4767_v17, %v4765_v56  ;;  %v4371_v40 = vadd.f32 %v4370_v36, %v14813_v27  ;;  %v4372_v43 = vpop.f32.mrb[161].mxu1  ;;  %v12206_v17 = vld [vmem:[%s17395_s13] ss:$8 sps:$4 sm:$0xff]   ;;  %v12208_v36 = vld [vmem:[%s17395_s13 + $0x4] ss:$8 sps:$4 sm:$0xff]  }
 0x40d   : > { %v4373_v14 = vadd.f32 %v4372_v43, %v14817_v20  ;;  %v4374_v34 = vpop.f32.mrb[162].mxu1  ;;  %v4880_v48 = vpack.c.bf16 %v4768_v58, %v4766_v44  ;;  %6759 = vmatprep.subr.bf16.mxu0 %v12208_v36 }
 0x40e   : > { %v4641_v35 = vmax.f32 %v4371_v40, 0.0  ;;  %v4375_v6 = vadd.f32 %v4374_v34, %v14813_v27  ;;  %v4376_v61 = vpop.f32.mrb[163].mxu1  ;;  %v17871_v40 = vld [vmem:[#allocation21_spill] sm:$0xff]  ;;  %6760 = vmatpush1.bf16.msra.mxu0 %v12206_v17 }
 0x40f   : > { %v4642_v32 = vmax.f32 %v4373_v14, 0.0  ;;  %v4377_v7 = vadd.f32 %v4376_v61, %v14817_v20  ;;  %5235 = vmatprep.mubr.bf16.mxu0 %v4880_v48  ;;  %v17872_v43 = vmax.f32 %v17871_v40, 0.0  ;;  %v17874_v14 = vmax.f32 %v17873_v9, 0.0  ;;  %v12211_v61 = vld [vmem:[%s17393_s11 + $0xe4] ss:$8 sps:$4 sm:$0xff]   ;;  %6761 = vmatprep.subr.bf16.mxu0 %v12214_v49 }
 0x410   : > { %v4643_v41 = vmax.f32 %v4375_v6, 0.0  ;;  %v4769_v50 = vadd.f32 %v4641_v35, %v17862_v55  ;;  %5898 = vmatprep.subr.bf16.mxu1 %v12211_v61  ;;  %v17882_v40 = vmax.f32 %v13666_v22, 0.0  ;;  %v17883_v9 = vmax.f32 %v13611_v53, 0.0  ;;  %v12217_v22 = vld [vmem:[%s17393_s11 + $0xf4] ss:$8 sps:$4 sm:$0xff]  }
 0x411   : > { %5236 = vmatmul.mubr.bf16.gmra.mrb[92].mxu0 %v4879_v29  ;;  %v4644_v26 = vmax.f32 %v4377_v7, 0.0  ;;  %v4770_v62 = vadd.f32 %v4642_v32, %v17865_v18  ;;  %5899 = vmatpush1.bf16.msra.mxu1 %v12209_v63  ;;  %v17875_v18 = vmax.f32 %v13623_v19, 0.0  ;;  %v17893_v49 = vmax.f32 %v13724_v11, 0.0 }
 0x412   : > { %v4771_v33 = vadd.f32 %v4643_v41, %v17863_v28  ;;  %5900 = vmatprep.subr.bf16.mxu1 %v12217_v22 }
 0x413   : > { %v4380_v12 = vpop.f32.mrb[164].mxu1  ;;  %v4772_v51 = vadd.f32 %v4644_v26, %v17867_v60 }
 0x414   : > { %v4881_v39 = vpack.c.bf16 %v4771_v33, %v4769_v50  ;;  %v4381_v0 = vadd.f32 %v4380_v12, %v14813_v27  ;;  %v4382_v30 = vpop.f32.mrb[165].mxu1 }
 0x415   : > { %v4383_v52 = vadd.f32 %v4382_v30, %v14817_v20  ;;  %v4384_v24 = vpop.f32.mrb[166].mxu1  ;;  %v4882_v4 = vpack.c.bf16 %v4772_v51, %v4770_v62 }
 0x416   : > { %v4645_v38 = vmax.f32 %v4381_v0, 0.0  ;;  %v4385_v3 = vadd.f32 %v4384_v24, %v14813_v27  ;;  %v4386_v16 = vpop.f32.mrb[167].mxu1 }
 0x417   : > { %v4646_v5 = vmax.f32 %v4383_v52, 0.0  ;;  %v4387_v56 = vadd.f32 %v4386_v16, %v14817_v20  ;;  %5245 = vmatprep.mubr.bf16.mxu0 %v4882_v4  ;;  %v17879_v52 = vld [vmem:[#allocation24_spill] sm:$0xff] }
 0x418   : > { %v4647_v54 = vmax.f32 %v4385_v3, 0.0  ;;  %v4773_v44 = vadd.f32 %v4645_v38, %v17868_v21  ;;  %v17880_v24 = vmax.f32 %v17879_v52, 0.0 }
 0x419   : > { %5246 = vmatmul.mubr.bf16.gmra.mrb[96].mxu0 %v4881_v39  ;;  %v4648_v37 = vmax.f32 %v4387_v56, 0.0  ;;  %v4774_v25 = vadd.f32 %v4646_v5, %v17872_v43  ;;  %v17877_v39 = vld [vmem:[#allocation23_spill] sm:$0xff] }
 0x41a   : > { %v4775_v58 = vadd.f32 %v4647_v54, %v17870_v13  ;;  %v17878_v0 = vmax.f32 %v17877_v39, 0.0 }
 0x41b   : > { %v4390_v29 = vpop.f32.mrb[168].mxu1  ;;  %v4776_v34 = vadd.f32 %v4648_v37, %v17874_v14 }
 0x41c   : > { %v4883_v48 = vpack.c.bf16 %v4775_v58, %v4773_v44  ;;  %v4391_v35 = vadd.f32 %v4390_v29, %v14813_v27  ;;  %v4392_v6 = vpop.f32.mrb[169].mxu1  ;;  %v12212_v44 = vld [vmem:[%s17395_s13 + $0x10] ss:$8 sps:$4 sm:$0xff]   ;;  %v17881_v58 = vmax.f32 %v13663_v59, 0.0 }
 0x41d   : > { %v4393_v32 = vadd.f32 %v4392_v6, %v14817_v20  ;;  %v4394_v7 = vpop.f32.mrb[170].mxu1  ;;  %v4884_v41 = vpack.c.bf16 %v4776_v34, %v4774_v25  ;;  %v17884_v34 = vld [vmem:[#allocation26_spill] sm:$0xff]  ;;  %6762 = vmatpush1.bf16.msra.mxu0 %v12212_v44 }
 0x41e   : > { %v4649_v26 = vmax.f32 %v4391_v35, 0.0  ;;  %v4395_v55 = vadd.f32 %v4394_v7, %v14813_v27  ;;  %v4396_v50 = vpop.f32.mrb[171].mxu1  ;;  %v12215_v59 = vld [vmem:[%s17393_s11 + $0xf0] ss:$8 sps:$4 sm:$0xff]  }
 0x41f   : > { %v4650_v28 = vmax.f32 %v4393_v32, 0.0  ;;  %v4397_v33 = vadd.f32 %v4396_v50, %v14817_v20  ;;  %5255 = vmatprep.mubr.bf16.mxu0 %v4884_v41  ;;  %5901 = vmatpush1.bf16.msra.mxu1 %v12215_v59 }
 0x420   : > { %v4651_v12 = vmax.f32 %v4395_v55, 0.0  ;;  %v4777_v62 = vadd.f32 %v4649_v26, %v17875_v18 }
 0x421   : > { %5256 = vmatmul.mubr.bf16.gmra.mrb[100].mxu0 %v4883_v48  ;;  %v4652_v1 = vmax.f32 %v4397_v33, 0.0  ;;  %v4778_v30 = vadd.f32 %v4650_v28, %v17878_v0  ;;  %v17885_v48 = vmax.f32 %v17884_v34, 0.0  ;;  %v17889_v0 = vld [vmem:[#allocation27_spill] sm:$0xff] }
 0x422   : > { %v4779_v60 = vadd.f32 %v4651_v12, %v17876_v45 }
 0x423   : > { %v4400_v51 = vpop.f32.mrb[172].mxu1  ;;  %v4780_v4 = vadd.f32 %v4652_v1, %v17880_v24  ;;  %v17886_v1 = vmax.f32 %v13689_v42, 0.0 }
 0x424   : > { %v4885_v38 = vpack.c.bf16 %v4779_v60, %v4777_v62  ;;  %v4401_v3 = vadd.f32 %v4400_v51, %v14813_v27  ;;  %v4402_v16 = vpop.f32.mrb[173].mxu1  ;;  %v17887_v62 = vmax.f32 %v13692_v2, 0.0  ;;  %v17888_v51 = vmax.f32 %v13651_v23, 0.0 }
 0x425   : > { %v4403_v5 = vadd.f32 %v4402_v16, %v14817_v20  ;;  %v4404_v56 = vpop.f32.mrb[174].mxu1  ;;  %v4886_v54 = vpack.c.bf16 %v4780_v4, %v4778_v30  ;;  %v17890_v30 = vmax.f32 %v17889_v0, 0.0 }
 0x426   : > { %v4653_v19 = vmax.f32 %v4401_v3, 0.0  ;;  %v4405_v17 = vadd.f32 %v4404_v56, %v14813_v27  ;;  %v4406_v15 = vpop.f32.mrb[175].mxu1 }
 0x427   : > { %v4654_v36 = vmax.f32 %v4403_v5, 0.0  ;;  %v4407_v37 = vadd.f32 %v4406_v15, %v14817_v20  ;;  %5265 = vmatprep.mubr.bf16.mxu0 %v4886_v54  ;;  %v12220_v15 = vld [vmem:[%s17395_s13 + $0x24] ss:$8 sps:$4 sm:$0xff]  }
 0x428   : > { %v4655_v21 = vmax.f32 %v4405_v17, 0.0  ;;  %v4781_v29 = vadd.f32 %v4653_v19, %v17881_v58  ;;  %v12218_v17 = vld [vmem:[%s17395_s13 + $0x20] ss:$8 sps:$4 sm:$0xff]   ;;  %6763 = vmatprep.subr.bf16.mxu0 %v12220_v15 }
 0x429   : > { %5266 = vmatmul.mubr.bf16.gmra.mrb[104].mxu0 %v4885_v38  ;;  %v4656_v13 = vmax.f32 %v4407_v37, 0.0  ;;  %v4782_v14 = vadd.f32 %v4654_v36, %v17883_v9  ;;  %v17891_v37 = vld [vmem:[#allocation32_spill] sm:$0xff] }
 0x42a   : > { %v4783_v43 = vadd.f32 %v4655_v21, %v17882_v40  ;;  %v17892_v21 = vmax.f32 %v17891_v37, 0.0  ;;  %6764 = vmatpush1.bf16.msra.mxu0 %v12218_v17  ;;  %v17906_v17 = vld [vmem:[#allocation39_spill] sm:$0xff]  ;;  %v17908_v37 = vld [vmem:[#allocation40_spill] sm:$0xff] }
 0x42b   : > { %v4410_v25 = vpop.f32.mrb[176].mxu1  ;;  %v4784_v35 = vadd.f32 %v4656_v13, %v17885_v48  ;;  %v17907_v15 = vmax.f32 %v17906_v17, 0.0 }
 0x42c   : > { %v4887_v6 = vpack.c.bf16 %v4783_v43, %v4781_v29  ;;  %v4411_v63 = vadd.f32 %v4410_v25, %v14813_v27  ;;  %v4412_v61 = vpop.f32.mrb[177].mxu1  ;;  %v17894_v29 = vld [vmem:[#allocation28_spill] sm:$0xff]  ;;  %v17896_v25 = vld [vmem:[#allocation29_spill] sm:$0xff] }
 0x42d   : > { %v4413_v32 = vadd.f32 %v4412_v61, %v14817_v20  ;;  %v4414_v53 = vpop.f32.mrb[178].mxu1  ;;  %v4888_v7 = vpack.c.bf16 %v4784_v35, %v4782_v14  ;;  %v17895_v40 = vmax.f32 %v17894_v29, 0.0  ;;  %v17897_v9 = vmax.f32 %v17896_v25, 0.0 }
 0x42e   : > { %v4657_v41 = vmax.f32 %v4411_v63, 0.0  ;;  %v4415_v26 = vadd.f32 %v4414_v53, %v14813_v27  ;;  %v4416_v55 = vpop.f32.mrb[179].mxu1 }
 0x42f   : > { %v4658_v50 = vmax.f32 %v4413_v32, 0.0  ;;  %v4417_v28 = vadd.f32 %v4416_v55, %v14817_v20  ;;  %5275 = vmatprep.mubr.bf16.mxu0 %v4888_v7 }
 0x430   : > { %v4659_v33 = vmax.f32 %v4415_v26, 0.0  ;;  %v4785_v18 = vadd.f32 %v4657_v41, %v17886_v1  ;;  %v17898_v26 = vld [vmem:[#allocation35_spill] sm:$0xff] }
 0x431   : > { %5276 = vmatmul.mubr.bf16.gmra.mrb[108].mxu0 %v4887_v6  ;;  %v4660_v12 = vmax.f32 %v4417_v28, 0.0  ;;  %v4786_v39 = vadd.f32 %v4658_v50, %v17888_v51  ;;  %v17899_v55 = vmax.f32 %v17898_v26, 0.0  ;;  %v17900_v28 = vld [vmem:[#allocation36_spill] sm:$0xff] }
 0x432   : > { %v4787_v45 = vadd.f32 %v4659_v33, %v17887_v62  ;;  %v17901_v33 = vmax.f32 %v17900_v28, 0.0 }
 0x433   : > { %v4420_v60 = vpop.f32.mrb[180].mxu1  ;;  %v4788_v52 = vadd.f32 %v4660_v12, %v17890_v30 }
 0x434   : > { %v4889_v24 = vpack.c.bf16 %v4787_v45, %v4785_v18  ;;  %v4421_v4 = vadd.f32 %v4420_v60, %v14813_v27  ;;  %v4422_v38 = vpop.f32.mrb[181].mxu1  ;;  %v17902_v18 = vld [vmem:[#allocation30_spill] sm:$0xff]  ;;  %v17904_v60 = vld [vmem:[#allocation31_spill] sm:$0xff] }
 0x435   : > { %v4423_v3 = vadd.f32 %v4422_v38, %v14817_v20  ;;  %v4424_v16 = vpop.f32.mrb[182].mxu1  ;;  %v4890_v5 = vpack.c.bf16 %v4788_v52, %v4786_v39  ;;  %v17903_v62 = vmax.f32 %v17902_v18, 0.0  ;;  %v17905_v51 = vmax.f32 %v17904_v60, 0.0 }
 0x436   : > { %v4661_v42 = vmax.f32 %v4421_v4, 0.0  ;;  %v4425_v56 = vadd.f32 %v4424_v16, %v14813_v27  ;;  %v4426_v2 = vpop.f32.mrb[183].mxu1 }
 0x437   : > { %v4662_v54 = vmax.f32 %v4423_v3, 0.0  ;;  %v4427_v19 = vadd.f32 %v4426_v2, %v14817_v20  ;;  %5285 = vmatprep.mubr.bf16.mxu0 %v4890_v5 }
 0x438   : > { %v4663_v23 = vmax.f32 %v4425_v56, 0.0  ;;  %v4789_v44 = vadd.f32 %v4661_v42, %v17892_v21  ;;  %v17909_v21 = vmax.f32 %v17908_v37, 0.0 }
 0x439   : > { %5286 = vmatmul.mubr.bf16.gmra.mrb[112].mxu0 %v4889_v24  ;;  %v4664_v36 = vmax.f32 %v4427_v19, 0.0  ;;  %v4790_v43 = vadd.f32 %v4662_v54, %v17895_v40  ;;  %v12221_v54 = vld [vmem:[%s17395_s13 + $0x30] ss:$8 sps:$4 sm:$0xff]   ;;  %v12223_v19 = vld [vmem:[%s17395_s13 + $0x34] ss:$8 sps:$4 sm:$0xff]  }
 0x43a   : > { %v4791_v13 = vadd.f32 %v4663_v23, %v17893_v49  ;;  %6765 = vmatprep.subr.bf16.mxu0 %v12223_v19  ;;  %v17912_v40 = vld [vmem:[#allocation34_spill] sm:$0xff]  ;;  %v17922_v19 = vld [vmem:[#allocation47_spill] sm:$0xff] }
 0x43b   : > { %v4430_v58 = vpop.f32.mrb[184].mxu1  ;;  %v4792_v14 = vadd.f32 %v4664_v36, %v17897_v9  ;;  %6766 = vmatpush1.bf16.msra.mxu0 %v12221_v54 }
 0x43c   : > { %v4891_v34 = vpack.c.bf16 %v4791_v13, %v4789_v44  ;;  %v4431_v48 = vadd.f32 %v4430_v58, %v14813_v27  ;;  %v4432_v35 = vpop.f32.mrb[185].mxu1  ;;  %v17910_v13 = vld [vmem:[#allocation33_spill] sm:$0xff] }
 0x43d   : > { %v4433_v6 = vadd.f32 %v4432_v35, %v14817_v20  ;;  %v4434_v63 = vpop.f32.mrb[186].mxu1  ;;  %v4892_v61 = vpack.c.bf16 %v4792_v14, %v4790_v43  ;;  %v17911_v58 = vmax.f32 %v17910_v13, 0.0  ;;  %v17913_v43 = vmax.f32 %v17912_v40, 0.0 }
 0x43e   : > { %v4665_v59 = vmax.f32 %v4431_v48, 0.0  ;;  %v4435_v11 = vadd.f32 %v4434_v63, %v14813_v27  ;;  %v4436_v22 = vpop.f32.mrb[187].mxu1 }
 0x43f   : > { %v4666_v32 = vmax.f32 %v4433_v6, 0.0  ;;  %v4437_v53 = vadd.f32 %v4436_v22, %v14817_v20  ;;  %5295 = vmatprep.mubr.bf16.mxu0 %v4892_v61 }
 0x440   : > { %v4667_v7 = vmax.f32 %v4435_v11, 0.0  ;;  %v4793_v50 = vadd.f32 %v4665_v59, %v17899_v55  ;;  %v17916_v55 = vld [vmem:[#allocation44_spill] sm:$0xff] }
 0x441   : > { %5296 = vmatmul.mubr.bf16.gmra.mrb[116].mxu0 %v4891_v34  ;;  %v4668_v41 = vmax.f32 %v4437_v53, 0.0  ;;  %v4794_v45 = vadd.f32 %v4666_v32, %v17903_v62  ;;  %v17920_v62 = vld [vmem:[#allocation38_spill] sm:$0xff] }
 0x442   : > { %v4795_v12 = vadd.f32 %v4667_v7, %v17901_v33  ;;  %v17914_v7 = vld [vmem:[#allocation43_spill] sm:$0xff] }
 0x443   : > { %v4440_v1 = vpop.f32.mrb[188].mxu1  ;;  %v4796_v39 = vadd.f32 %v4668_v41, %v17905_v51  ;;  %v17915_v41 = vmax.f32 %v17914_v7, 0.0 }
 0x444   : > { %v4893_v0 = vpack.c.bf16 %v4795_v12, %v4793_v50  ;;  %v4441_v30 = vadd.f32 %v4440_v1, %v14813_v27  ;;  %v4442_v52 = vpop.f32.mrb[189].mxu1  ;;  %v17917_v50 = vmax.f32 %v17916_v55, 0.0  ;;  %v17918_v12 = vld [vmem:[#allocation37_spill] sm:$0xff] }
 0x445   : > { %v4443_v24 = vadd.f32 %v4442_v52, %v14817_v20  ;;  %v4444_v4 = vpop.f32.mrb[190].mxu1  ;;  %v4894_v38 = vpack.c.bf16 %v4796_v39, %v4794_v45  ;;  %v17919_v1 = vmax.f32 %v17918_v12, 0.0  ;;  %v17921_v45 = vmax.f32 %v17920_v62, 0.0 }
 0x446   : > { %v4669_v3 = vmax.f32 %v4441_v30, 0.0  ;;  %v4445_v16 = vadd.f32 %v4444_v4, %v14813_v27  ;;  %v4446_v5 = vpop.f32.mrb[191].mxu1 }
 0x447   : > { %v4670_v42 = vmax.f32 %v4443_v24, 0.0  ;;  %v4447_v56 = vadd.f32 %v4446_v5, %v14817_v20  ;;  %5305 = vmatprep.mubr.bf16.mxu0 %v4894_v38 }
 0x448   : > { %v4671_v2 = vmax.f32 %v4445_v16, 0.0  ;;  %v4797_v36 = vadd.f32 %v4669_v3, %v17907_v15  ;;  %v17924_v15 = vld [vmem:[#allocation48_spill] sm:$0xff] }
 0x449   : > { %5306 = vmatmul.mubr.bf16.gmra.mrb[120].mxu0 %v4893_v0  ;;  %v4672_v23 = vmax.f32 %v4447_v56, 0.0  ;;  %v4798_v29 = vadd.f32 %v4670_v42, %v17911_v58  ;;  %v12224_v42 = vld [vmem:[%s17395_s13 + $0x40] ss:$8 sps:$4 sm:$0xff]   ;;  %v12226_v56 = vld [vmem:[%s17395_s13 + $0x44] ss:$8 sps:$4 sm:$0xff]   ;;  %v17928_v58 = vld [vmem:[#allocation42_spill] sm:$0xff] }
 0x44a   : > { %v4799_v44 = vadd.f32 %v4671_v2, %v17909_v21  ;;  %6767 = vmatprep.subr.bf16.mxu0 %v12226_v56 }
 0x44b   : > { %v4450_v49 = vpop.f32.mrb[192].mxu1  ;;  %v4800_v25 = vadd.f32 %v4672_v23, %v17913_v43  ;;  %v17923_v23 = vmax.f32 %v17922_v19, 0.0  ;;  %6768 = vmatpush1.bf16.msra.mxu0 %v12224_v42 }
 0x44c   : > { %v4895_v9 = vpack.c.bf16 %v4799_v44, %v4797_v36  ;;  %v4451_v14 = vadd.f32 %v4450_v49, %v14813_v27  ;;  %v4452_v34 = vpop.f32.mrb[193].mxu1  ;;  %v17925_v36 = vmax.f32 %v17924_v15, 0.0  ;;  %v17926_v44 = vld [vmem:[#allocation41_spill] sm:$0xff] }
 0x44d   : > { %v4453_v48 = vadd.f32 %v4452_v34, %v14817_v20  ;;  %v4454_v35 = vpop.f32.mrb[194].mxu1  ;;  %v4896_v6 = vpack.c.bf16 %v4800_v25, %v4798_v29  ;;  %v17927_v49 = vmax.f32 %v17926_v44, 0.0  ;;  %v17929_v29 = vmax.f32 %v17928_v58, 0.0 }
 0x44e   : > { %v4673_v63 = vmax.f32 %v4451_v14, 0.0  ;;  %v4455_v61 = vadd.f32 %v4454_v35, %v14813_v27  ;;  %v4456_v59 = vpop.f32.mrb[195].mxu1 }
 0x44f   : > { %v4674_v11 = vmax.f32 %v4453_v48, 0.0  ;;  %v4457_v22 = vadd.f32 %v4456_v59, %v14817_v20  ;;  %5315 = vmatprep.mubr.bf16.mxu0 %v4896_v6 }
 0x450   : > { %v4675_v32 = vmax.f32 %v4455_v61, 0.0  ;;  %v4801_v26 = vadd.f32 %v4673_v63, %v17915_v41  ;;  %v17932_v41 = vld [vmem:[#allocation52_spill] sm:$0xff] }
 0x451   : > { %5316 = vmatmul.mubr.bf16.gmra.mrb[124].mxu0 %v4895_v9  ;;  %v4676_v53 = vmax.f32 %v4457_v22, 0.0  ;;  %v4802_v18 = vadd.f32 %v4674_v11, %v17919_v1  ;;  %v17936_v1 = vld [vmem:[#allocation46_spill] sm:$0xff] }
 0x452   : > { %v4803_v28 = vadd.f32 %v4675_v32, %v17917_v50  ;;  %v17930_v32 = vld [vmem:[#allocation51_spill] sm:$0xff] }
 0x453   : > { %v4460_v33 = vpop.f32.mrb[196].mxu1  ;;  %v4804_v60 = vadd.f32 %v4676_v53, %v17921_v45  ;;  %v17931_v53 = vmax.f32 %v17930_v32, 0.0 }
 0x454   : > { %v4897_v51 = vpack.c.bf16 %v4803_v28, %v4801_v26  ;;  %v4461_v39 = vadd.f32 %v4460_v33, %v14813_v27  ;;  %v4462_v0 = vpop.f32.mrb[197].mxu1  ;;  %v17933_v26 = vmax.f32 %v17932_v41, 0.0  ;;  %v17934_v28 = vld [vmem:[#allocation45_spill] sm:$0xff] }
 0x455   : > { %v4463_v30 = vadd.f32 %v4462_v0, %v14817_v20  ;;  %v4464_v52 = vpop.f32.mrb[198].mxu1  ;;  %v4898_v24 = vpack.c.bf16 %v4804_v60, %v4802_v18  ;;  %v17935_v33 = vmax.f32 %v17934_v28, 0.0  ;;  %v17937_v18 = vmax.f32 %v17936_v1, 0.0 }
 0x456   : > { %v4677_v4 = vmax.f32 %v4461_v39, 0.0  ;;  %v4465_v38 = vadd.f32 %v4464_v52, %v14813_v27  ;;  %v4466_v3 = vpop.f32.mrb[199].mxu1 }
 0x457   : > { %v4678_v16 = vmax.f32 %v4463_v30, 0.0  ;;  %v4467_v5 = vadd.f32 %v4466_v3, %v14817_v20  ;;  %5325 = vmatprep.mubr.bf16.mxu0 %v4898_v24 }
 0x458   : > { %v4679_v2 = vmax.f32 %v4465_v38, 0.0  ;;  %v4805_v17 = vadd.f32 %v4677_v4, %v17923_v23  ;;  %v17940_v23 = vld [vmem:[#allocation56_spill] sm:$0xff] }
 0x459   : > { %5326 = vmatmul.mubr.bf16.gmra.mrb[128].mxu0 %v4897_v51  ;;  %v4680_v54 = vmax.f32 %v4467_v5, 0.0  ;;  %v4806_v13 = vadd.f32 %v4678_v16, %v17927_v49  ;;  %v12227_v16 = vld [vmem:[%s17395_s13 + $0x50] ss:$8 sps:$4 sm:$0xff]   ;;  %v12229_v5 = vld [vmem:[%s17395_s13 + $0x54] ss:$8 sps:$4 sm:$0xff]  }
 0x45a   : > { %v4807_v37 = vadd.f32 %v4679_v2, %v17925_v36  ;;  %6769 = vmatprep.subr.bf16.mxu0 %v12229_v5  ;;  %v17938_v2 = vld [vmem:[#allocation55_spill] sm:$0xff]  ;;  %v17944_v49 = vld [vmem:[#allocation50_spill] sm:$0xff] }
 0x45b   : > { %v4470_v21 = vpop.f32.mrb[200].mxu1  ;;  %v4808_v40 = vadd.f32 %v4680_v54, %v17929_v29  ;;  %v17939_v54 = vmax.f32 %v17938_v2, 0.0  ;;  %6770 = vmatpush1.bf16.msra.mxu0 %v12227_v16 }
 0x45c   : > { %v4899_v43 = vpack.c.bf16 %v4807_v37, %v4805_v17  ;;  %v4471_v25 = vadd.f32 %v4470_v21, %v14813_v27  ;;  %v4472_v9 = vpop.f32.mrb[201].mxu1  ;;  %v17941_v17 = vmax.f32 %v17940_v23, 0.0  ;;  %v17942_v37 = vld [vmem:[#allocation49_spill] sm:$0xff] }
 0x45d   : > { %v4473_v14 = vadd.f32 %v4472_v9, %v14817_v20  ;;  %v4474_v34 = vpop.f32.mrb[202].mxu1  ;;  %v4900_v48 = vpack.c.bf16 %v4808_v40, %v4806_v13  ;;  %v17943_v21 = vmax.f32 %v17942_v37, 0.0  ;;  %v17945_v13 = vmax.f32 %v17944_v49, 0.0 }
 0x45e   : > { %v4681_v35 = vmax.f32 %v4471_v25, 0.0  ;;  %v4475_v6 = vadd.f32 %v4474_v34, %v14813_v27  ;;  %v4476_v63 = vpop.f32.mrb[203].mxu1 }
 0x45f   : > { %v4682_v61 = vmax.f32 %v4473_v14, 0.0  ;;  %v4477_v59 = vadd.f32 %v4476_v63, %v14817_v20  ;;  %5335 = vmatprep.mubr.bf16.mxu0 %v4900_v48 }
 0x460   : > { %v4683_v11 = vmax.f32 %v4475_v6, 0.0  ;;  %v4809_v7 = vadd.f32 %v4681_v35, %v17931_v53  ;;  %v17948_v53 = vld [vmem:[#allocation60_spill] sm:$0xff] }
 0x461   : > { %5336 = vmatmul.mubr.bf16.gmra.mrb[132].mxu0 %v4899_v43  ;;  %v4684_v22 = vmax.f32 %v4477_v59, 0.0  ;;  %v4810_v12 = vadd.f32 %v4682_v61, %v17935_v33  ;;  %v17952_v33 = vld [vmem:[#allocation54_spill] sm:$0xff] }
 0x462   : > { %v4811_v55 = vadd.f32 %v4683_v11, %v17933_v26  ;;  %v17946_v11 = vld [vmem:[#allocation59_spill] sm:$0xff] }
 0x463   : > { %v4480_v50 = vpop.f32.mrb[204].mxu1  ;;  %v4812_v62 = vadd.f32 %v4684_v22, %v17937_v18  ;;  %v17947_v22 = vmax.f32 %v17946_v11, 0.0 }
 0x464   : > { %v4901_v45 = vpack.c.bf16 %v4811_v55, %v4809_v7  ;;  %v4481_v60 = vadd.f32 %v4480_v50, %v14813_v27  ;;  %v4482_v51 = vpop.f32.mrb[205].mxu1  ;;  %v17949_v7 = vmax.f32 %v17948_v53, 0.0  ;;  %v17950_v55 = vld [vmem:[#allocation53_spill] sm:$0xff] }
 0x465   : > { %v4483_v39 = vadd.f32 %v4482_v51, %v14817_v20  ;;  %v4484_v0 = vpop.f32.mrb[206].mxu1  ;;  %v4902_v30 = vpack.c.bf16 %v4812_v62, %v4810_v12  ;;  %v17951_v50 = vmax.f32 %v17950_v55, 0.0  ;;  %v17953_v12 = vmax.f32 %v17952_v33, 0.0 }
 0x466   : > { %v4685_v52 = vmax.f32 %v4481_v60, 0.0  ;;  %v4485_v24 = vadd.f32 %v4484_v0, %v14813_v27  ;;  %v4486_v4 = vpop.f32.mrb[207].mxu1 }
 0x467   : > { %v4686_v38 = vmax.f32 %v4483_v39, 0.0  ;;  %v4487_v3 = vadd.f32 %v4486_v4, %v14817_v20  ;;  %5345 = vmatprep.mubr.bf16.mxu0 %v4902_v30 }
 0x468   : > { %v4687_v42 = vmax.f32 %v4485_v24, 0.0  ;;  %v4813_v19 = vadd.f32 %v4685_v52, %v17939_v54  ;;  %v17956_v54 = vld [vmem:[#allocation64_spill] sm:$0xff] }
 0x469   : > { %5346 = vmatmul.mubr.bf16.gmra.mrb[136].mxu0 %v4901_v45  ;;  %v4688_v56 = vmax.f32 %v4487_v3, 0.0  ;;  %v4814_v44 = vadd.f32 %v4686_v38, %v17943_v21  ;;  %v12230_v38 = vld [vmem:[%s17395_s13 + $0x60] ss:$8 sps:$4 sm:$0xff]   ;;  %v12232_v3 = vld [vmem:[%s17395_s13 + $0x64] ss:$8 sps:$4 sm:$0xff]   ;;  %v17960_v21 = vld [vmem:[#allocation58_spill] sm:$0xff] }
 0x46a   : > { %v4815_v15 = vadd.f32 %v4687_v42, %v17941_v17  ;;  %6771 = vmatprep.subr.bf16.mxu0 %v12232_v3  ;;  %v17954_v42 = vld [vmem:[#allocation63_spill] sm:$0xff] }
 0x46b   : > { %v4490_v36 = vpop.f32.mrb[208].mxu1  ;;  %v4816_v58 = vadd.f32 %v4688_v56, %v17945_v13  ;;  %v17955_v56 = vmax.f32 %v17954_v42, 0.0  ;;  %6772 = vmatpush1.bf16.msra.mxu0 %v12230_v38 }
 0x46c   : > { %v4903_v29 = vpack.c.bf16 %v4815_v15, %v4813_v19  ;;  %v4491_v40 = vadd.f32 %v4490_v36, %v14813_v27  ;;  %v4492_v43 = vpop.f32.mrb[209].mxu1  ;;  %v17957_v19 = vmax.f32 %v17956_v54, 0.0  ;;  %v17958_v15 = vld [vmem:[#allocation57_spill] sm:$0xff] }
 0x46d   : > { %v4493_v25 = vadd.f32 %v4492_v43, %v14817_v20  ;;  %v4494_v9 = vpop.f32.mrb[210].mxu1  ;;  %v4904_v14 = vpack.c.bf16 %v4816_v58, %v4814_v44  ;;  %v17959_v36 = vmax.f32 %v17958_v15, 0.0  ;;  %v17961_v44 = vmax.f32 %v17960_v21, 0.0 }
 0x46e   : > { %v4689_v34 = vmax.f32 %v4491_v40, 0.0  ;;  %v4495_v48 = vadd.f32 %v4494_v9, %v14813_v27  ;;  %v4496_v35 = vpop.f32.mrb[211].mxu1 }
 0x46f   : > { %v4690_v6 = vmax.f32 %v4493_v25, 0.0  ;;  %v4497_v63 = vadd.f32 %v4496_v35, %v14817_v20  ;;  %5355 = vmatprep.mubr.bf16.mxu0 %v4904_v14 }
 0x470   : > { %v4691_v61 = vmax.f32 %v4495_v48, 0.0  ;;  %v4817_v32 = vadd.f32 %v4689_v34, %v17947_v22  ;;  %v17964_v22 = vld [vmem:[#allocation68_spill] sm:$0xff] }
 0x471   : > { %5356 = vmatmul.mubr.bf16.gmra.mrb[140].mxu0 %v4903_v29  ;;  %v4692_v59 = vmax.f32 %v4497_v63, 0.0  ;;  %v4818_v28 = vadd.f32 %v4690_v6, %v17951_v50  ;;  %v17968_v50 = vld [vmem:[#allocation62_spill] sm:$0xff] }
 0x472   : > { %v4819_v41 = vadd.f32 %v4691_v61, %v17949_v7  ;;  %v17962_v61 = vld [vmem:[#allocation67_spill] sm:$0xff] }
 0x473   : > { %v4500_v26 = vpop.f32.mrb[212].mxu1  ;;  %v4820_v1 = vadd.f32 %v4692_v59, %v17953_v12  ;;  %v17963_v59 = vmax.f32 %v17962_v61, 0.0 }
 0x474   : > { %v4905_v18 = vpack.c.bf16 %v4819_v41, %v4817_v32  ;;  %v4501_v62 = vadd.f32 %v4500_v26, %v14813_v27  ;;  %v4502_v45 = vpop.f32.mrb[213].mxu1  ;;  %v17965_v32 = vmax.f32 %v17964_v22, 0.0  ;;  %v17966_v41 = vld [vmem:[#allocation61_spill] sm:$0xff] }
 0x475   : > { %v4503_v60 = vadd.f32 %v4502_v45, %v14817_v20  ;;  %v4504_v51 = vpop.f32.mrb[214].mxu1  ;;  %v4906_v39 = vpack.c.bf16 %v4820_v1, %v4818_v28  ;;  %v17967_v26 = vmax.f32 %v17966_v41, 0.0  ;;  %v17969_v28 = vmax.f32 %v17968_v50, 0.0 }
 0x476   : > { %v4693_v0 = vmax.f32 %v4501_v62, 0.0  ;;  %v4505_v30 = vadd.f32 %v4504_v51, %v14813_v27  ;;  %v4506_v52 = vpop.f32.mrb[215].mxu1 }
 0x477   : > { %v4694_v24 = vmax.f32 %v4503_v60, 0.0  ;;  %v4507_v4 = vadd.f32 %v4506_v52, %v14817_v20  ;;  %5365 = vmatprep.mubr.bf16.mxu0 %v4906_v39 }
 0x478   : > { %v4695_v16 = vmax.f32 %v4505_v30, 0.0  ;;  %v4821_v2 = vadd.f32 %v4693_v0, %v17955_v56  ;;  %v17972_v56 = vld [vmem:[#allocation72_spill] sm:$0xff] }
 0x479   : > { %5366 = vmatmul.mubr.bf16.gmra.mrb[144].mxu0 %v4905_v18  ;;  %v4696_v5 = vmax.f32 %v4507_v4, 0.0  ;;  %v4822_v37 = vadd.f32 %v4694_v24, %v17959_v36  ;;  %v12233_v24 = vld [vmem:[%s17395_s13 + $0x70] ss:$8 sps:$4 sm:$0xff]   ;;  %v12235_v4 = vld [vmem:[%s17395_s13 + $0x74] ss:$8 sps:$4 sm:$0xff]  }
 0x47a   : > { %v4823_v23 = vadd.f32 %v4695_v16, %v17957_v19  ;;  %6773 = vmatprep.subr.bf16.mxu0 %v12235_v4  ;;  %v17970_v16 = vld [vmem:[#allocation71_spill] sm:$0xff]  ;;  %v17976_v36 = vld [vmem:[#allocation66_spill] sm:$0xff] }
 0x47b   : > { %v4510_v17 = vpop.f32.mrb[216].mxu1  ;;  %v4824_v49 = vadd.f32 %v4696_v5, %v17961_v44  ;;  %v17971_v5 = vmax.f32 %v17970_v16, 0.0  ;;  %6774 = vmatpush1.bf16.msra.mxu0 %v12233_v24 }
 0x47c   : > { %v4907_v13 = vpack.c.bf16 %v4823_v23, %v4821_v2  ;;  %v4511_v58 = vadd.f32 %v4510_v17, %v14813_v27  ;;  %v4512_v29 = vpop.f32.mrb[217].mxu1  ;;  %v17973_v2 = vmax.f32 %v17972_v56, 0.0  ;;  %v17974_v23 = vld [vmem:[#allocation65_spill] sm:$0xff] }
 0x47d   : > { %v4513_v40 = vadd.f32 %v4512_v29, %v14817_v20  ;;  %v4514_v43 = vpop.f32.mrb[218].mxu1  ;;  %v4908_v25 = vpack.c.bf16 %v4824_v49, %v4822_v37  ;;  %v17975_v17 = vmax.f32 %v17974_v23, 0.0  ;;  %v17977_v37 = vmax.f32 %v17976_v36, 0.0 }
 0x47e   : > { %v4697_v9 = vmax.f32 %v4511_v58, 0.0  ;;  %v4515_v14 = vadd.f32 %v4514_v43, %v14813_v27  ;;  %v4516_v34 = vpop.f32.mrb[219].mxu1 }
 0x47f   : > { %v4698_v48 = vmax.f32 %v4513_v40, 0.0  ;;  %v4517_v35 = vadd.f32 %v4516_v34, %v14817_v20  ;;  %5375 = vmatprep.mubr.bf16.mxu0 %v4908_v25 }
 0x480   : > { %v4699_v6 = vmax.f32 %v4515_v14, 0.0  ;;  %v4825_v11 = vadd.f32 %v4697_v9, %v17963_v59  ;;  %v17980_v59 = vld [vmem:[#allocation76_spill] sm:$0xff] }
 0x481   : > { %5376 = vmatmul.mubr.bf16.gmra.mrb[148].mxu0 %v4907_v13  ;;  %v4700_v63 = vmax.f32 %v4517_v35, 0.0  ;;  %v4826_v55 = vadd.f32 %v4698_v48, %v17967_v26  ;;  %v17984_v26 = vld [vmem:[#allocation70_spill] sm:$0xff] }
 0x482   : > { %v4827_v53 = vadd.f32 %v4699_v6, %v17965_v32  ;;  %v17978_v6 = vld [vmem:[#allocation75_spill] sm:$0xff] }
 0x483   : > { %v4520_v7 = vpop.f32.mrb[220].mxu1  ;;  %v4828_v33 = vadd.f32 %v4700_v63, %v17969_v28  ;;  %v17979_v63 = vmax.f32 %v17978_v6, 0.0 }
 0x484   : > { %v4909_v12 = vpack.c.bf16 %v4827_v53, %v4825_v11  ;;  %v4521_v1 = vadd.f32 %v4520_v7, %v14813_v27  ;;  %v4522_v18 = vpop.f32.mrb[221].mxu1  ;;  %v17981_v11 = vmax.f32 %v17980_v59, 0.0  ;;  %v17982_v53 = vld [vmem:[#allocation69_spill] sm:$0xff] }
 0x485   : > { %v4523_v62 = vadd.f32 %v4522_v18, %v14817_v20  ;;  %v4524_v45 = vpop.f32.mrb[222].mxu1  ;;  %v4910_v60 = vpack.c.bf16 %v4828_v33, %v4826_v55  ;;  %v17983_v7 = vmax.f32 %v17982_v53, 0.0  ;;  %v17985_v55 = vmax.f32 %v17984_v26, 0.0 }
 0x486   : > { %v4701_v51 = vmax.f32 %v4521_v1, 0.0  ;;  %v4525_v39 = vadd.f32 %v4524_v45, %v14813_v27  ;;  %v4526_v0 = vpop.f32.mrb[223].mxu1 }
 0x487   : > { %v4702_v30 = vmax.f32 %v4523_v62, 0.0  ;;  %v4527_v52 = vadd.f32 %v4526_v0, %v14817_v20  ;;  %5385 = vmatprep.mubr.bf16.mxu0 %v4910_v60 }
 0x488   : > { %v4703_v38 = vmax.f32 %v4525_v39, 0.0  ;;  %v4829_v42 = vadd.f32 %v4701_v51, %v17971_v5  ;;  %v17988_v5 = vld [vmem:[#allocation80_spill] sm:$0xff] }
 0x489   : > { %5386 = vmatmul.mubr.bf16.gmra.mrb[152].mxu0 %v4909_v12  ;;  %v4704_v3 = vmax.f32 %v4527_v52, 0.0  ;;  %v4830_v15 = vadd.f32 %v4702_v30, %v17975_v17  ;;  %v12236_v30 = vld [vmem:[%s17395_s13 + $0x80] ss:$8 sps:$4 sm:$0xff]   ;;  %v12238_v52 = vld [vmem:[%s17395_s13 + $0x84] ss:$8 sps:$4 sm:$0xff]   ;;  %v17992_v17 = vld [vmem:[#allocation74_spill] sm:$0xff] }
 0x48a   : > { %v4831_v54 = vadd.f32 %v4703_v38, %v17973_v2  ;;  %6775 = vmatprep.subr.bf16.mxu0 %v12238_v52  ;;  %v17986_v38 = vld [vmem:[#allocation79_spill] sm:$0xff] }
 0x48b   : > { %v4530_v19 = vpop.f32.mrb[224].mxu1  ;;  %v4832_v21 = vadd.f32 %v4704_v3, %v17977_v37  ;;  %v17987_v3 = vmax.f32 %v17986_v38, 0.0  ;;  %6776 = vmatpush1.bf16.msra.mxu0 %v12236_v30  ;;  %v12241_v30 = vld [vmem:[%s17395_s13 + $0x94] ss:$8 sps:$4 sm:$0xff]  }
 0x48c   : > { %v4911_v44 = vpack.c.bf16 %v4831_v54, %v4829_v42  ;;  %v4531_v49 = vadd.f32 %v4530_v19, %v14813_v27  ;;  %v4532_v13 = vpop.f32.mrb[225].mxu1  ;;  %v17989_v42 = vmax.f32 %v17988_v5, 0.0  ;;  %v17990_v54 = vld [vmem:[#allocation73_spill] sm:$0xff]  ;;  %6777 = vmatprep.subr.bf16.mxu0 %v12241_v30  ;;  %v18016_v30 = vld [vmem:[#allocation86_spill] sm:$0xff] }
 0x48d   : > { %v4533_v58 = vadd.f32 %v4532_v13, %v14817_v20  ;;  %v4534_v29 = vpop.f32.mrb[226].mxu1  ;;  %v4912_v40 = vpack.c.bf16 %v4832_v21, %v4830_v15  ;;  %v17991_v19 = vmax.f32 %v17990_v54, 0.0  ;;  %v17993_v15 = vmax.f32 %v17992_v17, 0.0 }
 0x48e   : > { %v4705_v43 = vmax.f32 %v4531_v49, 0.0  ;;  %v4535_v25 = vadd.f32 %v4534_v29, %v14813_v27  ;;  %v4536_v9 = vpop.f32.mrb[227].mxu1 }
 0x48f   : > { %v4706_v14 = vmax.f32 %v4533_v58, 0.0  ;;  %v4537_v34 = vadd.f32 %v4536_v9, %v14817_v20  ;;  %5395 = vmatprep.mubr.bf16.mxu0 %v4912_v40 }
 0x490   : > { %v4707_v48 = vmax.f32 %v4535_v25, 0.0  ;;  %v4833_v61 = vadd.f32 %v4705_v43, %v17979_v63  ;;  %v17996_v63 = vld [vmem:[#allocation84_spill] sm:$0xff] }
 0x491   : > { %5396 = vmatmul.mubr.bf16.gmra.mrb[156].mxu0 %v4911_v44  ;;  %v4708_v35 = vmax.f32 %v4537_v34, 0.0  ;;  %v4834_v41 = vadd.f32 %v4706_v14, %v17983_v7  ;;  %v18000_v7 = vld [vmem:[#allocation78_spill] sm:$0xff] }
 0x492   : > { %v4835_v22 = vadd.f32 %v4707_v48, %v17981_v11  ;;  %v17994_v48 = vld [vmem:[#allocation83_spill] sm:$0xff] }
 0x493   : > { %v4540_v32 = vpop.f32.mrb[228].mxu1  ;;  %v4836_v50 = vadd.f32 %v4708_v35, %v17985_v55  ;;  %v17995_v35 = vmax.f32 %v17994_v48, 0.0 }
 0x494   : > { %v4913_v28 = vpack.c.bf16 %v4835_v22, %v4833_v61  ;;  %v4541_v33 = vadd.f32 %v4540_v32, %v14813_v27  ;;  %v4542_v12 = vpop.f32.mrb[229].mxu1  ;;  %v17997_v61 = vmax.f32 %v17996_v63, 0.0  ;;  %v17998_v22 = vld [vmem:[#allocation77_spill] sm:$0xff] }
 0x495   : > { %v4543_v1 = vadd.f32 %v4542_v12, %v14817_v20  ;;  %v4544_v18 = vpop.f32.mrb[230].mxu1  ;;  %v4914_v62 = vpack.c.bf16 %v4836_v50, %v4834_v41  ;;  %v17999_v32 = vmax.f32 %v17998_v22, 0.0  ;;  %v18001_v41 = vmax.f32 %v18000_v7, 0.0 }
 0x496   : > { %v4709_v45 = vmax.f32 %v4541_v33, 0.0  ;;  %v4545_v60 = vadd.f32 %v4544_v18, %v14813_v27  ;;  %v4546_v51 = vpop.f32.mrb[231].mxu1  ;;  %v4961_v18 = vld [vmem:[%s17392_s10] sm:$0x3] }
 0x497   : > { %v4710_v39 = vmax.f32 %v4543_v1, 0.0  ;;  %v4547_v0 = vadd.f32 %v4546_v51, %v14817_v20  ;;  %5405 = vmatprep.mubr.bf16.mxu0 %v4914_v62  ;;  %v15272_v38 = vrot.slane %v4961_v18, %v13191_v47 }
 0x498   : > { %v4711_v24 = vmax.f32 %v4545_v60, 0.0  ;;  %v4837_v16 = vadd.f32 %v4709_v45, %v17987_v3  ;;  %v18002_v3 = vld [vmem:[#allocation87_spill] sm:$0xff] }
 0x499   : > { %5406 = vmatmul.mubr.bf16.gmra.mrb[160].mxu0 %v4913_v28  ;;  %v4712_v4 = vmax.f32 %v4547_v0, 0.0  ;;  %v4838_v23 = vadd.f32 %v4710_v39, %v17991_v19  ;;  %v12239_v0 = vld [vmem:[%s17395_s13 + $0x90] ss:$8 sps:$4 sm:$0xff]  }
 0x49a   : > { %v4839_v56 = vadd.f32 %v4711_v24, %v17989_v42  ;;  %v15269_v24 = vrot.slane %v4961_v18, %v13214_v57  ;;  %v18004_v42 = vld [vmem:[#allocation88_spill] sm:$0xff]  ;;  %6778 = vmatpush1.bf16.msra.mxu0 %v12239_v0 }
 0x49b   : > { %v4550_v2 = vpop.f32.mrb[232].mxu1  ;;  %v4840_v36 = vadd.f32 %v4712_v4, %v17993_v15 }
 0x49c   : > { %v4915_v37 = vpack.c.bf16 %v4839_v56, %v4837_v16  ;;  %v4551_v21 = vadd.f32 %v4550_v2, %v14813_v27  ;;  %v4552_v44 = vpop.f32.mrb[233].mxu1  ;;  %v18003_v16 = vmax.f32 %v18002_v3, 0.0  ;;  %v18005_v56 = vmax.f32 %v18004_v42, 0.0 }
 0x49d   : > { %v4553_v49 = vadd.f32 %v4552_v44, %v14817_v20  ;;  %v4554_v13 = vpop.f32.mrb[234].mxu1  ;;  %v4916_v58 = vpack.c.bf16 %v4840_v36, %v4838_v23  ;;  %v18006_v23 = vld [vmem:[#allocation81_spill] sm:$0xff]  ;;  %v18008_v36 = vld [vmem:[#allocation82_spill] sm:$0xff] }
 0x49e   : > { %v4713_v29 = vmax.f32 %v4551_v21, 0.0  ;;  %v4555_v40 = vadd.f32 %v4554_v13, %v14813_v27  ;;  %v4556_v43 = vpop.f32.mrb[235].mxu1  ;;  %v18007_v17 = vmax.f32 %v18006_v23, 0.0 }
 0x49f   : > { %v4714_v25 = vmax.f32 %v4553_v49, 0.0  ;;  %v4557_v9 = vadd.f32 %v4556_v43, %v14817_v20  ;;  %5415 = vmatprep.mubr.bf16.mxu0 %v4916_v58 }
 0x4a0   : > { %v4715_v14 = vmax.f32 %v4555_v40, 0.0  ;;  %v4841_v6 = vadd.f32 %v4713_v29, %v17995_v35 }
 0x4a1   : > { %5416 = vmatmul.mubr.bf16.gmra.mrb[164].mxu0 %v4915_v37  ;;  %v4716_v34 = vmax.f32 %v4557_v9, 0.0  ;;  %v4842_v53 = vadd.f32 %v4714_v25, %v17999_v32  ;;  %v18009_v37 = vmax.f32 %v18008_v36, 0.0 }
 0x4a2   : > { %v4843_v59 = vadd.f32 %v4715_v14, %v17997_v61 }
 0x4a3   : > { %v4560_v11 = vpop.f32.mrb[236].mxu1  ;;  %v4844_v26 = vadd.f32 %v4716_v34, %v18001_v41 }
 0x4a4   : > { %v4917_v55 = vpack.c.bf16 %v4843_v59, %v4841_v6  ;;  %v4561_v50 = vadd.f32 %v4560_v11, %v14813_v27  ;;  %v4562_v28 = vpop.f32.mrb[237].mxu1 }
 0x4a5   : > { %v4563_v33 = vadd.f32 %v4562_v28, %v14817_v20  ;;  %v4564_v12 = vpop.f32.mrb[238].mxu1  ;;  %v4918_v1 = vpack.c.bf16 %v4844_v26, %v4842_v53 }
 0x4a6   : > { %v4717_v62 = vmax.f32 %v4561_v50, 0.0  ;;  %v4565_v45 = vadd.f32 %v4564_v12, %v14813_v27  ;;  %v4566_v60 = vpop.f32.mrb[239].mxu1 }
 0x4a7   : > { %v4718_v51 = vmax.f32 %v4563_v33, 0.0  ;;  %v4567_v39 = vadd.f32 %v4566_v60, %v14817_v20  ;;  %5425 = vmatprep.mubr.bf16.mxu0 %v4918_v1  ;;  %v18012_v33 = vld [vmem:[#allocation92_spill] sm:$0xff] }
 0x4a8   : > { %v4719_v52 = vmax.f32 %v4565_v45, 0.0  ;;  %v4845_v5 = vadd.f32 %v4717_v62, %v18003_v16  ;;  %v18013_v12 = vmax.f32 %v18012_v33, 0.0 }
 0x4a9   : > { %5426 = vmatmul.mubr.bf16.gmra.mrb[168].mxu0 %v4917_v55  ;;  %v4720_v4 = vmax.f32 %v4567_v39, 0.0  ;;  %v4846_v15 = vadd.f32 %v4718_v51, %v18007_v17  ;;  %v18010_v55 = vld [vmem:[#allocation91_spill] sm:$0xff]  ;;  %v18014_v51 = vld [vmem:[#allocation85_spill] sm:$0xff] }
 0x4aa   : > { %v4847_v2 = vadd.f32 %v4719_v52, %v18005_v56  ;;  %v18011_v50 = vmax.f32 %v18010_v55, 0.0  ;;  %v18015_v39 = vmax.f32 %v18014_v51, 0.0  ;;  %v18017_v52 = vmax.f32 %v18016_v30, 0.0 }
 0x4ab   : > { %v5167_v19 = vpop.f32.mrb[64].mxu0  ;;  %v4848_v21 = vadd.f32 %v4720_v4, %v18009_v37 }
 0x4ac   : > { %v4570_v54 = vpop.f32.mrb[240].mxu1  ;;  %v4919_v44 = vpack.c.bf16 %v4847_v2, %v4845_v5  ;;  %v5168_v13 = vadd.f32 %v5167_v19, %v15269_v24  ;;  %v5169_v29 = vpop.f32.mrb[65].mxu0 }
 0x4ad   : > { %v4571_v49 = vadd.f32 %v4570_v54, %v14813_v27  ;;  %v4572_v58 = vpop.f32.mrb[241].mxu1  ;;  %v5170_v43 = vadd.f32 %v5169_v29, %v15272_v38  ;;  %v5171_v9 = vpop.f32.mrb[66].mxu0  ;;  %v4920_v14 = vpack.c.bf16 %v4848_v21, %v4846_v15  ;;  %v12242_v29 = vld [vmem:[%s17395_s13 + $0xa0] ss:$8 sps:$4 sm:$0xff]  }
 0x4ae   : > { %v4573_v40 = vadd.f32 %v4572_v58, %v14817_v20  ;;  %v4574_v25 = vpop.f32.mrb[242].mxu1  ;;  %v5172_v35 = vadd.f32 %v5171_v9, %v15269_v24  ;;  %v5173_v63 = vpop.f32.mrb[67].mxu0  ;;  %v5486_v22 = vmax.f32 %v5168_v13, 0.0 }
 0x4af   : > { %v4721_v34 = vmax.f32 %v4571_v49, 0.0  ;;  %v4575_v48 = vadd.f32 %v4574_v25, %v14813_v27  ;;  %v4576_v6 = vpop.f32.mrb[243].mxu1  ;;  %v5174_v11 = vadd.f32 %v5173_v63, %v15272_v38  ;;  %5435 = vmatprep.mubr.bf16.mxu0 %v4920_v14  ;;  %v5487_v7 = vmax.f32 %v5170_v43, 0.0 }
 0x4b0   : > { %v4722_v61 = vmax.f32 %v4573_v40, 0.0  ;;  %v4577_v59 = vadd.f32 %v4576_v6, %v14817_v20  ;;  %v5488_v53 = vmax.f32 %v5172_v35, 0.0  ;;  %v12244_v40 = vld [vmem:[%s17395_s13 + $0xa4] ss:$8 sps:$4 sm:$0xff]   ;;  %v18018_v35 = vmax.f32 %v14191_v31, 0.0 }
 0x4b1   : > { %v4723_v32 = vmax.f32 %v4575_v48, 0.0  ;;  %5436 = vmatmul.mubr.bf16.gmra.mrb[172].mxu0 %v4919_v44  ;;  %v5489_v26 = vmax.f32 %v5174_v11, 0.0  ;;  %v4849_v28 = vadd.f32 %v4721_v34, %v18011_v50  ;;  %6779 = vmatprep.subr.bf16.mxu0 %v12244_v40  ;;  %v18019_v63 = vmax.f32 %v14195_v8, 0.0  ;;  %v18028_v40 = vld [vmem:[#allocation94_spill] sm:$0xff] }
 0x4b2   : > { %v4724_v41 = vmax.f32 %v4577_v59, 0.0  ;;  %v5614_v18 = vpack.c.bf16 %v5488_v53, %v5486_v22  ;;  %v4850_v0 = vadd.f32 %v4722_v61, %v18015_v39  ;;  %6780 = vmatpush1.bf16.msra.mxu0 %v12242_v29  ;;  %v18020_v53 = vld [vmem:[#allocation89_spill] sm:$0xff] }
 0x4b3   : > { %v4851_v1 = vadd.f32 %v4723_v32, %v18013_v12  ;;  %v5615_v60 = vpack.c.bf16 %v5489_v26, %v5487_v7  ;;  %v18021_v7 = vmax.f32 %v18020_v53, 0.0  ;;  %v18022_v26 = vld [vmem:[#allocation90_spill] sm:$0xff] }
 0x4b4   : > { %v4580_v62 = vpop.f32.mrb[244].mxu1  ;;  %v5177_v45 = vpop.f32.mrb[68].mxu0  ;;  %v4852_v4 = vadd.f32 %v4724_v41, %v18017_v52  ;;  %v18023_v55 = vmax.f32 %v18022_v26, 0.0 }
 0x4b5   : > { %v4921_v3 = vpack.c.bf16 %v4851_v1, %v4849_v28  ;;  %v4581_v16 = vadd.f32 %v4580_v62, %v14813_v27  ;;  %v5178_v5 = vadd.f32 %v5177_v45, %v15269_v24  ;;  %v4582_v42 = vpop.f32.mrb[245].mxu1  ;;  %v5179_v56 = vpop.f32.mrb[69].mxu0  ;;  %5902 = vmatprep.mubr.bf16.mxu1 %v5615_v60 }
 0x4b6   : > { %v4583_v2 = vadd.f32 %v4582_v42, %v14817_v20  ;;  %v5180_v54 = vadd.f32 %v5179_v56, %v15272_v38  ;;  %v4584_v19 = vpop.f32.mrb[246].mxu1  ;;  %v5181_v23 = vpop.f32.mrb[70].mxu0  ;;  %v4922_v17 = vpack.c.bf16 %v4852_v4, %v4850_v0  ;;  %5903 = vmatmul.mubr.bf16.vlgmr.msra.gmra.mrb[0].mxu1 %v5614_v18 }
 0x4b7   : > { %v4725_v15 = vmax.f32 %v4581_v16, 0.0  ;;  %v4585_v36 = vadd.f32 %v4584_v19, %v14813_v27  ;;  %v5182_v37 = vadd.f32 %v5181_v23, %v15269_v24  ;;  %v4586_v21 = vpop.f32.mrb[247].mxu1  ;;  %v5183_v44 = vpop.f32.mrb[71].mxu0  ;;  %v5490_v43 = vmax.f32 %v5178_v5, 0.0 }
 0x4b8   : > { %v4726_v49 = vmax.f32 %v4583_v2, 0.0  ;;  %v4587_v13 = vadd.f32 %v4586_v21, %v14817_v20  ;;  %v5184_v58 = vadd.f32 %v5183_v44, %v15272_v38  ;;  %5445 = vmatprep.mubr.bf16.mxu0 %v4922_v17  ;;  %v5491_v14 = vmax.f32 %v5180_v54, 0.0 }
 0x4b9   : > { %v4727_v25 = vmax.f32 %v4585_v36, 0.0  ;;  %v5492_v9 = vmax.f32 %v5182_v37, 0.0  ;;  %5446 = vmatmul.mubr.bf16.gmra.mrb[176].mxu0 %v4921_v3  ;;  %v4853_v6 = vadd.f32 %v4725_v15, %v18018_v35  ;;  %v18024_v23 = vmax.f32 %v14235_v46, 0.0 }
 0x4ba   : > { %v4728_v34 = vmax.f32 %v4587_v13, 0.0  ;;  %v5493_v48 = vmax.f32 %v5184_v58, 0.0  ;;  %v4854_v41 = vadd.f32 %v4726_v49, %v18021_v7  ;;  %v18025_v15 = vmax.f32 %v14239_v10, 0.0  ;;  %v18026_v13 = vld [vmem:[#allocation93_spill] sm:$0xff] }
 0x4bb   : > { %v4855_v61 = vadd.f32 %v4727_v25, %v18019_v63  ;;  %v5616_v59 = vpack.c.bf16 %v5492_v9, %v5490_v43  ;;  %v18027_v58 = vmax.f32 %v18026_v13, 0.0  ;;  %v18029_v43 = vmax.f32 %v18028_v40, 0.0 }
 0x4bc   : > { %v4590_v11 = vpop.f32.mrb[248].mxu1  ;;  %v5187_v22 = vpop.f32.mrb[72].mxu0  ;;  %v5617_v32 = vpack.c.bf16 %v5493_v48, %v5491_v14  ;;  %v4856_v50 = vadd.f32 %v4728_v34, %v18023_v55  ;;  %v12245_v55 = vld [vmem:[%s17395_s13 + $0xb0] ss:$8 sps:$4 sm:$0xff]  }
 0x4bd   : > { %v4923_v28 = vpack.c.bf16 %v4855_v61, %v4853_v6  ;;  %v4591_v33 = vadd.f32 %v4590_v11, %v14813_v27  ;;  %v5188_v31 = vadd.f32 %v5187_v22, %v15269_v24  ;;  %v4592_v12 = vpop.f32.mrb[249].mxu1  ;;  %v5189_v1 = vpop.f32.mrb[73].mxu0 }
 0x4be   : > { %v4593_v8 = vadd.f32 %v4592_v12, %v14817_v20  ;;  %v5190_v18 = vadd.f32 %v5189_v1, %v15272_v38  ;;  %v4594_v62 = vpop.f32.mrb[250].mxu1  ;;  %v5191_v45 = vpop.f32.mrb[74].mxu0  ;;  %5912 = vmatprep.mubr.bf16.mxu1 %v5617_v32  ;;  %v4924_v60 = vpack.c.bf16 %v4856_v50, %v4854_v41  ;;  %v12247_v50 = vld [vmem:[%s17395_s13 + $0xb4] ss:$8 sps:$4 sm:$0xff]  }
 0x4bf   : > { %v4729_v51 = vmax.f32 %v4591_v33, 0.0  ;;  %v4595_v39 = vadd.f32 %v4594_v62, %v14813_v27  ;;  %v5192_v0 = vadd.f32 %v5191_v45, %v15269_v24  ;;  %v4596_v30 = vpop.f32.mrb[251].mxu1  ;;  %v5193_v52 = vpop.f32.mrb[75].mxu0  ;;  %5913 = vmatmul.mubr.bf16.gmra.mrb[4].mxu1 %v5616_v59  ;;  %v5494_v5 = vmax.f32 %v5188_v31, 0.0  ;;  %6781 = vmatprep.subr.bf16.mxu0 %v12247_v50  ;;  %v18032_v62 = vld [vmem:[#allocation106_spill] sm:$0xff] }
 0x4c0   : > { %v4730_v4 = vmax.f32 %v4593_v8, 0.0  ;;  %v4597_v3 = vadd.f32 %v4596_v30, %v14817_v20  ;;  %v5194_v16 = vadd.f32 %v5193_v52, %v15272_v38  ;;  %5455 = vmatprep.mubr.bf16.mxu0 %v4924_v60  ;;  %v5495_v2 = vmax.f32 %v5190_v18, 0.0  ;;  %6782 = vmatpush1.bf16.msra.mxu0 %v12245_v55  ;;  %v18034_v30 = vld [vmem:[#allocation99_spill] sm:$0xff] }
 0x4c1   : > { %v4731_v42 = vmax.f32 %v4595_v39, 0.0  ;;  %v5496_v56 = vmax.f32 %v5192_v0, 0.0  ;;  %5456 = vmatmul.mubr.bf16.gmra.mrb[180].mxu0 %v4923_v28  ;;  %v4857_v17 = vadd.f32 %v4729_v51, %v18024_v23  ;;  %v18033_v45 = vmax.f32 %v18032_v62, 0.0 }
 0x4c2   : > { %v4732_v54 = vmax.f32 %v4597_v3, 0.0  ;;  %v5497_v19 = vmax.f32 %v5194_v16, 0.0  ;;  %v4858_v29 = vadd.f32 %v4730_v4, %v18027_v58  ;;  %v18035_v52 = vmax.f32 %v18034_v30, 0.0  ;;  %v18036_v3 = vld [vmem:[#allocation100_spill] sm:$0xff]  ;;  %v12253_v30 = vld [vmem:[%s17395_s13 + $0xd4] ss:$8 sps:$4 sm:$0xff]  }
 0x4c3   : > { %v4859_v36 = vadd.f32 %v4731_v42, %v18025_v15  ;;  %v5618_v37 = vpack.c.bf16 %v5496_v56, %v5494_v5  ;;  %v18037_v16 = vmax.f32 %v18036_v3, 0.0 }
 0x4c4   : > { %v4600_v21 = vpop.f32.mrb[252].mxu1  ;;  %v5197_v44 = vpop.f32.mrb[76].mxu0  ;;  %v5619_v49 = vpack.c.bf16 %v5497_v19, %v5495_v2  ;;  %v4860_v25 = vadd.f32 %v4732_v54, %v18029_v43 }
 0x4c5   : > { %v4925_v9 = vpack.c.bf16 %v4859_v36, %v4857_v17  ;;  %v4601_v14 = vadd.f32 %v4600_v21, %v14813_v27  ;;  %v5198_v34 = vadd.f32 %v5197_v44, %v15269_v24  ;;  %v4602_v46 = vpop.f32.mrb[253].mxu1  ;;  %v5199_v48 = vpop.f32.mrb[77].mxu0 }
 0x4c6   : > { %v4603_v10 = vadd.f32 %v4602_v46, %v14817_v20  ;;  %v5200_v35 = vadd.f32 %v5199_v48, %v15272_v38  ;;  %v4604_v6 = vpop.f32.mrb[254].mxu1  ;;  %v5201_v63 = vpop.f32.mrb[78].mxu0  ;;  %5922 = vmatprep.mubr.bf16.mxu1 %v5619_v49  ;;  %v4926_v61 = vpack.c.bf16 %v4860_v25, %v4858_v29  ;;  %v12248_v48 = vld [vmem:[%s17395_s13 + $0xc0] ss:$8 sps:$4 sm:$0xff]  }
 0x4c7   : > { %v4733_v59 = vmax.f32 %v4601_v14, 0.0  ;;  %v4605_v11 = vadd.f32 %v4604_v6, %v14813_v27  ;;  %v5202_v22 = vadd.f32 %v5201_v63, %v15269_v24  ;;  %v4606_v32 = vpop.f32.mrb[255].mxu1  ;;  %v5203_v53 = vpop.f32.mrb[79].mxu0  ;;  %5923 = vmatmul.mubr.bf16.gmra.mrb[8].mxu1 %v5618_v37  ;;  %v5498_v27 = vmax.f32 %v5198_v34, 0.0 }
 0x4c8   : > { %v4734_v7 = vmax.f32 %v4603_v10, 0.0  ;;  %v4607_v41 = vadd.f32 %v4606_v32, %v14817_v20  ;;  %v5204_v26 = vadd.f32 %v5203_v53, %v15272_v38  ;;  %5465 = vmatprep.mubr.bf16.mxu0 %v4926_v61  ;;  %v5499_v31 = vmax.f32 %v5200_v35, 0.0  ;;  %v18030_v20 = vld [vmem:[#allocation105_spill] sm:$0xff]  ;;  %v12250_v10 = vld [vmem:[%s17395_s13 + $0xc4] ss:$8 sps:$4 sm:$0xff]  }
 0x4c9   : > { %v4735_v28 = vmax.f32 %v4605_v11, 0.0  ;;  %v5500_v33 = vmax.f32 %v5202_v22, 0.0  ;;  %5466 = vmatmul.mubr.bf16.gmra.mrb[184].mxu0 %v4925_v9  ;;  %v18031_v8 = vmax.f32 %v18030_v20, 0.0  ;;  %6783 = vmatprep.subr.bf16.mxu0 %v12250_v10 }
 0x4ca   : > { %v4736_v12 = vmax.f32 %v4607_v41, 0.0  ;;  %v5501_v1 = vmax.f32 %v5204_v26, 0.0  ;;  %v4862_v4 = vadd.f32 %v4734_v7, %v18035_v52  ;;  %6784 = vmatpush1.bf16.msra.mxu0 %v12248_v48 }
 0x4cb   : > { %v4861_v18 = vadd.f32 %v4733_v59, %v18031_v8  ;;  %v4863_v60 = vadd.f32 %v4735_v28, %v18033_v45  ;;  %v5620_v51 = vpack.c.bf16 %v5500_v33, %v5498_v27  ;;  %6785 = vmatprep.subr.bf16.mxu0 %v12253_v30 }
 0x4cc   : > { %v5207_v39 = vpop.f32.mrb[80].mxu0  ;;  %v5621_v0 = vpack.c.bf16 %v5501_v1, %v5499_v31  ;;  %v4864_v5 = vadd.f32 %v4736_v12, %v18037_v16 }
 0x4cd   : > { %v4927_v42 = vpack.c.bf16 %v4863_v60, %v4861_v18  ;;  %v5208_v56 = vadd.f32 %v5207_v39, %v15269_v24  ;;  %v5209_v2 = vpop.f32.mrb[81].mxu0 }
 0x4ce   : > { %v5210_v54 = vadd.f32 %v5209_v2, %v15272_v38  ;;  %v5211_v19 = vpop.f32.mrb[82].mxu0  ;;  %5932 = vmatprep.mubr.bf16.mxu1 %v5621_v0  ;;  %v4928_v23 = vpack.c.bf16 %v4864_v5, %v4862_v4  ;;  %v12251_v0 = vld [vmem:[%s17395_s13 + $0xd0] ss:$8 sps:$4 sm:$0xff]  }
 0x4cf   : > { %v5212_v17 = vadd.f32 %v5211_v19, %v15269_v24  ;;  %v5213_v15 = vpop.f32.mrb[83].mxu0  ;;  %5933 = vmatmul.mubr.bf16.gmra.mrb[12].mxu1 %v5620_v51  ;;  %v5502_v37 = vmax.f32 %v5208_v56, 0.0  ;;  %6786 = vmatpush1.bf16.msra.mxu0 %v12251_v0 }
 0x4d0   : > { %v5214_v36 = vadd.f32 %v5213_v15, %v15272_v38  ;;  %5475 = vmatprep.mubr.bf16.mxu0 %v4928_v23  ;;  %v5503_v44 = vmax.f32 %v5210_v54, 0.0 }
 0x4d1   : > { %v5504_v21 = vmax.f32 %v5212_v17, 0.0  ;;  %5476 = vmatmul.mubr.bf16.gmra.mrb[188].mxu0 %v4927_v42 }
 0x4d2   : > { %v5505_v49 = vmax.f32 %v5214_v36, 0.0 }
 0x4d3   : > { %v5622_v13 = vpack.c.bf16 %v5504_v21, %v5502_v37 }
 0x4d4   : > { %v5217_v58 = vpop.f32.mrb[84].mxu0  ;;  %v5623_v29 = vpack.c.bf16 %v5505_v49, %v5503_v44 }
 0x4d5   : > { %v5218_v40 = vadd.f32 %v5217_v58, %v15269_v24  ;;  %v5219_v43 = vpop.f32.mrb[85].mxu0  ;;  %v12256_v58 = vld [vmem:[%s17397_s15 + $0x4] ss:$8 sps:$4 sm:$0xff]  }
 0x4d6   : > { %v5220_v25 = vadd.f32 %v5219_v43, %v15272_v38  ;;  %v5221_v9 = vpop.f32.mrb[86].mxu0  ;;  %5942 = vmatprep.mubr.bf16.mxu1 %v5623_v29  ;;  %7508 = vmatprep.subr.bf16.mxu1 %v12256_v58 }
 0x4d7   : > { %v5222_v14 = vadd.f32 %v5221_v9, %v15269_v24  ;;  %v5223_v34 = vpop.f32.mrb[87].mxu0  ;;  %5943 = vmatmul.mubr.bf16.gmra.mrb[16].mxu1 %v5622_v13  ;;  %v5506_v35 = vmax.f32 %v5218_v40, 0.0  ;;  %v12254_v13 = vld [vmem:[%s17397_s15] ss:$8 sps:$4 sm:$0xff]  }
 0x4d8   : > { %v5224_v46 = vadd.f32 %v5223_v34, %v15272_v38  ;;  %v5507_v63 = vmax.f32 %v5220_v25, 0.0  ;;  %7509 = vmatpush1.bf16.msra.mxu1 %v12254_v13 }
 0x4d9   : > { %v5508_v6 = vmax.f32 %v5222_v14, 0.0 }
 0x4da   : > { %v5509_v61 = vmax.f32 %v5224_v46, 0.0 }
 0x4db   : > { %v5624_v59 = vpack.c.bf16 %v5508_v6, %v5506_v35  ;;  %v12257_v35 = vld [vmem:[%s17395_s13 + $0xe0] ss:$8 sps:$4 sm:$0xff]   ;;  %v12259_v6 = vld [vmem:[%s17395_s13 + $0xe4] ss:$8 sps:$4 sm:$0xff]  }
 0x4dc   : > { %v5227_v11 = vpop.f32.mrb[88].mxu0  ;;  %v5625_v22 = vpack.c.bf16 %v5509_v61, %v5507_v63  ;;  %6787 = vmatprep.subr.bf16.mxu0 %v12259_v6 }
 0x4dd   : > { %v5228_v32 = vadd.f32 %v5227_v11, %v15269_v24  ;;  %v5229_v53 = vpop.f32.mrb[89].mxu0  ;;  %6788 = vmatpush1.bf16.msra.mxu0 %v12257_v35  ;;  %v12268_v35 = vld [vmem:[%s17397_s15 + $0x24] ss:$8 sps:$4 sm:$0xff]  }
 0x4de   : > { %v5230_v7 = vadd.f32 %v5229_v53, %v15272_v38  ;;  %v5231_v41 = vpop.f32.mrb[90].mxu0  ;;  %5952 = vmatprep.mubr.bf16.mxu1 %v5625_v22 }
 0x4df   : > { %v5232_v26 = vadd.f32 %v5231_v41, %v15269_v24  ;;  %v5233_v55 = vpop.f32.mrb[91].mxu0  ;;  %5953 = vmatmul.mubr.bf16.gmra.mrb[20].mxu1 %v5624_v59  ;;  %v5510_v27 = vmax.f32 %v5228_v32, 0.0 }
 0x4e0   : > { %v5234_v50 = vadd.f32 %v5233_v55, %v15272_v38  ;;  %v5511_v33 = vmax.f32 %v5230_v7, 0.0 }
 0x4e1   : > { %v5512_v28 = vmax.f32 %v5232_v26, 0.0 }
 0x4e2   : > { %v5513_v31 = vmax.f32 %v5234_v50, 0.0 }
 0x4e3   : > { %v5626_v12 = vpack.c.bf16 %v5512_v28, %v5510_v27 }
 0x4e4   : > { %v5237_v1 = vpop.f32.mrb[92].mxu0  ;;  %v5627_v20 = vpack.c.bf16 %v5513_v31, %v5511_v33 }
 0x4e5   : > { %v5238_v8 = vadd.f32 %v5237_v1, %v15269_v24  ;;  %v5239_v18 = vpop.f32.mrb[93].mxu0 }
 0x4e6   : > { %v5240_v62 = vadd.f32 %v5239_v18, %v15272_v38  ;;  %v5241_v45 = vpop.f32.mrb[94].mxu0  ;;  %5962 = vmatprep.mubr.bf16.mxu1 %v5627_v20  ;;  %v12260_v20 = vld [vmem:[%s17397_s15 + $0x10] ss:$8 sps:$4 sm:$0xff]  }
 0x4e7   : > { %v5242_v60 = vadd.f32 %v5241_v45, %v15269_v24  ;;  %v5243_v51 = vpop.f32.mrb[95].mxu0  ;;  %5963 = vmatmul.mubr.bf16.gmra.mrb[24].mxu1 %v5626_v12  ;;  %v5514_v52 = vmax.f32 %v5238_v8, 0.0  ;;  %v12262_v8 = vld [vmem:[%s17397_s15 + $0x14] ss:$8 sps:$4 sm:$0xff]  }
 0x4e8   : > { %v5244_v39 = vadd.f32 %v5243_v51, %v15272_v38  ;;  %v5515_v3 = vmax.f32 %v5240_v62, 0.0  ;;  %7510 = vmatprep.subr.bf16.mxu1 %v12262_v8 }
 0x4e9   : > { %v5516_v4 = vmax.f32 %v5242_v60, 0.0  ;;  %7511 = vmatpush1.bf16.msra.mxu1 %v12260_v20 }
 0x4ea   : > { %v5517_v16 = vmax.f32 %v5244_v39, 0.0  ;;  %7512 = vmatprep.subr.bf16.mxu1 %v12268_v35  ;;  %v12274_v35 = vld [vmem:[%s17397_s15 + $0x44] ss:$8 sps:$4 sm:$0xff]  }
 0x4eb   : > { %v5628_v5 = vpack.c.bf16 %v5516_v4, %v5514_v52 }
 0x4ec   : > { %v5247_v42 = vpop.f32.mrb[96].mxu0  ;;  %v5629_v56 = vpack.c.bf16 %v5517_v16, %v5515_v3  ;;  %v12263_v3 = vld [vmem:[%s17395_s13 + $0xf0] ss:$8 sps:$4 sm:$0xff]   ;;  %v12265_v16 = vld [vmem:[%s17395_s13 + $0xf4] ss:$8 sps:$4 sm:$0xff]  }
 0x4ed   : > { %v5248_v2 = vadd.f32 %v5247_v42, %v15269_v24  ;;  %v5249_v54 = vpop.f32.mrb[97].mxu0  ;;  %6789 = vmatprep.subr.bf16.mxu0 %v12265_v16 }
 0x4ee   : > { %v5250_v19 = vadd.f32 %v5249_v54, %v15272_v38  ;;  %v5251_v23 = vpop.f32.mrb[98].mxu0  ;;  %5972 = vmatprep.mubr.bf16.mxu1 %v5629_v56  ;;  %6790 = vmatpush1.bf16.msra.mxu0 %v12263_v3 }
 0x4ef   : > { %v5252_v17 = vadd.f32 %v5251_v23, %v15269_v24  ;;  %v5253_v15 = vpop.f32.mrb[99].mxu0  ;;  %5973 = vmatmul.mubr.bf16.gmra.mrb[28].mxu1 %v5628_v5  ;;  %v5518_v37 = vmax.f32 %v5248_v2, 0.0 }
 0x4f0   : > { %v5254_v36 = vadd.f32 %v5253_v15, %v15272_v38  ;;  %v5519_v44 = vmax.f32 %v5250_v19, 0.0 }
 0x4f1   : > { %v5520_v21 = vmax.f32 %v5252_v17, 0.0 }
 0x4f2   : > { %v5521_v49 = vmax.f32 %v5254_v36, 0.0 }
 0x4f3   : > { %v5630_v29 = vpack.c.bf16 %v5520_v21, %v5518_v37 }
 0x4f4   : > { %v5257_v40 = vpop.f32.mrb[100].mxu0  ;;  %v5631_v43 = vpack.c.bf16 %v5521_v49, %v5519_v44 }
 0x4f5   : > { %v5258_v25 = vadd.f32 %v5257_v40, %v15269_v24  ;;  %v5259_v9 = vpop.f32.mrb[101].mxu0 }
 0x4f6   : > { %v5260_v14 = vadd.f32 %v5259_v9, %v15272_v38  ;;  %v5261_v34 = vpop.f32.mrb[102].mxu0  ;;  %5982 = vmatprep.mubr.bf16.mxu1 %v5631_v43 }
 0x4f7   : > { %v5262_v46 = vadd.f32 %v5261_v34, %v15269_v24  ;;  %v5263_v48 = vpop.f32.mrb[103].mxu0  ;;  %5983 = vmatmul.mubr.bf16.gmra.mrb[32].mxu1 %v5630_v29  ;;  %v5522_v63 = vmax.f32 %v5258_v25, 0.0 }
 0x4f8   : > { %v5264_v10 = vadd.f32 %v5263_v48, %v15272_v38  ;;  %v5523_v59 = vmax.f32 %v5260_v14, 0.0 }
 0x4f9   : > { %v5524_v61 = vmax.f32 %v5262_v46, 0.0 }
 0x4fa   : > { %v5525_v11 = vmax.f32 %v5264_v10, 0.0  ;;  %v12266_v10 = vld [vmem:[%s17397_s15 + $0x20] ss:$8 sps:$4 sm:$0xff]  }
 0x4fb   : > { %v5632_v22 = vpack.c.bf16 %v5524_v61, %v5522_v63  ;;  %7513 = vmatpush1.bf16.msra.mxu1 %v12266_v10  ;;  %v12272_v10 = vld [vmem:[%s17397_s15 + $0x40] ss:$8 sps:$4 sm:$0xff]  }
 0x4fc   : > { %v5267_v32 = vpop.f32.mrb[104].mxu0  ;;  %v5633_v53 = vpack.c.bf16 %v5525_v11, %v5523_v59 }
 0x4fd   : > { %v5268_v7 = vadd.f32 %v5267_v32, %v15269_v24  ;;  %v5269_v41 = vpop.f32.mrb[105].mxu0 }
 0x4fe   : > { %v5270_v26 = vadd.f32 %v5269_v41, %v15272_v38  ;;  %v5271_v55 = vpop.f32.mrb[106].mxu0  ;;  %5992 = vmatprep.mubr.bf16.mxu1 %v5633_v53 }
 0x4ff   : > { %v5272_v50 = vadd.f32 %v5271_v55, %v15269_v24  ;;  %v5273_v27 = vpop.f32.mrb[107].mxu0  ;;  %5993 = vmatmul.mubr.bf16.gmra.mrb[36].mxu1 %v5632_v22  ;;  %v5526_v33 = vmax.f32 %v5268_v7, 0.0 }
 0x500   : > { %v5274_v28 = vadd.f32 %v5273_v27, %v15272_v38  ;;  %v5527_v12 = vmax.f32 %v5270_v26, 0.0 }
 0x501   : > { %v5528_v31 = vmax.f32 %v5272_v50, 0.0 }
 0x502   : > { %v5529_v1 = vmax.f32 %v5274_v28, 0.0 }
 0x503   : > { %v5634_v18 = vpack.c.bf16 %v5528_v31, %v5526_v33 }
 0x504   : > { %v5277_v62 = vpop.f32.mrb[108].mxu0  ;;  %v5635_v45 = vpack.c.bf16 %v5529_v1, %v5527_v12 }
 0x505   : > { %v5278_v60 = vadd.f32 %v5277_v62, %v15269_v24  ;;  %v5279_v51 = vpop.f32.mrb[109].mxu0 }
 0x506   : > { %v5280_v39 = vadd.f32 %v5279_v51, %v15272_v38  ;;  %v5281_v0 = vpop.f32.mrb[110].mxu0  ;;  %6002 = vmatprep.mubr.bf16.mxu1 %v5635_v45 }
 0x507   : > { %v5282_v30 = vadd.f32 %v5281_v0, %v15269_v24  ;;  %v5283_v52 = vpop.f32.mrb[111].mxu0  ;;  %6003 = vmatmul.mubr.bf16.gmra.mrb[40].mxu1 %v5634_v18  ;;  %v5530_v5 = vmax.f32 %v5278_v60, 0.0 }
 0x508   : > { %v5284_v4 = vadd.f32 %v5283_v52, %v15272_v38  ;;  %v5531_v56 = vmax.f32 %v5280_v39, 0.0  ;;  %v12271_v52 = vld [vmem:[%s17397_s15 + $0x34] ss:$8 sps:$4 sm:$0xff]  }
 0x509   : > { %v5532_v42 = vmax.f32 %v5282_v30, 0.0  ;;  %v12269_v30 = vld [vmem:[%s17397_s15 + $0x30] ss:$8 sps:$4 sm:$0xff]   ;;  %7514 = vmatprep.subr.bf16.mxu1 %v12271_v52  ;;  %v12277_v52 = vld [vmem:[%s17397_s15 + $0x54] ss:$8 sps:$4 sm:$0xff]  }
 0x50a   : > { %v5533_v2 = vmax.f32 %v5284_v4, 0.0  ;;  %7515 = vmatpush1.bf16.msra.mxu1 %v12269_v30  ;;  %v12275_v30 = vld [vmem:[%s17397_s15 + $0x50] ss:$8 sps:$4 sm:$0xff]  }
 0x50b   : > { %v5636_v54 = vpack.c.bf16 %v5532_v42, %v5530_v5  ;;  %7516 = vmatprep.subr.bf16.mxu1 %v12274_v35  ;;  %v12280_v35 = vld [vmem:[%s17397_s15 + $0x64] ss:$8 sps:$4 sm:$0xff]  }
 0x50c   : > { %v5287_v19 = vpop.f32.mrb[112].mxu0  ;;  %v5637_v23 = vpack.c.bf16 %v5533_v2, %v5531_v56 }
 0x50d   : > { %v5288_v17 = vadd.f32 %v5287_v19, %v15269_v24  ;;  %v5289_v15 = vpop.f32.mrb[113].mxu0 }
 0x50e   : > { %v5290_v36 = vadd.f32 %v5289_v15, %v15272_v38  ;;  %v5291_v37 = vpop.f32.mrb[114].mxu0  ;;  %6012 = vmatprep.mubr.bf16.mxu1 %v5637_v23  ;;  %7517 = vmatpush1.bf16.msra.mxu1 %v12272_v10  ;;  %v12278_v10 = vld [vmem:[%s17397_s15 + $0x60] ss:$8 sps:$4 sm:$0xff]  }
 0x50f   : > { %v5292_v21 = vadd.f32 %v5291_v37, %v15269_v24  ;;  %v5293_v44 = vpop.f32.mrb[115].mxu0  ;;  %6013 = vmatmul.mubr.bf16.gmra.mrb[44].mxu1 %v5636_v54  ;;  %v5534_v13 = vmax.f32 %v5288_v17, 0.0  ;;  %7518 = vmatprep.subr.bf16.mxu1 %v12277_v52  ;;  %v12283_v52 = vld [vmem:[%s17397_s15 + $0x74] ss:$8 sps:$4 sm:$0xff]  }
 0x510   : > { %v5294_v49 = vadd.f32 %v5293_v44, %v15272_v38  ;;  %v5535_v29 = vmax.f32 %v5290_v36, 0.0 }
 0x511   : > { %v5536_v58 = vmax.f32 %v5292_v21, 0.0 }
 0x512   : > { %v5537_v40 = vmax.f32 %v5294_v49, 0.0  ;;  %7519 = vmatpush1.bf16.msra.mxu1 %v12275_v30  ;;  %v12281_v30 = vld [vmem:[%s17397_s15 + $0x70] ss:$8 sps:$4 sm:$0xff]  }
 0x513   : > { %v5638_v43 = vpack.c.bf16 %v5536_v58, %v5534_v13  ;;  %7520 = vmatprep.subr.bf16.mxu1 %v12280_v35  ;;  %v12286_v35 = vld [vmem:[%s17397_s15 + $0x84] ss:$8 sps:$4 sm:$0xff]  }
 0x514   : > { %v5297_v25 = vpop.f32.mrb[116].mxu0  ;;  %v5639_v9 = vpack.c.bf16 %v5537_v40, %v5535_v29 }
 0x515   : > { %v5298_v14 = vadd.f32 %v5297_v25, %v15269_v24  ;;  %v5299_v34 = vpop.f32.mrb[117].mxu0 }
 0x516   : > { %v5300_v46 = vadd.f32 %v5299_v34, %v15272_v38  ;;  %v5301_v48 = vpop.f32.mrb[118].mxu0  ;;  %6022 = vmatprep.mubr.bf16.mxu1 %v5639_v9  ;;  %7521 = vmatpush1.bf16.msra.mxu1 %v12278_v10  ;;  %v12284_v10 = vld [vmem:[%s17397_s15 + $0x80] ss:$8 sps:$4 sm:$0xff]  }
 0x517   : > { %v5302_v6 = vadd.f32 %v5301_v48, %v15269_v24  ;;  %v5303_v63 = vpop.f32.mrb[119].mxu0  ;;  %6023 = vmatmul.mubr.bf16.gmra.mrb[48].mxu1 %v5638_v43  ;;  %v5538_v59 = vmax.f32 %v5298_v14, 0.0  ;;  %7522 = vmatprep.subr.bf16.mxu1 %v12283_v52  ;;  %v12287_v52 = vld [vmem:[%s17397_s15 + $0x90] ss:$8 sps:$4 sm:$0xff]  }
 0x518   : > { %v5304_v61 = vadd.f32 %v5303_v63, %v15272_v38  ;;  %v5539_v22 = vmax.f32 %v5300_v46, 0.0 }
 0x519   : > { %v5540_v11 = vmax.f32 %v5302_v6, 0.0 }
 0x51a   : > { %v5541_v32 = vmax.f32 %v5304_v61, 0.0  ;;  %7523 = vmatpush1.bf16.msra.mxu1 %v12281_v30 }
 0x51b   : > { %v5640_v53 = vpack.c.bf16 %v5540_v11, %v5538_v59  ;;  %7524 = vmatprep.subr.bf16.mxu1 %v12286_v35 }
 0x51c   : > { %v5307_v7 = vpop.f32.mrb[120].mxu0  ;;  %v5641_v41 = vpack.c.bf16 %v5541_v32, %v5539_v22 }
 0x51d   : > { %v5308_v26 = vadd.f32 %v5307_v7, %v15269_v24  ;;  %v5309_v55 = vpop.f32.mrb[121].mxu0 }
 0x51e   : > { %v5310_v50 = vadd.f32 %v5309_v55, %v15272_v38  ;;  %v5311_v27 = vpop.f32.mrb[122].mxu0  ;;  %6032 = vmatprep.mubr.bf16.mxu1 %v5641_v41  ;;  %7525 = vmatpush1.bf16.msra.mxu1 %v12284_v10 }
 0x51f   : > { %v5312_v28 = vadd.f32 %v5311_v27, %v15269_v24  ;;  %v5313_v33 = vpop.f32.mrb[123].mxu0  ;;  %6033 = vmatmul.mubr.bf16.gmra.mrb[52].mxu1 %v5640_v53  ;;  %v5542_v12 = vmax.f32 %v5308_v26, 0.0 }
 0x520   : > { %v5314_v31 = vadd.f32 %v5313_v33, %v15272_v38  ;;  %v5543_v20 = vmax.f32 %v5310_v50, 0.0 }
 0x521   : > { %v5544_v1 = vmax.f32 %v5312_v28, 0.0 }
 0x522   : > { %v5545_v8 = vmax.f32 %v5314_v31, 0.0 }
 0x523   : > { %v5642_v18 = vpack.c.bf16 %v5544_v1, %v5542_v12 }
 0x524   : > { %v5317_v62 = vpop.f32.mrb[124].mxu0  ;;  %v5643_v45 = vpack.c.bf16 %v5545_v8, %v5543_v20 }
 0x525   : > { %v5318_v60 = vadd.f32 %v5317_v62, %v15269_v24  ;;  %v5319_v51 = vpop.f32.mrb[125].mxu0 }
 0x526   : > { %v5320_v39 = vadd.f32 %v5319_v51, %v15272_v38  ;;  %v5321_v0 = vpop.f32.mrb[126].mxu0  ;;  %6042 = vmatprep.mubr.bf16.mxu1 %v5643_v45 }
 0x527   : > { %v5322_v4 = vadd.f32 %v5321_v0, %v15269_v24  ;;  %v5323_v3 = vpop.f32.mrb[127].mxu0  ;;  %6043 = vmatmul.mubr.bf16.gmra.mrb[56].mxu1 %v5642_v18  ;;  %v5546_v5 = vmax.f32 %v5318_v60, 0.0 }
 0x528   : > { %v5324_v16 = vadd.f32 %v5323_v3, %v15272_v38  ;;  %v5547_v56 = vmax.f32 %v5320_v39, 0.0 }
 0x529   : > { %v5548_v42 = vmax.f32 %v5322_v4, 0.0 }
 0x52a   : > { %v5549_v2 = vmax.f32 %v5324_v16, 0.0 }
 0x52b   : > { %v5644_v54 = vpack.c.bf16 %v5548_v42, %v5546_v5 }
 0x52c   : > { %v5327_v19 = vpop.f32.mrb[128].mxu0  ;;  %v5645_v23 = vpack.c.bf16 %v5549_v2, %v5547_v56 }
 0x52d   : > { %v5328_v17 = vadd.f32 %v5327_v19, %v15269_v24  ;;  %v5329_v15 = vpop.f32.mrb[129].mxu0 }
 0x52e   : > { %v5330_v36 = vadd.f32 %v5329_v15, %v15272_v38  ;;  %v5331_v37 = vpop.f32.mrb[130].mxu0  ;;  %6052 = vmatprep.mubr.bf16.mxu1 %v5645_v23 }
 0x52f   : > { %v5332_v21 = vadd.f32 %v5331_v37, %v15269_v24  ;;  %v5333_v44 = vpop.f32.mrb[131].mxu0  ;;  %6053 = vmatmul.mubr.bf16.gmra.mrb[60].mxu1 %v5644_v54  ;;  %v5550_v13 = vmax.f32 %v5328_v17, 0.0 }
 0x530   : > { %v5334_v49 = vadd.f32 %v5333_v44, %v15272_v38  ;;  %v5551_v29 = vmax.f32 %v5330_v36, 0.0 }
 0x531   : > { %v5552_v58 = vmax.f32 %v5332_v21, 0.0 }
 0x532   : > { %v5553_v40 = vmax.f32 %v5334_v49, 0.0 }
 0x533   : > { %v5646_v43 = vpack.c.bf16 %v5552_v58, %v5550_v13 }
 0x534   : > { %v5337_v25 = vpop.f32.mrb[132].mxu0  ;;  %v5647_v9 = vpack.c.bf16 %v5553_v40, %v5551_v29 }
 0x535   : > { %v5338_v14 = vadd.f32 %v5337_v25, %v15269_v24  ;;  %v5339_v34 = vpop.f32.mrb[133].mxu0 }
 0x536   : > { %v5340_v46 = vadd.f32 %v5339_v34, %v15272_v38  ;;  %v5341_v48 = vpop.f32.mrb[134].mxu0  ;;  %6062 = vmatprep.mubr.bf16.mxu1 %v5647_v9 }
 0x537   : > { %v5342_v6 = vadd.f32 %v5341_v48, %v15269_v24  ;;  %v5343_v63 = vpop.f32.mrb[135].mxu0  ;;  %6063 = vmatmul.mubr.bf16.gmra.mrb[64].mxu1 %v5646_v43  ;;  %v5554_v59 = vmax.f32 %v5338_v14, 0.0 }
 0x538   : > { %v5344_v61 = vadd.f32 %v5343_v63, %v15272_v38  ;;  %v5555_v22 = vmax.f32 %v5340_v46, 0.0 }
 0x539   : > { %v5556_v11 = vmax.f32 %v5342_v6, 0.0 }
 0x53a   : > { %v5557_v32 = vmax.f32 %v5344_v61, 0.0 }
 0x53b   : > { %v5648_v53 = vpack.c.bf16 %v5556_v11, %v5554_v59 }
 0x53c   : > { %v5347_v7 = vpop.f32.mrb[136].mxu0  ;;  %v5649_v41 = vpack.c.bf16 %v5557_v32, %v5555_v22 }
 0x53d   : > { %v5348_v26 = vadd.f32 %v5347_v7, %v15269_v24  ;;  %v5349_v55 = vpop.f32.mrb[137].mxu0 }
 0x53e   : > { %v5350_v50 = vadd.f32 %v5349_v55, %v15272_v38  ;;  %v5351_v27 = vpop.f32.mrb[138].mxu0  ;;  %6072 = vmatprep.mubr.bf16.mxu1 %v5649_v41 }
 0x53f   : > { %v5352_v28 = vadd.f32 %v5351_v27, %v15269_v24  ;;  %v5353_v33 = vpop.f32.mrb[139].mxu0  ;;  %6073 = vmatmul.mubr.bf16.gmra.mrb[68].mxu1 %v5648_v53  ;;  %v5558_v12 = vmax.f32 %v5348_v26, 0.0 }
 0x540   : > { %v5354_v31 = vadd.f32 %v5353_v33, %v15272_v38  ;;  %v5559_v20 = vmax.f32 %v5350_v50, 0.0 }
 0x541   : > { %v5560_v1 = vmax.f32 %v5352_v28, 0.0 }
 0x542   : > { %v5561_v8 = vmax.f32 %v5354_v31, 0.0 }
 0x543   : > { %v5650_v18 = vpack.c.bf16 %v5560_v1, %v5558_v12 }
 0x544   : > { %v5357_v62 = vpop.f32.mrb[140].mxu0  ;;  %v5651_v45 = vpack.c.bf16 %v5561_v8, %v5559_v20 }
 0x545   : > { %v5358_v60 = vadd.f32 %v5357_v62, %v15269_v24  ;;  %v5359_v51 = vpop.f32.mrb[141].mxu0 }
 0x546   : > { %v5360_v39 = vadd.f32 %v5359_v51, %v15272_v38  ;;  %v5361_v0 = vpop.f32.mrb[142].mxu0  ;;  %6082 = vmatprep.mubr.bf16.mxu1 %v5651_v45 }
 0x547   : > { %v5362_v4 = vadd.f32 %v5361_v0, %v15269_v24  ;;  %v5363_v3 = vpop.f32.mrb[143].mxu0  ;;  %6083 = vmatmul.mubr.bf16.gmra.mrb[72].mxu1 %v5650_v18  ;;  %v5562_v5 = vmax.f32 %v5358_v60, 0.0 }
 0x548   : > { %v5364_v16 = vadd.f32 %v5363_v3, %v15272_v38  ;;  %v5563_v56 = vmax.f32 %v5360_v39, 0.0 }
 0x549   : > { %v5564_v42 = vmax.f32 %v5362_v4, 0.0 }
 0x54a   : > { %v5565_v2 = vmax.f32 %v5364_v16, 0.0 }
 0x54b   : > { %v5652_v54 = vpack.c.bf16 %v5564_v42, %v5562_v5 }
 0x54c   : > { %v5367_v19 = vpop.f32.mrb[144].mxu0  ;;  %v5653_v23 = vpack.c.bf16 %v5565_v2, %v5563_v56 }
 0x54d   : > { %v5368_v17 = vadd.f32 %v5367_v19, %v15269_v24  ;;  %v5369_v15 = vpop.f32.mrb[145].mxu0 }
 0x54e   : > { %v5370_v36 = vadd.f32 %v5369_v15, %v15272_v38  ;;  %v5371_v37 = vpop.f32.mrb[146].mxu0  ;;  %6092 = vmatprep.mubr.bf16.mxu1 %v5653_v23 }
 0x54f   : > { %v5372_v21 = vadd.f32 %v5371_v37, %v15269_v24  ;;  %v5373_v44 = vpop.f32.mrb[147].mxu0  ;;  %6093 = vmatmul.mubr.bf16.gmra.mrb[76].mxu1 %v5652_v54  ;;  %v5566_v13 = vmax.f32 %v5368_v17, 0.0 }
 0x550   : > { %v5374_v49 = vadd.f32 %v5373_v44, %v15272_v38  ;;  %v5567_v29 = vmax.f32 %v5370_v36, 0.0 }
 0x551   : > { %v5568_v58 = vmax.f32 %v5372_v21, 0.0 }
 0x552   : > { %v5569_v40 = vmax.f32 %v5374_v49, 0.0 }
 0x553   : > { %v5654_v43 = vpack.c.bf16 %v5568_v58, %v5566_v13 }
 0x554   : > { %v5377_v25 = vpop.f32.mrb[148].mxu0  ;;  %v5655_v9 = vpack.c.bf16 %v5569_v40, %v5567_v29 }
 0x555   : > { %v5378_v14 = vadd.f32 %v5377_v25, %v15269_v24  ;;  %v5379_v34 = vpop.f32.mrb[149].mxu0 }
 0x556   : > { %v5380_v46 = vadd.f32 %v5379_v34, %v15272_v38  ;;  %v5381_v48 = vpop.f32.mrb[150].mxu0  ;;  %6102 = vmatprep.mubr.bf16.mxu1 %v5655_v9 }
 0x557   : > { %v5382_v6 = vadd.f32 %v5381_v48, %v15269_v24  ;;  %v5383_v63 = vpop.f32.mrb[151].mxu0  ;;  %6103 = vmatmul.mubr.bf16.gmra.mrb[80].mxu1 %v5654_v43  ;;  %v5570_v59 = vmax.f32 %v5378_v14, 0.0 }
 0x558   : > { %v5384_v61 = vadd.f32 %v5383_v63, %v15272_v38  ;;  %v5571_v22 = vmax.f32 %v5380_v46, 0.0 }
 0x559   : > { %v5572_v11 = vmax.f32 %v5382_v6, 0.0 }
 0x55a   : > { %v5573_v32 = vmax.f32 %v5384_v61, 0.0 }
 0x55b   : > { %v5656_v53 = vpack.c.bf16 %v5572_v11, %v5570_v59 }
 0x55c   : > { %v5387_v7 = vpop.f32.mrb[152].mxu0  ;;  %v5657_v41 = vpack.c.bf16 %v5573_v32, %v5571_v22 }
 0x55d   : > { %v5388_v26 = vadd.f32 %v5387_v7, %v15269_v24  ;;  %v5389_v55 = vpop.f32.mrb[153].mxu0 }
 0x55e   : > { %v5390_v50 = vadd.f32 %v5389_v55, %v15272_v38  ;;  %v5391_v27 = vpop.f32.mrb[154].mxu0  ;;  %6112 = vmatprep.mubr.bf16.mxu1 %v5657_v41 }
 0x55f   : > { %v5392_v28 = vadd.f32 %v5391_v27, %v15269_v24  ;;  %v5393_v33 = vpop.f32.mrb[155].mxu0  ;;  %6113 = vmatmul.mubr.bf16.gmra.mrb[84].mxu1 %v5656_v53  ;;  %v5574_v12 = vmax.f32 %v5388_v26, 0.0 }
 0x560   : > { %v5394_v31 = vadd.f32 %v5393_v33, %v15272_v38  ;;  %v5575_v20 = vmax.f32 %v5390_v50, 0.0 }
 0x561   : > { %v5576_v1 = vmax.f32 %v5392_v28, 0.0 }
 0x562   : > { %v5577_v8 = vmax.f32 %v5394_v31, 0.0 }
 0x563   : > { %v5658_v18 = vpack.c.bf16 %v5576_v1, %v5574_v12 }
 0x564   : > { %v5397_v62 = vpop.f32.mrb[156].mxu0  ;;  %v5659_v45 = vpack.c.bf16 %v5577_v8, %v5575_v20 }
 0x565   : > { %v5398_v60 = vadd.f32 %v5397_v62, %v15269_v24  ;;  %v5399_v51 = vpop.f32.mrb[157].mxu0 }
 0x566   : > { %v5400_v39 = vadd.f32 %v5399_v51, %v15272_v38  ;;  %v5401_v0 = vpop.f32.mrb[158].mxu0  ;;  %6122 = vmatprep.mubr.bf16.mxu1 %v5659_v45 }
 0x567   : > { %v5402_v4 = vadd.f32 %v5401_v0, %v15269_v24  ;;  %v5403_v3 = vpop.f32.mrb[159].mxu0  ;;  %6123 = vmatmul.mubr.bf16.gmra.mrb[88].mxu1 %v5658_v18  ;;  %v5578_v5 = vmax.f32 %v5398_v60, 0.0  ;;  %v6223_v60 = vld [vmem:[%s17394_s12] sm:$0x3] }
 0x568   : > { %v5404_v16 = vadd.f32 %v5403_v3, %v15272_v38  ;;  %v5579_v56 = vmax.f32 %v5400_v39, 0.0 }
 0x569   : > { %v5580_v42 = vmax.f32 %v5402_v4, 0.0  ;;  %v12289_v4 = vld [vmem:[%s17397_s15 + $0x94] ss:$8 sps:$4 sm:$0xff]  }
 0x56a   : > { %v5581_v2 = vmax.f32 %v5404_v16, 0.0  ;;  %7526 = vmatprep.subr.bf16.mxu1 %v12289_v4 }
 0x56b   : > { %v5660_v54 = vpack.c.bf16 %v5580_v42, %v5578_v5  ;;  %v15541_v5 = vrot.slane %v6223_v60, %v13214_v57  ;;  %7527 = vmatpush1.bf16.msra.mxu1 %v12287_v52 }
 0x56c   : > { %v5407_v19 = vpop.f32.mrb[160].mxu0  ;;  %v5661_v23 = vpack.c.bf16 %v5581_v2, %v5579_v56  ;;  %v15545_v56 = vrot.slane %v6223_v60, %v13191_v47  ;;  %v12292_v60 = vld [vmem:[%s17397_s15 + $0xa4] ss:$8 sps:$4 sm:$0xff]  }
 0x56d   : > { %v5408_v17 = vadd.f32 %v5407_v19, %v15269_v24  ;;  %v5409_v15 = vpop.f32.mrb[161].mxu0  ;;  %7528 = vmatprep.subr.bf16.mxu1 %v12292_v60  ;;  %v12295_v60 = vld [vmem:[%s17397_s15 + $0xb4] ss:$8 sps:$4 sm:$0xff]  }
 0x56e   : > { %v5410_v36 = vadd.f32 %v5409_v15, %v15272_v38  ;;  %v5411_v37 = vpop.f32.mrb[162].mxu0  ;;  %6132 = vmatprep.mubr.bf16.mxu1 %v5661_v23 }
 0x56f   : > { %v5412_v21 = vadd.f32 %v5411_v37, %v15269_v24  ;;  %v5413_v44 = vpop.f32.mrb[163].mxu0  ;;  %6133 = vmatmul.mubr.bf16.gmra.mrb[92].mxu1 %v5660_v54  ;;  %v5582_v13 = vmax.f32 %v5408_v17, 0.0 }
 0x570   : > { %v5414_v49 = vadd.f32 %v5413_v44, %v15272_v38  ;;  %v5583_v29 = vmax.f32 %v5410_v36, 0.0 }
 0x571   : > { %v5584_v58 = vmax.f32 %v5412_v21, 0.0 }
 0x572   : > { %v5585_v40 = vmax.f32 %v5414_v49, 0.0 }
 0x573   : > { %v5662_v43 = vpack.c.bf16 %v5584_v58, %v5582_v13 }
 0x574   : > { %v5417_v25 = vpop.f32.mrb[164].mxu0  ;;  %v5663_v9 = vpack.c.bf16 %v5585_v40, %v5583_v29 }
 0x575   : > { %v5418_v14 = vadd.f32 %v5417_v25, %v15269_v24  ;;  %v5419_v34 = vpop.f32.mrb[165].mxu0 }
 0x576   : > { %v5420_v46 = vadd.f32 %v5419_v34, %v15272_v38  ;;  %v5421_v48 = vpop.f32.mrb[166].mxu0  ;;  %6142 = vmatprep.mubr.bf16.mxu1 %v5663_v9 }
 0x577   : > { %v5422_v6 = vadd.f32 %v5421_v48, %v15269_v24  ;;  %v5423_v63 = vpop.f32.mrb[167].mxu0  ;;  %6143 = vmatmul.mubr.bf16.gmra.mrb[96].mxu1 %v5662_v43  ;;  %v5586_v59 = vmax.f32 %v5418_v14, 0.0 }
 0x578   : > { %v5424_v61 = vadd.f32 %v5423_v63, %v15272_v38  ;;  %v5587_v22 = vmax.f32 %v5420_v46, 0.0 }
 0x579   : > { %v5588_v11 = vmax.f32 %v5422_v6, 0.0 }
 0x57a   : > { %v5589_v32 = vmax.f32 %v5424_v61, 0.0 }
 0x57b   : > { %v5664_v53 = vpack.c.bf16 %v5588_v11, %v5586_v59 }
 0x57c   : > { %v5427_v7 = vpop.f32.mrb[168].mxu0  ;;  %v5665_v41 = vpack.c.bf16 %v5589_v32, %v5587_v22 }
 0x57d   : > { %v5428_v26 = vadd.f32 %v5427_v7, %v15269_v24  ;;  %v5429_v55 = vpop.f32.mrb[169].mxu0 }
 0x57e   : > { %v5430_v50 = vadd.f32 %v5429_v55, %v15272_v38  ;;  %v5431_v27 = vpop.f32.mrb[170].mxu0  ;;  %6152 = vmatprep.mubr.bf16.mxu1 %v5665_v41 }
 0x57f   : > { %v5432_v28 = vadd.f32 %v5431_v27, %v15269_v24  ;;  %v5433_v33 = vpop.f32.mrb[171].mxu0  ;;  %6153 = vmatmul.mubr.bf16.gmra.mrb[100].mxu1 %v5664_v53  ;;  %v5590_v12 = vmax.f32 %v5428_v26, 0.0 }
 0x580   : > { %v5434_v31 = vadd.f32 %v5433_v33, %v15272_v38  ;;  %v5591_v20 = vmax.f32 %v5430_v50, 0.0 }
 0x581   : > { %v5592_v1 = vmax.f32 %v5432_v28, 0.0 }
 0x582   : > { %v5593_v8 = vmax.f32 %v5434_v31, 0.0 }
 0x583   : > { %v5666_v18 = vpack.c.bf16 %v5592_v1, %v5590_v12 }
 0x584   : > { %v5437_v62 = vpop.f32.mrb[172].mxu0  ;;  %v5667_v45 = vpack.c.bf16 %v5593_v8, %v5591_v20 }
 0x585   : > { %v5438_v51 = vadd.f32 %v5437_v62, %v15269_v24  ;;  %v5439_v39 = vpop.f32.mrb[173].mxu0 }
 0x586   : > { %v5440_v0 = vadd.f32 %v5439_v39, %v15272_v38  ;;  %v5441_v30 = vpop.f32.mrb[174].mxu0  ;;  %6162 = vmatprep.mubr.bf16.mxu1 %v5667_v45  ;;  %v12290_v45 = vld [vmem:[%s17397_s15 + $0xa0] ss:$8 sps:$4 sm:$0xff]  }
 0x587   : > { %v5442_v3 = vadd.f32 %v5441_v30, %v15269_v24  ;;  %v5443_v16 = vpop.f32.mrb[175].mxu0  ;;  %6163 = vmatmul.mubr.bf16.gmra.mrb[104].mxu1 %v5666_v18  ;;  %v5594_v2 = vmax.f32 %v5438_v51, 0.0 }
 0x588   : > { %v5444_v42 = vadd.f32 %v5443_v16, %v15272_v38  ;;  %v5595_v19 = vmax.f32 %v5440_v0, 0.0  ;;  %7529 = vmatpush1.bf16.msra.mxu1 %v12290_v45  ;;  %v12293_v45 = vld [vmem:[%s17397_s15 + $0xb0] ss:$8 sps:$4 sm:$0xff]  }
 0x589   : > { %v5596_v54 = vmax.f32 %v5442_v3, 0.0  ;;  %v5904_v17 = vpop.f32.mrb[0].mxu1  ;;  %7530 = vmatprep.subr.bf16.mxu1 %v12295_v60 }
 0x58a   : > { %v5597_v23 = vmax.f32 %v5444_v42, 0.0  ;;  %v6235_v15 = vadd.f32 %v15541_v5, %v5904_v17  ;;  %v5906_v36 = vpop.f32.mrb[1].mxu1 }
 0x58b   : > { %v5668_v37 = vpack.c.bf16 %v5596_v54, %v5594_v2  ;;  %v6236_v21 = vadd.f32 %v15545_v56, %v5906_v36  ;;  %v5908_v49 = vpop.f32.mrb[2].mxu1 }
 0x58c   : > { %v5447_v44 = vpop.f32.mrb[176].mxu0  ;;  %v5669_v13 = vpack.c.bf16 %v5597_v23, %v5595_v19  ;;  %v6237_v29 = vadd.f32 %v15541_v5, %v5908_v49  ;;  %v5910_v43 = vpop.f32.mrb[3].mxu1  ;;  %v6363_v34 = vmax.f32 %v6235_v15, 0.0  ;;  %7531 = vmatpush1.bf16.msra.mxu1 %v12293_v45 }
 0x58d   : > { %v5448_v58 = vadd.f32 %v5447_v44, %v15269_v24  ;;  %v5449_v40 = vpop.f32.mrb[177].mxu0  ;;  %v6238_v9 = vadd.f32 %v15545_v56, %v5910_v43  ;;  %v6364_v35 = vmax.f32 %v6236_v21, 0.0 }
 0x58e   : > { %v5450_v25 = vadd.f32 %v5449_v40, %v15272_v38  ;;  %v5451_v14 = vpop.f32.mrb[178].mxu0  ;;  %6172 = vmatprep.mubr.bf16.mxu1 %v5669_v13  ;;  %v6365_v46 = vmax.f32 %v6237_v29, 0.0 }
 0x58f   : > { %v5452_v48 = vadd.f32 %v5451_v14, %v15269_v24  ;;  %v5453_v10 = vpop.f32.mrb[179].mxu0  ;;  %6173 = vmatmul.mubr.bf16.gmra.mrb[108].mxu1 %v5668_v37  ;;  %v6366_v6 = vmax.f32 %v6238_v9, 0.0  ;;  %v5598_v61 = vmax.f32 %v5448_v58, 0.0 }
 0x590   : > { %v5454_v63 = vadd.f32 %v5453_v10, %v15272_v38  ;;  %v6491_v59 = vpack.c.bf16 %v6365_v46, %v6363_v34  ;;  %v5599_v22 = vmax.f32 %v5450_v25, 0.0 }
 0x591   : > { %v5600_v11 = vmax.f32 %v5452_v48, 0.0  ;;  %v6492_v7 = vpack.c.bf16 %v6366_v6, %v6364_v35 }
 0x592   : > { %v5601_v32 = vmax.f32 %v5454_v63, 0.0  ;;  %v5914_v53 = vpop.f32.mrb[4].mxu1 }
 0x593   : > { %v6239_v41 = vadd.f32 %v15541_v5, %v5914_v53  ;;  %v5916_v26 = vpop.f32.mrb[5].mxu1  ;;  %v5670_v55 = vpack.c.bf16 %v5600_v11, %v5598_v61  ;;  %6791 = vmatprep.mubr.bf16.mxu0 %v6492_v7 }
 0x594   : > { %v6240_v50 = vadd.f32 %v15545_v56, %v5916_v26  ;;  %v5457_v27 = vpop.f32.mrb[180].mxu0  ;;  %v5918_v28 = vpop.f32.mrb[6].mxu1  ;;  %v5671_v33 = vpack.c.bf16 %v5601_v32, %v5599_v22  ;;  %6792 = vmatmul.mubr.bf16.vlgmr.msra.gmra.mrb[192].mxu0 %v6491_v59 }
 0x595   : > { %v5458_v31 = vadd.f32 %v5457_v27, %v15269_v24  ;;  %v6241_v12 = vadd.f32 %v15541_v5, %v5918_v28  ;;  %v5459_v1 = vpop.f32.mrb[181].mxu0  ;;  %v5920_v20 = vpop.f32.mrb[7].mxu1  ;;  %v6367_v51 = vmax.f32 %v6239_v41, 0.0 }
 0x596   : > { %v5460_v8 = vadd.f32 %v5459_v1, %v15272_v38  ;;  %v6242_v18 = vadd.f32 %v15545_v56, %v5920_v20  ;;  %v5461_v62 = vpop.f32.mrb[182].mxu0  ;;  %6182 = vmatprep.mubr.bf16.mxu1 %v5671_v33  ;;  %v6368_v52 = vmax.f32 %v6240_v50, 0.0 }
 0x597   : > { %v6369_v39 = vmax.f32 %v6241_v12, 0.0  ;;  %v5462_v0 = vadd.f32 %v5461_v62, %v15269_v24  ;;  %v5463_v30 = vpop.f32.mrb[183].mxu0  ;;  %6183 = vmatmul.mubr.bf16.gmra.mrb[112].mxu1 %v5670_v55  ;;  %v5602_v16 = vmax.f32 %v5458_v31, 0.0 }
 0x598   : > { %v6370_v4 = vmax.f32 %v6242_v18, 0.0  ;;  %v5464_v3 = vadd.f32 %v5463_v30, %v15272_v38  ;;  %v5603_v54 = vmax.f32 %v5460_v8, 0.0 }
 0x599   : > { %v6493_v42 = vpack.c.bf16 %v6369_v39, %v6367_v51  ;;  %v5604_v2 = vmax.f32 %v5462_v0, 0.0 }
 0x59a   : > { %v5605_v19 = vmax.f32 %v5464_v3, 0.0  ;;  %v5924_v23 = vpop.f32.mrb[8].mxu1  ;;  %v6494_v17 = vpack.c.bf16 %v6370_v4, %v6368_v52 }
 0x59b   : > { %v6243_v15 = vadd.f32 %v15541_v5, %v5924_v23  ;;  %v5926_v36 = vpop.f32.mrb[9].mxu1  ;;  %v5672_v37 = vpack.c.bf16 %v5604_v2, %v5602_v16 }
 0x59c   : > { %v6244_v21 = vadd.f32 %v15545_v56, %v5926_v36  ;;  %v5467_v44 = vpop.f32.mrb[184].mxu0  ;;  %v5928_v49 = vpop.f32.mrb[10].mxu1  ;;  %6801 = vmatprep.mubr.bf16.mxu0 %v6494_v17  ;;  %v5673_v13 = vpack.c.bf16 %v5605_v19, %v5603_v54 }
 0x59d   : > { %v5468_v58 = vadd.f32 %v5467_v44, %v15269_v24  ;;  %v6245_v29 = vadd.f32 %v15541_v5, %v5928_v49  ;;  %v5469_v40 = vpop.f32.mrb[185].mxu0  ;;  %v5930_v43 = vpop.f32.mrb[11].mxu1  ;;  %6802 = vmatmul.mubr.bf16.gmra.mrb[196].mxu0 %v6493_v42  ;;  %v6371_v34 = vmax.f32 %v6243_v15, 0.0 }
 0x59e   : > { %v5470_v25 = vadd.f32 %v5469_v40, %v15272_v38  ;;  %v6246_v9 = vadd.f32 %v15545_v56, %v5930_v43  ;;  %v5471_v14 = vpop.f32.mrb[186].mxu0  ;;  %6192 = vmatprep.mubr.bf16.mxu1 %v5673_v13  ;;  %v6372_v35 = vmax.f32 %v6244_v21, 0.0 }
 0x59f   : > { %v6373_v46 = vmax.f32 %v6245_v29, 0.0  ;;  %v5472_v48 = vadd.f32 %v5471_v14, %v15269_v24  ;;  %v5473_v10 = vpop.f32.mrb[187].mxu0  ;;  %6193 = vmatmul.mubr.bf16.gmra.mrb[116].mxu1 %v5672_v37  ;;  %v5606_v61 = vmax.f32 %v5468_v58, 0.0 }
 0x5a0   : > { %v6374_v6 = vmax.f32 %v6246_v9, 0.0  ;;  %v5474_v63 = vadd.f32 %v5473_v10, %v15272_v38  ;;  %v5607_v22 = vmax.f32 %v5470_v25, 0.0 }
 0x5a1   : > { %v6495_v59 = vpack.c.bf16 %v6373_v46, %v6371_v34  ;;  %v5608_v11 = vmax.f32 %v5472_v48, 0.0 }
 0x5a2   : > { %v5609_v32 = vmax.f32 %v5474_v63, 0.0  ;;  %v5934_v53 = vpop.f32.mrb[12].mxu1  ;;  %v6496_v7 = vpack.c.bf16 %v6374_v6, %v6372_v35 }
 0x5a3   : > { %v6247_v41 = vadd.f32 %v15541_v5, %v5934_v53  ;;  %v5936_v26 = vpop.f32.mrb[13].mxu1  ;;  %v5674_v55 = vpack.c.bf16 %v5608_v11, %v5606_v61  ;;  %v12296_v61 = vld [vmem:[%s17397_s15 + $0xc0] ss:$8 sps:$4 sm:$0xff]  }
 0x5a4   : > { %v6248_v50 = vadd.f32 %v15545_v56, %v5936_v26  ;;  %v5477_v27 = vpop.f32.mrb[188].mxu0  ;;  %v5938_v28 = vpop.f32.mrb[14].mxu1  ;;  %6811 = vmatprep.mubr.bf16.mxu0 %v6496_v7  ;;  %v5675_v33 = vpack.c.bf16 %v5609_v32, %v5607_v22 }
 0x5a5   : > { %v5478_v31 = vadd.f32 %v5477_v27, %v15269_v24  ;;  %v6249_v12 = vadd.f32 %v15541_v5, %v5938_v28  ;;  %v5479_v1 = vpop.f32.mrb[189].mxu0  ;;  %v5940_v20 = vpop.f32.mrb[15].mxu1  ;;  %6812 = vmatmul.mubr.bf16.gmra.mrb[200].mxu0 %v6495_v59  ;;  %v6375_v51 = vmax.f32 %v6247_v41, 0.0  ;;  %v12298_v59 = vld [vmem:[%s17397_s15 + $0xc4] ss:$8 sps:$4 sm:$0xff]  }
 0x5a6   : > { %v5480_v8 = vadd.f32 %v5479_v1, %v15272_v38  ;;  %v6250_v18 = vadd.f32 %v15545_v56, %v5940_v20  ;;  %v5481_v62 = vpop.f32.mrb[190].mxu0  ;;  %6202 = vmatprep.mubr.bf16.mxu1 %v5675_v33  ;;  %v6376_v52 = vmax.f32 %v6248_v50, 0.0  ;;  %7532 = vmatprep.subr.bf16.mxu1 %v12298_v59 }
 0x5a7   : > { %v6377_v39 = vmax.f32 %v6249_v12, 0.0  ;;  %v5482_v0 = vadd.f32 %v5481_v62, %v15269_v24  ;;  %v5483_v30 = vpop.f32.mrb[191].mxu0  ;;  %6203 = vmatmul.mubr.bf16.gmra.mrb[120].mxu1 %v5674_v55  ;;  %v5610_v16 = vmax.f32 %v5478_v31, 0.0 }
 0x5a8   : > { %v6378_v4 = vmax.f32 %v6250_v18, 0.0  ;;  %v5484_v3 = vadd.f32 %v5483_v30, %v15272_v38  ;;  %v5611_v54 = vmax.f32 %v5480_v8, 0.0  ;;  %7533 = vmatpush1.bf16.msra.mxu1 %v12296_v61 }
 0x5a9   : > { %v6497_v42 = vpack.c.bf16 %v6377_v39, %v6375_v51  ;;  %v5612_v2 = vmax.f32 %v5482_v0, 0.0 }
 0x5aa   : > { %v5613_v19 = vmax.f32 %v5484_v3, 0.0  ;;  %v5944_v23 = vpop.f32.mrb[16].mxu1  ;;  %v6498_v17 = vpack.c.bf16 %v6378_v4, %v6376_v52 }
 0x5ab   : > { %v6251_v15 = vadd.f32 %v15541_v5, %v5944_v23  ;;  %v5946_v36 = vpop.f32.mrb[17].mxu1  ;;  %v5676_v37 = vpack.c.bf16 %v5612_v2, %v5610_v16  ;;  %v12299_v16 = vld [vmem:[%s17397_s15 + $0xd0] ss:$8 sps:$4 sm:$0xff]  }
 0x5ac   : > { %v6252_v24 = vadd.f32 %v15545_v56, %v5946_v36  ;;  %v5948_v21 = vpop.f32.mrb[18].mxu1  ;;  %6821 = vmatprep.mubr.bf16.mxu0 %v6498_v17  ;;  %v5677_v44 = vpack.c.bf16 %v5613_v19, %v5611_v54 }
 0x5ad   : > { %v6253_v38 = vadd.f32 %v15541_v5, %v5948_v21  ;;  %v5950_v49 = vpop.f32.mrb[19].mxu1  ;;  %6822 = vmatmul.mubr.bf16.gmra.mrb[204].mxu0 %v6497_v42  ;;  %v6379_v58 = vmax.f32 %v6251_v15, 0.0  ;;  %v12301_v42 = vld [vmem:[%s17397_s15 + $0xd4] ss:$8 sps:$4 sm:$0xff]  }
 0x5ae   : > { %v6254_v13 = vadd.f32 %v15545_v56, %v5950_v49  ;;  %6212 = vmatprep.mubr.bf16.mxu1 %v5677_v44  ;;  %v6380_v40 = vmax.f32 %v6252_v24, 0.0  ;;  %7534 = vmatprep.subr.bf16.mxu1 %v12301_v42 }
 0x5af   : > { %v6381_v29 = vmax.f32 %v6253_v38, 0.0  ;;  %6213 = vmatmul.mubr.bf16.gmra.mrb[124].mxu1 %v5676_v37 }
 0x5b0   : > { %v6382_v43 = vmax.f32 %v6254_v13, 0.0  ;;  %7535 = vmatpush1.bf16.msra.mxu1 %v12299_v16 }
 0x5b1   : > { %v6499_v25 = vpack.c.bf16 %v6381_v29, %v6379_v58 }
 0x5b2   : > { %v5954_v9 = vpop.f32.mrb[20].mxu1  ;;  %v6500_v14 = vpack.c.bf16 %v6382_v43, %v6380_v40 }
 0x5b3   : > { %v6255_v34 = vadd.f32 %v15541_v5, %v5954_v9  ;;  %v5956_v46 = vpop.f32.mrb[21].mxu1  ;;  %v12302_v9 = vld [vmem:[%s17399_s17] ss:$12 sps:$4 sm:$0xff]  }
 0x5b4   : > { %v6256_v48 = vadd.f32 %v15545_v56, %v5956_v46  ;;  %v5958_v10 = vpop.f32.mrb[22].mxu1  ;;  %6831 = vmatprep.mubr.bf16.mxu0 %v6500_v14  ;;  %v12304_v14 = vld [vmem:[%s17399_s17 + $0x4] ss:$12 sps:$4 sm:$0xff]  }
 0x5b5   : > { %v6257_v35 = vadd.f32 %v15541_v5, %v5958_v10  ;;  %v5960_v6 = vpop.f32.mrb[23].mxu1  ;;  %6832 = vmatmul.mubr.bf16.gmra.mrb[208].mxu0 %v6499_v25  ;;  %v6383_v11 = vmax.f32 %v6255_v34, 0.0  ;;  %8390 = vmatprep.subr.bf16.mxu0 %v12304_v14 }
 0x5b6   : > { %v6258_v63 = vadd.f32 %v15545_v56, %v5960_v6  ;;  %v6384_v32 = vmax.f32 %v6256_v48, 0.0  ;;  %8391 = vmatpush1.bf16.msra.mxu0 %v12302_v9 }
 0x5b7   : > { %v6385_v22 = vmax.f32 %v6257_v35, 0.0 }
 0x5b8   : > { %v6386_v53 = vmax.f32 %v6258_v63, 0.0 }
 0x5b9   : > { %v6501_v7 = vpack.c.bf16 %v6385_v22, %v6383_v11  ;;  %v12305_v11 = vld [vmem:[%s17397_s15 + $0xe0] ss:$8 sps:$4 sm:$0xff]   ;;  %v12307_v22 = vld [vmem:[%s17397_s15 + $0xe4] ss:$8 sps:$4 sm:$0xff]  }
 0x5ba   : > { %v5964_v41 = vpop.f32.mrb[24].mxu1  ;;  %v6502_v26 = vpack.c.bf16 %v6386_v53, %v6384_v32  ;;  %7536 = vmatprep.subr.bf16.mxu1 %v12307_v22  ;;  %v12316_v22 = vld [vmem:[%s17399_s17 + $0x34] ss:$12 sps:$4 sm:$0xff]  }
 0x5bb   : > { %v6259_v55 = vadd.f32 %v15541_v5, %v5964_v41  ;;  %v5966_v50 = vpop.f32.mrb[25].mxu1  ;;  %7537 = vmatpush1.bf16.msra.mxu1 %v12305_v11  ;;  %v12314_v11 = vld [vmem:[%s17399_s17 + $0x30] ss:$12 sps:$4 sm:$0xff]  }
 0x5bc   : > { %v6260_v27 = vadd.f32 %v15545_v56, %v5966_v50  ;;  %v5968_v28 = vpop.f32.mrb[26].mxu1  ;;  %6841 = vmatprep.mubr.bf16.mxu0 %v6502_v26 }
 0x5bd   : > { %v6261_v33 = vadd.f32 %v15541_v5, %v5968_v28  ;;  %v5970_v31 = vpop.f32.mrb[27].mxu1  ;;  %6842 = vmatmul.mubr.bf16.gmra.mrb[212].mxu0 %v6501_v7  ;;  %v6387_v1 = vmax.f32 %v6259_v55, 0.0 }
 0x5be   : > { %v6262_v12 = vadd.f32 %v15545_v56, %v5970_v31  ;;  %v6388_v8 = vmax.f32 %v6260_v27, 0.0 }
 0x5bf   : > { %v6389_v20 = vmax.f32 %v6261_v33, 0.0 }
 0x5c0   : > { %v6390_v18 = vmax.f32 %v6262_v12, 0.0 }
 0x5c1   : > { %v6503_v62 = vpack.c.bf16 %v6389_v20, %v6387_v1 }
 0x5c2   : > { %v5974_v45 = vpop.f32.mrb[28].mxu1  ;;  %v6504_v60 = vpack.c.bf16 %v6390_v18, %v6388_v8 }
 0x5c3   : > { %v6263_v51 = vadd.f32 %v15541_v5, %v5974_v45  ;;  %v5976_v39 = vpop.f32.mrb[29].mxu1 }
 0x5c4   : > { %v6264_v0 = vadd.f32 %v15545_v56, %v5976_v39  ;;  %v5978_v30 = vpop.f32.mrb[30].mxu1  ;;  %6851 = vmatprep.mubr.bf16.mxu0 %v6504_v60  ;;  %v12310_v39 = vld [vmem:[%s17399_s17 + $0x1c] ss:$12 sps:$4 sm:$0xff]  }
 0x5c5   : > { %v6265_v52 = vadd.f32 %v15541_v5, %v5978_v30  ;;  %v5980_v4 = vpop.f32.mrb[31].mxu1  ;;  %6852 = vmatmul.mubr.bf16.gmra.mrb[216].mxu0 %v6503_v62  ;;  %v6391_v2 = vmax.f32 %v6263_v51, 0.0  ;;  %v12308_v51 = vld [vmem:[%s17399_s17 + $0x18] ss:$12 sps:$4 sm:$0xff]   ;;  %8392 = vmatprep.subr.bf16.mxu0 %v12310_v39 }
 0x5c6   : > { %v6266_v3 = vadd.f32 %v15545_v56, %v5980_v4  ;;  %v6392_v19 = vmax.f32 %v6264_v0, 0.0  ;;  %8393 = vmatpush1.bf16.msra.mxu0 %v12308_v51 }
 0x5c7   : > { %v6393_v54 = vmax.f32 %v6265_v52, 0.0  ;;  %8394 = vmatprep.subr.bf16.mxu0 %v12316_v22  ;;  %v12320_v22 = vld [vmem:[%s17399_s17 + $0x60] ss:$12 sps:$4 sm:$0xff]  }
 0x5c8   : > { %v6394_v23 = vmax.f32 %v6266_v3, 0.0 }
 0x5c9   : > { %v6505_v17 = vpack.c.bf16 %v6393_v54, %v6391_v2 }
 0x5ca   : > { %v5984_v15 = vpop.f32.mrb[32].mxu1  ;;  %v6506_v36 = vpack.c.bf16 %v6394_v23, %v6392_v19  ;;  %v12311_v19 = vld [vmem:[%s17397_s15 + $0xf0] ss:$8 sps:$4 sm:$0xff]   ;;  %v12313_v23 = vld [vmem:[%s17397_s15 + $0xf4] ss:$8 sps:$4 sm:$0xff]   ;;  %8395 = vmatpush1.bf16.msra.mxu0 %v12314_v11 }
 0x5cb   : > { %v6267_v37 = vadd.f32 %v15541_v5, %v5984_v15  ;;  %v5986_v24 = vpop.f32.mrb[33].mxu1  ;;  %7538 = vmatprep.subr.bf16.mxu1 %v12313_v23 }
 0x5cc   : > { %v6268_v21 = vadd.f32 %v15545_v56, %v5986_v24  ;;  %v5988_v44 = vpop.f32.mrb[34].mxu1  ;;  %6861 = vmatprep.mubr.bf16.mxu0 %v6506_v36  ;;  %7539 = vmatpush1.bf16.msra.mxu1 %v12311_v19 }
 0x5cd   : > { %v6269_v38 = vadd.f32 %v15541_v5, %v5988_v44  ;;  %v5990_v49 = vpop.f32.mrb[35].mxu1  ;;  %6862 = vmatmul.mubr.bf16.gmra.mrb[220].mxu0 %v6505_v17  ;;  %v6395_v58 = vmax.f32 %v6267_v37, 0.0 }
 0x5ce   : > { %v6270_v13 = vadd.f32 %v15545_v56, %v5990_v49  ;;  %v6396_v40 = vmax.f32 %v6268_v21, 0.0 }
 0x5cf   : > { %v6397_v29 = vmax.f32 %v6269_v38, 0.0  ;;  %v18038_v38 = vmov 0  }
 0x5d0   : > { %v6398_v43 = vmax.f32 %v6270_v13, 0.0  ;;  %8743 = vmatprep.subr.bf16.mxu1 %v18038_v38 }
 0x5d1   : > { %v6507_v25 = vpack.c.bf16 %v6397_v29, %v6395_v58 }
 0x5d2   : > { %v5994_v34 = vpop.f32.mrb[36].mxu1  ;;  %v6508_v46 = vpack.c.bf16 %v6398_v43, %v6396_v40 }
 0x5d3   : > { %v6271_v48 = vadd.f32 %v15541_v5, %v5994_v34  ;;  %v5996_v10 = vpop.f32.mrb[37].mxu1 }
 0x5d4   : > { %v6272_v35 = vadd.f32 %v15545_v56, %v5996_v10  ;;  %v5998_v6 = vpop.f32.mrb[38].mxu1  ;;  %6871 = vmatprep.mubr.bf16.mxu0 %v6508_v46 }
 0x5d5   : > { %v6273_v63 = vadd.f32 %v15541_v5, %v5998_v6  ;;  %v6000_v61 = vpop.f32.mrb[39].mxu1  ;;  %6872 = vmatmul.mubr.bf16.gmra.mrb[224].mxu0 %v6507_v25  ;;  %v6399_v32 = vmax.f32 %v6271_v48, 0.0 }
 0x5d6   : > { %v6274_v59 = vadd.f32 %v15545_v56, %v6000_v61  ;;  %v6400_v7 = vmax.f32 %v6272_v35, 0.0 }
 0x5d7   : > { %v6401_v53 = vmax.f32 %v6273_v63, 0.0 }
 0x5d8   : > { %v6402_v41 = vmax.f32 %v6274_v59, 0.0 }
 0x5d9   : > { %v6509_v26 = vpack.c.bf16 %v6401_v53, %v6399_v32 }
 0x5da   : > { %v6004_v55 = vpop.f32.mrb[40].mxu1  ;;  %v6510_v50 = vpack.c.bf16 %v6402_v41, %v6400_v7 }
 0x5db   : > { %v6275_v27 = vadd.f32 %v15541_v5, %v6004_v55  ;;  %v6006_v28 = vpop.f32.mrb[41].mxu1 }
 0x5dc   : > { %v6276_v33 = vadd.f32 %v15545_v56, %v6006_v28  ;;  %v6008_v31 = vpop.f32.mrb[42].mxu1  ;;  %6881 = vmatprep.mubr.bf16.mxu0 %v6510_v50 }
 0x5dd   : > { %v6277_v12 = vadd.f32 %v15541_v5, %v6008_v31  ;;  %v6010_v1 = vpop.f32.mrb[43].mxu1  ;;  %6882 = vmatmul.mubr.bf16.gmra.mrb[228].mxu0 %v6509_v26  ;;  %v6403_v8 = vmax.f32 %v6275_v27, 0.0 }
 0x5de   : > { %v6278_v20 = vadd.f32 %v15545_v56, %v6010_v1  ;;  %v6404_v62 = vmax.f32 %v6276_v33, 0.0 }
 0x5df   : > { %v6405_v18 = vmax.f32 %v6277_v12, 0.0 }
 0x5e0   : > { %v6406_v45 = vmax.f32 %v6278_v20, 0.0 }
 0x5e1   : > { %v6511_v60 = vpack.c.bf16 %v6405_v18, %v6403_v8 }
 0x5e2   : > { %v6014_v0 = vpop.f32.mrb[44].mxu1  ;;  %v6512_v30 = vpack.c.bf16 %v6406_v45, %v6404_v62 }
 0x5e3   : > { %v6279_v52 = vadd.f32 %v15541_v5, %v6014_v0  ;;  %v6016_v4 = vpop.f32.mrb[45].mxu1 }
 0x5e4   : > { %v6280_v3 = vadd.f32 %v15545_v56, %v6016_v4  ;;  %v6018_v16 = vpop.f32.mrb[46].mxu1  ;;  %6891 = vmatprep.mubr.bf16.mxu0 %v6512_v30 }
 0x5e5   : > { %v6281_v42 = vadd.f32 %v15541_v5, %v6018_v16  ;;  %v6020_v2 = vpop.f32.mrb[47].mxu1  ;;  %6892 = vmatmul.mubr.bf16.gmra.mrb[232].mxu0 %v6511_v60  ;;  %v6407_v17 = vmax.f32 %v6279_v52, 0.0 }
 0x5e6   : > { %v6282_v54 = vadd.f32 %v15545_v56, %v6020_v2  ;;  %v6408_v36 = vmax.f32 %v6280_v3, 0.0  ;;  %v12317_v2 = vld [vmem:[%s17399_s17 + $0x48] ss:$12 sps:$4 sm:$0xff]  }
 0x5e7   : > { %v6409_v15 = vmax.f32 %v6281_v42, 0.0 }
 0x5e8   : > { %v6410_v37 = vmax.f32 %v6282_v54, 0.0  ;;  %v12319_v54 = vld [vmem:[%s17399_s17 + $0x4c] ss:$12 sps:$4 sm:$0xff]  }
 0x5e9   : > { %v6513_v24 = vpack.c.bf16 %v6409_v15, %v6407_v17  ;;  %8396 = vmatprep.subr.bf16.mxu0 %v12319_v54  ;;  %v12323_v54 = vld [vmem:[%s17399_s17 + $0x78] ss:$12 sps:$4 sm:$0xff]  }
 0x5ea   : > { %v6024_v21 = vpop.f32.mrb[48].mxu1  ;;  %v6514_v44 = vpack.c.bf16 %v6410_v37, %v6408_v36  ;;  %8397 = vmatpush1.bf16.msra.mxu0 %v12317_v2 }
 0x5eb   : > { %v6283_v49 = vadd.f32 %v15541_v5, %v6024_v21  ;;  %v6026_v13 = vpop.f32.mrb[49].mxu1 }
 0x5ec   : > { %v6284_v58 = vadd.f32 %v15545_v56, %v6026_v13  ;;  %v6028_v29 = vpop.f32.mrb[50].mxu1  ;;  %6901 = vmatprep.mubr.bf16.mxu0 %v6514_v44 }
 0x5ed   : > { %v6285_v40 = vadd.f32 %v15541_v5, %v6028_v29  ;;  %v6030_v43 = vpop.f32.mrb[51].mxu1  ;;  %6902 = vmatmul.mubr.bf16.gmra.mrb[236].mxu0 %v6513_v24  ;;  %v6411_v9 = vmax.f32 %v6283_v49, 0.0 }
 0x5ee   : > { %v6286_v25 = vadd.f32 %v15545_v56, %v6030_v43  ;;  %v6412_v34 = vmax.f32 %v6284_v58, 0.0 }
 0x5ef   : > { %v6413_v14 = vmax.f32 %v6285_v40, 0.0 }
 0x5f0   : > { %v6414_v46 = vmax.f32 %v6286_v25, 0.0 }
 0x5f1   : > { %v6515_v48 = vpack.c.bf16 %v6413_v14, %v6411_v9 }
 0x5f2   : > { %v6034_v10 = vpop.f32.mrb[52].mxu1  ;;  %v6516_v35 = vpack.c.bf16 %v6414_v46, %v6412_v34 }
 0x5f3   : > { %v6287_v6 = vadd.f32 %v15541_v5, %v6034_v10  ;;  %v6036_v63 = vpop.f32.mrb[53].mxu1 }
 0x5f4   : > { %v6288_v61 = vadd.f32 %v15545_v56, %v6036_v63  ;;  %v6038_v59 = vpop.f32.mrb[54].mxu1  ;;  %6911 = vmatprep.mubr.bf16.mxu0 %v6516_v35 }
 0x5f5   : > { %v6289_v32 = vadd.f32 %v15541_v5, %v6038_v59  ;;  %v6040_v53 = vpop.f32.mrb[55].mxu1  ;;  %6912 = vmatmul.mubr.bf16.gmra.mrb[240].mxu0 %v6515_v48  ;;  %v6415_v41 = vmax.f32 %v6287_v6, 0.0 }
 0x5f6   : > { %v6290_v7 = vadd.f32 %v15545_v56, %v6040_v53  ;;  %v6416_v55 = vmax.f32 %v6288_v61, 0.0 }
 0x5f7   : > { %v6417_v26 = vmax.f32 %v6289_v32, 0.0  ;;  %v12322_v32 = vld [vmem:[%s17399_s17 + $0x64] ss:$12 sps:$4 sm:$0xff]  }
 0x5f8   : > { %v6418_v50 = vmax.f32 %v6290_v7, 0.0  ;;  %8398 = vmatprep.subr.bf16.mxu0 %v12322_v32  ;;  %v12326_v32 = vld [vmem:[%s17399_s17 + $0x90] ss:$12 sps:$4 sm:$0xff]  }
 0x5f9   : > { %v6517_v27 = vpack.c.bf16 %v6417_v26, %v6415_v41  ;;  %8399 = vmatpush1.bf16.msra.mxu0 %v12320_v22 }
 0x5fa   : > { %v6044_v28 = vpop.f32.mrb[56].mxu1  ;;  %v6518_v33 = vpack.c.bf16 %v6418_v50, %v6416_v55 }
 0x5fb   : > { %v6291_v31 = vadd.f32 %v15541_v5, %v6044_v28  ;;  %v6046_v12 = vpop.f32.mrb[57].mxu1 }
 0x5fc   : > { %v6292_v1 = vadd.f32 %v15545_v56, %v6046_v12  ;;  %v6048_v20 = vpop.f32.mrb[58].mxu1  ;;  %6921 = vmatprep.mubr.bf16.mxu0 %v6518_v33 }
 0x5fd   : > { %v6293_v8 = vadd.f32 %v15541_v5, %v6048_v20  ;;  %v6050_v18 = vpop.f32.mrb[59].mxu1  ;;  %6922 = vmatmul.mubr.bf16.gmra.mrb[244].mxu0 %v6517_v27  ;;  %v6419_v45 = vmax.f32 %v6291_v31, 0.0 }
 0x5fe   : > { %v6294_v62 = vadd.f32 %v15545_v56, %v6050_v18  ;;  %v6420_v51 = vmax.f32 %v6292_v1, 0.0 }
 0x5ff   : > { %v6421_v60 = vmax.f32 %v6293_v8, 0.0 }
 0x600   : > { %v6422_v39 = vmax.f32 %v6294_v62, 0.0 }
 0x601   : > { %v6519_v0 = vpack.c.bf16 %v6421_v60, %v6419_v45 }
 0x602   : > { %v6054_v30 = vpop.f32.mrb[60].mxu1  ;;  %v6520_v52 = vpack.c.bf16 %v6422_v39, %v6420_v51 }
 0x603   : > { %v6295_v4 = vadd.f32 %v15541_v5, %v6054_v30  ;;  %v6056_v3 = vpop.f32.mrb[61].mxu1 }
 0x604   : > { %v6296_v16 = vadd.f32 %v15545_v56, %v6056_v3  ;;  %v6058_v42 = vpop.f32.mrb[62].mxu1  ;;  %6931 = vmatprep.mubr.bf16.mxu0 %v6520_v52 }
 0x605   : > { %v6297_v19 = vadd.f32 %v15541_v5, %v6058_v42  ;;  %v6060_v23 = vpop.f32.mrb[63].mxu1  ;;  %6932 = vmatmul.mubr.bf16.gmra.mrb[248].mxu0 %v6519_v0  ;;  %v6423_v15 = vmax.f32 %v6295_v4, 0.0 }
 0x606   : > { %v6298_v17 = vadd.f32 %v15545_v56, %v6060_v23  ;;  %v6424_v37 = vmax.f32 %v6296_v16, 0.0 }
 0x607   : > { %v6425_v36 = vmax.f32 %v6297_v19, 0.0  ;;  %v12325_v19 = vld [vmem:[%s17399_s17 + $0x7c] ss:$12 sps:$4 sm:$0xff]  }
 0x608   : > { %v6426_v24 = vmax.f32 %v6298_v17, 0.0  ;;  %8400 = vmatprep.subr.bf16.mxu0 %v12325_v19  ;;  %v12329_v19 = vld [vmem:[%s17399_s17 + $0xa8] ss:$12 sps:$4 sm:$0xff]  }
 0x609   : > { %v6521_v21 = vpack.c.bf16 %v6425_v36, %v6423_v15  ;;  %8401 = vmatpush1.bf16.msra.mxu0 %v12323_v54 }
 0x60a   : > { %v6064_v44 = vpop.f32.mrb[64].mxu1  ;;  %v6522_v49 = vpack.c.bf16 %v6426_v24, %v6424_v37 }
 0x60b   : > { %v6299_v13 = vadd.f32 %v15541_v5, %v6064_v44  ;;  %v6066_v58 = vpop.f32.mrb[65].mxu1 }
 0x60c   : > { %v6300_v29 = vadd.f32 %v15545_v56, %v6066_v58  ;;  %v6068_v40 = vpop.f32.mrb[66].mxu1  ;;  %6941 = vmatprep.mubr.bf16.mxu0 %v6522_v49 }
 0x60d   : > { %v6301_v43 = vadd.f32 %v15541_v5, %v6068_v40  ;;  %v6070_v25 = vpop.f32.mrb[67].mxu1  ;;  %6942 = vmatmul.mubr.bf16.gmra.mrb[252].mxu0 %v6521_v21  ;;  %v6427_v14 = vmax.f32 %v6299_v13, 0.0 }
 0x60e   : > { %v6302_v9 = vadd.f32 %v15545_v56, %v6070_v25  ;;  %v6428_v46 = vmax.f32 %v6300_v29, 0.0 }
 0x60f   : > { %v6429_v34 = vmax.f32 %v6301_v43, 0.0 }
 0x610   : > { %v6430_v48 = vmax.f32 %v6302_v9, 0.0 }
 0x611   : > { %v6523_v10 = vpack.c.bf16 %v6429_v34, %v6427_v14 }
 0x612   : > { %v6074_v35 = vpop.f32.mrb[68].mxu1  ;;  %v6524_v6 = vpack.c.bf16 %v6430_v48, %v6428_v46 }
 0x613   : > { %v6303_v63 = vadd.f32 %v15541_v5, %v6074_v35  ;;  %v6076_v61 = vpop.f32.mrb[69].mxu1 }
 0x614   : > { %v6304_v59 = vadd.f32 %v15545_v56, %v6076_v61  ;;  %v6078_v11 = vpop.f32.mrb[70].mxu1  ;;  %6951 = vmatprep.mubr.bf16.mxu0 %v6524_v6 }
 0x615   : > { %v6305_v53 = vadd.f32 %v15541_v5, %v6078_v11  ;;  %v6080_v7 = vpop.f32.mrb[71].mxu1  ;;  %6952 = vmatmul.mubr.bf16.gmra.mrb[0].mxu0 %v6523_v10  ;;  %v6431_v26 = vmax.f32 %v6303_v63, 0.0 }
 0x616   : > { %v6306_v41 = vadd.f32 %v15545_v56, %v6080_v7  ;;  %v6432_v50 = vmax.f32 %v6304_v59, 0.0 }
 0x617   : > { %v6433_v55 = vmax.f32 %v6305_v53, 0.0  ;;  %v12328_v53 = vld [vmem:[%s17399_s17 + $0x94] ss:$12 sps:$4 sm:$0xff]  }
 0x618   : > { %v6434_v27 = vmax.f32 %v6306_v41, 0.0  ;;  %8402 = vmatprep.subr.bf16.mxu0 %v12328_v53  ;;  %v12332_v53 = vld [vmem:[%s17399_s17 + $0xc0] ss:$12 sps:$4 sm:$0xff]  }
 0x619   : > { %v6525_v28 = vpack.c.bf16 %v6433_v55, %v6431_v26  ;;  %8403 = vmatpush1.bf16.msra.mxu0 %v12326_v32 }
 0x61a   : > { %v6084_v33 = vpop.f32.mrb[72].mxu1  ;;  %v6526_v31 = vpack.c.bf16 %v6434_v27, %v6432_v50 }
 0x61b   : > { %v6307_v12 = vadd.f32 %v15541_v5, %v6084_v33  ;;  %v6086_v1 = vpop.f32.mrb[73].mxu1 }
 0x61c   : > { %v6308_v20 = vadd.f32 %v15545_v56, %v6086_v1  ;;  %v6088_v8 = vpop.f32.mrb[74].mxu1  ;;  %6961 = vmatprep.mubr.bf16.mxu0 %v6526_v31 }
 0x61d   : > { %v6309_v18 = vadd.f32 %v15541_v5, %v6088_v8  ;;  %v6090_v62 = vpop.f32.mrb[75].mxu1  ;;  %6962 = vmatmul.mubr.bf16.gmra.mrb[4].mxu0 %v6525_v28  ;;  %v6435_v60 = vmax.f32 %v6307_v12, 0.0 }
 0x61e   : > { %v6310_v45 = vadd.f32 %v15545_v56, %v6090_v62  ;;  %v6436_v39 = vmax.f32 %v6308_v20, 0.0 }
 0x61f   : > { %v6437_v51 = vmax.f32 %v6309_v18, 0.0 }
 0x620   : > { %v6438_v0 = vmax.f32 %v6310_v45, 0.0 }
 0x621   : > { %v6527_v30 = vpack.c.bf16 %v6437_v51, %v6435_v60 }
 0x622   : > { %v6094_v52 = vpop.f32.mrb[76].mxu1  ;;  %v6528_v4 = vpack.c.bf16 %v6438_v0, %v6436_v39 }
 0x623   : > { %v6311_v3 = vadd.f32 %v15541_v5, %v6094_v52  ;;  %v6096_v16 = vpop.f32.mrb[77].mxu1 }
 0x624   : > { %v6312_v42 = vadd.f32 %v15545_v56, %v6096_v16  ;;  %v6098_v2 = vpop.f32.mrb[78].mxu1  ;;  %6971 = vmatprep.mubr.bf16.mxu0 %v6528_v4 }
 0x625   : > { %v6313_v23 = vadd.f32 %v15541_v5, %v6098_v2  ;;  %v6100_v17 = vpop.f32.mrb[79].mxu1  ;;  %6972 = vmatmul.mubr.bf16.gmra.mrb[8].mxu0 %v6527_v30  ;;  %v6439_v36 = vmax.f32 %v6311_v3, 0.0 }
 0x626   : > { %v6314_v15 = vadd.f32 %v15545_v56, %v6100_v17  ;;  %v6440_v24 = vmax.f32 %v6312_v42, 0.0 }
 0x627   : > { %v6441_v37 = vmax.f32 %v6313_v23, 0.0  ;;  %v12331_v23 = vld [vmem:[%s17399_s17 + $0xac] ss:$12 sps:$4 sm:$0xff]  }
 0x628   : > { %v6442_v21 = vmax.f32 %v6314_v15, 0.0  ;;  %8404 = vmatprep.subr.bf16.mxu0 %v12331_v23 }
 0x629   : > { %v6529_v44 = vpack.c.bf16 %v6441_v37, %v6439_v36  ;;  %8405 = vmatpush1.bf16.msra.mxu0 %v12329_v19 }
 0x62a   : > { %v6104_v49 = vpop.f32.mrb[80].mxu1  ;;  %v6530_v13 = vpack.c.bf16 %v6442_v21, %v6440_v24 }
 0x62b   : > { %v6315_v58 = vadd.f32 %v15541_v5, %v6104_v49  ;;  %v6106_v29 = vpop.f32.mrb[81].mxu1 }
 0x62c   : > { %v6316_v40 = vadd.f32 %v15545_v56, %v6106_v29  ;;  %v6108_v43 = vpop.f32.mrb[82].mxu1  ;;  %6981 = vmatprep.mubr.bf16.mxu0 %v6530_v13 }
 0x62d   : > { %v6317_v25 = vadd.f32 %v15541_v5, %v6108_v43  ;;  %v6110_v9 = vpop.f32.mrb[83].mxu1  ;;  %6982 = vmatmul.mubr.bf16.gmra.mrb[12].mxu0 %v6529_v44  ;;  %v6443_v34 = vmax.f32 %v6315_v58, 0.0 }
 0x62e   : > { %v6318_v14 = vadd.f32 %v15545_v56, %v6110_v9  ;;  %v6444_v48 = vmax.f32 %v6316_v40, 0.0 }
 0x62f   : > { %v6445_v46 = vmax.f32 %v6317_v25, 0.0 }
 0x630   : > { %v6446_v10 = vmax.f32 %v6318_v14, 0.0 }
 0x631   : > { %v6531_v35 = vpack.c.bf16 %v6445_v46, %v6443_v34 }
 0x632   : > { %v6114_v6 = vpop.f32.mrb[84].mxu1  ;;  %v6532_v63 = vpack.c.bf16 %v6446_v10, %v6444_v48 }
 0x633   : > { %v6319_v61 = vadd.f32 %v15541_v5, %v6114_v6  ;;  %v6116_v59 = vpop.f32.mrb[85].mxu1 }
 0x634   : > { %v6320_v11 = vadd.f32 %v15545_v56, %v6116_v59  ;;  %v6118_v22 = vpop.f32.mrb[86].mxu1  ;;  %6991 = vmatprep.mubr.bf16.mxu0 %v6532_v63 }
 0x635   : > { %v6321_v7 = vadd.f32 %v15541_v5, %v6118_v22  ;;  %v6120_v41 = vpop.f32.mrb[87].mxu1  ;;  %6992 = vmatmul.mubr.bf16.gmra.mrb[16].mxu0 %v6531_v35  ;;  %v6447_v55 = vmax.f32 %v6319_v61, 0.0 }
 0x636   : > { %v6322_v26 = vadd.f32 %v15545_v56, %v6120_v41  ;;  %v6448_v27 = vmax.f32 %v6320_v11, 0.0 }
 0x637   : > { %v6449_v50 = vmax.f32 %v6321_v7, 0.0  ;;  %v12334_v7 = vld [vmem:[%s17399_s17 + $0xc4] ss:$12 sps:$4 sm:$0xff]  }
 0x638   : > { %v6450_v28 = vmax.f32 %v6322_v26, 0.0  ;;  %8406 = vmatprep.subr.bf16.mxu0 %v12334_v7 }
 0x639   : > { %v6533_v33 = vpack.c.bf16 %v6449_v50, %v6447_v55  ;;  %8407 = vmatpush1.bf16.msra.mxu0 %v12332_v53 }
 0x63a   : > { %v6124_v31 = vpop.f32.mrb[88].mxu1  ;;  %v6534_v12 = vpack.c.bf16 %v6450_v28, %v6448_v27 }
 0x63b   : > { %v6323_v1 = vadd.f32 %v15541_v5, %v6124_v31  ;;  %v6126_v20 = vpop.f32.mrb[89].mxu1 }
 0x63c   : > { %v6324_v8 = vadd.f32 %v15545_v56, %v6126_v20  ;;  %v6128_v18 = vpop.f32.mrb[90].mxu1  ;;  %7001 = vmatprep.mubr.bf16.mxu0 %v6534_v12 }
 0x63d   : > { %v6325_v62 = vadd.f32 %v15541_v5, %v6128_v18  ;;  %v6130_v45 = vpop.f32.mrb[91].mxu1  ;;  %7002 = vmatmul.mubr.bf16.gmra.mrb[20].mxu0 %v6533_v33  ;;  %v6451_v51 = vmax.f32 %v6323_v1, 0.0 }
 0x63e   : > { %v6326_v60 = vadd.f32 %v15545_v56, %v6130_v45  ;;  %v6452_v0 = vmax.f32 %v6324_v8, 0.0 }
 0x63f   : > { %v6453_v39 = vmax.f32 %v6325_v62, 0.0 }
 0x640   : > { %v6454_v30 = vmax.f32 %v6326_v60, 0.0 }
 0x641   : > { %v6535_v52 = vpack.c.bf16 %v6453_v39, %v6451_v51 }
 0x642   : > { %v6134_v4 = vpop.f32.mrb[92].mxu1  ;;  %v6536_v3 = vpack.c.bf16 %v6454_v30, %v6452_v0 }
 0x643   : > { %v6327_v16 = vadd.f32 %v15541_v5, %v6134_v4  ;;  %v6136_v42 = vpop.f32.mrb[93].mxu1 }
 0x644   : > { %v6328_v2 = vadd.f32 %v15545_v56, %v6136_v42  ;;  %v6138_v54 = vpop.f32.mrb[94].mxu1  ;;  %7011 = vmatprep.mubr.bf16.mxu0 %v6536_v3  ;;  %v6587_v42 = vld [vmem:[%s17396_s14] sm:$0x3] }
 0x645   : > { %v6329_v17 = vadd.f32 %v15541_v5, %v6138_v54  ;;  %v6140_v15 = vpop.f32.mrb[95].mxu1  ;;  %7012 = vmatmul.mubr.bf16.gmra.mrb[24].mxu0 %v6535_v52  ;;  %v6455_v37 = vmax.f32 %v6327_v16, 0.0 }
 0x646   : > { %v6330_v36 = vadd.f32 %v15545_v56, %v6140_v15  ;;  %v6456_v21 = vmax.f32 %v6328_v2, 0.0  ;;  %v12337_v15 = vld [vmem:[%s17399_s17 + $0xdc] ss:$12 sps:$4 sm:$0xff]  }
 0x647   : > { %v6457_v24 = vmax.f32 %v6329_v17, 0.0  ;;  %v12335_v17 = vld [vmem:[%s17399_s17 + $0xd8] ss:$12 sps:$4 sm:$0xff]   ;;  %8408 = vmatprep.subr.bf16.mxu0 %v12337_v15 }
 0x648   : > { %v6458_v44 = vmax.f32 %v6330_v36, 0.0  ;;  %8409 = vmatpush1.bf16.msra.mxu0 %v12335_v17 }
 0x649   : > { %v6537_v49 = vpack.c.bf16 %v6457_v24, %v6455_v37  ;;  %v15775_v24 = vrot.slane %v6587_v42, %v13214_v57 }
 0x64a   : > { %v6144_v13 = vpop.f32.mrb[96].mxu1  ;;  %v6538_v58 = vpack.c.bf16 %v6458_v44, %v6456_v21  ;;  %v15779_v44 = vrot.slane %v6587_v42, %v13191_v47  ;;  %v12338_v42 = vld [vmem:[%s17399_s17 + $0xf0] ss:$12 sps:$4 sm:$0xff]  }
 0x64b   : > { %v6331_v29 = vadd.f32 %v15541_v5, %v6144_v13  ;;  %v6146_v40 = vpop.f32.mrb[97].mxu1 }
 0x64c   : > { %v6332_v43 = vadd.f32 %v15545_v56, %v6146_v40  ;;  %v6148_v25 = vpop.f32.mrb[98].mxu1  ;;  %7021 = vmatprep.mubr.bf16.mxu0 %v6538_v58 }
 0x64d   : > { %v6333_v9 = vadd.f32 %v15541_v5, %v6148_v25  ;;  %v6150_v14 = vpop.f32.mrb[99].mxu1  ;;  %7022 = vmatmul.mubr.bf16.gmra.mrb[28].mxu0 %v6537_v49  ;;  %v6459_v46 = vmax.f32 %v6331_v29, 0.0 }
 0x64e   : > { %v6334_v34 = vadd.f32 %v15545_v56, %v6150_v14  ;;  %v6460_v10 = vmax.f32 %v6332_v43, 0.0 }
 0x64f   : > { %v6461_v48 = vmax.f32 %v6333_v9, 0.0 }
 0x650   : > { %v6462_v35 = vmax.f32 %v6334_v34, 0.0 }
 0x651   : > { %v6539_v6 = vpack.c.bf16 %v6461_v48, %v6459_v46 }
 0x652   : > { %v6154_v63 = vpop.f32.mrb[100].mxu1  ;;  %v6540_v61 = vpack.c.bf16 %v6462_v35, %v6460_v10 }
 0x653   : > { %v6335_v59 = vadd.f32 %v15541_v5, %v6154_v63  ;;  %v6156_v11 = vpop.f32.mrb[101].mxu1 }
 0x654   : > { %v6336_v22 = vadd.f32 %v15545_v56, %v6156_v11  ;;  %v6158_v32 = vpop.f32.mrb[102].mxu1  ;;  %7031 = vmatprep.mubr.bf16.mxu0 %v6540_v61 }
 0x655   : > { %v6337_v41 = vadd.f32 %v15541_v5, %v6158_v32  ;;  %v6160_v26 = vpop.f32.mrb[103].mxu1  ;;  %7032 = vmatmul.mubr.bf16.gmra.mrb[32].mxu0 %v6539_v6  ;;  %v6463_v50 = vmax.f32 %v6335_v59, 0.0 }
 0x656   : > { %v6338_v55 = vadd.f32 %v15545_v56, %v6160_v26  ;;  %v6464_v28 = vmax.f32 %v6336_v22, 0.0 }
 0x657   : > { %v6465_v27 = vmax.f32 %v6337_v41, 0.0 }
 0x658   : > { %v6466_v33 = vmax.f32 %v6338_v55, 0.0 }
 0x659   : > { %v6541_v31 = vpack.c.bf16 %v6465_v27, %v6463_v50 }
 0x65a   : > { %v6164_v12 = vpop.f32.mrb[104].mxu1  ;;  %v6542_v1 = vpack.c.bf16 %v6466_v33, %v6464_v28 }
 0x65b   : > { %v6339_v20 = vadd.f32 %v15541_v5, %v6164_v12  ;;  %v6166_v8 = vpop.f32.mrb[105].mxu1 }
 0x65c   : > { %v6340_v18 = vadd.f32 %v15545_v56, %v6166_v8  ;;  %v6168_v62 = vpop.f32.mrb[106].mxu1  ;;  %7041 = vmatprep.mubr.bf16.mxu0 %v6542_v1 }
 0x65d   : > { %v6341_v45 = vadd.f32 %v15541_v5, %v6168_v62  ;;  %v6170_v60 = vpop.f32.mrb[107].mxu1  ;;  %7042 = vmatmul.mubr.bf16.gmra.mrb[36].mxu0 %v6541_v31  ;;  %v6467_v39 = vmax.f32 %v6339_v20, 0.0 }
 0x65e   : > { %v6342_v51 = vadd.f32 %v15545_v56, %v6170_v60  ;;  %v6468_v30 = vmax.f32 %v6340_v18, 0.0 }
 0x65f   : > { %v6469_v0 = vmax.f32 %v6341_v45, 0.0 }
 0x660   : > { %v6470_v52 = vmax.f32 %v6342_v51, 0.0 }
 0x661   : > { %v6543_v4 = vpack.c.bf16 %v6469_v0, %v6467_v39 }
 0x662   : > { %v6174_v3 = vpop.f32.mrb[108].mxu1  ;;  %v6544_v16 = vpack.c.bf16 %v6470_v52, %v6468_v30 }
 0x663   : > { %v6343_v2 = vadd.f32 %v15541_v5, %v6174_v3  ;;  %v6176_v54 = vpop.f32.mrb[109].mxu1 }
 0x664   : > { %v6344_v19 = vadd.f32 %v15545_v56, %v6176_v54  ;;  %v6178_v23 = vpop.f32.mrb[110].mxu1  ;;  %7051 = vmatprep.mubr.bf16.mxu0 %v6544_v16 }
 0x665   : > { %v6345_v36 = vadd.f32 %v15541_v5, %v6178_v23  ;;  %v6180_v37 = vpop.f32.mrb[111].mxu1  ;;  %7052 = vmatmul.mubr.bf16.gmra.mrb[40].mxu0 %v6543_v4  ;;  %v6471_v49 = vmax.f32 %v6343_v2, 0.0  ;;  %v12340_v2 = vld [vmem:[%s17399_s17 + $0xf4] ss:$12 sps:$4 sm:$0xff]  }
 0x666   : > { %v6346_v21 = vadd.f32 %v15545_v56, %v6180_v37  ;;  %v6472_v58 = vmax.f32 %v6344_v19, 0.0  ;;  %8410 = vmatprep.subr.bf16.mxu0 %v12340_v2  ;;  %v12341_v2 = vld [vmem:[%s17399_s17 + $0x108] ss:$12 sps:$4 sm:$0xff]  }
 0x667   : > { %v6473_v13 = vmax.f32 %v6345_v36, 0.0  ;;  %v6793_v40 = vpop.f32.mrb[192].mxu0  ;;  %8411 = vmatpush1.bf16.msra.mxu0 %v12338_v42 }
 0x668   : > { %v6474_v29 = vmax.f32 %v6346_v21, 0.0  ;;  %v6794_v25 = vadd.f32 %v6793_v40, %v15775_v24  ;;  %v6795_v9 = vpop.f32.mrb[193].mxu0 }
 0x669   : > { %v6545_v43 = vpack.c.bf16 %v6473_v13, %v6471_v49  ;;  %v6796_v14 = vadd.f32 %v6795_v9, %v15779_v44  ;;  %v6797_v46 = vpop.f32.mrb[194].mxu0 }
 0x66a   : > { %v6184_v34 = vpop.f32.mrb[112].mxu1  ;;  %v6546_v48 = vpack.c.bf16 %v6474_v29, %v6472_v58  ;;  %v6798_v35 = vadd.f32 %v6797_v46, %v15775_v24  ;;  %v6799_v63 = vpop.f32.mrb[195].mxu0  ;;  %v7112_v22 = vmax.f32 %v6794_v25, 0.0 }
 0x66b   : > { %v6347_v10 = vadd.f32 %v15541_v5, %v6184_v34  ;;  %v6186_v6 = vpop.f32.mrb[113].mxu1  ;;  %v6800_v59 = vadd.f32 %v6799_v63, %v15779_v44  ;;  %v7113_v41 = vmax.f32 %v6796_v14, 0.0 }
 0x66c   : > { %v6348_v61 = vadd.f32 %v15545_v56, %v6186_v6  ;;  %v6188_v11 = vpop.f32.mrb[114].mxu1  ;;  %7061 = vmatprep.mubr.bf16.mxu0 %v6546_v48  ;;  %v7114_v32 = vmax.f32 %v6798_v35, 0.0 }
 0x66d   : > { %v6349_v53 = vadd.f32 %v15541_v5, %v6188_v11  ;;  %v6190_v7 = vpop.f32.mrb[115].mxu1  ;;  %7062 = vmatmul.mubr.bf16.gmra.mrb[44].mxu0 %v6545_v43  ;;  %v7115_v26 = vmax.f32 %v6800_v59, 0.0  ;;  %v6475_v50 = vmax.f32 %v6347_v10, 0.0 }
 0x66e   : > { %v6350_v55 = vadd.f32 %v15545_v56, %v6190_v7  ;;  %v7240_v27 = vpack.c.bf16 %v7114_v32, %v7112_v22  ;;  %v6476_v33 = vmax.f32 %v6348_v61, 0.0 }
 0x66f   : > { %v6477_v28 = vmax.f32 %v6349_v53, 0.0  ;;  %v7241_v1 = vpack.c.bf16 %v7115_v26, %v7113_v41 }
 0x670   : > { %v6478_v31 = vmax.f32 %v6350_v55, 0.0  ;;  %v6803_v12 = vpop.f32.mrb[196].mxu0 }
 0x671   : > { %v6547_v20 = vpack.c.bf16 %v6477_v28, %v6475_v50  ;;  %v6804_v8 = vadd.f32 %v6803_v12, %v15775_v24  ;;  %v6805_v18 = vpop.f32.mrb[197].mxu0  ;;  %7540 = vmatprep.mubr.bf16.mxu1 %v7241_v1 }
 0x672   : > { %v6806_v62 = vadd.f32 %v6805_v18, %v15779_v44  ;;  %v6194_v45 = vpop.f32.mrb[116].mxu1  ;;  %v6807_v60 = vpop.f32.mrb[198].mxu0  ;;  %v6548_v51 = vpack.c.bf16 %v6478_v31, %v6476_v33  ;;  %7541 = vmatmul.mubr.bf16.vlgmr.msra.gmra.mrb[128].mxu1 %v7240_v27 }
 0x673   : > { %v6351_v39 = vadd.f32 %v15541_v5, %v6194_v45  ;;  %v6808_v0 = vadd.f32 %v6807_v60, %v15775_v24  ;;  %v6196_v30 = vpop.f32.mrb[117].mxu1  ;;  %v6809_v52 = vpop.f32.mrb[199].mxu0  ;;  %v7116_v54 = vmax.f32 %v6804_v8, 0.0 }
 0x674   : > { %v6352_v4 = vadd.f32 %v15545_v56, %v6196_v30  ;;  %v6810_v3 = vadd.f32 %v6809_v52, %v15779_v44  ;;  %v6198_v16 = vpop.f32.mrb[118].mxu1  ;;  %7071 = vmatprep.mubr.bf16.mxu0 %v6548_v51  ;;  %v7117_v15 = vmax.f32 %v6806_v62, 0.0 }
 0x675   : > { %v7118_v19 = vmax.f32 %v6808_v0, 0.0  ;;  %v6353_v23 = vadd.f32 %v15541_v5, %v6198_v16  ;;  %v6200_v17 = vpop.f32.mrb[119].mxu1  ;;  %7072 = vmatmul.mubr.bf16.gmra.mrb[48].mxu0 %v6547_v20  ;;  %v6479_v21 = vmax.f32 %v6351_v39, 0.0 }
 0x676   : > { %v7119_v36 = vmax.f32 %v6810_v3, 0.0  ;;  %v6354_v37 = vadd.f32 %v15545_v56, %v6200_v17  ;;  %v6480_v58 = vmax.f32 %v6352_v4, 0.0 }
 0x677   : > { %v7242_v49 = vpack.c.bf16 %v7118_v19, %v7116_v54  ;;  %v6481_v13 = vmax.f32 %v6353_v23, 0.0  ;;  %v12343_v54 = vld [vmem:[%s17399_s17 + $0x10c] ss:$12 sps:$4 sm:$0xff]  }
 0x678   : > { %v6482_v29 = vmax.f32 %v6354_v37, 0.0  ;;  %v6813_v40 = vpop.f32.mrb[200].mxu0  ;;  %v7243_v43 = vpack.c.bf16 %v7119_v36, %v7117_v15  ;;  %8412 = vmatprep.subr.bf16.mxu0 %v12343_v54 }
 0x679   : > { %v6549_v25 = vpack.c.bf16 %v6481_v13, %v6479_v21  ;;  %v6814_v9 = vadd.f32 %v6813_v40, %v15775_v24  ;;  %v6815_v14 = vpop.f32.mrb[201].mxu0  ;;  %8413 = vmatpush1.bf16.msra.mxu0 %v12341_v2 }
 0x67a   : > { %v6816_v34 = vadd.f32 %v6815_v14, %v15779_v44  ;;  %v6204_v46 = vpop.f32.mrb[120].mxu1  ;;  %v6817_v48 = vpop.f32.mrb[202].mxu0  ;;  %7550 = vmatprep.mubr.bf16.mxu1 %v7243_v43  ;;  %v6550_v10 = vpack.c.bf16 %v6482_v29, %v6480_v58 }
 0x67b   : > { %v6355_v35 = vadd.f32 %v15541_v5, %v6204_v46  ;;  %v6818_v6 = vadd.f32 %v6817_v48, %v15775_v24  ;;  %v6206_v63 = vpop.f32.mrb[121].mxu1  ;;  %v6819_v61 = vpop.f32.mrb[203].mxu0  ;;  %7551 = vmatmul.mubr.bf16.gmra.mrb[132].mxu1 %v7242_v49  ;;  %v7120_v32 = vmax.f32 %v6814_v9, 0.0 }
 0x67c   : > { %v6356_v59 = vadd.f32 %v15545_v56, %v6206_v63  ;;  %v6820_v11 = vadd.f32 %v6819_v61, %v15779_v44  ;;  %v6208_v22 = vpop.f32.mrb[122].mxu1  ;;  %7081 = vmatprep.mubr.bf16.mxu0 %v6550_v10  ;;  %v7121_v26 = vmax.f32 %v6816_v34, 0.0 }
 0x67d   : > { %v7122_v53 = vmax.f32 %v6818_v6, 0.0  ;;  %v6357_v7 = vadd.f32 %v15541_v5, %v6208_v22  ;;  %v6210_v41 = vpop.f32.mrb[123].mxu1  ;;  %7082 = vmatmul.mubr.bf16.gmra.mrb[52].mxu0 %v6549_v25  ;;  %v6483_v27 = vmax.f32 %v6355_v35, 0.0 }
 0x67e   : > { %v7123_v55 = vmax.f32 %v6820_v11, 0.0  ;;  %v6358_v50 = vadd.f32 %v15545_v56, %v6210_v41  ;;  %v6484_v31 = vmax.f32 %v6356_v59, 0.0 }
 0x67f   : > { %v7244_v28 = vpack.c.bf16 %v7122_v53, %v7120_v32  ;;  %v6485_v33 = vmax.f32 %v6357_v7, 0.0 }
 0x680   : > { %v6486_v12 = vmax.f32 %v6358_v50, 0.0  ;;  %v6823_v1 = vpop.f32.mrb[204].mxu0  ;;  %v7245_v20 = vpack.c.bf16 %v7123_v55, %v7121_v26 }
 0x681   : > { %v6551_v8 = vpack.c.bf16 %v6485_v33, %v6483_v27  ;;  %v6824_v18 = vadd.f32 %v6823_v1, %v15775_v24  ;;  %v6825_v62 = vpop.f32.mrb[205].mxu0  ;;  %v12346_v33 = vld [vmem:[%s17399_s17 + $0x124] ss:$12 sps:$4 sm:$0xff]  }
 0x682   : > { %v6826_v45 = vadd.f32 %v6825_v62, %v15779_v44  ;;  %v6214_v60 = vpop.f32.mrb[124].mxu1  ;;  %v6827_v51 = vpop.f32.mrb[206].mxu0  ;;  %7560 = vmatprep.mubr.bf16.mxu1 %v7245_v20  ;;  %v6552_v39 = vpack.c.bf16 %v6486_v12, %v6484_v31  ;;  %8414 = vmatprep.subr.bf16.mxu0 %v12346_v33 }
 0x683   : > { %v6359_v0 = vadd.f32 %v15541_v5, %v6214_v60  ;;  %v6828_v30 = vadd.f32 %v6827_v51, %v15775_v24  ;;  %v6216_v52 = vpop.f32.mrb[125].mxu1  ;;  %v6829_v4 = vpop.f32.mrb[207].mxu0  ;;  %7561 = vmatmul.mubr.bf16.gmra.mrb[136].mxu1 %v7244_v28  ;;  %v7124_v19 = vmax.f32 %v6824_v18, 0.0  ;;  %v12344_v28 = vld [vmem:[%s17399_s17 + $0x120] ss:$12 sps:$4 sm:$0xff]  }
 0x684   : > { %v6360_v3 = vadd.f32 %v15545_v56, %v6216_v52  ;;  %v6830_v16 = vadd.f32 %v6829_v4, %v15779_v44  ;;  %v6218_v42 = vpop.f32.mrb[126].mxu1  ;;  %7091 = vmatprep.mubr.bf16.mxu0 %v6552_v39  ;;  %v7125_v36 = vmax.f32 %v6826_v45, 0.0  ;;  %8415 = vmatpush1.bf16.msra.mxu0 %v12344_v28 }
 0x685   : > { %v7126_v23 = vmax.f32 %v6828_v30, 0.0  ;;  %v6361_v17 = vadd.f32 %v15541_v5, %v6218_v42  ;;  %v6220_v15 = vpop.f32.mrb[127].mxu1  ;;  %7092 = vmatmul.mubr.bf16.gmra.mrb[56].mxu0 %v6551_v8  ;;  %v6487_v49 = vmax.f32 %v6359_v0, 0.0 }
 0x686   : > { %v7127_v37 = vmax.f32 %v6830_v16, 0.0  ;;  %v6362_v21 = vadd.f32 %v15545_v56, %v6220_v15  ;;  %v6488_v29 = vmax.f32 %v6360_v3, 0.0 }
 0x687   : > { %v7246_v13 = vpack.c.bf16 %v7126_v23, %v7124_v19  ;;  %v6489_v58 = vmax.f32 %v6361_v17, 0.0 }
 0x688   : > { %v6490_v40 = vmax.f32 %v6362_v21, 0.0  ;;  %v6833_v43 = vpop.f32.mrb[208].mxu0  ;;  %v7247_v25 = vpack.c.bf16 %v7127_v37, %v7125_v36 }
 0x689   : > { %v6553_v9 = vpack.c.bf16 %v6489_v58, %v6487_v49  ;;  %v6834_v14 = vadd.f32 %v6833_v43, %v15775_v24  ;;  %v6835_v34 = vpop.f32.mrb[209].mxu0  ;;  %v12349_v58 = vld [vmem:[%s17399_s17 + $0x13c] ss:$12 sps:$4 sm:$0xff]  }
 0x68a   : > { %v6836_v5 = vadd.f32 %v6835_v34, %v15779_v44  ;;  %v6837_v46 = vpop.f32.mrb[210].mxu0  ;;  %7570 = vmatprep.mubr.bf16.mxu1 %v7247_v25  ;;  %v6554_v48 = vpack.c.bf16 %v6490_v40, %v6488_v29  ;;  %8416 = vmatprep.subr.bf16.mxu0 %v12349_v58 }
 0x68b   : > { %v6838_v56 = vadd.f32 %v6837_v46, %v15775_v24  ;;  %v6839_v10 = vpop.f32.mrb[211].mxu0  ;;  %7571 = vmatmul.mubr.bf16.gmra.mrb[140].mxu1 %v7246_v13  ;;  %v7128_v6 = vmax.f32 %v6834_v14, 0.0  ;;  %v12347_v13 = vld [vmem:[%s17399_s17 + $0x138] ss:$12 sps:$4 sm:$0xff]  }
 0x68c   : > { %v6840_v35 = vadd.f32 %v6839_v10, %v15779_v44  ;;  %7101 = vmatprep.mubr.bf16.mxu0 %v6554_v48  ;;  %v7129_v61 = vmax.f32 %v6836_v5, 0.0  ;;  %8417 = vmatpush1.bf16.msra.mxu0 %v12347_v13 }
 0x68d   : > { %v7130_v63 = vmax.f32 %v6838_v56, 0.0  ;;  %7102 = vmatmul.mubr.bf16.gmra.mrb[60].mxu0 %v6553_v9 }
 0x68e   : > { %v7131_v59 = vmax.f32 %v6840_v35, 0.0 }
 0x68f   : > { %v7248_v11 = vpack.c.bf16 %v7130_v63, %v7128_v6 }
 0x690   : > { %v6843_v22 = vpop.f32.mrb[212].mxu0  ;;  %v7249_v32 = vpack.c.bf16 %v7131_v59, %v7129_v61 }
 0x691   : > { %v6844_v53 = vadd.f32 %v6843_v22, %v15775_v24  ;;  %v6845_v7 = vpop.f32.mrb[213].mxu0 }
 0x692   : > { %v6846_v41 = vadd.f32 %v6845_v7, %v15779_v44  ;;  %v6847_v26 = vpop.f32.mrb[214].mxu0  ;;  %7580 = vmatprep.mubr.bf16.mxu1 %v7249_v32 }
 0x693   : > { %v6848_v55 = vadd.f32 %v6847_v26, %v15775_v24  ;;  %v6849_v50 = vpop.f32.mrb[215].mxu0  ;;  %7581 = vmatmul.mubr.bf16.gmra.mrb[144].mxu1 %v7248_v11  ;;  %v7132_v31 = vmax.f32 %v6844_v53, 0.0 }
 0x694   : > { %v6850_v27 = vadd.f32 %v6849_v50, %v15779_v44  ;;  %v7133_v1 = vmax.f32 %v6846_v41, 0.0  ;;  %v12353_v50 = vld [vmem:[%s17399_s17 + $0x8] ss:$12 sps:$4 sm:$0xff]  }
 0x695   : > { %v7134_v12 = vmax.f32 %v6848_v55, 0.0  ;;  %8744 = vmatpush1.bf16.msra.mxu1 %v12353_v50 }
 0x696   : > { %v7135_v20 = vmax.f32 %v6850_v27, 0.0  ;;  %8745 = vmatprep.subr.bf16.mxu1 %v18038_v38 }
 0x697   : > { %v7250_v8 = vpack.c.bf16 %v7134_v12, %v7132_v31  ;;  %v12350_v31 = vld [vmem:[%s17399_s17 + $0x150] ss:$12 sps:$4 sm:$0xff]   ;;  %v12352_v12 = vld [vmem:[%s17399_s17 + $0x154] ss:$12 sps:$4 sm:$0xff]  }
 0x698   : > { %v6853_v18 = vpop.f32.mrb[216].mxu0  ;;  %v7251_v62 = vpack.c.bf16 %v7135_v20, %v7133_v1  ;;  %8418 = vmatprep.subr.bf16.mxu0 %v12352_v12 }
 0x699   : > { %v6854_v45 = vadd.f32 %v6853_v18, %v15775_v24  ;;  %v6855_v60 = vpop.f32.mrb[217].mxu0  ;;  %8419 = vmatpush1.bf16.msra.mxu0 %v12350_v31 }
 0x69a   : > { %v6856_v51 = vadd.f32 %v6855_v60, %v15779_v44  ;;  %v6857_v39 = vpop.f32.mrb[218].mxu0  ;;  %7590 = vmatprep.mubr.bf16.mxu1 %v7251_v62  ;;  %v12354_v62 = vld [vmem:[%s17399_s17 + $0x20] ss:$12 sps:$4 sm:$0xff]  }
 0x69b   : > { %v6858_v0 = vadd.f32 %v6857_v39, %v15775_v24  ;;  %v6859_v30 = vpop.f32.mrb[219].mxu0  ;;  %7591 = vmatmul.mubr.bf16.gmra.mrb[148].mxu1 %v7250_v8  ;;  %v7136_v4 = vmax.f32 %v6854_v45, 0.0 }
 0x69c   : > { %v6860_v52 = vadd.f32 %v6859_v30, %v15779_v44  ;;  %v7137_v16 = vmax.f32 %v6856_v51, 0.0  ;;  %8746 = vmatpush1.bf16.msra.mxu1 %v12354_v62 }
 0x69d   : > { %v7138_v3 = vmax.f32 %v6858_v0, 0.0  ;;  %8747 = vmatprep.subr.bf16.mxu1 %v18038_v38 }
 0x69e   : > { %v7139_v42 = vmax.f32 %v6860_v52, 0.0 }
 0x69f   : > { %v7252_v2 = vpack.c.bf16 %v7138_v3, %v7136_v4  ;;  %v12355_v4 = vld [vmem:[%s17399_s17 + $0x38] ss:$12 sps:$4 sm:$0xff]  }
 0x6a0   : > { %v6863_v54 = vpop.f32.mrb[220].mxu0  ;;  %v7253_v19 = vpack.c.bf16 %v7139_v42, %v7137_v16  ;;  %8748 = vmatpush1.bf16.msra.mxu1 %v12355_v4 }
 0x6a1   : > { %v6864_v23 = vadd.f32 %v6863_v54, %v15775_v24  ;;  %v6865_v17 = vpop.f32.mrb[221].mxu0  ;;  %8749 = vmatprep.subr.bf16.mxu1 %v18038_v38 }
 0x6a2   : > { %v6866_v15 = vadd.f32 %v6865_v17, %v15779_v44  ;;  %v6867_v36 = vpop.f32.mrb[222].mxu0  ;;  %7600 = vmatprep.mubr.bf16.mxu1 %v7253_v19  ;;  %v12356_v17 = vld [vmem:[%s17399_s17 + $0x50] ss:$12 sps:$4 sm:$0xff]  }
 0x6a3   : > { %v6868_v37 = vadd.f32 %v6867_v36, %v15775_v24  ;;  %v6869_v21 = vpop.f32.mrb[223].mxu0  ;;  %7601 = vmatmul.mubr.bf16.gmra.mrb[152].mxu1 %v7252_v2  ;;  %v7140_v29 = vmax.f32 %v6864_v23, 0.0 }
 0x6a4   : > { %v6870_v49 = vadd.f32 %v6869_v21, %v15779_v44  ;;  %v7141_v43 = vmax.f32 %v6866_v15, 0.0  ;;  %8750 = vmatpush1.bf16.msra.mxu1 %v12356_v17 }
 0x6a5   : > { %v7142_v40 = vmax.f32 %v6868_v37, 0.0  ;;  %8751 = vmatprep.subr.bf16.mxu1 %v18038_v38 }
 0x6a6   : > { %v7143_v25 = vmax.f32 %v6870_v49, 0.0 }
 0x6a7   : > { %v7254_v9 = vpack.c.bf16 %v7142_v40, %v7140_v29  ;;  %v12360_v29 = vld [vmem:[%s17399_s17 + $0x68] ss:$12 sps:$4 sm:$0xff]  }
 0x6a8   : > { %v6873_v14 = vpop.f32.mrb[224].mxu0  ;;  %v7255_v34 = vpack.c.bf16 %v7143_v25, %v7141_v43  ;;  %8752 = vmatpush1.bf16.msra.mxu1 %v12360_v29 }
 0x6a9   : > { %v6874_v5 = vadd.f32 %v6873_v14, %v15775_v24  ;;  %v6875_v46 = vpop.f32.mrb[225].mxu0  ;;  %v12359_v14 = vld [vmem:[%s17399_s17 + $0x16c] ss:$12 sps:$4 sm:$0xff]   ;;  %8753 = vmatprep.subr.bf16.mxu1 %v18038_v38 }
 0x6aa   : > { %v6876_v48 = vadd.f32 %v6875_v46, %v15779_v44  ;;  %v6877_v56 = vpop.f32.mrb[226].mxu0  ;;  %7610 = vmatprep.mubr.bf16.mxu1 %v7255_v34  ;;  %8420 = vmatprep.subr.bf16.mxu0 %v12359_v14 }
 0x6ab   : > { %v6878_v10 = vadd.f32 %v6877_v56, %v15775_v24  ;;  %v6879_v35 = vpop.f32.mrb[227].mxu0  ;;  %7611 = vmatmul.mubr.bf16.gmra.mrb[156].mxu1 %v7254_v9  ;;  %v7144_v63 = vmax.f32 %v6874_v5, 0.0  ;;  %v12357_v9 = vld [vmem:[%s17399_s17 + $0x168] ss:$12 sps:$4 sm:$0xff]   ;;  %v12361_v56 = vld [vmem:[%s17399_s17 + $0x80] ss:$12 sps:$4 sm:$0xff]  }
 0x6ac   : > { %v6880_v6 = vadd.f32 %v6879_v35, %v15779_v44  ;;  %v7145_v59 = vmax.f32 %v6876_v48, 0.0  ;;  %8421 = vmatpush1.bf16.msra.mxu0 %v12357_v9  ;;  %8754 = vmatpush1.bf16.msra.mxu1 %v12361_v56 }
 0x6ad   : > { %v7146_v61 = vmax.f32 %v6878_v10, 0.0  ;;  %9352 = vmatprep.subr.bf16.mxu0 %v18038_v38  ;;  %8755 = vmatprep.subr.bf16.mxu1 %v18038_v38 }
 0x6ae   : > { %v7147_v11 = vmax.f32 %v6880_v6, 0.0 }
 0x6af   : > { %v7256_v22 = vpack.c.bf16 %v7146_v61, %v7144_v63 }
 0x6b0   : > { %v6883_v32 = vpop.f32.mrb[228].mxu0  ;;  %v7257_v53 = vpack.c.bf16 %v7147_v11, %v7145_v59 }
 0x6b1   : > { %v6884_v7 = vadd.f32 %v6883_v32, %v15775_v24  ;;  %v6885_v41 = vpop.f32.mrb[229].mxu0 }
 0x6b2   : > { %v6886_v26 = vadd.f32 %v6885_v41, %v15779_v44  ;;  %v6887_v55 = vpop.f32.mrb[230].mxu0  ;;  %7620 = vmatprep.mubr.bf16.mxu1 %v7257_v53 }
 0x6b3   : > { %v6888_v27 = vadd.f32 %v6887_v55, %v15775_v24  ;;  %v6889_v28 = vpop.f32.mrb[231].mxu0  ;;  %7621 = vmatmul.mubr.bf16.gmra.mrb[160].mxu1 %v7256_v22  ;;  %v7148_v1 = vmax.f32 %v6884_v7, 0.0  ;;  %v12362_v22 = vld [vmem:[%s17399_s17 + $0x98] ss:$12 sps:$4 sm:$0xff]  }
 0x6b4   : > { %v6890_v33 = vadd.f32 %v6889_v28, %v15779_v44  ;;  %v7149_v8 = vmax.f32 %v6886_v26, 0.0  ;;  %8756 = vmatpush1.bf16.msra.mxu1 %v12362_v22 }
 0x6b5   : > { %v7150_v20 = vmax.f32 %v6888_v27, 0.0  ;;  %8757 = vmatprep.subr.bf16.mxu1 %v18038_v38  ;;  %v12363_v27 = vld [vmem:[%s17399_s17 + $0xb0] ss:$12 sps:$4 sm:$0xff]  }
 0x6b6   : > { %v7151_v18 = vmax.f32 %v6890_v33, 0.0 }
 0x6b7   : > { %v7258_v45 = vpack.c.bf16 %v7150_v20, %v7148_v1 }
 0x6b8   : > { %v6893_v60 = vpop.f32.mrb[232].mxu0  ;;  %v7259_v51 = vpack.c.bf16 %v7151_v18, %v7149_v8  ;;  %8758 = vmatpush1.bf16.msra.mxu1 %v12363_v27  ;;  %v12365_v18 = vld [vmem:[%s17399_s17 + $0xc8] ss:$12 sps:$4 sm:$0xff]  }
 0x6b9   : > { %v6894_v39 = vadd.f32 %v6893_v60, %v15775_v24  ;;  %v6895_v0 = vpop.f32.mrb[233].mxu0  ;;  %8759 = vmatprep.subr.bf16.mxu1 %v18038_v38 }
 0x6ba   : > { %v6896_v30 = vadd.f32 %v6895_v0, %v15779_v44  ;;  %v6897_v52 = vpop.f32.mrb[234].mxu0  ;;  %7630 = vmatprep.mubr.bf16.mxu1 %v7259_v51 }
 0x6bb   : > { %v6898_v3 = vadd.f32 %v6897_v52, %v15775_v24  ;;  %v6899_v16 = vpop.f32.mrb[235].mxu0  ;;  %7631 = vmatmul.mubr.bf16.gmra.mrb[164].mxu1 %v7258_v45  ;;  %v7152_v2 = vmax.f32 %v6894_v39, 0.0  ;;  %v12366_v52 = vld [vmem:[%s17399_s17 + $0xe0] ss:$12 sps:$4 sm:$0xff]  }
 0x6bc   : > { %v6900_v42 = vadd.f32 %v6899_v16, %v15779_v44  ;;  %v7153_v19 = vmax.f32 %v6896_v30, 0.0  ;;  %8760 = vmatpush1.bf16.msra.mxu1 %v12365_v18 }
 0x6bd   : > { %v7154_v54 = vmax.f32 %v6898_v3, 0.0  ;;  %8761 = vmatprep.subr.bf16.mxu1 %v18038_v38 }
 0x6be   : > { %v7155_v23 = vmax.f32 %v6900_v42, 0.0 }
 0x6bf   : > { %v7260_v15 = vpack.c.bf16 %v7154_v54, %v7152_v2 }
 0x6c0   : > { %v6903_v36 = vpop.f32.mrb[236].mxu0  ;;  %v7261_v37 = vpack.c.bf16 %v7155_v23, %v7153_v19  ;;  %8762 = vmatpush1.bf16.msra.mxu1 %v12366_v52  ;;  %v12367_v23 = vld [vmem:[%s17399_s17 + $0xf8] ss:$12 sps:$4 sm:$0xff]  }
 0x6c1   : > { %v6904_v21 = vadd.f32 %v6903_v36, %v15775_v24  ;;  %v6905_v49 = vpop.f32.mrb[237].mxu0  ;;  %8763 = vmatprep.subr.bf16.mxu1 %v18038_v38 }
 0x6c2   : > { %v6906_v13 = vadd.f32 %v6905_v49, %v15779_v44  ;;  %v6907_v58 = vpop.f32.mrb[238].mxu0  ;;  %7640 = vmatprep.mubr.bf16.mxu1 %v7261_v37 }
 0x6c3   : > { %v6908_v40 = vadd.f32 %v6907_v58, %v15775_v24  ;;  %v6909_v43 = vpop.f32.mrb[239].mxu0  ;;  %7641 = vmatmul.mubr.bf16.gmra.mrb[168].mxu1 %v7260_v15  ;;  %v7156_v34 = vmax.f32 %v6904_v21, 0.0  ;;  %v12368_v58 = vld [vmem:[%s17399_s17 + $0x110] ss:$12 sps:$4 sm:$0xff]  }
 0x6c4   : > { %v6910_v25 = vadd.f32 %v6909_v43, %v15779_v44  ;;  %v7157_v46 = vmax.f32 %v6906_v13, 0.0  ;;  %8764 = vmatpush1.bf16.msra.mxu1 %v12367_v23 }
 0x6c5   : > { %v7158_v5 = vmax.f32 %v6908_v40, 0.0  ;;  %8765 = vmatprep.subr.bf16.mxu1 %v18038_v38 }
 0x6c6   : > { %v7159_v48 = vmax.f32 %v6910_v25, 0.0 }
 0x6c7   : > { %v7262_v10 = vpack.c.bf16 %v7158_v5, %v7156_v34  ;;  %v12370_v5 = vld [vmem:[%s17399_s17 + $0x128] ss:$12 sps:$4 sm:$0xff]  }
 0x6c8   : > { %v6913_v35 = vpop.f32.mrb[240].mxu0  ;;  %v7263_v6 = vpack.c.bf16 %v7159_v48, %v7157_v46  ;;  %8766 = vmatpush1.bf16.msra.mxu1 %v12368_v58 }
 0x6c9   : > { %v6914_v63 = vadd.f32 %v6913_v35, %v15775_v24  ;;  %v6915_v61 = vpop.f32.mrb[241].mxu0  ;;  %8767 = vmatprep.subr.bf16.mxu1 %v18038_v38 }
 0x6ca   : > { %v6916_v59 = vadd.f32 %v6915_v61, %v15779_v44  ;;  %v6917_v11 = vpop.f32.mrb[242].mxu0  ;;  %7650 = vmatprep.mubr.bf16.mxu1 %v7263_v6  ;;  %v12371_v61 = vld [vmem:[%s17399_s17 + $0x140] ss:$12 sps:$4 sm:$0xff]  }
 0x6cb   : > { %v6918_v32 = vadd.f32 %v6917_v11, %v15775_v24  ;;  %v6919_v53 = vpop.f32.mrb[243].mxu0  ;;  %7651 = vmatmul.mubr.bf16.gmra.mrb[172].mxu1 %v7262_v10  ;;  %v7160_v41 = vmax.f32 %v6914_v63, 0.0 }
 0x6cc   : > { %v6920_v7 = vadd.f32 %v6919_v53, %v15779_v44  ;;  %v7161_v55 = vmax.f32 %v6916_v59, 0.0  ;;  %8768 = vmatpush1.bf16.msra.mxu1 %v12370_v5 }
 0x6cd   : > { %v7162_v26 = vmax.f32 %v6918_v32, 0.0  ;;  %8769 = vmatprep.subr.bf16.mxu1 %v18038_v38 }
 0x6ce   : > { %v7163_v50 = vmax.f32 %v6920_v7, 0.0 }
 0x6cf   : > { %v7264_v28 = vpack.c.bf16 %v7162_v26, %v7160_v41  ;;  %v12372_v26 = vld [vmem:[%s17399_s17 + $0x158] ss:$12 sps:$4 sm:$0xff]  }
 0x6d0   : > { %v6923_v33 = vpop.f32.mrb[244].mxu0  ;;  %v7265_v31 = vpack.c.bf16 %v7163_v50, %v7161_v55  ;;  %8770 = vmatpush1.bf16.msra.mxu1 %v12371_v61 }
 0x6d1   : > { %v6924_v12 = vadd.f32 %v6923_v33, %v15775_v24  ;;  %v6925_v1 = vpop.f32.mrb[245].mxu0  ;;  %8771 = vmatprep.subr.bf16.mxu1 %v18038_v38 }
 0x6d2   : > { %v6926_v20 = vadd.f32 %v6925_v1, %v15779_v44  ;;  %v6927_v8 = vpop.f32.mrb[246].mxu0  ;;  %7660 = vmatprep.mubr.bf16.mxu1 %v7265_v31  ;;  %v12373_v1 = vld [vmem:[%s17399_s17 + $0x170] ss:$12 sps:$4 sm:$0xff]  }
 0x6d3   : > { %v6928_v62 = vadd.f32 %v6927_v8, %v15775_v24  ;;  %v6929_v45 = vpop.f32.mrb[247].mxu0  ;;  %7661 = vmatmul.mubr.bf16.gmra.mrb[176].mxu1 %v7264_v28  ;;  %v7164_v51 = vmax.f32 %v6924_v12, 0.0 }
 0x6d4   : > { %v6930_v60 = vadd.f32 %v6929_v45, %v15779_v44  ;;  %v7165_v0 = vmax.f32 %v6926_v20, 0.0  ;;  %8772 = vmatpush1.bf16.msra.mxu1 %v12372_v26 }
 0x6d5   : > { %v7166_v39 = vmax.f32 %v6928_v62, 0.0  ;;  %8773 = vmatprep.subr.bf16.mxu1 %v18038_v38 }
 0x6d6   : > { %v7167_v30 = vmax.f32 %v6930_v60, 0.0 }
 0x6d7   : > { %v7266_v4 = vpack.c.bf16 %v7166_v39, %v7164_v51 }
 0x6d8   : > { %v6933_v3 = vpop.f32.mrb[248].mxu0  ;;  %v7267_v16 = vpack.c.bf16 %v7167_v30, %v7165_v0  ;;  %8774 = vmatpush1.bf16.msra.mxu1 %v12373_v1 }
 0x6d9   : > { %v6934_v42 = vadd.f32 %v6933_v3, %v15775_v24  ;;  %v6935_v2 = vpop.f32.mrb[249].mxu0 }
 0x6da   : > { %v6936_v54 = vadd.f32 %v6935_v2, %v15779_v44  ;;  %v6937_v19 = vpop.f32.mrb[250].mxu0  ;;  %7670 = vmatprep.mubr.bf16.mxu1 %v7267_v16 }
 0x6db   : > { %v6938_v17 = vadd.f32 %v6937_v19, %v15775_v24  ;;  %v6939_v15 = vpop.f32.mrb[251].mxu0  ;;  %7671 = vmatmul.mubr.bf16.gmra.mrb[180].mxu1 %v7266_v4  ;;  %v7168_v37 = vmax.f32 %v6934_v42, 0.0 }
 0x6dc   : > { %v6940_v36 = vadd.f32 %v6939_v15, %v15779_v44  ;;  %v7169_v49 = vmax.f32 %v6936_v54, 0.0 }
 0x6dd   : > { %v7170_v21 = vmax.f32 %v6938_v17, 0.0 }
 0x6de   : > { %v7171_v13 = vmax.f32 %v6940_v36, 0.0 }
 0x6df   : > { %v7268_v29 = vpack.c.bf16 %v7170_v21, %v7168_v37 }
 0x6e0   : > { %v6943_v40 = vpop.f32.mrb[252].mxu0  ;;  %v7269_v43 = vpack.c.bf16 %v7171_v13, %v7169_v49 }
 0x6e1   : > { %v6944_v25 = vadd.f32 %v6943_v40, %v15775_v24  ;;  %v6945_v9 = vpop.f32.mrb[253].mxu0 }
 0x6e2   : > { %v6946_v14 = vadd.f32 %v6945_v9, %v15779_v44  ;;  %v6947_v34 = vpop.f32.mrb[254].mxu0  ;;  %7680 = vmatprep.mubr.bf16.mxu1 %v7269_v43 }
 0x6e3   : > { %v6948_v46 = vadd.f32 %v6947_v34, %v15775_v24  ;;  %v6949_v48 = vpop.f32.mrb[255].mxu0  ;;  %7681 = vmatmul.mubr.bf16.gmra.mrb[184].mxu1 %v7268_v29  ;;  %v7172_v10 = vmax.f32 %v6944_v25, 0.0 }
 0x6e4   : > { %v6950_v56 = vadd.f32 %v6949_v48, %v15779_v44  ;;  %v7173_v6 = vmax.f32 %v6946_v14, 0.0 }
 0x6e5   : > { %v7174_v35 = vmax.f32 %v6948_v46, 0.0 }
 0x6e6   : > { %v7175_v63 = vmax.f32 %v6950_v56, 0.0 }
 0x6e7   : > { %v7270_v59 = vpack.c.bf16 %v7174_v35, %v7172_v10 }
 0x6e8   : > { %v6953_v11 = vpop.f32.mrb[0].mxu0  ;;  %v7271_v22 = vpack.c.bf16 %v7175_v63, %v7173_v6 }
 0x6e9   : > { %v6954_v32 = vadd.f32 %v6953_v11, %v15775_v24  ;;  %v6955_v53 = vpop.f32.mrb[1].mxu0 }
 0x6ea   : > { %v6956_v7 = vadd.f32 %v6955_v53, %v15779_v44  ;;  %v6957_v41 = vpop.f32.mrb[2].mxu0  ;;  %7690 = vmatprep.mubr.bf16.mxu1 %v7271_v22 }
 0x6eb   : > { %v6958_v55 = vadd.f32 %v6957_v41, %v15775_v24  ;;  %v6959_v50 = vpop.f32.mrb[3].mxu0  ;;  %7691 = vmatmul.mubr.bf16.gmra.mrb[188].mxu1 %v7270_v59  ;;  %v7176_v28 = vmax.f32 %v6954_v32, 0.0 }
 0x6ec   : > { %v6960_v27 = vadd.f32 %v6959_v50, %v15779_v44  ;;  %v7177_v31 = vmax.f32 %v6956_v7, 0.0 }
 0x6ed   : > { %v7178_v33 = vmax.f32 %v6958_v55, 0.0 }
 0x6ee   : > { %v7179_v12 = vmax.f32 %v6960_v27, 0.0 }
 0x6ef   : > { %v7272_v20 = vpack.c.bf16 %v7178_v33, %v7176_v28 }
 0x6f0   : > { %v6963_v8 = vpop.f32.mrb[4].mxu0  ;;  %v7273_v18 = vpack.c.bf16 %v7179_v12, %v7177_v31 }
 0x6f1   : > { %v6964_v62 = vadd.f32 %v6963_v8, %v15775_v24  ;;  %v6965_v45 = vpop.f32.mrb[5].mxu0 }
 0x6f2   : > { %v6966_v60 = vadd.f32 %v6965_v45, %v15779_v44  ;;  %v6967_v51 = vpop.f32.mrb[6].mxu0  ;;  %7700 = vmatprep.mubr.bf16.mxu1 %v7273_v18 }
 0x6f3   : > { %v6968_v39 = vadd.f32 %v6967_v51, %v15775_v24  ;;  %v6969_v0 = vpop.f32.mrb[7].mxu0  ;;  %7701 = vmatmul.mubr.bf16.gmra.mrb[192].mxu1 %v7272_v20  ;;  %v7180_v52 = vmax.f32 %v6964_v62, 0.0 }
 0x6f4   : > { %v6970_v30 = vadd.f32 %v6969_v0, %v15779_v44  ;;  %v7181_v3 = vmax.f32 %v6966_v60, 0.0 }
 0x6f5   : > { %v7182_v4 = vmax.f32 %v6968_v39, 0.0 }
 0x6f6   : > { %v7183_v16 = vmax.f32 %v6970_v30, 0.0 }
 0x6f7   : > { %v7274_v42 = vpack.c.bf16 %v7182_v4, %v7180_v52 }
 0x6f8   : > { %v6973_v2 = vpop.f32.mrb[8].mxu0  ;;  %v7275_v54 = vpack.c.bf16 %v7183_v16, %v7181_v3 }
 0x6f9   : > { %v6974_v19 = vadd.f32 %v6973_v2, %v15775_v24  ;;  %v6975_v23 = vpop.f32.mrb[9].mxu0 }
 0x6fa   : > { %v6976_v17 = vadd.f32 %v6975_v23, %v15779_v44  ;;  %v6977_v15 = vpop.f32.mrb[10].mxu0  ;;  %7710 = vmatprep.mubr.bf16.mxu1 %v7275_v54 }
 0x6fb   : > { %v6978_v36 = vadd.f32 %v6977_v15, %v15775_v24  ;;  %v6979_v37 = vpop.f32.mrb[11].mxu0  ;;  %7711 = vmatmul.mubr.bf16.gmra.mrb[196].mxu1 %v7274_v42  ;;  %v7184_v49 = vmax.f32 %v6974_v19, 0.0 }
 0x6fc   : > { %v6980_v21 = vadd.f32 %v6979_v37, %v15779_v44  ;;  %v7185_v58 = vmax.f32 %v6976_v17, 0.0 }
 0x6fd   : > { %v7186_v13 = vmax.f32 %v6978_v36, 0.0 }
 0x6fe   : > { %v7187_v29 = vmax.f32 %v6980_v21, 0.0 }
 0x6ff   : > { %v7276_v40 = vpack.c.bf16 %v7186_v13, %v7184_v49 }
 0x700   : > { %v6983_v43 = vpop.f32.mrb[12].mxu0  ;;  %v7277_v25 = vpack.c.bf16 %v7187_v29, %v7185_v58 }
 0x701   : > { %v6984_v9 = vadd.f32 %v6983_v43, %v15775_v24  ;;  %v6985_v14 = vpop.f32.mrb[13].mxu0 }
 0x702   : > { %v6986_v34 = vadd.f32 %v6985_v14, %v15779_v44  ;;  %v6987_v5 = vpop.f32.mrb[14].mxu0  ;;  %7720 = vmatprep.mubr.bf16.mxu1 %v7277_v25 }
 0x703   : > { %v6988_v46 = vadd.f32 %v6987_v5, %v15775_v24  ;;  %v6989_v48 = vpop.f32.mrb[15].mxu0  ;;  %7721 = vmatmul.mubr.bf16.gmra.mrb[200].mxu1 %v7276_v40  ;;  %v7188_v10 = vmax.f32 %v6984_v9, 0.0 }
 0x704   : > { %v6990_v56 = vadd.f32 %v6989_v48, %v15779_v44  ;;  %v7189_v6 = vmax.f32 %v6986_v34, 0.0 }
 0x705   : > { %v7190_v35 = vmax.f32 %v6988_v46, 0.0 }
 0x706   : > { %v7191_v63 = vmax.f32 %v6990_v56, 0.0 }
 0x707   : > { %v7278_v61 = vpack.c.bf16 %v7190_v35, %v7188_v10 }
 0x708   : > { %v6993_v59 = vpop.f32.mrb[16].mxu0  ;;  %v7279_v11 = vpack.c.bf16 %v7191_v63, %v7189_v6 }
 0x709   : > { %v6994_v22 = vadd.f32 %v6993_v59, %v15775_v24  ;;  %v6995_v32 = vpop.f32.mrb[17].mxu0 }
 0x70a   : > { %v6996_v53 = vadd.f32 %v6995_v32, %v15779_v44  ;;  %v6997_v7 = vpop.f32.mrb[18].mxu0  ;;  %7730 = vmatprep.mubr.bf16.mxu1 %v7279_v11 }
 0x70b   : > { %v6998_v41 = vadd.f32 %v6997_v7, %v15775_v24  ;;  %v6999_v26 = vpop.f32.mrb[19].mxu0  ;;  %7731 = vmatmul.mubr.bf16.gmra.mrb[204].mxu1 %v7278_v61  ;;  %v7192_v50 = vmax.f32 %v6994_v22, 0.0 }
 0x70c   : > { %v7000_v55 = vadd.f32 %v6999_v26, %v15779_v44  ;;  %v7193_v28 = vmax.f32 %v6996_v53, 0.0 }
 0x70d   : > { %v7194_v27 = vmax.f32 %v6998_v41, 0.0 }
 0x70e   : > { %v7195_v33 = vmax.f32 %v7000_v55, 0.0 }
 0x70f   : > { %v7280_v31 = vpack.c.bf16 %v7194_v27, %v7192_v50 }
 0x710   : > { %v7003_v12 = vpop.f32.mrb[20].mxu0  ;;  %v7281_v1 = vpack.c.bf16 %v7195_v33, %v7193_v28 }
 0x711   : > { %v7004_v20 = vadd.f32 %v7003_v12, %v15775_v24  ;;  %v7005_v8 = vpop.f32.mrb[21].mxu0 }
 0x712   : > { %v7006_v18 = vadd.f32 %v7005_v8, %v15779_v44  ;;  %v7007_v62 = vpop.f32.mrb[22].mxu0  ;;  %7740 = vmatprep.mubr.bf16.mxu1 %v7281_v1 }
 0x713   : > { %v7008_v45 = vadd.f32 %v7007_v62, %v15775_v24  ;;  %v7009_v60 = vpop.f32.mrb[23].mxu0  ;;  %7741 = vmatmul.mubr.bf16.gmra.mrb[208].mxu1 %v7280_v31  ;;  %v7196_v39 = vmax.f32 %v7004_v20, 0.0 }
 0x714   : > { %v7010_v51 = vadd.f32 %v7009_v60, %v15779_v44  ;;  %v7197_v30 = vmax.f32 %v7006_v18, 0.0 }
 0x715   : > { %v7198_v0 = vmax.f32 %v7008_v45, 0.0 }
 0x716   : > { %v7199_v52 = vmax.f32 %v7010_v51, 0.0 }
 0x717   : > { %v7282_v4 = vpack.c.bf16 %v7198_v0, %v7196_v39 }
 0x718   : > { %v7013_v3 = vpop.f32.mrb[24].mxu0  ;;  %v7283_v16 = vpack.c.bf16 %v7199_v52, %v7197_v30 }
 0x719   : > { %v7014_v42 = vadd.f32 %v7013_v3, %v15775_v24  ;;  %v7015_v2 = vpop.f32.mrb[25].mxu0 }
 0x71a   : > { %v7016_v54 = vadd.f32 %v7015_v2, %v15779_v44  ;;  %v7017_v19 = vpop.f32.mrb[26].mxu0  ;;  %7750 = vmatprep.mubr.bf16.mxu1 %v7283_v16 }
 0x71b   : > { %v7018_v23 = vadd.f32 %v7017_v19, %v15775_v24  ;;  %v7019_v17 = vpop.f32.mrb[27].mxu0  ;;  %7751 = vmatmul.mubr.bf16.gmra.mrb[212].mxu1 %v7282_v4  ;;  %v7200_v36 = vmax.f32 %v7014_v42, 0.0 }
 0x71c   : > { %v7020_v15 = vadd.f32 %v7019_v17, %v15779_v44  ;;  %v7201_v21 = vmax.f32 %v7016_v54, 0.0 }
 0x71d   : > { %v7202_v37 = vmax.f32 %v7018_v23, 0.0 }
 0x71e   : > { %v7203_v49 = vmax.f32 %v7020_v15, 0.0 }
 0x71f   : > { %v7284_v13 = vpack.c.bf16 %v7202_v37, %v7200_v36 }
 0x720   : > { %v7023_v58 = vpop.f32.mrb[28].mxu0  ;;  %v7285_v29 = vpack.c.bf16 %v7203_v49, %v7201_v21 }
 0x721   : > { %v7024_v40 = vadd.f32 %v7023_v58, %v15775_v24  ;;  %v7025_v43 = vpop.f32.mrb[29].mxu0 }
 0x722   : > { %v7026_v25 = vadd.f32 %v7025_v43, %v15779_v44  ;;  %v7027_v9 = vpop.f32.mrb[30].mxu0  ;;  %7760 = vmatprep.mubr.bf16.mxu1 %v7285_v29 }
 0x723   : > { %v7028_v14 = vadd.f32 %v7027_v9, %v15775_v24  ;;  %v7029_v34 = vpop.f32.mrb[31].mxu0  ;;  %7761 = vmatmul.mubr.bf16.gmra.mrb[216].mxu1 %v7284_v13  ;;  %v7204_v46 = vmax.f32 %v7024_v40, 0.0  ;;  %v7336_v13 = vld [vmem:[%s17398_s16] sm:$0x3] }
 0x724   : > { %v7030_v5 = vadd.f32 %v7029_v34, %v15779_v44  ;;  %v7205_v56 = vmax.f32 %v7026_v25, 0.0 }
 0x725   : > { %v7206_v48 = vmax.f32 %v7028_v14, 0.0  ;;  %v16012_v14 = vrot.slane %v7336_v13, %v13214_v57 }
 0x726   : > { %v7207_v10 = vmax.f32 %v7030_v5, 0.0  ;;  %v16016_v5 = vrot.slane %v7336_v13, %v13191_v47 }
 0x727   : > { %v7286_v35 = vpack.c.bf16 %v7206_v48, %v7204_v46 }
 0x728   : > { %v7033_v6 = vpop.f32.mrb[32].mxu0  ;;  %v7287_v63 = vpack.c.bf16 %v7207_v10, %v7205_v56 }
 0x729   : > { %v7034_v61 = vadd.f32 %v7033_v6, %v15775_v24  ;;  %v7035_v59 = vpop.f32.mrb[33].mxu0 }
 0x72a   : > { %v7036_v11 = vadd.f32 %v7035_v59, %v15779_v44  ;;  %v7037_v22 = vpop.f32.mrb[34].mxu0  ;;  %7770 = vmatprep.mubr.bf16.mxu1 %v7287_v63 }
 0x72b   : > { %v7038_v32 = vadd.f32 %v7037_v22, %v15775_v24  ;;  %v7039_v53 = vpop.f32.mrb[35].mxu0  ;;  %7771 = vmatmul.mubr.bf16.gmra.mrb[220].mxu1 %v7286_v35  ;;  %v7208_v41 = vmax.f32 %v7034_v61, 0.0 }
 0x72c   : > { %v7040_v7 = vadd.f32 %v7039_v53, %v15779_v44  ;;  %v7209_v55 = vmax.f32 %v7036_v11, 0.0 }
 0x72d   : > { %v7210_v26 = vmax.f32 %v7038_v32, 0.0 }
 0x72e   : > { %v7211_v50 = vmax.f32 %v7040_v7, 0.0 }
 0x72f   : > { %v7288_v27 = vpack.c.bf16 %v7210_v26, %v7208_v41 }
 0x730   : > { %v7043_v28 = vpop.f32.mrb[36].mxu0  ;;  %v7289_v33 = vpack.c.bf16 %v7211_v50, %v7209_v55 }
 0x731   : > { %v7044_v31 = vadd.f32 %v7043_v28, %v15775_v24  ;;  %v7045_v12 = vpop.f32.mrb[37].mxu0 }
 0x732   : > { %v7046_v1 = vadd.f32 %v7045_v12, %v15779_v44  ;;  %v7047_v20 = vpop.f32.mrb[38].mxu0  ;;  %7780 = vmatprep.mubr.bf16.mxu1 %v7289_v33 }
 0x733   : > { %v7048_v8 = vadd.f32 %v7047_v20, %v15775_v24  ;;  %v7049_v18 = vpop.f32.mrb[39].mxu0  ;;  %7781 = vmatmul.mubr.bf16.gmra.mrb[224].mxu1 %v7288_v27  ;;  %v7212_v45 = vmax.f32 %v7044_v31, 0.0 }
 0x734   : > { %v7050_v62 = vadd.f32 %v7049_v18, %v15779_v44  ;;  %v7213_v51 = vmax.f32 %v7046_v1, 0.0 }
 0x735   : > { %v7214_v60 = vmax.f32 %v7048_v8, 0.0 }
 0x736   : > { %v7215_v39 = vmax.f32 %v7050_v62, 0.0 }
 0x737   : > { %v7290_v0 = vpack.c.bf16 %v7214_v60, %v7212_v45 }
 0x738   : > { %v7053_v30 = vpop.f32.mrb[40].mxu0  ;;  %v7291_v52 = vpack.c.bf16 %v7215_v39, %v7213_v51 }
 0x739   : > { %v7054_v4 = vadd.f32 %v7053_v30, %v15775_v24  ;;  %v7055_v3 = vpop.f32.mrb[41].mxu0  ;;  %v12364_v30 = vld [vmem:[%s17401_s19] sm:$0xff]  }
 0x73a   : > { %v7056_v16 = vadd.f32 %v7055_v3, %v15779_v44  ;;  %v7057_v42 = vpop.f32.mrb[42].mxu0  ;;  %7790 = vmatprep.mubr.bf16.mxu1 %v7291_v52 }
 0x73b   : > { %v7058_v2 = vadd.f32 %v7057_v42, %v15775_v24  ;;  %v7059_v54 = vpop.f32.mrb[43].mxu0  ;;  %7791 = vmatmul.mubr.bf16.gmra.mrb[228].mxu1 %v7290_v0  ;;  %v7216_v23 = vmax.f32 %v7054_v4, 0.0 }
 0x73c   : > { %v7060_v19 = vadd.f32 %v7059_v54, %v15779_v44  ;;  %v7217_v15 = vmax.f32 %v7056_v16, 0.0 }
 0x73d   : > { %v7218_v17 = vmax.f32 %v7058_v2, 0.0 }
 0x73e   : > { %v7219_v36 = vmax.f32 %v7060_v19, 0.0 }
 0x73f   : > { %v7292_v37 = vpack.c.bf16 %v7218_v17, %v7216_v23 }
 0x740   : > { %v7063_v21 = vpop.f32.mrb[44].mxu0  ;;  %v7293_v49 = vpack.c.bf16 %v7219_v36, %v7217_v15 }
 0x741   : > { %v7064_v58 = vadd.f32 %v7063_v21, %v15775_v24  ;;  %v7065_v29 = vpop.f32.mrb[45].mxu0 }
 0x742   : > { %v7066_v40 = vadd.f32 %v7065_v29, %v15779_v44  ;;  %v7067_v43 = vpop.f32.mrb[46].mxu0  ;;  %7800 = vmatprep.mubr.bf16.mxu1 %v7293_v49  ;;  %v12369_v49 = vld [vmem:[%s17401_s19 + $0x8] sm:$0xff]  }
 0x743   : > { %v7068_v25 = vadd.f32 %v7067_v43, %v15775_v24  ;;  %v7069_v9 = vpop.f32.mrb[47].mxu0  ;;  %7801 = vmatmul.mubr.bf16.gmra.mrb[232].mxu1 %v7292_v37  ;;  %v7220_v46 = vmax.f32 %v7064_v58, 0.0 }
 0x744   : > { %v7070_v34 = vadd.f32 %v7069_v9, %v15779_v44  ;;  %v7221_v56 = vmax.f32 %v7066_v40, 0.0 }
 0x745   : > { %v7222_v48 = vmax.f32 %v7068_v25, 0.0  ;;  %v7542_v35 = vpop.f32.mrb[128].mxu1 }
 0x746   : > { %v7223_v10 = vmax.f32 %v7070_v34, 0.0  ;;  %v7543_v63 = vadd.f32 %v7542_v35, %v16012_v14  ;;  %v7544_v61 = vpop.f32.mrb[129].mxu1 }
 0x747   : > { %v7294_v6 = vpack.c.bf16 %v7222_v48, %v7220_v46  ;;  %v7545_v59 = vadd.f32 %v7544_v61, %v16016_v5  ;;  %v7546_v22 = vpop.f32.mrb[130].mxu1 }
 0x748   : > { %v7073_v11 = vpop.f32.mrb[48].mxu0  ;;  %v7295_v32 = vpack.c.bf16 %v7223_v10, %v7221_v56  ;;  %v7547_v7 = vadd.f32 %v7546_v22, %v16012_v14  ;;  %v7548_v26 = vpop.f32.mrb[131].mxu1  ;;  %v7861_v28 = vmax.f32 %v7543_v63, 0.0  ;;  %v12374_v63 = vld [vmem:[%s17401_s19 + $0x10] sm:$0xff]  }
 0x749   : > { %v7074_v53 = vadd.f32 %v7073_v11, %v15775_v24  ;;  %v7075_v41 = vpop.f32.mrb[49].mxu0  ;;  %v7549_v50 = vadd.f32 %v7548_v26, %v16016_v5  ;;  %v7862_v1 = vmax.f32 %v7545_v59, 0.0 }
 0x74a   : > { %v7076_v55 = vadd.f32 %v7075_v41, %v15779_v44  ;;  %v7077_v27 = vpop.f32.mrb[50].mxu0  ;;  %7810 = vmatprep.mubr.bf16.mxu1 %v7295_v32  ;;  %v7863_v33 = vmax.f32 %v7547_v7, 0.0 }
 0x74b   : > { %v7078_v31 = vadd.f32 %v7077_v27, %v15775_v24  ;;  %v7079_v12 = vpop.f32.mrb[51].mxu0  ;;  %7811 = vmatmul.mubr.bf16.gmra.mrb[236].mxu1 %v7294_v6  ;;  %v7864_v20 = vmax.f32 %v7549_v50, 0.0  ;;  %v7224_v18 = vmax.f32 %v7074_v53, 0.0 }
 0x74c   : > { %v7080_v8 = vadd.f32 %v7079_v12, %v15779_v44  ;;  %v16026_v62 = vpack.c.bf16 %v7863_v33, %v7861_v28  ;;  %v7225_v60 = vmax.f32 %v7076_v55, 0.0 }
 0x74d   : > { %v7226_v45 = vmax.f32 %v7078_v31, 0.0  ;;  %v16028_v0 = vpack.c.bf16 %v7864_v20, %v7862_v1  ;;  %v12375_v31 = vld [vmem:[%s17401_s19 + $0x18] sm:$0xff]  }
 0x74e   : > { %v7227_v51 = vmax.f32 %v7080_v8, 0.0  ;;  %v7552_v39 = vpop.f32.mrb[132].mxu1 }
 0x74f   : > { %v7296_v52 = vpack.c.bf16 %v7226_v45, %v7224_v18  ;;  %v7553_v4 = vadd.f32 %v7552_v39, %v16012_v14  ;;  %v7554_v3 = vpop.f32.mrb[133].mxu1  ;;  %8422 = vmatprep.mubr.bf16.mxu0 %v16028_v0 }
 0x750   : > { %v7555_v16 = vadd.f32 %v7554_v3, %v16016_v5  ;;  %v7083_v42 = vpop.f32.mrb[52].mxu0  ;;  %v7556_v2 = vpop.f32.mrb[134].mxu1  ;;  %v7297_v54 = vpack.c.bf16 %v7227_v51, %v7225_v60  ;;  %8423 = vmatmul.mubr.bf16.vlgmr.msra.gmra.mrb[64].mxu0 %v16026_v62 }
 0x751   : > { %v7084_v19 = vadd.f32 %v7083_v42, %v15775_v24  ;;  %v7557_v23 = vadd.f32 %v7556_v2, %v16012_v14  ;;  %v7085_v17 = vpop.f32.mrb[53].mxu0  ;;  %v7558_v15 = vpop.f32.mrb[135].mxu1  ;;  %9353 = vmatpush1.bf16.msra.mxu0 %v12364_v30  ;;  %v7865_v13 = vmax.f32 %v7553_v4, 0.0  ;;  %v12376_v42 = vld [vmem:[%s17401_s19 + $0x20] sm:$0xff]  }
 0x752   : > { %v7086_v36 = vadd.f32 %v7085_v17, %v15779_v44  ;;  %v7559_v37 = vadd.f32 %v7558_v15, %v16016_v5  ;;  %v7087_v21 = vpop.f32.mrb[54].mxu0  ;;  %7820 = vmatprep.mubr.bf16.mxu1 %v7297_v54  ;;  %9354 = vmatprep.subr.bf16.mxu0 %v18038_v38  ;;  %v7866_v43 = vmax.f32 %v7555_v16, 0.0 }
 0x753   : > { %v7867_v58 = vmax.f32 %v7557_v23, 0.0  ;;  %v7088_v29 = vadd.f32 %v7087_v21, %v15775_v24  ;;  %v7089_v40 = vpop.f32.mrb[55].mxu0  ;;  %7821 = vmatmul.mubr.bf16.gmra.mrb[240].mxu1 %v7296_v52  ;;  %v7228_v34 = vmax.f32 %v7084_v19, 0.0 }
 0x754   : > { %v7868_v25 = vmax.f32 %v7559_v37, 0.0  ;;  %v7090_v9 = vadd.f32 %v7089_v40, %v15779_v44  ;;  %v7229_v56 = vmax.f32 %v7086_v36, 0.0 }
 0x755   : > { %v16047_v46 = vpack.c.bf16 %v7867_v58, %v7865_v13  ;;  %v7230_v48 = vmax.f32 %v7088_v29, 0.0  ;;  %9355 = vmatpush1.bf16.msra.mxu0 %v12369_v49 }
 0x756   : > { %v7231_v10 = vmax.f32 %v7090_v9, 0.0  ;;  %v7562_v35 = vpop.f32.mrb[136].mxu1  ;;  %v16049_v6 = vpack.c.bf16 %v7868_v25, %v7866_v43  ;;  %9356 = vmatprep.subr.bf16.mxu0 %v18038_v38  ;;  %v12377_v43 = vld [vmem:[%s17401_s19 + $0x28] sm:$0xff]  }
 0x757   : > { %v7298_v61 = vpack.c.bf16 %v7230_v48, %v7228_v34  ;;  %v7563_v59 = vadd.f32 %v7562_v35, %v16012_v14  ;;  %v7564_v11 = vpop.f32.mrb[137].mxu1 }
 0x758   : > { %v7565_v22 = vadd.f32 %v7564_v11, %v16016_v5  ;;  %v7093_v32 = vpop.f32.mrb[56].mxu0  ;;  %v7566_v53 = vpop.f32.mrb[138].mxu1  ;;  %8432 = vmatprep.mubr.bf16.mxu0 %v16049_v6  ;;  %v7299_v7 = vpack.c.bf16 %v7231_v10, %v7229_v56 }
 0x759   : > { %v7094_v41 = vadd.f32 %v7093_v32, %v15775_v24  ;;  %v7567_v26 = vadd.f32 %v7566_v53, %v16012_v14  ;;  %v7095_v55 = vpop.f32.mrb[57].mxu0  ;;  %v7568_v50 = vpop.f32.mrb[139].mxu1  ;;  %8433 = vmatmul.mubr.bf16.gmra.mrb[68].mxu0 %v16047_v46  ;;  %v7869_v12 = vmax.f32 %v7563_v59, 0.0 }
 0x75a   : > { %v7096_v27 = vadd.f32 %v7095_v55, %v15779_v44  ;;  %v7569_v28 = vadd.f32 %v7568_v50, %v16016_v5  ;;  %v7097_v33 = vpop.f32.mrb[58].mxu0  ;;  %7830 = vmatprep.mubr.bf16.mxu1 %v7299_v7  ;;  %9357 = vmatpush1.bf16.msra.mxu0 %v12374_v63  ;;  %v7870_v18 = vmax.f32 %v7565_v22, 0.0 }
 0x75b   : > { %v7871_v1 = vmax.f32 %v7567_v26, 0.0  ;;  %v7098_v20 = vadd.f32 %v7097_v33, %v15775_v24  ;;  %v7099_v8 = vpop.f32.mrb[59].mxu0  ;;  %7831 = vmatmul.mubr.bf16.gmra.mrb[244].mxu1 %v7298_v61  ;;  %9358 = vmatprep.subr.bf16.mxu0 %v18038_v38  ;;  %v7232_v51 = vmax.f32 %v7094_v41, 0.0 }
 0x75c   : > { %v7872_v45 = vmax.f32 %v7569_v28, 0.0  ;;  %v7100_v60 = vadd.f32 %v7099_v8, %v15779_v44  ;;  %v7233_v52 = vmax.f32 %v7096_v27, 0.0 }
 0x75d   : > { %v16069_v39 = vpack.c.bf16 %v7871_v1, %v7869_v12  ;;  %v7234_v30 = vmax.f32 %v7098_v20, 0.0 }
 0x75e   : > { %v7235_v4 = vmax.f32 %v7100_v60, 0.0  ;;  %v7572_v3 = vpop.f32.mrb[140].mxu1  ;;  %v16071_v16 = vpack.c.bf16 %v7872_v45, %v7870_v18  ;;  %9359 = vmatpush1.bf16.msra.mxu0 %v12375_v31  ;;  %v12379_v31 = vld [vmem:[%s17401_s19 + $0x38] sm:$0xff]  }
 0x75f   : > { %v7300_v2 = vpack.c.bf16 %v7234_v30, %v7232_v51  ;;  %v7573_v54 = vadd.f32 %v7572_v3, %v16012_v14  ;;  %v7574_v19 = vpop.f32.mrb[141].mxu1  ;;  %9360 = vmatprep.subr.bf16.mxu0 %v18038_v38  ;;  %v12380_v51 = vld [vmem:[%s17401_s19 + $0x40] sm:$0xff]  }
 0x760   : > { %v7575_v23 = vadd.f32 %v7574_v19, %v16016_v5  ;;  %v7103_v17 = vpop.f32.mrb[60].mxu0  ;;  %v7576_v15 = vpop.f32.mrb[142].mxu1  ;;  %8442 = vmatprep.mubr.bf16.mxu0 %v16071_v16  ;;  %v7301_v36 = vpack.c.bf16 %v7235_v4, %v7233_v52 }
 0x761   : > { %v7104_v37 = vadd.f32 %v7103_v17, %v15775_v24  ;;  %v7577_v21 = vadd.f32 %v7576_v15, %v16012_v14  ;;  %v7105_v49 = vpop.f32.mrb[61].mxu0  ;;  %v7578_v13 = vpop.f32.mrb[143].mxu1  ;;  %8443 = vmatmul.mubr.bf16.gmra.mrb[72].mxu0 %v16069_v39  ;;  %v7873_v25 = vmax.f32 %v7573_v54, 0.0  ;;  %v12381_v54 = vld [vmem:[%s17401_s19 + $0x48] sm:$0xff]  }
 0x762   : > { %v7106_v58 = vadd.f32 %v7105_v49, %v15779_v44  ;;  %v7579_v29 = vadd.f32 %v7578_v13, %v16016_v5  ;;  %v7107_v40 = vpop.f32.mrb[62].mxu0  ;;  %7840 = vmatprep.mubr.bf16.mxu1 %v7301_v36  ;;  %9361 = vmatpush1.bf16.msra.mxu0 %v12376_v42  ;;  %v7874_v56 = vmax.f32 %v7575_v23, 0.0  ;;  %v12382_v49 = vld [vmem:[%s17401_s19 + $0x50] sm:$0xff]  }
 0x763   : > { %v7875_v9 = vmax.f32 %v7577_v21, 0.0  ;;  %v7108_v34 = vadd.f32 %v7107_v40, %v15775_v24  ;;  %v7109_v48 = vpop.f32.mrb[63].mxu0  ;;  %7841 = vmatmul.mubr.bf16.gmra.mrb[248].mxu1 %v7300_v2  ;;  %9362 = vmatprep.subr.bf16.mxu0 %v18038_v38  ;;  %v7236_v63 = vmax.f32 %v7104_v37, 0.0  ;;  %v12378_v24 = vld [vmem:[%s17401_s19 + $0x30] sm:$0xff]  }
 0x764   : > { %v7876_v10 = vmax.f32 %v7579_v29, 0.0  ;;  %v7110_v35 = vadd.f32 %v7109_v48, %v15779_v44  ;;  %v7237_v11 = vmax.f32 %v7106_v58, 0.0 }
 0x765   : > { %v16091_v61 = vpack.c.bf16 %v7875_v9, %v7873_v25  ;;  %v7238_v59 = vmax.f32 %v7108_v34, 0.0 }
 0x766   : > { %v7239_v22 = vmax.f32 %v7110_v35, 0.0  ;;  %v7582_v32 = vpop.f32.mrb[144].mxu1  ;;  %v16093_v53 = vpack.c.bf16 %v7876_v10, %v7874_v56  ;;  %9363 = vmatpush1.bf16.msra.mxu0 %v12377_v43 }
 0x767   : > { %v7302_v7 = vpack.c.bf16 %v7238_v59, %v7236_v63  ;;  %v7583_v41 = vadd.f32 %v7582_v32, %v16012_v14  ;;  %v7584_v26 = vpop.f32.mrb[145].mxu1  ;;  %9364 = vmatprep.subr.bf16.mxu0 %v18038_v38 }
 0x768   : > { %v7585_v44 = vadd.f32 %v7584_v26, %v16016_v5  ;;  %v7586_v55 = vpop.f32.mrb[146].mxu1  ;;  %8452 = vmatprep.mubr.bf16.mxu0 %v16093_v53  ;;  %v7303_v50 = vpack.c.bf16 %v7239_v22, %v7237_v11 }
 0x769   : > { %v7587_v27 = vadd.f32 %v7586_v55, %v16012_v14  ;;  %v7588_v28 = vpop.f32.mrb[147].mxu1  ;;  %8453 = vmatmul.mubr.bf16.gmra.mrb[76].mxu0 %v16091_v61  ;;  %v7877_v12 = vmax.f32 %v7583_v41, 0.0 }
 0x76a   : > { %v7589_v33 = vadd.f32 %v7588_v28, %v16016_v5  ;;  %7850 = vmatprep.mubr.bf16.mxu1 %v7303_v50  ;;  %9365 = vmatpush1.bf16.msra.mxu0 %v12378_v24  ;;  %v7878_v20 = vmax.f32 %v7585_v44, 0.0 }
 0x76b   : > { %v7879_v1 = vmax.f32 %v7587_v27, 0.0  ;;  %7851 = vmatmul.mubr.bf16.gmra.mrb[252].mxu1 %v7302_v7  ;;  %9366 = vmatprep.subr.bf16.mxu0 %v18038_v38  ;;  %v12383_v27 = vld [vmem:[%s17401_s19 + $0x58] sm:$0xff]  }
 0x76c   : > { %v7880_v8 = vmax.f32 %v7589_v33, 0.0  ;;  %8775 = vmatprep.mubr.bf16.mxu1 %v16028_v0 }
 0x76d   : > { %v16110_v18 = vpack.c.bf16 %v7879_v1, %v7877_v12 }
 0x76e   : > { %v7592_v45 = vpop.f32.mrb[148].mxu1  ;;  %v16112_v60 = vpack.c.bf16 %v7880_v8, %v7878_v20  ;;  %9367 = vmatpush1.bf16.msra.mxu0 %v12379_v31 }
 0x76f   : > { %v7593_v30 = vadd.f32 %v7592_v45, %v16012_v14  ;;  %v7594_v52 = vpop.f32.mrb[149].mxu1  ;;  %9368 = vmatprep.subr.bf16.mxu0 %v18038_v38 }
 0x770   : > { %v7595_v4 = vadd.f32 %v7594_v52, %v16016_v5  ;;  %v7596_v3 = vpop.f32.mrb[150].mxu1  ;;  %8462 = vmatprep.mubr.bf16.mxu0 %v16112_v60 }
 0x771   : > { %v7597_v0 = vadd.f32 %v7596_v3, %v16012_v14  ;;  %v7598_v42 = vpop.f32.mrb[151].mxu1  ;;  %8463 = vmatmul.mubr.bf16.gmra.mrb[80].mxu0 %v16110_v18  ;;  %v7881_v19 = vmax.f32 %v7593_v30, 0.0 }
 0x772   : > { %v7599_v2 = vadd.f32 %v7598_v42, %v16016_v5  ;;  %9369 = vmatpush1.bf16.msra.mxu0 %v12380_v51  ;;  %v7882_v17 = vmax.f32 %v7595_v4, 0.0 }
 0x773   : > { %v7883_v23 = vmax.f32 %v7597_v0, 0.0  ;;  %8776 = vmatmul.mubr.bf16.vlgmr.msra.gmra.mrb[0].mxu1 %v16026_v62  ;;  %9370 = vmatprep.subr.bf16.mxu0 %v18038_v38 }
 0x774   : > { %v7884_v15 = vmax.f32 %v7599_v2, 0.0  ;;  %8783 = vmatprep.mubr.bf16.mxu1 %v16049_v6 }
 0x775   : > { %v16130_v36 = vpack.c.bf16 %v7883_v23, %v7881_v19 }
 0x776   : > { %v7602_v37 = vpop.f32.mrb[152].mxu1  ;;  %v16132_v21 = vpack.c.bf16 %v7884_v15, %v7882_v17  ;;  %9371 = vmatpush1.bf16.msra.mxu0 %v12381_v54 }
 0x777   : > { %v7603_v13 = vadd.f32 %v7602_v37, %v16012_v14  ;;  %v7604_v58 = vpop.f32.mrb[153].mxu1  ;;  %9372 = vmatprep.subr.bf16.mxu0 %v18038_v38 }
 0x778   : > { %v7605_v62 = vadd.f32 %v7604_v58, %v16016_v5  ;;  %v7606_v29 = vpop.f32.mrb[154].mxu1  ;;  %8472 = vmatprep.mubr.bf16.mxu0 %v16132_v21  ;;  %v12384_v58 = vld [vmem:[%s17401_s19 + $0x60] sm:$0xff]  }
 0x779   : > { %v7607_v6 = vadd.f32 %v7606_v29, %v16012_v14  ;;  %v7608_v40 = vpop.f32.mrb[155].mxu1  ;;  %8473 = vmatmul.mubr.bf16.gmra.mrb[84].mxu0 %v16130_v36  ;;  %v7885_v25 = vmax.f32 %v7603_v13, 0.0 }
 0x77a   : > { %v7609_v43 = vadd.f32 %v7608_v40, %v16016_v5  ;;  %9373 = vmatpush1.bf16.msra.mxu0 %v12382_v49  ;;  %v7886_v34 = vmax.f32 %v7605_v62, 0.0 }
 0x77b   : > { %v7887_v9 = vmax.f32 %v7607_v6, 0.0  ;;  %8784 = vmatmul.mubr.bf16.gmra.mrb[4].mxu1 %v16047_v46  ;;  %9374 = vmatprep.subr.bf16.mxu0 %v18038_v38 }
 0x77c   : > { %v7888_v48 = vmax.f32 %v7609_v43, 0.0  ;;  %8791 = vmatprep.mubr.bf16.mxu1 %v16071_v16 }
 0x77d   : > { %v16147_v56 = vpack.c.bf16 %v7887_v9, %v7885_v25 }
 0x77e   : > { %v7612_v10 = vpop.f32.mrb[156].mxu1  ;;  %v16149_v35 = vpack.c.bf16 %v7888_v48, %v7886_v34  ;;  %9375 = vmatpush1.bf16.msra.mxu0 %v12383_v27 }
 0x77f   : > { %v7613_v63 = vadd.f32 %v7612_v10, %v16012_v14  ;;  %v7614_v59 = vpop.f32.mrb[157].mxu1  ;;  %9376 = vmatprep.subr.bf16.mxu0 %v18038_v38 }
 0x780   : > { %v7615_v11 = vadd.f32 %v7614_v59, %v16016_v5  ;;  %v7616_v22 = vpop.f32.mrb[158].mxu1  ;;  %8482 = vmatprep.mubr.bf16.mxu0 %v16149_v35 }
 0x781   : > { %v7617_v46 = vadd.f32 %v7616_v22, %v16012_v14  ;;  %v7618_v32 = vpop.f32.mrb[159].mxu1  ;;  %8483 = vmatmul.mubr.bf16.gmra.mrb[88].mxu0 %v16147_v56  ;;  %v7889_v24 = vmax.f32 %v7613_v63, 0.0 }
 0x782   : > { %v7619_v16 = vadd.f32 %v7618_v32, %v16016_v5  ;;  %v7890_v41 = vmax.f32 %v7615_v11, 0.0  ;;  %9377 = vmatpush1.bf16.msra.mxu0 %v12384_v58 }
 0x783   : > { %v7891_v7 = vmax.f32 %v7617_v46, 0.0  ;;  %8792 = vmatmul.mubr.bf16.gmra.mrb[8].mxu1 %v16069_v39  ;;  %9378 = vmatprep.subr.bf16.mxu0 %v18038_v38 }
 0x784   : > { %v7892_v26 = vmax.f32 %v7619_v16, 0.0  ;;  %8799 = vmatprep.mubr.bf16.mxu1 %v16093_v53 }
 0x785   : > { %v16159_v44 = vpack.c.bf16 %v7891_v7, %v7889_v24 }
 0x786   : > { %v7622_v55 = vpop.f32.mrb[160].mxu1  ;;  %v16161_v50 = vpack.c.bf16 %v7892_v26, %v7890_v41 }
 0x787   : > { %v7623_v28 = vadd.f32 %v7622_v55, %v16012_v14  ;;  %v7624_v33 = vpop.f32.mrb[161].mxu1 }
 0x788   : > { %v7625_v31 = vadd.f32 %v7624_v33, %v16016_v5  ;;  %v7626_v12 = vpop.f32.mrb[162].mxu1  ;;  %8492 = vmatprep.mubr.bf16.mxu0 %v16161_v50  ;;  %v12385_v33 = vld [vmem:[%s17401_s19 + $0x68] sm:$0xff]  }
 0x789   : > { %v7627_v39 = vadd.f32 %v7626_v12, %v16012_v14  ;;  %v7628_v53 = vpop.f32.mrb[163].mxu1  ;;  %8493 = vmatmul.mubr.bf16.gmra.mrb[92].mxu0 %v16159_v44  ;;  %v7893_v20 = vmax.f32 %v7623_v28, 0.0 }
 0x78a   : > { %v7629_v1 = vadd.f32 %v7628_v53, %v16016_v5  ;;  %v7894_v45 = vmax.f32 %v7625_v31, 0.0  ;;  %9379 = vmatpush1.bf16.msra.mxu0 %v12385_v33 }
 0x78b   : > { %v7895_v8 = vmax.f32 %v7627_v39, 0.0  ;;  %8800 = vmatmul.mubr.bf16.gmra.mrb[12].mxu1 %v16091_v61  ;;  %9380 = vmatprep.subr.bf16.mxu0 %v18038_v38 }
 0x78c   : > { %v7896_v51 = vmax.f32 %v7629_v1, 0.0  ;;  %8807 = vmatprep.mubr.bf16.mxu1 %v16112_v60 }
 0x78d   : > { %v16175_v30 = vpack.c.bf16 %v7895_v8, %v7893_v20 }
 0x78e   : > { %v7632_v52 = vpop.f32.mrb[164].mxu1  ;;  %v16177_v4 = vpack.c.bf16 %v7896_v51, %v7894_v45 }
 0x78f   : > { %v7633_v3 = vadd.f32 %v7632_v52, %v16012_v14  ;;  %v7634_v0 = vpop.f32.mrb[165].mxu1 }
 0x790   : > { %v7635_v42 = vadd.f32 %v7634_v0, %v16016_v5  ;;  %v7636_v2 = vpop.f32.mrb[166].mxu1  ;;  %8502 = vmatprep.mubr.bf16.mxu0 %v16177_v4 }
 0x791   : > { %v7637_v54 = vadd.f32 %v7636_v2, %v16012_v14  ;;  %v7638_v61 = vpop.f32.mrb[167].mxu1  ;;  %8503 = vmatmul.mubr.bf16.gmra.mrb[96].mxu0 %v16175_v30  ;;  %v7897_v19 = vmax.f32 %v7633_v3, 0.0 }
 0x792   : > { %v7639_v60 = vadd.f32 %v7638_v61, %v16016_v5  ;;  %v7898_v17 = vmax.f32 %v7635_v42, 0.0 }
 0x793   : > { %v7899_v23 = vmax.f32 %v7637_v54, 0.0  ;;  %8808 = vmatmul.mubr.bf16.gmra.mrb[16].mxu1 %v16110_v18 }
 0x794   : > { %v7900_v15 = vmax.f32 %v7639_v60, 0.0  ;;  %8815 = vmatprep.mubr.bf16.mxu1 %v16132_v21 }
 0x795   : > { %v16187_v37 = vpack.c.bf16 %v7899_v23, %v7897_v19 }
 0x796   : > { %v7642_v49 = vpop.f32.mrb[168].mxu1  ;;  %v16189_v13 = vpack.c.bf16 %v7900_v15, %v7898_v17 }
 0x797   : > { %v7643_v62 = vadd.f32 %v7642_v49, %v16012_v14  ;;  %v7644_v29 = vpop.f32.mrb[169].mxu1 }
 0x798   : > { %v7645_v6 = vadd.f32 %v7644_v29, %v16016_v5  ;;  %v7646_v40 = vpop.f32.mrb[170].mxu1  ;;  %8512 = vmatprep.mubr.bf16.mxu0 %v16189_v13  ;;  %v12386_v29 = vld [vmem:[%s17401_s19 + $0x70] sm:$0xff]  }
 0x799   : > { %v7647_v18 = vadd.f32 %v7646_v40, %v16012_v14  ;;  %v7648_v21 = vpop.f32.mrb[171].mxu1  ;;  %8513 = vmatmul.mubr.bf16.gmra.mrb[100].mxu0 %v16187_v37  ;;  %v7901_v25 = vmax.f32 %v7643_v62, 0.0 }
 0x79a   : > { %v7649_v43 = vadd.f32 %v7648_v21, %v16016_v5  ;;  %v7902_v34 = vmax.f32 %v7645_v6, 0.0  ;;  %9381 = vmatpush1.bf16.msra.mxu0 %v12386_v29 }
 0x79b   : > { %v7903_v9 = vmax.f32 %v7647_v18, 0.0  ;;  %8816 = vmatmul.mubr.bf16.gmra.mrb[20].mxu1 %v16130_v36  ;;  %9382 = vmatprep.subr.bf16.mxu0 %v18038_v38 }
 0x79c   : > { %v7904_v48 = vmax.f32 %v7649_v43, 0.0  ;;  %8823 = vmatprep.mubr.bf16.mxu1 %v16149_v35 }
 0x79d   : > { %v16203_v10 = vpack.c.bf16 %v7903_v9, %v7901_v25 }
 0x79e   : > { %v7652_v63 = vpop.f32.mrb[172].mxu1  ;;  %v16205_v59 = vpack.c.bf16 %v7904_v48, %v7902_v34 }
 0x79f   : > { %v7653_v11 = vadd.f32 %v7652_v63, %v16012_v14  ;;  %v7654_v22 = vpop.f32.mrb[173].mxu1 }
 0x7a0   : > { %v7655_v46 = vadd.f32 %v7654_v22, %v16016_v5  ;;  %v7656_v32 = vpop.f32.mrb[174].mxu1  ;;  %8522 = vmatprep.mubr.bf16.mxu0 %v16205_v59 }
 0x7a1   : > { %v7657_v16 = vadd.f32 %v7656_v32, %v16012_v14  ;;  %v7658_v36 = vpop.f32.mrb[175].mxu1  ;;  %8523 = vmatmul.mubr.bf16.gmra.mrb[104].mxu0 %v16203_v10  ;;  %v7905_v24 = vmax.f32 %v7653_v11, 0.0 }
 0x7a2   : > { %v7659_v35 = vadd.f32 %v7658_v36, %v16016_v5  ;;  %v7906_v41 = vmax.f32 %v7655_v46, 0.0 }
 0x7a3   : > { %v7907_v7 = vmax.f32 %v7657_v16, 0.0  ;;  %8824 = vmatmul.mubr.bf16.gmra.mrb[24].mxu1 %v16147_v56 }
 0x7a4   : > { %v7908_v26 = vmax.f32 %v7659_v35, 0.0  ;;  %8831 = vmatprep.mubr.bf16.mxu1 %v16161_v50 }
 0x7a5   : > { %v16215_v55 = vpack.c.bf16 %v7907_v7, %v7905_v24 }
 0x7a6   : > { %v7662_v27 = vpop.f32.mrb[176].mxu1  ;;  %v16217_v28 = vpack.c.bf16 %v7908_v26, %v7906_v41 }
 0x7a7   : > { %v7663_v31 = vadd.f32 %v7662_v27, %v16012_v14  ;;  %v7664_v12 = vpop.f32.mrb[177].mxu1 }
 0x7a8   : > { %v7665_v39 = vadd.f32 %v7664_v12, %v16016_v5  ;;  %v7666_v53 = vpop.f32.mrb[178].mxu1  ;;  %8532 = vmatprep.mubr.bf16.mxu0 %v16217_v28 }
 0x7a9   : > { %v7667_v56 = vadd.f32 %v7666_v53, %v16012_v14  ;;  %v7668_v50 = vpop.f32.mrb[179].mxu1  ;;  %8533 = vmatmul.mubr.bf16.gmra.mrb[108].mxu0 %v16215_v55  ;;  %v7909_v20 = vmax.f32 %v7663_v31, 0.0  ;;  %v12387_v31 = vld [vmem:[%s17401_s19 + $0x78] sm:$0xff]  }
 0x7aa   : > { %v7669_v1 = vadd.f32 %v7668_v50, %v16016_v5  ;;  %v7910_v45 = vmax.f32 %v7665_v39, 0.0  ;;  %9383 = vmatpush1.bf16.msra.mxu0 %v12387_v31 }
 0x7ab   : > { %v7911_v8 = vmax.f32 %v7667_v56, 0.0  ;;  %8832 = vmatmul.mubr.bf16.gmra.mrb[28].mxu1 %v16159_v44 }
 0x7ac   : > { %v7912_v51 = vmax.f32 %v7669_v1, 0.0  ;;  %8839 = vmatprep.mubr.bf16.mxu1 %v16177_v4 }
 0x7ad   : > { %v16231_v52 = vpack.c.bf16 %v7911_v8, %v7909_v20 }
 0x7ae   : > { %v7672_v3 = vpop.f32.mrb[180].mxu1  ;;  %v16233_v0 = vpack.c.bf16 %v7912_v51, %v7910_v45 }
 0x7af   : > { %v7673_v42 = vadd.f32 %v7672_v3, %v16012_v14  ;;  %v7674_v2 = vpop.f32.mrb[181].mxu1 }
 0x7b0   : > { %v7675_v54 = vadd.f32 %v7674_v2, %v16016_v5  ;;  %v7676_v61 = vpop.f32.mrb[182].mxu1  ;;  %8542 = vmatprep.mubr.bf16.mxu0 %v16233_v0 }
 0x7b1   : > { %v7677_v60 = vadd.f32 %v7676_v61, %v16012_v14  ;;  %v7678_v44 = vpop.f32.mrb[183].mxu1  ;;  %8543 = vmatmul.mubr.bf16.gmra.mrb[112].mxu0 %v16231_v52  ;;  %v7913_v19 = vmax.f32 %v7673_v42, 0.0 }
 0x7b2   : > { %v7679_v4 = vadd.f32 %v7678_v44, %v16016_v5  ;;  %v7914_v17 = vmax.f32 %v7675_v54, 0.0 }
 0x7b3   : > { %v7915_v23 = vmax.f32 %v7677_v60, 0.0  ;;  %8840 = vmatmul.mubr.bf16.gmra.mrb[32].mxu1 %v16175_v30 }
 0x7b4   : > { %v7916_v15 = vmax.f32 %v7679_v4, 0.0  ;;  %8847 = vmatprep.mubr.bf16.mxu1 %v16189_v13 }
 0x7b5   : > { %v16243_v49 = vpack.c.bf16 %v7915_v23, %v7913_v19 }
 0x7b6   : > { %v7682_v58 = vpop.f32.mrb[184].mxu1  ;;  %v16245_v62 = vpack.c.bf16 %v7916_v15, %v7914_v17 }
 0x7b7   : > { %v7683_v6 = vadd.f32 %v7682_v58, %v16012_v14  ;;  %v7684_v40 = vpop.f32.mrb[185].mxu1 }
 0x7b8   : > { %v7685_v18 = vadd.f32 %v7684_v40, %v16016_v5  ;;  %v7686_v21 = vpop.f32.mrb[186].mxu1  ;;  %8552 = vmatprep.mubr.bf16.mxu0 %v16245_v62 }
 0x7b9   : > { %v7687_v30 = vadd.f32 %v7686_v21, %v16012_v14  ;;  %v7688_v13 = vpop.f32.mrb[187].mxu1  ;;  %8553 = vmatmul.mubr.bf16.gmra.mrb[116].mxu0 %v16243_v49  ;;  %v7917_v25 = vmax.f32 %v7683_v6, 0.0 }
 0x7ba   : > { %v7689_v43 = vadd.f32 %v7688_v13, %v16016_v5  ;;  %v7918_v34 = vmax.f32 %v7685_v18, 0.0 }
 0x7bb   : > { %v7919_v9 = vmax.f32 %v7687_v30, 0.0  ;;  %8848 = vmatmul.mubr.bf16.gmra.mrb[36].mxu1 %v16187_v37 }
 0x7bc   : > { %v7920_v48 = vmax.f32 %v7689_v43, 0.0  ;;  %8855 = vmatprep.mubr.bf16.mxu1 %v16205_v59 }
 0x7bd   : > { %v16259_v63 = vpack.c.bf16 %v7919_v9, %v7917_v25 }
 0x7be   : > { %v7692_v11 = vpop.f32.mrb[188].mxu1  ;;  %v16261_v22 = vpack.c.bf16 %v7920_v48, %v7918_v34 }
 0x7bf   : > { %v7693_v46 = vadd.f32 %v7692_v11, %v16012_v14  ;;  %v7694_v32 = vpop.f32.mrb[189].mxu1 }
 0x7c0   : > { %v7695_v38 = vadd.f32 %v7694_v32, %v16016_v5  ;;  %v7696_v16 = vpop.f32.mrb[190].mxu1  ;;  %8562 = vmatprep.mubr.bf16.mxu0 %v16261_v22 }
 0x7c1   : > { %v7697_v36 = vadd.f32 %v7696_v16, %v16012_v14  ;;  %v7698_v37 = vpop.f32.mrb[191].mxu1  ;;  %8563 = vmatmul.mubr.bf16.gmra.mrb[120].mxu0 %v16259_v63  ;;  %v7921_v35 = vmax.f32 %v7693_v46, 0.0 }
 0x7c2   : > { %v7699_v59 = vadd.f32 %v7698_v37, %v16016_v5  ;;  %v7922_v7 = vmax.f32 %v7695_v38, 0.0 }
 0x7c3   : > { %v7923_v24 = vmax.f32 %v7697_v36, 0.0  ;;  %8856 = vmatmul.mubr.bf16.gmra.mrb[40].mxu1 %v16203_v10 }
 0x7c4   : > { %v7924_v41 = vmax.f32 %v7699_v59, 0.0  ;;  %8863 = vmatprep.mubr.bf16.mxu1 %v16217_v28 }
 0x7c5   : > { %v16271_v26 = vpack.c.bf16 %v7923_v24, %v7921_v35 }
 0x7c6   : > { %v7702_v27 = vpop.f32.mrb[192].mxu1  ;;  %v16273_v33 = vpack.c.bf16 %v7924_v41, %v7922_v7 }
 0x7c7   : > { %v7703_v12 = vadd.f32 %v7702_v27, %v16012_v14  ;;  %v7704_v39 = vpop.f32.mrb[193].mxu1 }
 0x7c8   : > { %v7705_v53 = vadd.f32 %v7704_v39, %v16016_v5  ;;  %v7706_v56 = vpop.f32.mrb[194].mxu1  ;;  %8572 = vmatprep.mubr.bf16.mxu0 %v16273_v33 }
 0x7c9   : > { %v7707_v10 = vadd.f32 %v7706_v56, %v16012_v14  ;;  %v7708_v28 = vpop.f32.mrb[195].mxu1  ;;  %8573 = vmatmul.mubr.bf16.gmra.mrb[124].mxu0 %v16271_v26  ;;  %v7925_v1 = vmax.f32 %v7703_v12, 0.0 }
 0x7ca   : > { %v7709_v50 = vadd.f32 %v7708_v28, %v16016_v5  ;;  %v7926_v8 = vmax.f32 %v7705_v53, 0.0 }
 0x7cb   : > { %v7927_v20 = vmax.f32 %v7707_v10, 0.0  ;;  %8864 = vmatmul.mubr.bf16.gmra.mrb[44].mxu1 %v16215_v55 }
 0x7cc   : > { %v7928_v45 = vmax.f32 %v7709_v50, 0.0  ;;  %8871 = vmatprep.mubr.bf16.mxu1 %v16233_v0 }
 0x7cd   : > { %v16286_v51 = vpack.c.bf16 %v7927_v20, %v7925_v1 }
 0x7ce   : > { %v16288_v3 = vpack.c.bf16 %v7928_v45, %v7926_v8  ;;  %v7712_v42 = vpop.f32.mrb[196].mxu1 }
 0x7cf   : > { %v7713_v2 = vadd.f32 %v7712_v42, %v16012_v14  ;;  %v7714_v54 = vpop.f32.mrb[197].mxu1 }
 0x7d0   : > { %v7715_v61 = vadd.f32 %v7714_v54, %v16016_v5  ;;  %v7716_v60 = vpop.f32.mrb[198].mxu1  ;;  %8582 = vmatprep.mubr.bf16.mxu0 %v16288_v3 }
 0x7d1   : > { %v7717_v44 = vadd.f32 %v7716_v60, %v16012_v14  ;;  %v7718_v55 = vpop.f32.mrb[199].mxu1  ;;  %8583 = vmatmul.mubr.bf16.gmra.mrb[128].mxu0 %v16286_v51  ;;  %v7929_v4 = vmax.f32 %v7713_v2, 0.0 }
 0x7d2   : > { %v7719_v0 = vadd.f32 %v7718_v55, %v16016_v5  ;;  %v7930_v23 = vmax.f32 %v7715_v61, 0.0 }
 0x7d3   : > { %v7931_v19 = vmax.f32 %v7717_v44, 0.0  ;;  %8872 = vmatmul.mubr.bf16.gmra.mrb[48].mxu1 %v16231_v52 }
 0x7d4   : > { %v7932_v17 = vmax.f32 %v7719_v0, 0.0  ;;  %8879 = vmatprep.mubr.bf16.mxu1 %v16245_v62 }
 0x7d5   : > { %v16298_v15 = vpack.c.bf16 %v7931_v19, %v7929_v4 }
 0x7d6   : > { %v16300_v58 = vpack.c.bf16 %v7932_v17, %v7930_v23  ;;  %v7722_v29 = vpop.f32.mrb[200].mxu1 }
 0x7d7   : > { %v7723_v6 = vadd.f32 %v7722_v29, %v16012_v14  ;;  %v7724_v40 = vpop.f32.mrb[201].mxu1 }
 0x7d8   : > { %v7725_v18 = vadd.f32 %v7724_v40, %v16016_v5  ;;  %v7726_v21 = vpop.f32.mrb[202].mxu1  ;;  %8592 = vmatprep.mubr.bf16.mxu0 %v16300_v58 }
 0x7d9   : > { %v7727_v30 = vadd.f32 %v7726_v21, %v16012_v14  ;;  %v7728_v52 = vpop.f32.mrb[203].mxu1  ;;  %8593 = vmatmul.mubr.bf16.gmra.mrb[132].mxu0 %v16298_v15  ;;  %v7933_v13 = vmax.f32 %v7723_v6, 0.0 }
 0x7da   : > { %v7729_v62 = vadd.f32 %v7728_v52, %v16016_v5  ;;  %v7934_v25 = vmax.f32 %v7725_v18, 0.0 }
 0x7db   : > { %v7935_v43 = vmax.f32 %v7727_v30, 0.0  ;;  %8880 = vmatmul.mubr.bf16.gmra.mrb[52].mxu1 %v16243_v49 }
 0x7dc   : > { %v7936_v9 = vmax.f32 %v7729_v62, 0.0  ;;  %8887 = vmatprep.mubr.bf16.mxu1 %v16261_v22 }
 0x7dd   : > { %v16310_v34 = vpack.c.bf16 %v7935_v43, %v7933_v13 }
 0x7de   : > { %v16312_v48 = vpack.c.bf16 %v7936_v9, %v7934_v25  ;;  %v7732_v11 = vpop.f32.mrb[204].mxu1 }
 0x7df   : > { %v7733_v46 = vadd.f32 %v7732_v11, %v16012_v14  ;;  %v7734_v32 = vpop.f32.mrb[205].mxu1 }
 0x7e0   : > { %v7735_v38 = vadd.f32 %v7734_v32, %v16016_v5  ;;  %v7736_v16 = vpop.f32.mrb[206].mxu1  ;;  %8602 = vmatprep.mubr.bf16.mxu0 %v16312_v48 }
 0x7e1   : > { %v7737_v36 = vadd.f32 %v7736_v16, %v16012_v14  ;;  %v7738_v49 = vpop.f32.mrb[207].mxu1  ;;  %8603 = vmatmul.mubr.bf16.gmra.mrb[136].mxu0 %v16310_v34  ;;  %v7937_v37 = vmax.f32 %v7733_v46, 0.0 }
 0x7e2   : > { %v7739_v22 = vadd.f32 %v7738_v49, %v16016_v5  ;;  %v7938_v35 = vmax.f32 %v7735_v38, 0.0 }
 0x7e3   : > { %v7939_v59 = vmax.f32 %v7737_v36, 0.0  ;;  %8888 = vmatmul.mubr.bf16.gmra.mrb[56].mxu1 %v16259_v63 }
 0x7e4   : > { %v7940_v24 = vmax.f32 %v7739_v22, 0.0  ;;  %8895 = vmatprep.mubr.bf16.mxu1 %v16273_v33 }
 0x7e5   : > { %v16322_v7 = vpack.c.bf16 %v7939_v59, %v7937_v37 }
 0x7e6   : > { %v16324_v41 = vpack.c.bf16 %v7940_v24, %v7938_v35  ;;  %v7742_v27 = vpop.f32.mrb[208].mxu1 }
 0x7e7   : > { %v7743_v31 = vadd.f32 %v7742_v27, %v16012_v14  ;;  %v7744_v12 = vpop.f32.mrb[209].mxu1 }
 0x7e8   : > { %v7745_v39 = vadd.f32 %v7744_v12, %v16016_v5  ;;  %v7746_v53 = vpop.f32.mrb[210].mxu1  ;;  %8612 = vmatprep.mubr.bf16.mxu0 %v16324_v41 }
 0x7e9   : > { %v7747_v56 = vadd.f32 %v7746_v53, %v16012_v14  ;;  %v7748_v63 = vpop.f32.mrb[211].mxu1  ;;  %8613 = vmatmul.mubr.bf16.gmra.mrb[140].mxu0 %v16322_v7  ;;  %v7941_v10 = vmax.f32 %v7743_v31, 0.0 }
 0x7ea   : > { %v7749_v33 = vadd.f32 %v7748_v63, %v16016_v5  ;;  %v7942_v50 = vmax.f32 %v7745_v39, 0.0 }
 0x7eb   : > { %v7943_v28 = vmax.f32 %v7747_v56, 0.0  ;;  %8896 = vmatmul.mubr.bf16.gmra.mrb[60].mxu1 %v16271_v26 }
 0x7ec   : > { %v7944_v1 = vmax.f32 %v7749_v33, 0.0  ;;  %8903 = vmatprep.mubr.bf16.mxu1 %v16288_v3 }
 0x7ed   : > { %v16334_v20 = vpack.c.bf16 %v7943_v28, %v7941_v10 }
 0x7ee   : > { %v16336_v8 = vpack.c.bf16 %v7944_v1, %v7942_v50  ;;  %v7752_v45 = vpop.f32.mrb[212].mxu1 }
 0x7ef   : > { %v7753_v42 = vadd.f32 %v7752_v45, %v16012_v14  ;;  %v7754_v2 = vpop.f32.mrb[213].mxu1 }
 0x7f0   : > { %v7755_v54 = vadd.f32 %v7754_v2, %v16016_v5  ;;  %v7756_v61 = vpop.f32.mrb[214].mxu1  ;;  %8622 = vmatprep.mubr.bf16.mxu0 %v16336_v8 }
 0x7f1   : > { %v7757_v60 = vadd.f32 %v7756_v61, %v16012_v14  ;;  %v7758_v26 = vpop.f32.mrb[215].mxu1  ;;  %8623 = vmatmul.mubr.bf16.gmra.mrb[144].mxu0 %v16334_v20  ;;  %v7945_v44 = vmax.f32 %v7753_v42, 0.0 }
 0x7f2   : > { %v7759_v3 = vadd.f32 %v7758_v26, %v16016_v5  ;;  %v7946_v0 = vmax.f32 %v7755_v54, 0.0 }
 0x7f3   : > { %v7947_v55 = vmax.f32 %v7757_v60, 0.0  ;;  %8904 = vmatmul.mubr.bf16.gmra.mrb[64].mxu1 %v16286_v51 }
 0x7f4   : > { %v7948_v4 = vmax.f32 %v7759_v3, 0.0  ;;  %8911 = vmatprep.mubr.bf16.mxu1 %v16300_v58 }
 0x7f5   : > { %v16346_v19 = vpack.c.bf16 %v7947_v55, %v7945_v44 }
 0x7f6   : > { %v16348_v23 = vpack.c.bf16 %v7948_v4, %v7946_v0  ;;  %v7762_v17 = vpop.f32.mrb[216].mxu1 }
 0x7f7   : > { %v7763_v29 = vadd.f32 %v7762_v17, %v16012_v14  ;;  %v7764_v6 = vpop.f32.mrb[217].mxu1 }
 0x7f8   : > { %v7765_v40 = vadd.f32 %v7764_v6, %v16016_v5  ;;  %v7766_v18 = vpop.f32.mrb[218].mxu1  ;;  %8632 = vmatprep.mubr.bf16.mxu0 %v16348_v23 }
 0x7f9   : > { %v7767_v21 = vadd.f32 %v7766_v18, %v16012_v14  ;;  %v7768_v51 = vpop.f32.mrb[219].mxu1  ;;  %8633 = vmatmul.mubr.bf16.gmra.mrb[148].mxu0 %v16346_v19  ;;  %v7949_v30 = vmax.f32 %v7763_v29, 0.0 }
 0x7fa   : > { %v7769_v58 = vadd.f32 %v7768_v51, %v16016_v5  ;;  %v7950_v62 = vmax.f32 %v7765_v40, 0.0 }
 0x7fb   : > { %v7951_v52 = vmax.f32 %v7767_v21, 0.0  ;;  %8912 = vmatmul.mubr.bf16.gmra.mrb[68].mxu1 %v16298_v15 }
 0x7fc   : > { %v7952_v13 = vmax.f32 %v7769_v58, 0.0  ;;  %8919 = vmatprep.mubr.bf16.mxu1 %v16312_v48 }
 0x7fd   : > { %v16358_v43 = vpack.c.bf16 %v7951_v52, %v7949_v30 }
 0x7fe   : > { %v16360_v25 = vpack.c.bf16 %v7952_v13, %v7950_v62  ;;  %v7772_v9 = vpop.f32.mrb[220].mxu1 }
 0x7ff   : > { %v7773_v11 = vadd.f32 %v7772_v9, %v16012_v14  ;;  %v7774_v46 = vpop.f32.mrb[221].mxu1  ;;  %v16413_v9 = vld [vmem:[%s17400_s18] sm:$0x7] }
 0x800   : > { %v7775_v32 = vadd.f32 %v7774_v46, %v16016_v5  ;;  %v7776_v38 = vpop.f32.mrb[222].mxu1  ;;  %8642 = vmatprep.mubr.bf16.mxu0 %v16360_v25 }
 0x801   : > { %v7777_v16 = vadd.f32 %v7776_v38, %v16012_v14  ;;  %v7778_v15 = vpop.f32.mrb[223].mxu1  ;;  %8643 = vmatmul.mubr.bf16.gmra.mrb[152].mxu0 %v16358_v43  ;;  %v7953_v36 = vmax.f32 %v7773_v11, 0.0 }
 0x802   : > { %v7779_v48 = vadd.f32 %v7778_v15, %v16016_v5  ;;  %v7954_v22 = vmax.f32 %v7775_v32, 0.0 }
 0x803   : > { %v7955_v49 = vmax.f32 %v7777_v16, 0.0  ;;  %8920 = vmatmul.mubr.bf16.gmra.mrb[72].mxu1 %v16310_v34  ;;  %v16422_v16 = vrot.slane %v16413_v9, %v13214_v57 }
 0x804   : > { %v7956_v37 = vmax.f32 %v7779_v48, 0.0  ;;  %8927 = vmatprep.mubr.bf16.mxu1 %v16324_v41  ;;  %v16427_v48 = vrot.slane %v16413_v9, %v13191_v47 }
 0x805   : > { %v16370_v59 = vpack.c.bf16 %v7955_v49, %v7953_v36 }
 0x806   : > { %v16372_v35 = vpack.c.bf16 %v7956_v37, %v7954_v22  ;;  %v7782_v24 = vpop.f32.mrb[224].mxu1 }
 0x807   : > { %v7783_v27 = vadd.f32 %v7782_v24, %v16012_v14  ;;  %v7784_v31 = vpop.f32.mrb[225].mxu1 }
 0x808   : > { %v7785_v12 = vadd.f32 %v7784_v31, %v16016_v5  ;;  %v7786_v39 = vpop.f32.mrb[226].mxu1  ;;  %8652 = vmatprep.mubr.bf16.mxu0 %v16372_v35 }
 0x809   : > { %v7787_v53 = vadd.f32 %v7786_v39, %v16012_v14  ;;  %v7788_v34 = vpop.f32.mrb[227].mxu1  ;;  %8653 = vmatmul.mubr.bf16.gmra.mrb[156].mxu0 %v16370_v59  ;;  %v7957_v56 = vmax.f32 %v7783_v27, 0.0 }
 0x80a   : > { %v7789_v41 = vadd.f32 %v7788_v34, %v16016_v5  ;;  %v7958_v33 = vmax.f32 %v7785_v12, 0.0 }
 0x80b   : > { %v7959_v63 = vmax.f32 %v7787_v53, 0.0  ;;  %8928 = vmatmul.mubr.bf16.gmra.mrb[76].mxu1 %v16322_v7 }
 0x80c   : > { %v7960_v10 = vmax.f32 %v7789_v41, 0.0  ;;  %8935 = vmatprep.mubr.bf16.mxu1 %v16336_v8 }
 0x80d   : > { %v16382_v28 = vpack.c.bf16 %v7959_v63, %v7957_v56 }
 0x80e   : > { %v16384_v50 = vpack.c.bf16 %v7960_v10, %v7958_v33  ;;  %v7792_v1 = vpop.f32.mrb[228].mxu1 }
 0x80f   : > { %v7793_v45 = vadd.f32 %v7792_v1, %v16012_v14  ;;  %v7794_v42 = vpop.f32.mrb[229].mxu1 }
 0x810   : > { %v7795_v2 = vadd.f32 %v7794_v42, %v16016_v5  ;;  %v7796_v54 = vpop.f32.mrb[230].mxu1  ;;  %8662 = vmatprep.mubr.bf16.mxu0 %v16384_v50 }
 0x811   : > { %v7797_v61 = vadd.f32 %v7796_v54, %v16012_v14  ;;  %v7798_v7 = vpop.f32.mrb[231].mxu1  ;;  %8663 = vmatmul.mubr.bf16.gmra.mrb[160].mxu0 %v16382_v28  ;;  %v7961_v60 = vmax.f32 %v7793_v45, 0.0 }
 0x812   : > { %v7799_v8 = vadd.f32 %v7798_v7, %v16016_v5  ;;  %v7962_v3 = vmax.f32 %v7795_v2, 0.0 }
 0x813   : > { %v7963_v26 = vmax.f32 %v7797_v61, 0.0  ;;  %8936 = vmatmul.mubr.bf16.gmra.mrb[80].mxu1 %v16334_v20 }
 0x814   : > { %v7964_v44 = vmax.f32 %v7799_v8, 0.0  ;;  %8943 = vmatprep.mubr.bf16.mxu1 %v16348_v23 }
 0x815   : > { %v16394_v55 = vpack.c.bf16 %v7963_v26, %v7961_v60 }
 0x816   : > { %v16396_v0 = vpack.c.bf16 %v7964_v44, %v7962_v3  ;;  %v7802_v4 = vpop.f32.mrb[232].mxu1 }
 0x817   : > { %v7803_v17 = vadd.f32 %v7802_v4, %v16012_v14  ;;  %v7804_v29 = vpop.f32.mrb[233].mxu1 }
 0x818   : > { %v7805_v6 = vadd.f32 %v7804_v29, %v16016_v5  ;;  %v7806_v40 = vpop.f32.mrb[234].mxu1  ;;  %8672 = vmatprep.mubr.bf16.mxu0 %v16396_v0 }
 0x819   : > { %v7807_v18 = vadd.f32 %v7806_v40, %v16012_v14  ;;  %v7808_v20 = vpop.f32.mrb[235].mxu1  ;;  %8673 = vmatmul.mubr.bf16.gmra.mrb[164].mxu0 %v16394_v55  ;;  %v7965_v21 = vmax.f32 %v7803_v17, 0.0 }
 0x81a   : > { %v7809_v23 = vadd.f32 %v7808_v20, %v16016_v5  ;;  %v7966_v58 = vmax.f32 %v7805_v6, 0.0 }
 0x81b   : > { %v7967_v51 = vmax.f32 %v7807_v18, 0.0  ;;  %8944 = vmatmul.mubr.bf16.gmra.mrb[84].mxu1 %v16346_v19 }
 0x81c   : > { %v7968_v30 = vmax.f32 %v7809_v23, 0.0  ;;  %8951 = vmatprep.mubr.bf16.mxu1 %v16360_v25 }
 0x81d   : > { %v16406_v52 = vpack.c.bf16 %v7967_v51, %v7965_v21 }
 0x81e   : > { %v16408_v62 = vpack.c.bf16 %v7968_v30, %v7966_v58  ;;  %v7812_v13 = vpop.f32.mrb[236].mxu1 }
 0x81f   : > { %v7813_v11 = vadd.f32 %v7812_v13, %v16012_v14  ;;  %v7814_v46 = vpop.f32.mrb[237].mxu1 }
 0x820   : > { %v7815_v32 = vadd.f32 %v7814_v46, %v16016_v5  ;;  %v7816_v19 = vpop.f32.mrb[238].mxu1  ;;  %8682 = vmatprep.mubr.bf16.mxu0 %v16408_v62 }
 0x821   : > { %v7817_v25 = vadd.f32 %v7816_v19, %v16012_v14  ;;  %v7818_v38 = vpop.f32.mrb[239].mxu1  ;;  %8683 = vmatmul.mubr.bf16.gmra.mrb[168].mxu0 %v16406_v52  ;;  %v7969_v36 = vmax.f32 %v7813_v11, 0.0 }
 0x822   : > { %v7819_v15 = vadd.f32 %v7818_v38, %v16016_v5  ;;  %v7970_v22 = vmax.f32 %v7815_v32, 0.0 }
 0x823   : > { %v7971_v49 = vmax.f32 %v7817_v25, 0.0  ;;  %8952 = vmatmul.mubr.bf16.gmra.mrb[88].mxu1 %v16358_v43  ;;  %v8424_v24 = vpop.f32.mrb[64].mxu0 }
 0x824   : > { %v7972_v37 = vmax.f32 %v7819_v15, 0.0  ;;  %8959 = vmatprep.mubr.bf16.mxu1 %v16372_v35  ;;  %v8425_v57 = vadd.f32 %v8424_v24, %v16422_v16  ;;  %v8426_v31 = vpop.f32.mrb[65].mxu0 }
 0x825   : > { %v16431_v27 = vpack.c.bf16 %v7971_v49, %v7969_v36  ;;  %v8427_v39 = vadd.f32 %v8426_v31, %v16427_v48  ;;  %v8428_v53 = vpop.f32.mrb[66].mxu0 }
 0x826   : > { %v16434_v12 = vpack.c.bf16 %v7972_v37, %v7970_v22  ;;  %v7822_v47 = vpop.f32.mrb[240].mxu1  ;;  %v8429_v43 = vadd.f32 %v8428_v53, %v16422_v16  ;;  %v8430_v56 = vpop.f32.mrb[67].mxu0  ;;  %v9032_v10 = vmax.f32 %v8425_v57, 0.0 }
 0x827   : > { %v7823_v34 = vadd.f32 %v7822_v47, %v16012_v14  ;;  %v7824_v41 = vpop.f32.mrb[241].mxu1  ;;  %v8431_v35 = vadd.f32 %v8430_v56, %v16427_v48  ;;  %v9033_v2 = vmax.f32 %v8427_v39, 0.0  ;;  %v12388_v39 = vld [vmem:[%s17403_s21] sm:$0xff]  }
 0x828   : > { %v7825_v63 = vadd.f32 %v7824_v41, %v16016_v5  ;;  %v7826_v33 = vpop.f32.mrb[242].mxu1  ;;  %8692 = vmatprep.mubr.bf16.mxu0 %v16434_v12  ;;  %v9034_v1 = vmax.f32 %v8429_v43, 0.0  ;;  %11665 = vmatprep.subr.bf16.mxu1 %v12388_v39 }
 0x829   : > { %v7827_v45 = vadd.f32 %v7826_v33, %v16012_v14  ;;  %v7828_v42 = vpop.f32.mrb[243].mxu1  ;;  %8693 = vmatmul.mubr.bf16.gmra.mrb[172].mxu0 %v16431_v27  ;;  %v9035_v54 = vmax.f32 %v8431_v35, 0.0  ;;  %v7973_v7 = vmax.f32 %v7823_v34, 0.0  ;;  %11666 = vmatpush3.bf16.msra.mxu1 %v12388_v39 }
 0x82a   : > { %v7829_v61 = vadd.f32 %v7828_v42, %v16016_v5  ;;  %v16445_v8 = vpack.c.bf16 %v9034_v1, %v9032_v10  ;;  %v7974_v26 = vmax.f32 %v7825_v63, 0.0 }
 0x82b   : > { %v7975_v60 = vmax.f32 %v7827_v45, 0.0  ;;  %8960 = vmatmul.mubr.bf16.gmra.mrb[92].mxu1 %v16370_v59  ;;  %v16448_v3 = vpack.c.bf16 %v9035_v54, %v9033_v2 }
 0x82c   : > { %v7976_v44 = vmax.f32 %v7829_v61, 0.0  ;;  %v8434_v4 = vpop.f32.mrb[68].mxu0  ;;  %8967 = vmatprep.mubr.bf16.mxu1 %v16384_v50 }
 0x82d   : > { %v16451_v17 = vpack.c.bf16 %v7975_v60, %v7973_v7  ;;  %v8435_v29 = vadd.f32 %v8434_v4, %v16422_v16  ;;  %v8436_v6 = vpop.f32.mrb[69].mxu0 }
 0x82e   : > { %v16454_v40 = vpack.c.bf16 %v7976_v44, %v7974_v26  ;;  %v8437_v18 = vadd.f32 %v8436_v6, %v16427_v48  ;;  %v7832_v20 = vpop.f32.mrb[244].mxu1  ;;  %v8438_v23 = vpop.f32.mrb[70].mxu0 }
 0x82f   : > { %v7833_v59 = vadd.f32 %v7832_v20, %v16012_v14  ;;  %v8439_v21 = vadd.f32 %v8438_v23, %v16422_v16  ;;  %v7834_v51 = vpop.f32.mrb[245].mxu1  ;;  %v8440_v58 = vpop.f32.mrb[71].mxu0  ;;  %v9036_v11 = vmax.f32 %v8435_v29, 0.0 }
 0x830   : > { %v7835_v30 = vadd.f32 %v7834_v51, %v16016_v5  ;;  %v8441_v50 = vadd.f32 %v8440_v58, %v16427_v48  ;;  %v7836_v13 = vpop.f32.mrb[246].mxu1  ;;  %8702 = vmatprep.mubr.bf16.mxu0 %v16454_v40  ;;  %v9037_v25 = vmax.f32 %v8437_v18, 0.0 }
 0x831   : > { %v9038_v46 = vmax.f32 %v8439_v21, 0.0  ;;  %v7837_v32 = vadd.f32 %v7836_v13, %v16012_v14  ;;  %v7838_v19 = vpop.f32.mrb[247].mxu1  ;;  %8703 = vmatmul.mubr.bf16.gmra.mrb[176].mxu0 %v16451_v17  ;;  %v7977_v36 = vmax.f32 %v7833_v59, 0.0 }
 0x832   : > { %v9039_v38 = vmax.f32 %v8441_v50, 0.0  ;;  %v7839_v15 = vadd.f32 %v7838_v19, %v16016_v5  ;;  %v7978_v37 = vmax.f32 %v7835_v30, 0.0  ;;  %v18039_v19 = vld [vmem:[#allocation3_spill] sm:$0xff] }
 0x833   : > { %v16465_v49 = vpack.c.bf16 %v9038_v46, %v9036_v11  ;;  %v7979_v22 = vmax.f32 %v7837_v32, 0.0  ;;  %8968 = vmatmul.mubr.bf16.gmra.mrb[96].mxu1 %v16382_v28 }
 0x834   : > { %v16468_v24 = vpack.c.bf16 %v9039_v38, %v9037_v25  ;;  %v7980_v57 = vmax.f32 %v7839_v15, 0.0  ;;  %v8444_v31 = vpop.f32.mrb[72].mxu0  ;;  %8975 = vmatprep.mubr.bf16.mxu1 %v16396_v0  ;;  %v8129_v25 = vsub.s32 2, %v18039_v19 }
 0x835   : > { %v16474_v47 = vpack.c.bf16 %v7979_v22, %v7977_v36  ;;  %v8445_v53 = vadd.f32 %v8444_v31, %v16422_v16  ;;  %v8446_v34 = vpop.f32.mrb[73].mxu0 }
 0x836   : > { %v16477_v43 = vpack.c.bf16 %v7980_v57, %v7978_v37  ;;  %v8447_v28 = vadd.f32 %v8446_v34, %v16427_v48  ;;  %v7842_v41 = vpop.f32.mrb[248].mxu1  ;;  %v8448_v56 = vpop.f32.mrb[74].mxu0 }
 0x837   : > { %v7843_v63 = vadd.f32 %v7842_v41, %v16012_v14  ;;  %v8449_v0 = vadd.f32 %v8448_v56, %v16422_v16  ;;  %v7844_v35 = vpop.f32.mrb[249].mxu1  ;;  %v8450_v33 = vpop.f32.mrb[75].mxu0  ;;  %v9040_v42 = vmax.f32 %v8445_v53, 0.0  ;;  %v16513_v56 = vrot.slane %v16413_v9, %v8129_v25 }
 0x838   : > { %v7845_v10 = vadd.f32 %v7844_v35, %v16016_v5  ;;  %v8451_v1 = vadd.f32 %v8450_v33, %v16427_v48  ;;  %v7846_v45 = vpop.f32.mrb[250].mxu1  ;;  %8712 = vmatprep.mubr.bf16.mxu0 %v16477_v43  ;;  %v9041_v7 = vmax.f32 %v8447_v28, 0.0 }
 0x839   : > { %v9042_v2 = vmax.f32 %v8449_v0, 0.0  ;;  %v7847_v54 = vadd.f32 %v7846_v45, %v16012_v14  ;;  %v7848_v61 = vpop.f32.mrb[251].mxu1  ;;  %8713 = vmatmul.mubr.bf16.gmra.mrb[180].mxu0 %v16474_v47  ;;  %v7981_v44 = vmax.f32 %v7843_v63, 0.0 }
 0x83a   : > { %v9043_v60 = vmax.f32 %v8451_v1, 0.0  ;;  %v7849_v26 = vadd.f32 %v7848_v61, %v16016_v5  ;;  %v7982_v6 = vmax.f32 %v7845_v10, 0.0 }
 0x83b   : > { %v16488_v4 = vpack.c.bf16 %v9042_v2, %v9040_v42  ;;  %v7983_v29 = vmax.f32 %v7847_v54, 0.0  ;;  %8976 = vmatmul.mubr.bf16.gmra.mrb[100].mxu1 %v16394_v55 }
 0x83c   : > { %v16491_v18 = vpack.c.bf16 %v9043_v60, %v9041_v7  ;;  %v7984_v20 = vmax.f32 %v7849_v26, 0.0  ;;  %v8454_v23 = vpop.f32.mrb[76].mxu0  ;;  %8983 = vmatprep.mubr.bf16.mxu1 %v16408_v62 }
 0x83d   : > { %v16494_v59 = vpack.c.bf16 %v7983_v29, %v7981_v44  ;;  %v8455_v21 = vadd.f32 %v8454_v23, %v16422_v16  ;;  %v8456_v51 = vpop.f32.mrb[77].mxu0 }
 0x83e   : > { %v16497_v58 = vpack.c.bf16 %v7984_v20, %v7982_v6  ;;  %v8457_v30 = vadd.f32 %v8456_v51, %v16427_v48  ;;  %v7852_v50 = vpop.f32.mrb[252].mxu1  ;;  %v8458_v13 = vpop.f32.mrb[78].mxu0 }
 0x83f   : > { %v7853_v55 = vadd.f32 %v7852_v50, %v16012_v14  ;;  %v8459_v11 = vadd.f32 %v8458_v13, %v16422_v16  ;;  %v7854_v46 = vpop.f32.mrb[253].mxu1  ;;  %v8460_v32 = vpop.f32.mrb[79].mxu0  ;;  %v9044_v36 = vmax.f32 %v8455_v21, 0.0 }
 0x840   : > { %v7855_v62 = vadd.f32 %v7854_v46, %v16016_v5  ;;  %v8461_v38 = vadd.f32 %v8460_v32, %v16427_v48  ;;  %v7856_v15 = vpop.f32.mrb[254].mxu1  ;;  %8722 = vmatprep.mubr.bf16.mxu0 %v16497_v58  ;;  %v9045_v31 = vmax.f32 %v8457_v30, 0.0 }
 0x841   : > { %v9046_v22 = vmax.f32 %v8459_v11, 0.0  ;;  %v7857_v37 = vadd.f32 %v7856_v15, %v16012_v14  ;;  %v7858_v57 = vpop.f32.mrb[255].mxu1  ;;  %8723 = vmatmul.mubr.bf16.gmra.mrb[184].mxu0 %v16494_v59  ;;  %v7985_v34 = vmax.f32 %v7853_v55, 0.0 }
 0x842   : > { %v9047_v39 = vmax.f32 %v8461_v38, 0.0  ;;  %v7859_v53 = vadd.f32 %v7858_v57, %v16016_v5  ;;  %v7986_v63 = vmax.f32 %v7855_v62, 0.0 }
 0x843   : > { %v16509_v28 = vpack.c.bf16 %v9046_v22, %v9044_v36  ;;  %v7987_v41 = vmax.f32 %v7857_v37, 0.0  ;;  %8984 = vmatmul.mubr.bf16.gmra.mrb[104].mxu1 %v16406_v52 }
 0x844   : > { %v16515_v0 = vpack.c.bf16 %v9047_v39, %v9045_v31  ;;  %v7988_v14 = vmax.f32 %v7859_v53, 0.0  ;;  %v8464_v35 = vpop.f32.mrb[80].mxu0  ;;  %8991 = vmatprep.mubr.bf16.mxu1 %v16434_v12  ;;  %v12389_v39 = vld [vmem:[%s17403_s21 + $0x8] sm:$0xff]  }
 0x845   : > { %v16518_v33 = vpack.c.bf16 %v7987_v41, %v7985_v34  ;;  %v8465_v5 = vadd.f32 %v8464_v35, %v16422_v16  ;;  %v8466_v10 = vpop.f32.mrb[81].mxu0  ;;  %11667 = vmatprep.subr.bf16.mxu1 %v12389_v39 }
 0x846   : > { %v16521_v1 = vpack.c.bf16 %v7988_v14, %v7986_v63  ;;  %v8467_v45 = vadd.f32 %v8466_v10, %v16427_v48  ;;  %v8468_v52 = vpop.f32.mrb[82].mxu0  ;;  %v8777_v42 = vpop.f32.mrb[0].mxu1  ;;  %11668 = vmatpush3.bf16.msra.mxu1 %v12389_v39 }
 0x847   : > { %v8469_v9 = vadd.f32 %v8468_v52, %v16422_v16  ;;  %v8778_v2 = vadd.f32 %v8777_v42, %v16513_v56  ;;  %v8470_v54 = vpop.f32.mrb[83].mxu0  ;;  %v8779_v61 = vpop.f32.mrb[1].mxu1  ;;  %v9048_v60 = vmax.f32 %v8465_v5, 0.0 }
 0x848   : > { %v8471_v7 = vadd.f32 %v8470_v54, %v16427_v48  ;;  %8732 = vmatprep.mubr.bf16.mxu0 %v16521_v1  ;;  %v8780_v12 = vpop.f32.mrb[2].mxu1  ;;  %v9049_v29 = vmax.f32 %v8467_v45, 0.0 }
 0x849   : > { %v9050_v26 = vmax.f32 %v8469_v9, 0.0  ;;  %v8782_v44 = vpop.f32.mrb[3].mxu1  ;;  %10557 = vperm.xlu0 %11882, %v8778_v2   ;;  %8733 = vmatmul.mubr.bf16.gmra.mrb[188].mxu0 %v16518_v33  ;;  %v8781_v23 = vadd.f32 %v8780_v12, %v16513_v56 }
 0x84a   : > { %v9051_v6 = vmax.f32 %v8471_v7, 0.0  ;;  %9384 = vmatprep.mubr.bf16.mxu0 %v16448_v3 }
 0x84b   : > { %v16530_v20 = vpack.c.bf16 %v9050_v26, %v9048_v60  ;;  %8992 = vmatmul.mubr.bf16.gmra.mrb[108].mxu1 %v16431_v27 }
 0x84c   : > { %v16534_v21 = vpack.c.bf16 %v9051_v6, %v9049_v29  ;;  %v8474_v51 = vpop.f32.mrb[84].mxu0  ;;  %8999 = vmatprep.mubr.bf16.mxu1 %v16454_v40 }
 0x84d   : > { %v8475_v30 = vadd.f32 %v8474_v51, %v16422_v16  ;;  %v8476_v50 = vpop.f32.mrb[85].mxu0  ;;  %10562 = vperm.xlu0 %11882, %v8781_v23  }
 0x84e   : > { %v8477_v13 = vadd.f32 %v8476_v50, %v16427_v48  ;;  %v8478_v55 = vpop.f32.mrb[86].mxu0  ;;  %v8785_v11 = vpop.f32.mrb[4].mxu1 }
 0x84f   : > { %v8479_v3 = vadd.f32 %v8478_v55, %v16422_v16  ;;  %v8786_v46 = vadd.f32 %v8785_v11, %v16513_v56  ;;  %v8480_v32 = vpop.f32.mrb[87].mxu0  ;;  %v8787_v19 = vpop.f32.mrb[5].mxu1  ;;  %v9052_v62 = vmax.f32 %v8475_v30, 0.0 }
 0x850   : > { %v8481_v27 = vadd.f32 %v8480_v32, %v16427_v48  ;;  %v8788_v25 = vpop.f32.mrb[6].mxu1  ;;  %v9053_v15 = vmax.f32 %v8477_v13, 0.0 }
 0x851   : > { %v9054_v38 = vmax.f32 %v8479_v3, 0.0  ;;  %v8790_v40 = vpop.f32.mrb[7].mxu1  ;;  %10567 = vperm.xlu1 %11883, %v8786_v46   ;;  %9385 = vmatmul.mubr.bf16.vlgmr.msra.gmra.mrb[192].mxu0 %v16445_v8  ;;  %v8789_v37 = vadd.f32 %v8788_v25, %v16513_v56 }
 0x852   : > { %v9055_v36 = vmax.f32 %v8481_v27, 0.0  ;;  %9392 = vmatprep.mubr.bf16.mxu0 %v16468_v24 }
 0x853   : > { %v16544_v22 = vpack.c.bf16 %v9054_v38, %v9052_v62  ;;  %9000 = vmatmul.mubr.bf16.gmra.mrb[112].mxu1 %v16451_v17 }
 0x854   : > { %v16548_v57 = vpack.c.bf16 %v9055_v36, %v9053_v15  ;;  %v8484_v31 = vpop.f32.mrb[88].mxu0  ;;  %9007 = vmatprep.mubr.bf16.mxu1 %v16477_v43 }
 0x855   : > { %v8485_v8 = vadd.f32 %v8484_v31, %v16422_v16  ;;  %v8486_v53 = vpop.f32.mrb[89].mxu0  ;;  %10572 = vperm.xlu1 %11883, %v8789_v37  }
 0x856   : > { %v8487_v24 = vadd.f32 %v8486_v53, %v16427_v48  ;;  %v8488_v34 = vpop.f32.mrb[90].mxu0  ;;  %v8793_v41 = vpop.f32.mrb[8].mxu1 }
 0x857   : > { %v8489_v17 = vadd.f32 %v8488_v34, %v16422_v16  ;;  %v8794_v63 = vadd.f32 %v8793_v41, %v16513_v56  ;;  %v8490_v14 = vpop.f32.mrb[91].mxu0  ;;  %v8795_v35 = vpop.f32.mrb[9].mxu1  ;;  %v9056_v10 = vmax.f32 %v8485_v8, 0.0 }
 0x858   : > { %v8491_v43 = vadd.f32 %v8490_v14, %v16427_v48  ;;  %v8796_v5 = vpop.f32.mrb[10].mxu1  ;;  %v9057_v9 = vmax.f32 %v8487_v24, 0.0 }
 0x859   : > { %v9058_v45 = vmax.f32 %v8489_v17, 0.0  ;;  %v8797_v52 = vadd.f32 %v8796_v5, %v16513_v56  ;;  %v8798_v42 = vpop.f32.mrb[11].mxu1  ;;  %10577 = vperm.xlu0 %11882, %v8794_v63   ;;  %9393 = vmatmul.mubr.bf16.gmra.mrb[196].mxu0 %v16465_v49 }
 0x85a   : > { %v9059_v2 = vmax.f32 %v8491_v43, 0.0  ;;  %9400 = vmatprep.mubr.bf16.mxu0 %v16491_v18 }
 0x85b   : > { %v16562_v54 = vpack.c.bf16 %v9058_v45, %v9056_v10  ;;  %9008 = vmatmul.mubr.bf16.gmra.mrb[116].mxu1 %v16474_v47  ;;  %10582 = vperm.xlu1 %11883, %v8797_v52  }
 0x85c   : > { %v16565_v61 = vpack.c.bf16 %v9059_v2, %v9057_v9  ;;  %v8494_v7 = vpop.f32.mrb[92].mxu0  ;;  %9015 = vmatprep.mubr.bf16.mxu1 %v16497_v58 }
 0x85d   : > { %v8495_v12 = vadd.f32 %v8494_v7, %v16422_v16  ;;  %v8496_v60 = vpop.f32.mrb[93].mxu0 }
 0x85e   : > { %v8497_v26 = vadd.f32 %v8496_v60, %v16427_v48  ;;  %v8498_v49 = vpop.f32.mrb[94].mxu0  ;;  %v8801_v44 = vpop.f32.mrb[12].mxu1 }
 0x85f   : > { %v8499_v29 = vadd.f32 %v8498_v49, %v16422_v16  ;;  %v8802_v18 = vadd.f32 %v8801_v44, %v16513_v56  ;;  %v8500_v6 = vpop.f32.mrb[95].mxu0  ;;  %v8803_v23 = vpop.f32.mrb[13].mxu1  ;;  %v9060_v30 = vmax.f32 %v8495_v12, 0.0  ;;  %v12390_v44 = vld [vmem:[%s17403_s21 + $0x10] sm:$0xff]  }
 0x860   : > { %v8501_v47 = vadd.f32 %v8500_v6, %v16427_v48  ;;  %v8804_v51 = vpop.f32.mrb[14].mxu1  ;;  %v9061_v55 = vmax.f32 %v8497_v26, 0.0  ;;  %11669 = vmatprep.subr.bf16.mxu1 %v12390_v44 }
 0x861   : > { %v9062_v50 = vmax.f32 %v8499_v29, 0.0  ;;  %v8805_v58 = vadd.f32 %v8804_v51, %v16513_v56  ;;  %v8806_v13 = vpop.f32.mrb[15].mxu1  ;;  %10587 = vperm.xlu0 %11882, %v8802_v18   ;;  %9401 = vmatmul.mubr.bf16.gmra.mrb[200].mxu0 %v16488_v4 }
 0x862   : > { %v9063_v11 = vmax.f32 %v8501_v47, 0.0  ;;  %9408 = vmatprep.mubr.bf16.mxu0 %v16515_v0  ;;  %11670 = vmatpush3.bf16.msra.mxu1 %v12390_v44 }
 0x863   : > { %v16576_v3 = vpack.c.bf16 %v9062_v50, %v9060_v30  ;;  %9016 = vmatmul.mubr.bf16.gmra.mrb[120].mxu1 %v16494_v59  ;;  %10592 = vperm.xlu1 %11883, %v8805_v58  }
 0x864   : > { %v16579_v46 = vpack.c.bf16 %v9063_v11, %v9061_v55  ;;  %v8504_v32 = vpop.f32.mrb[96].mxu0  ;;  %9023 = vmatprep.mubr.bf16.mxu1 %v16521_v1 }
 0x865   : > { %v8505_v19 = vadd.f32 %v8504_v32, %v16422_v16  ;;  %v8506_v27 = vpop.f32.mrb[97].mxu0 }
 0x866   : > { %v8507_v25 = vadd.f32 %v8506_v27, %v16427_v48  ;;  %v8508_v4 = vpop.f32.mrb[98].mxu0  ;;  %v8809_v62 = vpop.f32.mrb[16].mxu1 }
 0x867   : > { %v8509_v38 = vadd.f32 %v8508_v4, %v16422_v16  ;;  %v8810_v0 = vadd.f32 %v8809_v62, %v16513_v56  ;;  %v8510_v40 = vpop.f32.mrb[99].mxu0  ;;  %v8811_v15 = vpop.f32.mrb[17].mxu1  ;;  %v9064_v37 = vmax.f32 %v8505_v19, 0.0 }
 0x868   : > { %v8511_v59 = vadd.f32 %v8510_v40, %v16427_v48  ;;  %v8812_v36 = vpop.f32.mrb[18].mxu1  ;;  %v9065_v8 = vmax.f32 %v8507_v25, 0.0 }
 0x869   : > { %v9066_v31 = vmax.f32 %v8509_v38, 0.0  ;;  %v8813_v1 = vadd.f32 %v8812_v36, %v16513_v56  ;;  %v8814_v39 = vpop.f32.mrb[19].mxu1  ;;  %10597 = vperm.xlu0 %11882, %v8810_v0   ;;  %9409 = vmatmul.mubr.bf16.gmra.mrb[204].mxu0 %v16509_v28 }
 0x86a   : > { %v9067_v53 = vmax.f32 %v8511_v59, 0.0  ;;  %9416 = vmatprep.mubr.bf16.mxu0 %v16534_v21 }
 0x86b   : > { %v16590_v24 = vpack.c.bf16 %v9066_v31, %v9064_v37  ;;  %10602 = vperm.xlu1 %11883, %v8813_v1   ;;  %9024 = vmatmul.mubr.bf16.gmra.mrb[124].mxu1 %v16518_v33 }
 0x86c   : > { %v16593_v34 = vpack.c.bf16 %v9067_v53, %v9065_v8  ;;  %v8514_v41 = vpop.f32.mrb[100].mxu0 }
 0x86d   : > { %v8515_v17 = vadd.f32 %v8514_v41, %v16422_v16  ;;  %v8516_v63 = vpop.f32.mrb[101].mxu0 }
 0x86e   : > { %v8517_v14 = vadd.f32 %v8516_v63, %v16427_v48  ;;  %v8518_v35 = vpop.f32.mrb[102].mxu0  ;;  %v8817_v43 = vpop.f32.mrb[20].mxu1 }
 0x86f   : > { %v8519_v28 = vadd.f32 %v8518_v35, %v16422_v16  ;;  %v8818_v5 = vadd.f32 %v8817_v43, %v16513_v56  ;;  %v8520_v21 = vpop.f32.mrb[103].mxu0  ;;  %v8819_v10 = vpop.f32.mrb[21].mxu1  ;;  %v9068_v33 = vmax.f32 %v8515_v17, 0.0 }
 0x870   : > { %v8521_v45 = vadd.f32 %v8520_v21, %v16427_v48  ;;  %v8820_v52 = vpop.f32.mrb[22].mxu1  ;;  %v9069_v7 = vmax.f32 %v8517_v14, 0.0 }
 0x871   : > { %v9070_v42 = vmax.f32 %v8519_v28, 0.0  ;;  %v8821_v9 = vadd.f32 %v8820_v52, %v16513_v56  ;;  %v8822_v2 = vpop.f32.mrb[23].mxu1  ;;  %10607 = vperm.xlu0 %11882, %v8818_v5   ;;  %9417 = vmatmul.mubr.bf16.gmra.mrb[208].mxu0 %v16530_v20 }
 0x872   : > { %v9071_v12 = vmax.f32 %v8521_v45, 0.0  ;;  %9424 = vmatprep.mubr.bf16.mxu0 %v16548_v57 }
 0x873   : > { %v16603_v60 = vpack.c.bf16 %v9070_v42, %v9068_v33  ;;  %10612 = vperm.xlu1 %11883, %v8821_v9  }
 0x874   : > { %v16605_v26 = vpack.c.bf16 %v9071_v12, %v9069_v7  ;;  %v8524_v49 = vpop.f32.mrb[104].mxu0 }
 0x875   : > { %v8525_v29 = vadd.f32 %v8524_v49, %v16422_v16  ;;  %v8526_v18 = vpop.f32.mrb[105].mxu0 }
 0x876   : > { %v8527_v6 = vadd.f32 %v8526_v18, %v16427_v48  ;;  %v8528_v20 = vpop.f32.mrb[106].mxu0  ;;  %v8825_v23 = vpop.f32.mrb[24].mxu1 }
 0x877   : > { %v8529_v57 = vadd.f32 %v8528_v20, %v16422_v16  ;;  %v8826_v47 = vadd.f32 %v8825_v23, %v16513_v56  ;;  %v8530_v51 = vpop.f32.mrb[107].mxu0  ;;  %v8827_v30 = vpop.f32.mrb[25].mxu1  ;;  %v9072_v13 = vmax.f32 %v8525_v29, 0.0 }
 0x878   : > { %v8531_v50 = vadd.f32 %v8530_v51, %v16427_v48  ;;  %v8828_v58 = vpop.f32.mrb[26].mxu1  ;;  %v9073_v19 = vmax.f32 %v8527_v6, 0.0 }
 0x879   : > { %v9074_v55 = vmax.f32 %v8529_v57, 0.0  ;;  %v8829_v11 = vadd.f32 %v8828_v58, %v16513_v56  ;;  %v8830_v32 = vpop.f32.mrb[27].mxu1  ;;  %10617 = vperm.xlu0 %11882, %v8826_v47   ;;  %9425 = vmatmul.mubr.bf16.gmra.mrb[212].mxu0 %v16544_v22 }
 0x87a   : > { %v9075_v27 = vmax.f32 %v8531_v50, 0.0  ;;  %9432 = vmatprep.mubr.bf16.mxu0 %v16565_v61 }
 0x87b   : > { %v16618_v25 = vpack.c.bf16 %v9074_v55, %v9072_v13  ;;  %10622 = vperm.xlu1 %11883, %v8829_v11  }
 0x87c   : > { %v16620_v4 = vpack.c.bf16 %v9075_v27, %v9073_v19  ;;  %v8534_v62 = vpop.f32.mrb[108].mxu0 }
 0x87d   : > { %v8535_v38 = vadd.f32 %v8534_v62, %v16422_v16  ;;  %v8536_v0 = vpop.f32.mrb[109].mxu0 }
 0x87e   : > { %v8537_v40 = vadd.f32 %v8536_v0, %v16427_v48  ;;  %v8538_v15 = vpop.f32.mrb[110].mxu0  ;;  %v8833_v59 = vpop.f32.mrb[28].mxu1 }
 0x87f   : > { %v8539_v36 = vadd.f32 %v8538_v15, %v16422_v16  ;;  %v8834_v22 = vadd.f32 %v8833_v59, %v16513_v56  ;;  %v8540_v37 = vpop.f32.mrb[111].mxu0  ;;  %v8835_v31 = vpop.f32.mrb[29].mxu1  ;;  %v9076_v39 = vmax.f32 %v8535_v38, 0.0  ;;  %v12391_v59 = vld [vmem:[%s17403_s21 + $0x18] sm:$0xff]  }
 0x880   : > { %v8541_v61 = vadd.f32 %v8540_v37, %v16427_v48  ;;  %v8836_v1 = vpop.f32.mrb[30].mxu1  ;;  %v9077_v17 = vmax.f32 %v8537_v40, 0.0  ;;  %11671 = vmatprep.subr.bf16.mxu1 %v12391_v59 }
 0x881   : > { %v9078_v8 = vmax.f32 %v8539_v36, 0.0  ;;  %v8837_v53 = vadd.f32 %v8836_v1, %v16513_v56  ;;  %v8838_v41 = vpop.f32.mrb[31].mxu1  ;;  %10627 = vperm.xlu0 %11882, %v8834_v22   ;;  %9433 = vmatmul.mubr.bf16.gmra.mrb[216].mxu0 %v16562_v54 }
 0x882   : > { %v9079_v63 = vmax.f32 %v8541_v61, 0.0  ;;  %9440 = vmatprep.mubr.bf16.mxu0 %v16579_v46  ;;  %11672 = vmatpush3.bf16.msra.mxu1 %v12391_v59 }
 0x883   : > { %v16630_v14 = vpack.c.bf16 %v9078_v8, %v9076_v39  ;;  %10632 = vperm.xlu1 %11883, %v8837_v53  }
 0x884   : > { %v16632_v35 = vpack.c.bf16 %v9079_v63, %v9077_v17  ;;  %v8544_v43 = vpop.f32.mrb[112].mxu0 }
 0x885   : > { %v8545_v28 = vadd.f32 %v8544_v43, %v16422_v16  ;;  %v8546_v5 = vpop.f32.mrb[113].mxu0 }
 0x886   : > { %v8547_v21 = vadd.f32 %v8546_v5, %v16427_v48  ;;  %v8548_v10 = vpop.f32.mrb[114].mxu0  ;;  %v8841_v45 = vpop.f32.mrb[32].mxu1 }
 0x887   : > { %v8549_v52 = vadd.f32 %v8548_v10, %v16422_v16  ;;  %v8842_v54 = vadd.f32 %v8841_v45, %v16513_v56  ;;  %v8550_v33 = vpop.f32.mrb[115].mxu0  ;;  %v8843_v42 = vpop.f32.mrb[33].mxu1  ;;  %v9080_v2 = vmax.f32 %v8545_v28, 0.0 }
 0x888   : > { %v8551_v46 = vadd.f32 %v8550_v33, %v16427_v48  ;;  %v8844_v9 = vpop.f32.mrb[34].mxu1  ;;  %v9081_v44 = vmax.f32 %v8547_v21, 0.0 }
 0x889   : > { %v9082_v7 = vmax.f32 %v8549_v52, 0.0  ;;  %v8845_v12 = vadd.f32 %v8844_v9, %v16513_v56  ;;  %v8846_v49 = vpop.f32.mrb[35].mxu1  ;;  %10637 = vperm.xlu0 %11882, %v8842_v54   ;;  %9441 = vmatmul.mubr.bf16.gmra.mrb[220].mxu0 %v16576_v3 }
 0x88a   : > { %v9083_v29 = vmax.f32 %v8551_v46, 0.0  ;;  %9448 = vmatprep.mubr.bf16.mxu0 %v16593_v34 }
 0x88b   : > { %v16642_v18 = vpack.c.bf16 %v9082_v7, %v9080_v2  ;;  %10642 = vperm.xlu1 %11883, %v8845_v12  }
 0x88c   : > { %v16644_v6 = vpack.c.bf16 %v9083_v29, %v9081_v44  ;;  %v8554_v20 = vpop.f32.mrb[116].mxu0 }
 0x88d   : > { %v8555_v23 = vadd.f32 %v8554_v20, %v16422_v16  ;;  %v8556_v57 = vpop.f32.mrb[117].mxu0 }
 0x88e   : > { %v8557_v47 = vadd.f32 %v8556_v57, %v16427_v48  ;;  %v8558_v51 = vpop.f32.mrb[118].mxu0  ;;  %v8849_v30 = vpop.f32.mrb[36].mxu1 }
 0x88f   : > { %v8559_v50 = vadd.f32 %v8558_v51, %v16422_v16  ;;  %v8850_v3 = vadd.f32 %v8849_v30, %v16513_v56  ;;  %v8560_v58 = vpop.f32.mrb[119].mxu0  ;;  %v8851_v13 = vpop.f32.mrb[37].mxu1  ;;  %v9084_v11 = vmax.f32 %v8555_v23, 0.0 }
 0x890   : > { %v8561_v34 = vadd.f32 %v8560_v58, %v16427_v48  ;;  %v8852_v55 = vpop.f32.mrb[38].mxu1  ;;  %v9085_v62 = vmax.f32 %v8557_v47, 0.0  ;;  %v12392_v58 = vld [vmem:[%s17403_s21 + $0x20] sm:$0xff]  }
 0x891   : > { %v9086_v32 = vmax.f32 %v8559_v50, 0.0  ;;  %v8853_v19 = vadd.f32 %v8852_v55, %v16513_v56  ;;  %v8854_v27 = vpop.f32.mrb[39].mxu1  ;;  %10647 = vperm.xlu0 %11882, %v8850_v3   ;;  %9449 = vmatmul.mubr.bf16.gmra.mrb[224].mxu0 %v16590_v24 }
 0x892   : > { %v9087_v38 = vmax.f32 %v8561_v34, 0.0  ;;  %9456 = vmatprep.mubr.bf16.mxu0 %v16605_v26  ;;  %11673 = vmatprep.subr.bf16.mxu1 %v12392_v58 }
 0x893   : > { %v16654_v0 = vpack.c.bf16 %v9086_v32, %v9084_v11  ;;  %10652 = vperm.xlu1 %11883, %v8853_v19   ;;  %11674 = vmatpush3.bf16.msra.mxu1 %v12392_v58 }
 0x894   : > { %v16656_v40 = vpack.c.bf16 %v9087_v38, %v9085_v62  ;;  %v8564_v15 = vpop.f32.mrb[120].mxu0 }
 0x895   : > { %v8565_v36 = vadd.f32 %v8564_v15, %v16422_v16  ;;  %v8566_v22 = vpop.f32.mrb[121].mxu0 }
 0x896   : > { %v8567_v37 = vadd.f32 %v8566_v22, %v16427_v48  ;;  %v8568_v24 = vpop.f32.mrb[122].mxu0  ;;  %v8857_v31 = vpop.f32.mrb[40].mxu1 }
 0x897   : > { %v8569_v26 = vadd.f32 %v8568_v24, %v16422_v16  ;;  %v8858_v61 = vadd.f32 %v8857_v31, %v16513_v56  ;;  %v8570_v1 = vpop.f32.mrb[123].mxu0  ;;  %v8859_v39 = vpop.f32.mrb[41].mxu1  ;;  %v9088_v41 = vmax.f32 %v8565_v36, 0.0  ;;  %v12393_v36 = vld [vmem:[%s17403_s21 + $0x28] sm:$0xff]  }
 0x898   : > { %v8571_v8 = vadd.f32 %v8570_v1, %v16427_v48  ;;  %v8860_v53 = vpop.f32.mrb[42].mxu1  ;;  %v9089_v28 = vmax.f32 %v8567_v37, 0.0  ;;  %11675 = vmatprep.subr.bf16.mxu1 %v12393_v36 }
 0x899   : > { %v9090_v17 = vmax.f32 %v8569_v26, 0.0  ;;  %v8861_v63 = vadd.f32 %v8860_v53, %v16513_v56  ;;  %v8862_v43 = vpop.f32.mrb[43].mxu1  ;;  %10657 = vperm.xlu0 %11882, %v8858_v61   ;;  %9457 = vmatmul.mubr.bf16.gmra.mrb[228].mxu0 %v16603_v60 }
 0x89a   : > { %v9091_v5 = vmax.f32 %v8571_v8, 0.0  ;;  %9464 = vmatprep.mubr.bf16.mxu0 %v16620_v4  ;;  %11676 = vmatpush3.bf16.msra.mxu1 %v12393_v36 }
 0x89b   : > { %v16669_v21 = vpack.c.bf16 %v9090_v17, %v9088_v41  ;;  %10662 = vperm.xlu1 %11883, %v8861_v63  }
 0x89c   : > { %v16671_v10 = vpack.c.bf16 %v9091_v5, %v9089_v28  ;;  %v8574_v45 = vpop.f32.mrb[124].mxu0 }
 0x89d   : > { %v8575_v52 = vadd.f32 %v8574_v45, %v16422_v16  ;;  %v8576_v54 = vpop.f32.mrb[125].mxu0 }
 0x89e   : > { %v8577_v33 = vadd.f32 %v8576_v54, %v16427_v48  ;;  %v8578_v42 = vpop.f32.mrb[126].mxu0  ;;  %v8865_v46 = vpop.f32.mrb[44].mxu1 }
 0x89f   : > { %v8579_v9 = vadd.f32 %v8578_v42, %v16422_v16  ;;  %v8866_v60 = vadd.f32 %v8865_v46, %v16513_v56  ;;  %v8580_v2 = vpop.f32.mrb[127].mxu0  ;;  %v8867_v7 = vpop.f32.mrb[45].mxu1  ;;  %v9092_v49 = vmax.f32 %v8575_v52, 0.0 }
 0x8a0   : > { %v8581_v4 = vadd.f32 %v8580_v2, %v16427_v48  ;;  %v8868_v12 = vpop.f32.mrb[46].mxu1  ;;  %v9093_v23 = vmax.f32 %v8577_v33, 0.0  ;;  %v12395_v33 = vld [vmem:[%s17403_s21 + $0x38] sm:$0xff]  }
 0x8a1   : > { %v9094_v44 = vmax.f32 %v8579_v9, 0.0  ;;  %v8869_v29 = vadd.f32 %v8868_v12, %v16513_v56  ;;  %v8870_v20 = vpop.f32.mrb[47].mxu1  ;;  %10667 = vperm.xlu0 %11882, %v8866_v60   ;;  %9465 = vmatmul.mubr.bf16.gmra.mrb[232].mxu0 %v16618_v25 }
 0x8a2   : > { %v9095_v57 = vmax.f32 %v8581_v4, 0.0  ;;  %9472 = vmatprep.mubr.bf16.mxu0 %v16632_v35 }
 0x8a3   : > { %v16681_v47 = vpack.c.bf16 %v9094_v44, %v9092_v49  ;;  %10672 = vperm.xlu1 %11883, %v8869_v29  }
 0x8a4   : > { %v16683_v51 = vpack.c.bf16 %v9095_v57, %v9093_v23  ;;  %v8584_v30 = vpop.f32.mrb[128].mxu0 }
 0x8a5   : > { %v8585_v50 = vadd.f32 %v8584_v30, %v16422_v16  ;;  %v8586_v3 = vpop.f32.mrb[129].mxu0 }
 0x8a6   : > { %v8587_v13 = vadd.f32 %v8586_v3, %v16427_v48  ;;  %v8588_v25 = vpop.f32.mrb[130].mxu0  ;;  %v8873_v34 = vpop.f32.mrb[48].mxu1 }
 0x8a7   : > { %v8589_v55 = vadd.f32 %v8588_v25, %v16422_v16  ;;  %v8874_v35 = vadd.f32 %v8873_v34, %v16513_v56  ;;  %v8590_v11 = vpop.f32.mrb[131].mxu0  ;;  %v8875_v32 = vpop.f32.mrb[49].mxu1  ;;  %v9096_v62 = vmax.f32 %v8585_v50, 0.0 }
 0x8a8   : > { %v8591_v19 = vadd.f32 %v8590_v11, %v16427_v48  ;;  %v8876_v27 = vpop.f32.mrb[50].mxu1  ;;  %v9097_v22 = vmax.f32 %v8587_v13, 0.0 }
 0x8a9   : > { %v9098_v38 = vmax.f32 %v8589_v55, 0.0  ;;  %v8877_v15 = vadd.f32 %v8876_v27, %v16513_v56  ;;  %v8878_v59 = vpop.f32.mrb[51].mxu1  ;;  %10677 = vperm.xlu0 %11882, %v8874_v35   ;;  %9473 = vmatmul.mubr.bf16.gmra.mrb[236].mxu0 %v16630_v14  ;;  %v12394_v14 = vld [vmem:[%s17403_s21 + $0x30] sm:$0xff]  }
 0x8aa   : > { %v9099_v37 = vmax.f32 %v8591_v19, 0.0  ;;  %9480 = vmatprep.mubr.bf16.mxu0 %v16644_v6  ;;  %11677 = vmatprep.subr.bf16.mxu1 %v12394_v14 }
 0x8ab   : > { %v16699_v24 = vpack.c.bf16 %v9098_v38, %v9096_v62  ;;  %10682 = vperm.xlu1 %11883, %v8877_v15   ;;  %11678 = vmatpush3.bf16.msra.mxu1 %v12394_v14 }
 0x8ac   : > { %v16701_v31 = vpack.c.bf16 %v9099_v37, %v9097_v22  ;;  %v8594_v26 = vpop.f32.mrb[132].mxu0  ;;  %11679 = vmatprep.subr.bf16.mxu1 %v12395_v33 }
 0x8ad   : > { %v8595_v61 = vadd.f32 %v8594_v26, %v16422_v16  ;;  %v8596_v1 = vpop.f32.mrb[133].mxu0 }
 0x8ae   : > { %v8597_v39 = vadd.f32 %v8596_v1, %v16427_v48  ;;  %v8598_v8 = vpop.f32.mrb[134].mxu0  ;;  %v8881_v53 = vpop.f32.mrb[52].mxu1 }
 0x8af   : > { %v8599_v6 = vadd.f32 %v8598_v8, %v16422_v16  ;;  %v8882_v41 = vadd.f32 %v8881_v53, %v16513_v56  ;;  %v8600_v17 = vpop.f32.mrb[135].mxu0  ;;  %v8883_v63 = vpop.f32.mrb[53].mxu1  ;;  %v9100_v5 = vmax.f32 %v8595_v61, 0.0  ;;  %11680 = vmatpush3.bf16.msra.mxu1 %v12395_v33 }
 0x8b0   : > { %v8601_v43 = vadd.f32 %v8600_v17, %v16427_v48  ;;  %v8884_v28 = vpop.f32.mrb[54].mxu1  ;;  %v9101_v42 = vmax.f32 %v8597_v39, 0.0 }
 0x8b1   : > { %v9102_v45 = vmax.f32 %v8599_v6, 0.0  ;;  %v8885_v52 = vadd.f32 %v8884_v28, %v16513_v56  ;;  %v8886_v54 = vpop.f32.mrb[55].mxu1  ;;  %10687 = vperm.xlu0 %11882, %v8882_v41   ;;  %9481 = vmatmul.mubr.bf16.gmra.mrb[240].mxu0 %v16642_v18 }
 0x8b2   : > { %v9103_v46 = vmax.f32 %v8601_v43, 0.0  ;;  %9488 = vmatprep.mubr.bf16.mxu0 %v16656_v40 }
 0x8b3   : > { %v16717_v9 = vpack.c.bf16 %v9102_v45, %v9100_v5  ;;  %10692 = vperm.xlu1 %11883, %v8885_v52  }
 0x8b4   : > { %v16719_v60 = vpack.c.bf16 %v9103_v46, %v9101_v42  ;;  %v8604_v2 = vpop.f32.mrb[136].mxu0 }
 0x8b5   : > { %v8605_v7 = vadd.f32 %v8604_v2, %v16422_v16  ;;  %v8606_v4 = vpop.f32.mrb[137].mxu0 }
 0x8b6   : > { %v8607_v18 = vadd.f32 %v8606_v4, %v16427_v48  ;;  %v8608_v12 = vpop.f32.mrb[138].mxu0  ;;  %v8889_v49 = vpop.f32.mrb[56].mxu1 }
 0x8b7   : > { %v8609_v44 = vadd.f32 %v8608_v12, %v16422_v16  ;;  %v8890_v29 = vadd.f32 %v8889_v49, %v16513_v56  ;;  %v8610_v40 = vpop.f32.mrb[139].mxu0  ;;  %v8891_v20 = vpop.f32.mrb[57].mxu1  ;;  %v9104_v30 = vmax.f32 %v8605_v7, 0.0 }
 0x8b8   : > { %v8611_v23 = vadd.f32 %v8610_v40, %v16427_v48  ;;  %v8892_v57 = vpop.f32.mrb[58].mxu1  ;;  %v9105_v13 = vmax.f32 %v8607_v18, 0.0 }
 0x8b9   : > { %v9106_v50 = vmax.f32 %v8609_v44, 0.0  ;;  %v8893_v3 = vadd.f32 %v8892_v57, %v16513_v56  ;;  %v8894_v58 = vpop.f32.mrb[59].mxu1  ;;  %10697 = vperm.xlu0 %11882, %v8890_v29   ;;  %9489 = vmatmul.mubr.bf16.gmra.mrb[244].mxu0 %v16654_v0 }
 0x8ba   : > { %v9107_v25 = vmax.f32 %v8611_v23, 0.0  ;;  %9496 = vmatprep.mubr.bf16.mxu0 %v16671_v10 }
 0x8bb   : > { %v16729_v34 = vpack.c.bf16 %v9106_v50, %v9104_v30  ;;  %10702 = vperm.xlu1 %11883, %v8893_v3  }
 0x8bc   : > { %v16731_v55 = vpack.c.bf16 %v9107_v25, %v9105_v13  ;;  %v8614_v35 = vpop.f32.mrb[140].mxu0 }
 0x8bd   : > { %v8615_v11 = vadd.f32 %v8614_v35, %v16422_v16  ;;  %v8616_v32 = vpop.f32.mrb[141].mxu0 }
 0x8be   : > { %v8617_v19 = vadd.f32 %v8616_v32, %v16427_v48  ;;  %v8618_v27 = vpop.f32.mrb[142].mxu0  ;;  %v8897_v62 = vpop.f32.mrb[60].mxu1 }
 0x8bf   : > { %v8619_v38 = vadd.f32 %v8618_v27, %v16422_v16  ;;  %v8898_v0 = vadd.f32 %v8897_v62, %v16513_v56  ;;  %v8620_v15 = vpop.f32.mrb[143].mxu0  ;;  %v8899_v59 = vpop.f32.mrb[61].mxu1  ;;  %v9108_v22 = vmax.f32 %v8615_v11, 0.0 }
 0x8c0   : > { %v8621_v10 = vadd.f32 %v8620_v15, %v16427_v48  ;;  %v8900_v36 = vpop.f32.mrb[62].mxu1  ;;  %v9109_v1 = vmax.f32 %v8617_v19, 0.0 }
 0x8c1   : > { %v9110_v37 = vmax.f32 %v8619_v38, 0.0  ;;  %v8901_v26 = vadd.f32 %v8900_v36, %v16513_v56  ;;  %v8902_v61 = vpop.f32.mrb[63].mxu1  ;;  %10707 = vperm.xlu0 %11882, %v8898_v0   ;;  %9497 = vmatmul.mubr.bf16.gmra.mrb[248].mxu0 %v16669_v21 }
 0x8c2   : > { %v9111_v14 = vmax.f32 %v8621_v10, 0.0  ;;  %9504 = vmatprep.mubr.bf16.mxu0 %v16683_v51 }
 0x8c3   : > { %v16741_v39 = vpack.c.bf16 %v9110_v37, %v9108_v22  ;;  %10712 = vperm.xlu1 %11883, %v8901_v26  }
 0x8c4   : > { %v16743_v8 = vpack.c.bf16 %v9111_v14, %v9109_v1  ;;  %v8624_v53 = vpop.f32.mrb[144].mxu0 }
 0x8c5   : > { %v8625_v6 = vadd.f32 %v8624_v53, %v16422_v16  ;;  %v8626_v41 = vpop.f32.mrb[145].mxu0 }
 0x8c6   : > { %v8627_v17 = vadd.f32 %v8626_v41, %v16427_v48  ;;  %v8628_v63 = vpop.f32.mrb[146].mxu0  ;;  %v8905_v43 = vpop.f32.mrb[64].mxu1 }
 0x8c7   : > { %v8629_v28 = vadd.f32 %v8628_v63, %v16422_v16  ;;  %v8906_v21 = vadd.f32 %v8905_v43, %v16513_v56  ;;  %v8630_v5 = vpop.f32.mrb[147].mxu0  ;;  %v8907_v45 = vpop.f32.mrb[65].mxu1  ;;  %v9112_v54 = vmax.f32 %v8625_v6, 0.0 }
 0x8c8   : > { %v8631_v51 = vadd.f32 %v8630_v5, %v16427_v48  ;;  %v8908_v52 = vpop.f32.mrb[66].mxu1  ;;  %v9113_v2 = vmax.f32 %v8627_v17, 0.0 }
 0x8c9   : > { %v9114_v33 = vmax.f32 %v8629_v28, 0.0  ;;  %v8909_v42 = vadd.f32 %v8908_v52, %v16513_v56  ;;  %v8910_v46 = vpop.f32.mrb[67].mxu1  ;;  %10717 = vperm.xlu0 %11882, %v8906_v21   ;;  %9505 = vmatmul.mubr.bf16.gmra.mrb[252].mxu0 %v16681_v47 }
 0x8ca   : > { %v9115_v7 = vmax.f32 %v8631_v51, 0.0  ;;  %9512 = vmatprep.mubr.bf16.mxu0 %v16701_v31 }
 0x8cb   : > { %v16753_v4 = vpack.c.bf16 %v9114_v33, %v9112_v54  ;;  %10722 = vperm.xlu1 %11883, %v8909_v42  }
 0x8cc   : > { %v16755_v18 = vpack.c.bf16 %v9115_v7, %v9113_v2  ;;  %v8634_v12 = vpop.f32.mrb[148].mxu0 }
 0x8cd   : > { %v8635_v49 = vadd.f32 %v8634_v12, %v16422_v16  ;;  %v8636_v44 = vpop.f32.mrb[149].mxu0 }
 0x8ce   : > { %v8637_v29 = vadd.f32 %v8636_v44, %v16427_v48  ;;  %v8638_v40 = vpop.f32.mrb[150].mxu0  ;;  %v8913_v20 = vpop.f32.mrb[68].mxu1 }
 0x8cf   : > { %v8639_v23 = vadd.f32 %v8638_v40, %v16422_v16  ;;  %v8914_v47 = vadd.f32 %v8913_v20, %v16513_v56  ;;  %v8640_v57 = vpop.f32.mrb[151].mxu0  ;;  %v8915_v30 = vpop.f32.mrb[69].mxu1  ;;  %v9116_v3 = vmax.f32 %v8635_v49, 0.0 }
 0x8d0   : > { %v8641_v31 = vadd.f32 %v8640_v57, %v16427_v48  ;;  %v8916_v50 = vpop.f32.mrb[70].mxu1  ;;  %v9117_v35 = vmax.f32 %v8637_v29, 0.0 }
 0x8d1   : > { %v9118_v58 = vmax.f32 %v8639_v23, 0.0  ;;  %v8917_v13 = vadd.f32 %v8916_v50, %v16513_v56  ;;  %v8918_v25 = vpop.f32.mrb[71].mxu1  ;;  %10727 = vperm.xlu0 %11882, %v8914_v47   ;;  %9513 = vmatmul.mubr.bf16.gmra.mrb[0].mxu0 %v16699_v24 }
 0x8d2   : > { %v9119_v11 = vmax.f32 %v8641_v31, 0.0  ;;  %9520 = vmatprep.mubr.bf16.mxu0 %v16719_v60 }
 0x8d3   : > { %v16765_v32 = vpack.c.bf16 %v9118_v58, %v9116_v3  ;;  %10732 = vperm.xlu1 %11883, %v8917_v13  }
 0x8d4   : > { %v16767_v19 = vpack.c.bf16 %v9119_v11, %v9117_v35  ;;  %v8644_v27 = vpop.f32.mrb[152].mxu0 }
 0x8d5   : > { %v8645_v62 = vadd.f32 %v8644_v27, %v16422_v16  ;;  %v8646_v38 = vpop.f32.mrb[153].mxu0 }
 0x8d6   : > { %v8647_v0 = vadd.f32 %v8646_v38, %v16427_v48  ;;  %v8648_v15 = vpop.f32.mrb[154].mxu0  ;;  %v8921_v59 = vpop.f32.mrb[72].mxu1 }
 0x8d7   : > { %v8649_v10 = vadd.f32 %v8648_v15, %v16422_v16  ;;  %v8922_v24 = vadd.f32 %v8921_v59, %v16513_v56  ;;  %v8650_v36 = vpop.f32.mrb[155].mxu0  ;;  %v8923_v22 = vpop.f32.mrb[73].mxu1  ;;  %v9120_v26 = vmax.f32 %v8645_v62, 0.0 }
 0x8d8   : > { %v8651_v60 = vadd.f32 %v8650_v36, %v16427_v48  ;;  %v8924_v37 = vpop.f32.mrb[74].mxu1  ;;  %v9121_v53 = vmax.f32 %v8647_v0, 0.0 }
 0x8d9   : > { %v9122_v61 = vmax.f32 %v8649_v10, 0.0  ;;  %v8925_v1 = vadd.f32 %v8924_v37, %v16513_v56  ;;  %v8926_v14 = vpop.f32.mrb[75].mxu1  ;;  %10737 = vperm.xlu0 %11882, %v8922_v24   ;;  %9521 = vmatmul.mubr.bf16.gmra.mrb[4].mxu0 %v16717_v9 }
 0x8da   : > { %v9123_v6 = vmax.f32 %v8651_v60, 0.0  ;;  %9528 = vmatprep.mubr.bf16.mxu0 %v16731_v55 }
 0x8db   : > { %v16777_v41 = vpack.c.bf16 %v9122_v61, %v9120_v26  ;;  %10742 = vperm.xlu1 %11883, %v8925_v1  }
 0x8dc   : > { %v16779_v17 = vpack.c.bf16 %v9123_v6, %v9121_v53  ;;  %v8654_v63 = vpop.f32.mrb[156].mxu0 }
 0x8dd   : > { %v8655_v43 = vadd.f32 %v8654_v63, %v16422_v16  ;;  %v8656_v28 = vpop.f32.mrb[157].mxu0 }
 0x8de   : > { %v8657_v21 = vadd.f32 %v8656_v28, %v16427_v48  ;;  %v8658_v5 = vpop.f32.mrb[158].mxu0  ;;  %v8929_v45 = vpop.f32.mrb[76].mxu1 }
 0x8df   : > { %v8659_v51 = vadd.f32 %v8658_v5, %v16422_v16  ;;  %v8930_v9 = vadd.f32 %v8929_v45, %v16513_v56  ;;  %v8660_v52 = vpop.f32.mrb[159].mxu0  ;;  %v8931_v54 = vpop.f32.mrb[77].mxu1  ;;  %v9124_v42 = vmax.f32 %v8655_v43, 0.0 }
 0x8e0   : > { %v8661_v55 = vadd.f32 %v8660_v52, %v16427_v48  ;;  %v8932_v33 = vpop.f32.mrb[78].mxu1  ;;  %v9125_v12 = vmax.f32 %v8657_v21, 0.0 }
 0x8e1   : > { %v9126_v46 = vmax.f32 %v8659_v51, 0.0  ;;  %v8933_v2 = vadd.f32 %v8932_v33, %v16513_v56  ;;  %v8934_v7 = vpop.f32.mrb[79].mxu1  ;;  %10747 = vperm.xlu0 %11882, %v8930_v9   ;;  %9529 = vmatmul.mubr.bf16.gmra.mrb[8].mxu0 %v16729_v34 }
 0x8e2   : > { %v9127_v49 = vmax.f32 %v8661_v55, 0.0  ;;  %9536 = vmatprep.mubr.bf16.mxu0 %v16743_v8 }
 0x8e3   : > { %v16789_v44 = vpack.c.bf16 %v9126_v46, %v9124_v42  ;;  %10752 = vperm.xlu1 %11883, %v8933_v2  }
 0x8e4   : > { %v16791_v29 = vpack.c.bf16 %v9127_v49, %v9125_v12  ;;  %v8664_v40 = vpop.f32.mrb[160].mxu0 }
 0x8e5   : > { %v8665_v20 = vadd.f32 %v8664_v40, %v16422_v16  ;;  %v8666_v23 = vpop.f32.mrb[161].mxu0 }
 0x8e6   : > { %v8667_v47 = vadd.f32 %v8666_v23, %v16427_v48  ;;  %v8668_v57 = vpop.f32.mrb[162].mxu0  ;;  %v8937_v30 = vpop.f32.mrb[80].mxu1 }
 0x8e7   : > { %v8669_v31 = vadd.f32 %v8668_v57, %v16422_v16  ;;  %v8938_v34 = vadd.f32 %v8937_v30, %v16513_v56  ;;  %v8670_v50 = vpop.f32.mrb[163].mxu0  ;;  %v8939_v3 = vpop.f32.mrb[81].mxu1  ;;  %v9128_v13 = vmax.f32 %v8665_v20, 0.0 }
 0x8e8   : > { %v8671_v8 = vadd.f32 %v8670_v50, %v16427_v48  ;;  %v8940_v58 = vpop.f32.mrb[82].mxu1  ;;  %v9129_v27 = vmax.f32 %v8667_v47, 0.0 }
 0x8e9   : > { %v9130_v25 = vmax.f32 %v8669_v31, 0.0  ;;  %v8941_v35 = vadd.f32 %v8940_v58, %v16513_v56  ;;  %v8942_v11 = vpop.f32.mrb[83].mxu1  ;;  %10757 = vperm.xlu0 %11882, %v8938_v34   ;;  %9537 = vmatmul.mubr.bf16.gmra.mrb[12].mxu0 %v16741_v39 }
 0x8ea   : > { %v9131_v62 = vmax.f32 %v8671_v8, 0.0  ;;  %9544 = vmatprep.mubr.bf16.mxu0 %v16755_v18 }
 0x8eb   : > { %v16801_v38 = vpack.c.bf16 %v9130_v25, %v9128_v13  ;;  %10762 = vperm.xlu1 %11883, %v8941_v35  }
 0x8ec   : > { %v16803_v0 = vpack.c.bf16 %v9131_v62, %v9129_v27  ;;  %v8674_v15 = vpop.f32.mrb[164].mxu0 }
 0x8ed   : > { %v8675_v59 = vadd.f32 %v8674_v15, %v16422_v16  ;;  %v8676_v10 = vpop.f32.mrb[165].mxu0 }
 0x8ee   : > { %v8677_v24 = vadd.f32 %v8676_v10, %v16427_v48  ;;  %v8678_v36 = vpop.f32.mrb[166].mxu0  ;;  %v8945_v22 = vpop.f32.mrb[84].mxu1 }
 0x8ef   : > { %v8679_v60 = vadd.f32 %v8678_v36, %v16422_v16  ;;  %v8946_v39 = vadd.f32 %v8945_v22, %v16513_v56  ;;  %v8680_v37 = vpop.f32.mrb[167].mxu0  ;;  %v8947_v26 = vpop.f32.mrb[85].mxu1  ;;  %v9132_v1 = vmax.f32 %v8675_v59, 0.0 }
 0x8f0   : > { %v8681_v18 = vadd.f32 %v8680_v37, %v16427_v48  ;;  %v8948_v61 = vpop.f32.mrb[86].mxu1  ;;  %v9133_v63 = vmax.f32 %v8677_v24, 0.0 }
 0x8f1   : > { %v9134_v14 = vmax.f32 %v8679_v60, 0.0  ;;  %v8949_v53 = vadd.f32 %v8948_v61, %v16513_v56  ;;  %v8950_v6 = vpop.f32.mrb[87].mxu1  ;;  %10767 = vperm.xlu0 %11882, %v8946_v39   ;;  %9545 = vmatmul.mubr.bf16.gmra.mrb[16].mxu0 %v16753_v4 }
 0x8f2   : > { %v9135_v43 = vmax.f32 %v8681_v18, 0.0  ;;  %9552 = vmatprep.mubr.bf16.mxu0 %v16767_v19 }
 0x8f3   : > { %v16813_v28 = vpack.c.bf16 %v9134_v14, %v9132_v1  ;;  %10772 = vperm.xlu1 %11883, %v8949_v53  }
 0x8f4   : > { %v16815_v21 = vpack.c.bf16 %v9135_v43, %v9133_v63  ;;  %v8684_v5 = vpop.f32.mrb[168].mxu0 }
 0x8f5   : > { %v8685_v45 = vadd.f32 %v8684_v5, %v16422_v16  ;;  %v8686_v51 = vpop.f32.mrb[169].mxu0 }
 0x8f6   : > { %v8687_v9 = vadd.f32 %v8686_v51, %v16427_v48  ;;  %v8688_v52 = vpop.f32.mrb[170].mxu0  ;;  %v8953_v54 = vpop.f32.mrb[88].mxu1 }
 0x8f7   : > { %v8689_v55 = vadd.f32 %v8688_v52, %v16422_v16  ;;  %v8954_v4 = vadd.f32 %v8953_v54, %v16513_v56  ;;  %v8690_v33 = vpop.f32.mrb[171].mxu0  ;;  %v8955_v42 = vpop.f32.mrb[89].mxu1  ;;  %v9136_v2 = vmax.f32 %v8685_v45, 0.0 }
 0x8f8   : > { %v8691_v19 = vadd.f32 %v8690_v33, %v16427_v48  ;;  %v8956_v46 = vpop.f32.mrb[90].mxu1  ;;  %v9137_v40 = vmax.f32 %v8687_v9, 0.0 }
 0x8f9   : > { %v9138_v7 = vmax.f32 %v8689_v55, 0.0  ;;  %v8957_v12 = vadd.f32 %v8956_v46, %v16513_v56  ;;  %v8958_v49 = vpop.f32.mrb[91].mxu1  ;;  %10777 = vperm.xlu0 %11882, %v8954_v4   ;;  %9553 = vmatmul.mubr.bf16.gmra.mrb[20].mxu0 %v16765_v32 }
 0x8fa   : > { %v9139_v20 = vmax.f32 %v8691_v19, 0.0  ;;  %9560 = vmatprep.mubr.bf16.mxu0 %v16779_v17 }
 0x8fb   : > { %v16825_v23 = vpack.c.bf16 %v9138_v7, %v9136_v2  ;;  %10782 = vperm.xlu1 %11883, %v8957_v12  }
 0x8fc   : > { %v16827_v47 = vpack.c.bf16 %v9139_v20, %v9137_v40  ;;  %v8694_v57 = vpop.f32.mrb[172].mxu0 }
 0x8fd   : > { %v8695_v30 = vadd.f32 %v8694_v57, %v16422_v16  ;;  %v8696_v31 = vpop.f32.mrb[173].mxu0 }
 0x8fe   : > { %v8697_v34 = vadd.f32 %v8696_v31, %v16427_v48  ;;  %v8698_v50 = vpop.f32.mrb[174].mxu0  ;;  %v8961_v3 = vpop.f32.mrb[92].mxu1 }
 0x8ff   : > { %v8699_v8 = vadd.f32 %v8698_v50, %v16422_v16  ;;  %v8962_v32 = vadd.f32 %v8961_v3, %v16513_v56  ;;  %v8700_v58 = vpop.f32.mrb[175].mxu0  ;;  %v8963_v13 = vpop.f32.mrb[93].mxu1  ;;  %v9140_v35 = vmax.f32 %v8695_v30, 0.0 }
 0x900   : > { %v8701_v17 = vadd.f32 %v8700_v58, %v16427_v48  ;;  %v8964_v25 = vpop.f32.mrb[94].mxu1  ;;  %v9141_v15 = vmax.f32 %v8697_v34, 0.0 }
 0x901   : > { %v9142_v11 = vmax.f32 %v8699_v8, 0.0  ;;  %v8965_v27 = vadd.f32 %v8964_v25, %v16513_v56  ;;  %v8966_v62 = vpop.f32.mrb[95].mxu1  ;;  %10787 = vperm.xlu0 %11882, %v8962_v32   ;;  %9561 = vmatmul.mubr.bf16.gmra.mrb[24].mxu0 %v16777_v41 }
 0x902   : > { %v9143_v59 = vmax.f32 %v8701_v17, 0.0  ;;  %9568 = vmatprep.mubr.bf16.mxu0 %v16791_v29 }
 0x903   : > { %v16837_v10 = vpack.c.bf16 %v9142_v11, %v9140_v35  ;;  %10792 = vperm.xlu1 %11883, %v8965_v27  }
 0x904   : > { %v16839_v24 = vpack.c.bf16 %v9143_v59, %v9141_v15  ;;  %v8704_v36 = vpop.f32.mrb[176].mxu0 }
 0x905   : > { %v8705_v22 = vadd.f32 %v8704_v36, %v16422_v16  ;;  %v8706_v60 = vpop.f32.mrb[177].mxu0 }
 0x906   : > { %v8707_v39 = vadd.f32 %v8706_v60, %v16427_v48  ;;  %v8708_v37 = vpop.f32.mrb[178].mxu0  ;;  %v8969_v26 = vpop.f32.mrb[96].mxu1 }
 0x907   : > { %v8709_v18 = vadd.f32 %v8708_v37, %v16422_v16  ;;  %v8970_v41 = vadd.f32 %v8969_v26, %v16513_v56  ;;  %v8710_v61 = vpop.f32.mrb[179].mxu0  ;;  %v8971_v1 = vpop.f32.mrb[97].mxu1  ;;  %v9144_v53 = vmax.f32 %v8705_v22, 0.0 }
 0x908   : > { %v8711_v29 = vadd.f32 %v8710_v61, %v16427_v48  ;;  %v8972_v14 = vpop.f32.mrb[98].mxu1  ;;  %v9145_v5 = vmax.f32 %v8707_v39, 0.0 }
 0x909   : > { %v9146_v6 = vmax.f32 %v8709_v18, 0.0  ;;  %v8973_v63 = vadd.f32 %v8972_v14, %v16513_v56  ;;  %v8974_v43 = vpop.f32.mrb[99].mxu1  ;;  %10797 = vperm.xlu0 %11882, %v8970_v41   ;;  %9569 = vmatmul.mubr.bf16.gmra.mrb[28].mxu0 %v16789_v44 }
 0x90a   : > { %v9147_v45 = vmax.f32 %v8711_v29, 0.0  ;;  %9576 = vmatprep.mubr.bf16.mxu0 %v16803_v0 }
 0x90b   : > { %v16849_v51 = vpack.c.bf16 %v9146_v6, %v9144_v53  ;;  %10802 = vperm.xlu1 %11883, %v8973_v63  }
 0x90c   : > { %v16851_v9 = vpack.c.bf16 %v9147_v45, %v9145_v5  ;;  %v8714_v52 = vpop.f32.mrb[180].mxu0 }
 0x90d   : > { %v8715_v54 = vadd.f32 %v8714_v52, %v16422_v16  ;;  %v8716_v55 = vpop.f32.mrb[181].mxu0 }
 0x90e   : > { %v8717_v4 = vadd.f32 %v8716_v55, %v16427_v48  ;;  %v8718_v33 = vpop.f32.mrb[182].mxu0  ;;  %v8977_v42 = vpop.f32.mrb[100].mxu1 }
 0x90f   : > { %v8719_v19 = vadd.f32 %v8718_v33, %v16422_v16  ;;  %v8978_v44 = vadd.f32 %v8977_v42, %v16513_v56  ;;  %v8720_v46 = vpop.f32.mrb[183].mxu0  ;;  %v8979_v2 = vpop.f32.mrb[101].mxu1  ;;  %v9148_v12 = vmax.f32 %v8715_v54, 0.0  ;;  %v18040_v33 = vld [vmem:[#allocation96_spill] sm:$0xff] }
 0x910   : > { %v8721_v0 = vadd.f32 %v8720_v46, %v16427_v48  ;;  %v8980_v7 = vpop.f32.mrb[102].mxu1  ;;  %v9149_v57 = vmax.f32 %v8717_v4, 0.0  ;;  %v18041_v2 = vld [vmem:[#allocation98_spill] sm:$0xff] }
 0x911   : > { %v9150_v49 = vmax.f32 %v8719_v19, 0.0  ;;  %v8981_v40 = vadd.f32 %v8980_v7, %v16513_v56  ;;  %v8982_v20 = vpop.f32.mrb[103].mxu1  ;;  %10807 = vperm.xlu0 %11882, %v8978_v44   ;;  %9577 = vmatmul.mubr.bf16.gmra.mrb[32].mxu0 %v16801_v38 }
 0x912   : > { %v9151_v30 = vmax.f32 %v8721_v0, 0.0  ;;  %9584 = vmatprep.mubr.bf16.mxu0 %v16815_v21 }
 0x913   : > { %v16861_v31 = vpack.c.bf16 %v9150_v49, %v9148_v12  ;;  %10812 = vperm.xlu1 %11883, %v8981_v40  }
 0x914   : > { %v16863_v34 = vpack.c.bf16 %v9151_v30, %v9149_v57  ;;  %v8724_v50 = vpop.f32.mrb[184].mxu0 }
 0x915   : > { %v8725_v3 = vadd.f32 %v8724_v50, %v16422_v16  ;;  %v8726_v8 = vpop.f32.mrb[185].mxu0 }
 0x916   : > { %v8727_v32 = vadd.f32 %v8726_v8, %v16427_v48  ;;  %v8728_v58 = vpop.f32.mrb[186].mxu0  ;;  %v8985_v13 = vpop.f32.mrb[104].mxu1  ;;  %v18042_v8 = vld [vmem:[#allocation95_spill] sm:$0xff] }
 0x917   : > { %v8729_v17 = vadd.f32 %v8728_v58, %v16422_v16  ;;  %v8986_v38 = vadd.f32 %v8985_v13, %v16513_v56  ;;  %v8730_v25 = vpop.f32.mrb[187].mxu0  ;;  %v8987_v35 = vpop.f32.mrb[105].mxu1  ;;  %v9152_v27 = vmax.f32 %v8725_v3, 0.0 }
 0x918   : > { %v8731_v21 = vadd.f32 %v8730_v25, %v16427_v48  ;;  %v8988_v11 = vpop.f32.mrb[106].mxu1  ;;  %v9153_v36 = vmax.f32 %v8727_v32, 0.0 }
 0x919   : > { %v9154_v62 = vmax.f32 %v8729_v17, 0.0  ;;  %v8989_v15 = vadd.f32 %v8988_v11, %v16513_v56  ;;  %v8990_v59 = vpop.f32.mrb[107].mxu1  ;;  %10817 = vperm.xlu0 %11882, %v8986_v38   ;;  %9585 = vmatmul.mubr.bf16.gmra.mrb[36].mxu0 %v16813_v28 }
 0x91a   : > { %v9155_v22 = vmax.f32 %v8731_v21, 0.0  ;;  %9592 = vmatprep.mubr.bf16.mxu0 %v16827_v47  ;;  %v18043_v21 = vld [vmem:[#allocation97_spill] sm:$0xff] }
 0x91b   : > { %v16873_v60 = vpack.c.bf16 %v9154_v62, %v9152_v27  ;;  %10822 = vperm.xlu1 %11883, %v8989_v15  }
 0x91c   : > { %v16875_v39 = vpack.c.bf16 %v9155_v22, %v9153_v36  ;;  %v8734_v37 = vpop.f32.mrb[188].mxu0 }
 0x91d   : > { %v8735_v26 = vadd.f32 %v8734_v37, %v16422_v16  ;;  %v8736_v18 = vpop.f32.mrb[189].mxu0 }
 0x91e   : > { %v8737_v41 = vadd.f32 %v8736_v18, %v16427_v48  ;;  %v8738_v61 = vpop.f32.mrb[190].mxu0  ;;  %v8993_v1 = vpop.f32.mrb[108].mxu1  ;;  %v18044_v18 = vld [vmem:[#allocation102_spill] sm:$0xff] }
 0x91f   : > { %v8739_v29 = vadd.f32 %v8738_v61, %v16422_v16  ;;  %v8994_v28 = vadd.f32 %v8993_v1, %v16513_v56  ;;  %v8740_v14 = vpop.f32.mrb[191].mxu0  ;;  %v8995_v53 = vpop.f32.mrb[109].mxu1  ;;  %v9156_v63 = vmax.f32 %v8735_v26, 0.0 }
 0x920   : > { %v8741_v47 = vadd.f32 %v8740_v14, %v16427_v48  ;;  %v8996_v6 = vpop.f32.mrb[110].mxu1  ;;  %v9157_v52 = vmax.f32 %v8737_v41, 0.0  ;;  %v16892_v48 = vld [vmem:[%s17402_s20] ss:$0 sm:$0xff]  ;;  %v18045_v53 = vld [vmem:[#allocation104_spill] sm:$0xff] }
 0x921   : > { %v9158_v43 = vmax.f32 %v8739_v29, 0.0  ;;  %v8997_v5 = vadd.f32 %v8996_v6, %v16513_v56  ;;  %v8998_v45 = vpop.f32.mrb[111].mxu1  ;;  %10827 = vperm.xlu0 %11882, %v8994_v28   ;;  %9593 = vmatmul.mubr.bf16.gmra.mrb[40].mxu0 %v16825_v23 }
 0x922   : > { %v9159_v54 = vmax.f32 %v8741_v47, 0.0  ;;  %9600 = vmatprep.mubr.bf16.mxu0 %v16839_v24 }
 0x923   : > { %v16885_v16 = vpack.c.bf16 %v9158_v43, %v9156_v63  ;;  %10832 = vperm.xlu1 %11883, %v8997_v5  }
 0x924   : > { %v16887_v55 = vpack.c.bf16 %v9159_v54, %v9157_v52  ;;  %v9386_v4 = vpop.f32.mrb[192].mxu0 }
 0x925   : > { %v9387_v42 = vadd.f32 %v9386_v4, %v18040_v33  ;;  %v9388_v19 = vpop.f32.mrb[193].mxu0  ;;  %v18046_v4 = vld [vmem:[#allocation101_spill] sm:$0xff] }
 0x926   : > { %v9001_v44 = vpop.f32.mrb[112].mxu1  ;;  %v9389_v23 = vpop.f32.mrb[194].mxu0 }
 0x927   : > { %v9648_v46 = vadd.f32 %v16892_v48, %v9387_v42  ;;  %v9002_v24 = vadd.f32 %v9001_v44, %v16513_v56  ;;  %v9390_v0 = vadd.f32 %v9389_v23, %v18041_v2  ;;  %v9003_v7 = vpop.f32.mrb[113].mxu1  ;;  %v9391_v12 = vpop.f32.mrb[195].mxu0  ;;  %v18047_v2 = vld [vmem:[#allocation103_spill] sm:$0xff] }
 0x928   : > { %v9004_v49 = vpop.f32.mrb[114].mxu1 }
 0x929   : > { %v9649_v40 = vadd.f32 %v16892_v48, %v9390_v0  ;;  %v9005_v20 = vadd.f32 %v9004_v49, %v16513_v56  ;;  %v9006_v57 = vpop.f32.mrb[115].mxu1  ;;  %10837 = vperm.xlu0 %11882, %v9002_v24   ;;  %9601 = vmatmul.mubr.bf16.gmra.mrb[44].mxu0 %v16837_v10  ;;  %v9712_v30 = vmax.f32 %v9648_v46, 0.0 }
 0x92a   : > { %9608 = vmatprep.mubr.bf16.mxu0 %v16851_v9 }
 0x92b   : > { %v9713_v50 = vmax.f32 %v9649_v40, 0.0  ;;  %10842 = vperm.xlu1 %11883, %v9005_v20  }
 0x92c   : > { %v9394_v3 = vpop.f32.mrb[196].mxu0 }
 0x92d   : > { %v9395_v32 = vadd.f32 %v18042_v8, %v9394_v3  ;;  %v9396_v58 = vpop.f32.mrb[197].mxu0  ;;  %v9776_v13 = vpack.c.bf16 %v9713_v50, %v9712_v30  ;;  %v18048_v3 = vld [vmem:[#allocation108_spill] sm:$0xff] }
 0x92e   : > { %v9009_v17 = vpop.f32.mrb[116].mxu1  ;;  %v9397_v38 = vpop.f32.mrb[198].mxu0 }
 0x92f   : > { %v9650_v25 = vadd.f32 %v16892_v48, %v9395_v32  ;;  %v9010_v35 = vadd.f32 %v9009_v17, %v16513_v56  ;;  %v9398_v11 = vadd.f32 %v18043_v21, %v9397_v38  ;;  %v9011_v27 = vpop.f32.mrb[117].mxu1  ;;  %v9399_v10 = vpop.f32.mrb[199].mxu0  ;;  %11681 = vmatprep.mubr.bf16.mxu1 %v9776_v13  ;;  %v18049_v17 = vld [vmem:[#allocation110_spill] sm:$0xff]  ;;  %v18050_v21 = vld [vmem:[#allocation107_spill] sm:$0xff] }
 0x930   : > { %v9012_v9 = vpop.f32.mrb[118].mxu1 }
 0x931   : > { %v9651_v62 = vadd.f32 %v16892_v48, %v9398_v11  ;;  %v9013_v15 = vadd.f32 %v9012_v9, %v16513_v56  ;;  %v9014_v59 = vpop.f32.mrb[119].mxu1  ;;  %10847 = vperm.xlu0 %11882, %v9010_v35   ;;  %9609 = vmatmul.mubr.bf16.gmra.mrb[48].mxu0 %v16849_v51  ;;  %v9714_v36 = vmax.f32 %v9650_v25, 0.0 }
 0x932   : > { %9616 = vmatprep.mubr.bf16.mxu0 %v16863_v34 }
 0x933   : > { %v9715_v22 = vmax.f32 %v9651_v62, 0.0  ;;  %10852 = vperm.xlu1 %11883, %v9013_v15   ;;  %v18051_v15 = vld [vmem:[#allocation109_spill] sm:$0xff] }
 0x934   : > { %v9402_v37 = vpop.f32.mrb[200].mxu0 }
 0x935   : > { %v9777_v26 = vpack.c.bf16 %v9715_v22, %v9714_v36  ;;  %v9403_v41 = vadd.f32 %v9402_v37, %v18044_v18  ;;  %v9404_v61 = vpop.f32.mrb[201].mxu0 }
 0x936   : > { %v9017_v1 = vpop.f32.mrb[120].mxu1  ;;  %v9405_v29 = vpop.f32.mrb[202].mxu0 }
 0x937   : > { %v9652_v28 = vadd.f32 %v16892_v48, %v9403_v41  ;;  %v9018_v14 = vadd.f32 %v9017_v1, %v16513_v56  ;;  %v9406_v47 = vadd.f32 %v9405_v29, %v18045_v53  ;;  %v9019_v6 = vpop.f32.mrb[121].mxu1  ;;  %v9407_v51 = vpop.f32.mrb[203].mxu0  ;;  %11682 = vmatmul.mubr.bf16.vlgmr.msra.gmra.mrb[128].mxu1 %v9777_v26  ;;  %v18052_v41 = vld [vmem:[#allocation112_spill] sm:$0xff] }
 0x938   : > { %v9020_v34 = vpop.f32.mrb[122].mxu1 }
 0x939   : > { %v9653_v63 = vadd.f32 %v16892_v48, %v9406_v47  ;;  %v9021_v43 = vadd.f32 %v9020_v34, %v16513_v56  ;;  %v9022_v5 = vpop.f32.mrb[123].mxu1  ;;  %10857 = vperm.xlu0 %11882, %v9018_v14   ;;  %9617 = vmatmul.mubr.bf16.gmra.mrb[52].mxu0 %v16861_v31  ;;  %v9716_v45 = vmax.f32 %v9652_v28, 0.0  ;;  %v18053_v14 = vld [vmem:[#allocation114_spill] sm:$0xff] }
 0x93a   : > { %9624 = vmatprep.mubr.bf16.mxu0 %v16875_v39 }
 0x93b   : > { %v9717_v52 = vmax.f32 %v9653_v63, 0.0  ;;  %10862 = vperm.xlu1 %11883, %v9021_v43   ;;  %v18054_v43 = vld [vmem:[#allocation111_spill] sm:$0xff] }
 0x93c   : > { %v9410_v54 = vpop.f32.mrb[204].mxu0 }
 0x93d   : > { %v9411_v33 = vadd.f32 %v18046_v4, %v9410_v54  ;;  %v9412_v42 = vpop.f32.mrb[205].mxu0  ;;  %v9778_v19 = vpack.c.bf16 %v9717_v52, %v9716_v45 }
 0x93e   : > { %v9025_v44 = vpop.f32.mrb[124].mxu1  ;;  %v9413_v23 = vpop.f32.mrb[206].mxu0 }
 0x93f   : > { %v9654_v46 = vadd.f32 %v16892_v48, %v9411_v33  ;;  %v9026_v24 = vadd.f32 %v9025_v44, %v16513_v56  ;;  %v9414_v0 = vadd.f32 %v18047_v2, %v9413_v23  ;;  %v9027_v7 = vpop.f32.mrb[125].mxu1  ;;  %v9415_v31 = vpop.f32.mrb[207].mxu0  ;;  %11685 = vmatprep.mubr.bf16.mxu1 %v9778_v19  ;;  %v18055_v33 = vld [vmem:[#allocation113_spill] sm:$0xff] }
 0x940   : > { %v9028_v39 = vpop.f32.mrb[126].mxu1 }
 0x941   : > { %v9655_v12 = vadd.f32 %v16892_v48, %v9414_v0  ;;  %v9029_v49 = vadd.f32 %v9028_v39, %v16513_v56  ;;  %v9030_v40 = vpop.f32.mrb[127].mxu1  ;;  %10867 = vperm.xlu0 %11882, %v9026_v24   ;;  %9625 = vmatmul.mubr.bf16.gmra.mrb[56].mxu0 %v16873_v60  ;;  %v9718_v20 = vmax.f32 %v9654_v46, 0.0  ;;  %v18056_v0 = vld [vmem:[#allocation116_spill] sm:$0xff] }
 0x942   : > { %9632 = vmatprep.mubr.bf16.mxu0 %v16887_v55 }
 0x943   : > { %v9719_v57 = vmax.f32 %v9655_v12, 0.0  ;;  %10872 = vperm.xlu1 %11883, %v9029_v49   ;;  %v18057_v49 = vld [vmem:[#allocation118_spill] sm:$0xff] }
 0x944   : > { %v9418_v30 = vpop.f32.mrb[208].mxu0 }
 0x945   : > { %v9779_v50 = vpack.c.bf16 %v9719_v57, %v9718_v20  ;;  %v9419_v8 = vadd.f32 %v9418_v30, %v18048_v3  ;;  %v9420_v32 = vpop.f32.mrb[209].mxu0 }
 0x946   : > { %v9421_v58 = vpop.f32.mrb[210].mxu0 }
 0x947   : > { %v9656_v13 = vadd.f32 %v16892_v48, %v9419_v8  ;;  %v9422_v38 = vadd.f32 %v9421_v58, %v18049_v17  ;;  %v9423_v56 = vpop.f32.mrb[211].mxu0  ;;  %11686 = vmatmul.mubr.bf16.gmra.mrb[132].mxu1 %v9779_v50  ;;  %v18058_v8 = vld [vmem:[#allocation115_spill] sm:$0xff] }
 0x948   : > { %v18059_v56 = vld [vmem:[#allocation117_spill] sm:$0xff] }
 0x949   : > { %v9657_v25 = vadd.f32 %v16892_v48, %v9422_v38  ;;  %9633 = vmatmul.mubr.bf16.gmra.mrb[60].mxu0 %v16885_v16  ;;  %v9720_v60 = vmax.f32 %v9656_v13, 0.0 }
 0x94b   : > { %v9721_v55 = vmax.f32 %v9657_v25, 0.0 }
 0x94c   : > { %v9426_v35 = vpop.f32.mrb[212].mxu0 }
 0x94d   : > { %v9427_v11 = vadd.f32 %v18050_v21, %v9426_v35  ;;  %v9428_v27 = vpop.f32.mrb[213].mxu0  ;;  %v9780_v10 = vpack.c.bf16 %v9721_v55, %v9720_v60 }
 0x94e   : > { %v9429_v9 = vpop.f32.mrb[214].mxu0 }
 0x94f   : > { %v9658_v62 = vadd.f32 %v16892_v48, %v9427_v11  ;;  %v9430_v59 = vadd.f32 %v18051_v15, %v9429_v9  ;;  %v9431_v36 = vpop.f32.mrb[215].mxu0  ;;  %11689 = vmatprep.mubr.bf16.mxu1 %v9780_v10  ;;  %v18060_v10 = vld [vmem:[#allocation120_spill] sm:$0xff] }
 0x950   : > { %v18061_v36 = vld [vmem:[#allocation122_spill] sm:$0xff] }
 0x951   : > { %v9659_v22 = vadd.f32 %v16892_v48, %v9430_v59  ;;  %v9722_v37 = vmax.f32 %v9658_v62, 0.0 }
 0x953   : > { %v9723_v26 = vmax.f32 %v9659_v22, 0.0 }
 0x954   : > { %v9434_v18 = vpop.f32.mrb[216].mxu0 }
 0x955   : > { %v9781_v16 = vpack.c.bf16 %v9723_v26, %v9722_v37  ;;  %v9435_v61 = vadd.f32 %v9434_v18, %v18052_v41  ;;  %v9436_v1 = vpop.f32.mrb[217].mxu0 }
 0x956   : > { %v9437_v29 = vpop.f32.mrb[218].mxu0 }
 0x957   : > { %v9660_v28 = vadd.f32 %v16892_v48, %v9435_v61  ;;  %v9438_v53 = vadd.f32 %v9437_v29, %v18053_v14  ;;  %v9439_v47 = vpop.f32.mrb[219].mxu0  ;;  %11690 = vmatmul.mubr.bf16.gmra.mrb[136].mxu1 %v9781_v16  ;;  %v18062_v61 = vld [vmem:[#allocation119_spill] sm:$0xff] }
 0x958   : > { %v18063_v47 = vld [vmem:[#allocation121_spill] sm:$0xff] }
 0x959   : > { %v9661_v6 = vadd.f32 %v16892_v48, %v9438_v53  ;;  %v9724_v51 = vmax.f32 %v9660_v28, 0.0 }
 0x95b   : > { %v9725_v34 = vmax.f32 %v9661_v6, 0.0 }
 0x95c   : > { %v9442_v63 = vpop.f32.mrb[220].mxu0 }
 0x95d   : > { %v9443_v5 = vadd.f32 %v18054_v43, %v9442_v63  ;;  %v9444_v45 = vpop.f32.mrb[221].mxu0  ;;  %v9782_v52 = vpack.c.bf16 %v9725_v34, %v9724_v51 }
 0x95e   : > { %v9445_v54 = vpop.f32.mrb[222].mxu0 }
 0x95f   : > { %v9662_v4 = vadd.f32 %v16892_v48, %v9443_v5  ;;  %v9446_v42 = vadd.f32 %v18055_v33, %v9445_v54  ;;  %v9447_v19 = vpop.f32.mrb[223].mxu0  ;;  %11693 = vmatprep.mubr.bf16.mxu1 %v9782_v52  ;;  %v18064_v52 = vld [vmem:[#allocation124_spill] sm:$0xff] }
 0x960   : > { %v18065_v19 = vld [vmem:[#allocation126_spill] sm:$0xff] }
 0x961   : > { %v9663_v44 = vadd.f32 %v16892_v48, %v9446_v42  ;;  %v9726_v23 = vmax.f32 %v9662_v4, 0.0 }
 0x963   : > { %v9727_v46 = vmax.f32 %v9663_v44, 0.0 }
 0x964   : > { %v9450_v24 = vpop.f32.mrb[224].mxu0 }
 0x965   : > { %v9783_v2 = vpack.c.bf16 %v9727_v46, %v9726_v23  ;;  %v9451_v7 = vadd.f32 %v9450_v24, %v18056_v0  ;;  %v9452_v31 = vpop.f32.mrb[225].mxu0 }
 0x966   : > { %v9453_v39 = vpop.f32.mrb[226].mxu0 }
 0x967   : > { %v9664_v12 = vadd.f32 %v16892_v48, %v9451_v7  ;;  %v9454_v40 = vadd.f32 %v9453_v39, %v18057_v49  ;;  %v9455_v20 = vpop.f32.mrb[227].mxu0  ;;  %11694 = vmatmul.mubr.bf16.gmra.mrb[140].mxu1 %v9783_v2  ;;  %v18066_v7 = vld [vmem:[#allocation123_spill] sm:$0xff] }
 0x968   : > { %v18067_v20 = vld [vmem:[#allocation125_spill] sm:$0xff] }
 0x969   : > { %v9665_v57 = vadd.f32 %v16892_v48, %v9454_v40  ;;  %v9728_v30 = vmax.f32 %v9664_v12, 0.0 }
 0x96b   : > { %v9729_v50 = vmax.f32 %v9665_v57, 0.0 }
 0x96c   : > { %v9458_v3 = vpop.f32.mrb[228].mxu0 }
 0x96d   : > { %v9459_v32 = vadd.f32 %v18058_v8, %v9458_v3  ;;  %v9460_v58 = vpop.f32.mrb[229].mxu0  ;;  %v9784_v13 = vpack.c.bf16 %v9729_v50, %v9728_v30 }
 0x96e   : > { %v9461_v17 = vpop.f32.mrb[230].mxu0 }
 0x96f   : > { %v9666_v38 = vadd.f32 %v16892_v48, %v9459_v32  ;;  %v9462_v25 = vadd.f32 %v18059_v56, %v9461_v17  ;;  %v9463_v60 = vpop.f32.mrb[231].mxu0  ;;  %11697 = vmatprep.mubr.bf16.mxu1 %v9784_v13  ;;  %v18068_v13 = vld [vmem:[#allocation128_spill] sm:$0xff] }
 0x970   : > { %v18069_v60 = vld [vmem:[#allocation130_spill] sm:$0xff] }
 0x971   : > { %v9667_v55 = vadd.f32 %v16892_v48, %v9462_v25  ;;  %v9730_v35 = vmax.f32 %v9666_v38, 0.0 }
 0x973   : > { %v9731_v21 = vmax.f32 %v9667_v55, 0.0 }
 0x974   : > { %v9466_v11 = vpop.f32.mrb[232].mxu0 }
 0x975   : > { %v9785_v27 = vpack.c.bf16 %v9731_v21, %v9730_v35  ;;  %v9467_v9 = vadd.f32 %v9466_v11, %v18060_v10  ;;  %v9468_v62 = vpop.f32.mrb[233].mxu0 }
 0x976   : > { %v9469_v15 = vpop.f32.mrb[234].mxu0 }
 0x977   : > { %v9668_v59 = vadd.f32 %v16892_v48, %v9467_v9  ;;  %v9470_v22 = vadd.f32 %v9469_v15, %v18061_v36  ;;  %v9471_v37 = vpop.f32.mrb[235].mxu0  ;;  %11698 = vmatmul.mubr.bf16.gmra.mrb[144].mxu1 %v9785_v27  ;;  %v18070_v9 = vld [vmem:[#allocation127_spill] sm:$0xff] }
 0x978   : > { %v18071_v37 = vld [vmem:[#allocation129_spill] sm:$0xff] }
 0x979   : > { %v9669_v26 = vadd.f32 %v16892_v48, %v9470_v22  ;;  %v9732_v18 = vmax.f32 %v9668_v59, 0.0 }
 0x97b   : > { %v9733_v16 = vmax.f32 %v9669_v26, 0.0 }
 0x97c   : > { %v9474_v41 = vpop.f32.mrb[236].mxu0 }
 0x97d   : > { %v9475_v1 = vadd.f32 %v18062_v61, %v9474_v41  ;;  %v9476_v29 = vpop.f32.mrb[237].mxu0  ;;  %v9786_v28 = vpack.c.bf16 %v9733_v16, %v9732_v18 }
 0x97e   : > { %v9477_v14 = vpop.f32.mrb[238].mxu0 }
 0x97f   : > { %v9670_v53 = vadd.f32 %v16892_v48, %v9475_v1  ;;  %v9478_v6 = vadd.f32 %v18063_v47, %v9477_v14  ;;  %v9479_v51 = vpop.f32.mrb[239].mxu0  ;;  %11701 = vmatprep.mubr.bf16.mxu1 %v9786_v28  ;;  %v18072_v28 = vld [vmem:[#allocation132_spill] sm:$0xff] }
 0x980   : > { %v18073_v51 = vld [vmem:[#allocation134_spill] sm:$0xff] }
 0x981   : > { %v9671_v34 = vadd.f32 %v16892_v48, %v9478_v6  ;;  %v9734_v63 = vmax.f32 %v9670_v53, 0.0 }
 0x983   : > { %v9735_v43 = vmax.f32 %v9671_v34, 0.0 }
 0x984   : > { %v9482_v5 = vpop.f32.mrb[240].mxu0 }
 0x985   : > { %v9787_v45 = vpack.c.bf16 %v9735_v43, %v9734_v63  ;;  %v9483_v54 = vadd.f32 %v9482_v5, %v18064_v52  ;;  %v9484_v4 = vpop.f32.mrb[241].mxu0 }
 0x986   : > { %v9485_v33 = vpop.f32.mrb[242].mxu0 }
 0x987   : > { %v9672_v42 = vadd.f32 %v16892_v48, %v9483_v54  ;;  %v9486_v44 = vadd.f32 %v9485_v33, %v18065_v19  ;;  %v9487_v23 = vpop.f32.mrb[243].mxu0  ;;  %11702 = vmatmul.mubr.bf16.gmra.mrb[148].mxu1 %v9787_v45  ;;  %v18074_v54 = vld [vmem:[#allocation131_spill] sm:$0xff] }
 0x988   : > { %v18075_v23 = vld [vmem:[#allocation133_spill] sm:$0xff] }
 0x989   : > { %v9673_v46 = vadd.f32 %v16892_v48, %v9486_v44  ;;  %v9736_v24 = vmax.f32 %v9672_v42, 0.0 }
 0x98b   : > { %v9737_v2 = vmax.f32 %v9673_v46, 0.0 }
 0x98c   : > { %v9490_v0 = vpop.f32.mrb[244].mxu0 }
 0x98d   : > { %v9491_v31 = vadd.f32 %v18066_v7, %v9490_v0  ;;  %v9492_v39 = vpop.f32.mrb[245].mxu0  ;;  %v9788_v12 = vpack.c.bf16 %v9737_v2, %v9736_v24 }
 0x98e   : > { %v9493_v49 = vpop.f32.mrb[246].mxu0 }
 0x98f   : > { %v9674_v40 = vadd.f32 %v16892_v48, %v9491_v31  ;;  %v9494_v57 = vadd.f32 %v18067_v20, %v9493_v49  ;;  %v9495_v30 = vpop.f32.mrb[247].mxu0  ;;  %11705 = vmatprep.mubr.bf16.mxu1 %v9788_v12  ;;  %v18076_v12 = vld [vmem:[#allocation136_spill] sm:$0xff] }
 0x990   : > { %v18077_v30 = vld [vmem:[#allocation138_spill] sm:$0xff] }
 0x991   : > { %v9675_v50 = vadd.f32 %v16892_v48, %v9494_v57  ;;  %v9738_v3 = vmax.f32 %v9674_v40, 0.0 }
 0x993   : > { %v9739_v8 = vmax.f32 %v9675_v50, 0.0 }
 0x994   : > { %v9498_v32 = vpop.f32.mrb[248].mxu0 }
 0x995   : > { %v9789_v58 = vpack.c.bf16 %v9739_v8, %v9738_v3  ;;  %v9499_v17 = vadd.f32 %v9498_v32, %v18068_v13  ;;  %v9500_v38 = vpop.f32.mrb[249].mxu0 }
 0x996   : > { %v9501_v56 = vpop.f32.mrb[250].mxu0 }
 0x997   : > { %v9676_v25 = vadd.f32 %v16892_v48, %v9499_v17  ;;  %v9502_v55 = vadd.f32 %v9501_v56, %v18069_v60  ;;  %v9503_v35 = vpop.f32.mrb[251].mxu0  ;;  %11706 = vmatmul.mubr.bf16.gmra.mrb[152].mxu1 %v9789_v58  ;;  %v18078_v17 = vld [vmem:[#allocation135_spill] sm:$0xff] }
 0x998   : > { %v18079_v35 = vld [vmem:[#allocation137_spill] sm:$0xff] }
 0x999   : > { %v9677_v21 = vadd.f32 %v16892_v48, %v9502_v55  ;;  %v9740_v11 = vmax.f32 %v9676_v25, 0.0 }
 0x99b   : > { %v9741_v27 = vmax.f32 %v9677_v21, 0.0 }
 0x99c   : > { %v9506_v10 = vpop.f32.mrb[252].mxu0 }
 0x99d   : > { %v9507_v62 = vadd.f32 %v18070_v9, %v9506_v10  ;;  %v9508_v15 = vpop.f32.mrb[253].mxu0  ;;  %v9790_v59 = vpack.c.bf16 %v9741_v27, %v9740_v11 }
 0x99e   : > { %v9509_v36 = vpop.f32.mrb[254].mxu0 }
 0x99f   : > { %v9678_v22 = vadd.f32 %v16892_v48, %v9507_v62  ;;  %v9510_v26 = vadd.f32 %v18071_v37, %v9509_v36  ;;  %v9511_v18 = vpop.f32.mrb[255].mxu0  ;;  %11709 = vmatprep.mubr.bf16.mxu1 %v9790_v59  ;;  %v18080_v59 = vld [vmem:[#allocation140_spill] sm:$0xff] }
 0x9a0   : > { %v18081_v18 = vld [vmem:[#allocation142_spill] sm:$0xff] }
 0x9a1   : > { %v9679_v16 = vadd.f32 %v16892_v48, %v9510_v26  ;;  %v9742_v41 = vmax.f32 %v9678_v22, 0.0 }
 0x9a3   : > { %v9743_v61 = vmax.f32 %v9679_v16, 0.0 }
 0x9a4   : > { %v9514_v1 = vpop.f32.mrb[0].mxu0 }
 0x9a5   : > { %v9791_v29 = vpack.c.bf16 %v9743_v61, %v9742_v41  ;;  %v9515_v14 = vadd.f32 %v9514_v1, %v18072_v28  ;;  %v9516_v53 = vpop.f32.mrb[1].mxu0 }
 0x9a6   : > { %v9517_v47 = vpop.f32.mrb[2].mxu0 }
 0x9a7   : > { %v9680_v6 = vadd.f32 %v16892_v48, %v9515_v14  ;;  %v9518_v34 = vadd.f32 %v9517_v47, %v18073_v51  ;;  %v9519_v63 = vpop.f32.mrb[3].mxu0  ;;  %11710 = vmatmul.mubr.bf16.gmra.mrb[156].mxu1 %v9791_v29  ;;  %v18082_v14 = vld [vmem:[#allocation139_spill] sm:$0xff] }
 0x9a8   : > { %v18083_v63 = vld [vmem:[#allocation141_spill] sm:$0xff] }
 0x9a9   : > { %v9681_v43 = vadd.f32 %v16892_v48, %v9518_v34  ;;  %v9744_v5 = vmax.f32 %v9680_v6, 0.0 }
 0x9ab   : > { %v9745_v45 = vmax.f32 %v9681_v43, 0.0 }
 0x9ac   : > { %v9522_v52 = vpop.f32.mrb[4].mxu0 }
 0x9ad   : > { %v9523_v4 = vadd.f32 %v18074_v54, %v9522_v52  ;;  %v9524_v33 = vpop.f32.mrb[5].mxu0  ;;  %v9792_v42 = vpack.c.bf16 %v9745_v45, %v9744_v5 }
 0x9ae   : > { %v9525_v19 = vpop.f32.mrb[6].mxu0 }
 0x9af   : > { %v9682_v44 = vadd.f32 %v16892_v48, %v9523_v4  ;;  %v9526_v46 = vadd.f32 %v18075_v23, %v9525_v19  ;;  %v9527_v24 = vpop.f32.mrb[7].mxu0  ;;  %11713 = vmatprep.mubr.bf16.mxu1 %v9792_v42  ;;  %v18084_v42 = vld [vmem:[#allocation144_spill] sm:$0xff] }
 0x9b0   : > { %v18085_v24 = vld [vmem:[#allocation146_spill] sm:$0xff] }
 0x9b1   : > { %v9683_v2 = vadd.f32 %v16892_v48, %v9526_v46  ;;  %v9746_v0 = vmax.f32 %v9682_v44, 0.0 }
 0x9b3   : > { %v9747_v7 = vmax.f32 %v9683_v2, 0.0 }
 0x9b4   : > { %v9530_v31 = vpop.f32.mrb[8].mxu0 }
 0x9b5   : > { %v9793_v39 = vpack.c.bf16 %v9747_v7, %v9746_v0  ;;  %v9531_v49 = vadd.f32 %v9530_v31, %v18076_v12  ;;  %v9532_v40 = vpop.f32.mrb[9].mxu0 }
 0x9b6   : > { %v9533_v20 = vpop.f32.mrb[10].mxu0 }
 0x9b7   : > { %v9684_v57 = vadd.f32 %v16892_v48, %v9531_v49  ;;  %v9534_v50 = vadd.f32 %v9533_v20, %v18077_v30  ;;  %v9535_v3 = vpop.f32.mrb[11].mxu0  ;;  %11714 = vmatmul.mubr.bf16.gmra.mrb[160].mxu1 %v9793_v39  ;;  %v18086_v49 = vld [vmem:[#allocation143_spill] sm:$0xff] }
 0x9b8   : > { %v18087_v3 = vld [vmem:[#allocation145_spill] sm:$0xff] }
 0x9b9   : > { %v9685_v8 = vadd.f32 %v16892_v48, %v9534_v50  ;;  %v9748_v32 = vmax.f32 %v9684_v57, 0.0 }
 0x9bb   : > { %v9749_v58 = vmax.f32 %v9685_v8, 0.0 }
 0x9bc   : > { %v9538_v13 = vpop.f32.mrb[12].mxu0 }
 0x9bd   : > { %v9539_v38 = vadd.f32 %v18078_v17, %v9538_v13  ;;  %v9540_v56 = vpop.f32.mrb[13].mxu0  ;;  %v9794_v25 = vpack.c.bf16 %v9749_v58, %v9748_v32 }
 0x9be   : > { %v9541_v60 = vpop.f32.mrb[14].mxu0 }
 0x9bf   : > { %v9686_v55 = vadd.f32 %v16892_v48, %v9539_v38  ;;  %v9542_v21 = vadd.f32 %v18079_v35, %v9541_v60  ;;  %v9543_v11 = vpop.f32.mrb[15].mxu0  ;;  %11717 = vmatprep.mubr.bf16.mxu1 %v9794_v25  ;;  %v18088_v25 = vld [vmem:[#allocation148_spill] sm:$0xff] }
 0x9c0   : > { %v18089_v11 = vld [vmem:[#allocation150_spill] sm:$0xff] }
 0x9c1   : > { %v9687_v27 = vadd.f32 %v16892_v48, %v9542_v21  ;;  %v9750_v10 = vmax.f32 %v9686_v55, 0.0 }
 0x9c3   : > { %v9751_v9 = vmax.f32 %v9687_v27, 0.0 }
 0x9c4   : > { %v9546_v62 = vpop.f32.mrb[16].mxu0 }
 0x9c5   : > { %v9795_v15 = vpack.c.bf16 %v9751_v9, %v9750_v10  ;;  %v9547_v36 = vadd.f32 %v9546_v62, %v18080_v59  ;;  %v9548_v22 = vpop.f32.mrb[17].mxu0 }
 0x9c6   : > { %v9549_v37 = vpop.f32.mrb[18].mxu0 }
 0x9c7   : > { %v9688_v26 = vadd.f32 %v16892_v48, %v9547_v36  ;;  %v9550_v16 = vadd.f32 %v9549_v37, %v18081_v18  ;;  %v9551_v41 = vpop.f32.mrb[19].mxu0  ;;  %11718 = vmatmul.mubr.bf16.gmra.mrb[164].mxu1 %v9795_v15  ;;  %v18090_v36 = vld [vmem:[#allocation147_spill] sm:$0xff] }
 0x9c8   : > { %v18091_v41 = vld [vmem:[#allocation149_spill] sm:$0xff] }
 0x9c9   : > { %v9689_v61 = vadd.f32 %v16892_v48, %v9550_v16  ;;  %v9752_v1 = vmax.f32 %v9688_v26, 0.0 }
 0x9cb   : > { %v9753_v29 = vmax.f32 %v9689_v61, 0.0 }
 0x9cc   : > { %v9554_v28 = vpop.f32.mrb[20].mxu0 }
 0x9cd   : > { %v9555_v53 = vadd.f32 %v18082_v14, %v9554_v28  ;;  %v9556_v47 = vpop.f32.mrb[21].mxu0  ;;  %v9796_v6 = vpack.c.bf16 %v9753_v29, %v9752_v1 }
 0x9ce   : > { %v9557_v51 = vpop.f32.mrb[22].mxu0 }
 0x9cf   : > { %v9690_v34 = vadd.f32 %v16892_v48, %v9555_v53  ;;  %v9558_v43 = vadd.f32 %v18083_v63, %v9557_v51  ;;  %v9559_v5 = vpop.f32.mrb[23].mxu0  ;;  %11721 = vmatprep.mubr.bf16.mxu1 %v9796_v6  ;;  %v18092_v6 = vld [vmem:[#allocation152_spill] sm:$0xff] }
 0x9d0   : > { %v18093_v5 = vld [vmem:[#allocation154_spill] sm:$0xff] }
 0x9d1   : > { %v9691_v45 = vadd.f32 %v16892_v48, %v9558_v43  ;;  %v9754_v52 = vmax.f32 %v9690_v34, 0.0 }
 0x9d3   : > { %v9755_v54 = vmax.f32 %v9691_v45, 0.0 }
 0x9d4   : > { %v9562_v4 = vpop.f32.mrb[24].mxu0 }
 0x9d5   : > { %v9797_v33 = vpack.c.bf16 %v9755_v54, %v9754_v52  ;;  %v9563_v19 = vadd.f32 %v9562_v4, %v18084_v42  ;;  %v9564_v44 = vpop.f32.mrb[25].mxu0 }
 0x9d6   : > { %v9565_v23 = vpop.f32.mrb[26].mxu0 }
 0x9d7   : > { %v9692_v46 = vadd.f32 %v16892_v48, %v9563_v19  ;;  %v9566_v2 = vadd.f32 %v9565_v23, %v18085_v24  ;;  %v9567_v0 = vpop.f32.mrb[27].mxu0  ;;  %11722 = vmatmul.mubr.bf16.gmra.mrb[168].mxu1 %v9797_v33  ;;  %v18094_v19 = vld [vmem:[#allocation151_spill] sm:$0xff] }
 0x9d8   : > { %v18095_v0 = vld [vmem:[#allocation153_spill] sm:$0xff] }
 0x9d9   : > { %v9693_v7 = vadd.f32 %v16892_v48, %v9566_v2  ;;  %v9756_v31 = vmax.f32 %v9692_v46, 0.0 }
 0x9db   : > { %v9757_v39 = vmax.f32 %v9693_v7, 0.0 }
 0x9dc   : > { %v9570_v12 = vpop.f32.mrb[28].mxu0 }
 0x9dd   : > { %v9571_v40 = vadd.f32 %v18086_v49, %v9570_v12  ;;  %v9572_v20 = vpop.f32.mrb[29].mxu0  ;;  %v9798_v57 = vpack.c.bf16 %v9757_v39, %v9756_v31 }
 0x9de   : > { %v9573_v30 = vpop.f32.mrb[30].mxu0 }
 0x9df   : > { %v9694_v50 = vadd.f32 %v16892_v48, %v9571_v40  ;;  %v9574_v8 = vadd.f32 %v18087_v3, %v9573_v30  ;;  %v9575_v32 = vpop.f32.mrb[31].mxu0  ;;  %11725 = vmatprep.mubr.bf16.mxu1 %v9798_v57  ;;  %v18096_v57 = vld [vmem:[#allocation156_spill] sm:$0xff] }
 0x9e0   : > { %v18097_v32 = vld [vmem:[#allocation158_spill] sm:$0xff] }
 0x9e1   : > { %v9695_v58 = vadd.f32 %v16892_v48, %v9574_v8  ;;  %v9758_v13 = vmax.f32 %v9694_v50, 0.0 }
 0x9e3   : > { %v9759_v17 = vmax.f32 %v9695_v58, 0.0 }
 0x9e4   : > { %v9578_v38 = vpop.f32.mrb[32].mxu0 }
 0x9e5   : > { %v9799_v56 = vpack.c.bf16 %v9759_v17, %v9758_v13  ;;  %v9579_v60 = vadd.f32 %v9578_v38, %v18088_v25  ;;  %v9580_v55 = vpop.f32.mrb[33].mxu0  ;;  %v17029_v17 = vld [vmem:[%s17404_s22] ss:$0 sm:$0xff] }
 0x9e6   : > { %v9581_v35 = vpop.f32.mrb[34].mxu0 }
 0x9e7   : > { %v9696_v21 = vadd.f32 %v16892_v48, %v9579_v60  ;;  %v9582_v27 = vadd.f32 %v9581_v35, %v18089_v11  ;;  %v9583_v10 = vpop.f32.mrb[35].mxu0  ;;  %11726 = vmatmul.mubr.bf16.gmra.mrb[172].mxu1 %v9799_v56 }
 0x9e9   : > { %v9697_v9 = vadd.f32 %v16892_v48, %v9582_v27  ;;  %v9760_v62 = vmax.f32 %v9696_v21, 0.0 }
 0x9eb   : > { %v9761_v15 = vmax.f32 %v9697_v9, 0.0  ;;  %v18098_v9 = vld [vmem:[#allocation155_spill] sm:$0xff] }
 0x9ec   : > { %v9586_v59 = vpop.f32.mrb[36].mxu0 }
 0x9ed   : > { %v9587_v22 = vadd.f32 %v18090_v36, %v9586_v59  ;;  %v9588_v37 = vpop.f32.mrb[37].mxu0  ;;  %v9800_v26 = vpack.c.bf16 %v9761_v15, %v9760_v62 }
 0x9ee   : > { %v9589_v18 = vpop.f32.mrb[38].mxu0 }
 0x9ef   : > { %v9698_v16 = vadd.f32 %v16892_v48, %v9587_v22  ;;  %v9590_v61 = vadd.f32 %v18091_v41, %v9589_v18  ;;  %v9591_v1 = vpop.f32.mrb[39].mxu0  ;;  %11729 = vmatprep.mubr.bf16.mxu1 %v9800_v26 }
 0x9f1   : > { %v9699_v29 = vadd.f32 %v16892_v48, %v9590_v61  ;;  %v9762_v28 = vmax.f32 %v9698_v16, 0.0  ;;  %v18099_v61 = vld [vmem:[#allocation157_spill] sm:$0xff] }
 0x9f3   : > { %v9763_v14 = vmax.f32 %v9699_v29, 0.0 }
 0x9f4   : > { %v9594_v53 = vpop.f32.mrb[40].mxu0 }
 0x9f5   : > { %v9801_v47 = vpack.c.bf16 %v9763_v14, %v9762_v28  ;;  %v9595_v51 = vadd.f32 %v9594_v53, %v18092_v6  ;;  %v9596_v34 = vpop.f32.mrb[41].mxu0 }
 0x9f6   : > { %v9597_v63 = vpop.f32.mrb[42].mxu0  ;;  %v18100_v34 = vld [vmem:[#allocation160_spill] sm:$0xff] }
 0x9f7   : > { %v9700_v43 = vadd.f32 %v16892_v48, %v9595_v51  ;;  %v9598_v45 = vadd.f32 %v9597_v63, %v18093_v5  ;;  %v9599_v52 = vpop.f32.mrb[43].mxu0  ;;  %11730 = vmatmul.mubr.bf16.gmra.mrb[176].mxu1 %v9801_v47 }
 0x9f9   : > { %v9701_v54 = vadd.f32 %v16892_v48, %v9598_v45  ;;  %v9764_v4 = vmax.f32 %v9700_v43, 0.0  ;;  %v18101_v45 = vld [vmem:[#allocation162_spill] sm:$0xff] }
 0x9fb   : > { %v9765_v33 = vmax.f32 %v9701_v54, 0.0 }
 0x9fc   : > { %v9602_v42 = vpop.f32.mrb[44].mxu0 }
 0x9fd   : > { %v9603_v44 = vadd.f32 %v18094_v19, %v9602_v42  ;;  %v9604_v23 = vpop.f32.mrb[45].mxu0  ;;  %v9802_v46 = vpack.c.bf16 %v9765_v33, %v9764_v4 }
 0x9fe   : > { %v9605_v24 = vpop.f32.mrb[46].mxu0 }
 0x9ff   : > { %v9702_v2 = vadd.f32 %v16892_v48, %v9603_v44  ;;  %v9606_v7 = vadd.f32 %v18095_v0, %v9605_v24  ;;  %v9607_v31 = vpop.f32.mrb[47].mxu0  ;;  %11733 = vmatprep.mubr.bf16.mxu1 %v9802_v46 }
 0xa01   : > { %v9703_v39 = vadd.f32 %v16892_v48, %v9606_v7  ;;  %v9766_v12 = vmax.f32 %v9702_v2, 0.0 }
 0xa03   : > { %v9767_v49 = vmax.f32 %v9703_v39, 0.0 }
 0xa04   : > { %v9610_v40 = vpop.f32.mrb[48].mxu0 }
 0xa05   : > { %v9803_v20 = vpack.c.bf16 %v9767_v49, %v9766_v12  ;;  %v9611_v30 = vadd.f32 %v9610_v40, %v18096_v57  ;;  %v9612_v50 = vpop.f32.mrb[49].mxu0 }
 0xa06   : > { %v9613_v3 = vpop.f32.mrb[50].mxu0  ;;  %v18102_v50 = vld [vmem:[#allocation159_spill] sm:$0xff] }
 0xa07   : > { %v9704_v8 = vadd.f32 %v16892_v48, %v9611_v30  ;;  %v9614_v58 = vadd.f32 %v9613_v3, %v18097_v32  ;;  %v9615_v13 = vpop.f32.mrb[51].mxu0  ;;  %11734 = vmatmul.mubr.bf16.gmra.mrb[180].mxu1 %v9803_v20 }
 0xa09   : > { %v9705_v38 = vadd.f32 %v16892_v48, %v9614_v58  ;;  %v9768_v25 = vmax.f32 %v9704_v8, 0.0 }
 0xa0a   : > { %v11683_v56 = vpop.f32.mrb[128].mxu1 }
 0xa0b   : > { %v9769_v60 = vmax.f32 %v9705_v38, 0.0  ;;  %v9922_v55 = vadd.f32 %v11683_v56, %v17029_v17  ;;  %v9913_v35 = vpop.f32.mrb[129].mxu1 }
 0xa0c   : > { %v9914_v21 = vadd.f32 %v17029_v17, %v9913_v35  ;;  %v9618_v11 = vpop.f32.mrb[52].mxu0  ;;  %v11684_v27 = vpop.f32.mrb[130].mxu1 }
 0xa0d   : > { %v11441_v10 = vmul.f32 -1.442695, %v9922_v55  ;;  %v9619_v62 = vadd.f32 %v18098_v9, %v9618_v11  ;;  %v9925_v15 = vadd.f32 %v11684_v27, %v17029_v17  ;;  %v9620_v59 = vpop.f32.mrb[53].mxu0  ;;  %v9916_v36 = vpop.f32.mrb[131].mxu1  ;;  %v9804_v22 = vpack.c.bf16 %v9769_v60, %v9768_v25  ;;  %v18103_v60 = vld [vmem:[#allocation161_spill] sm:$0xff] }
 0xa0e   : > { %v11439_v37 = vmul.f32 -1.442695, %v9914_v21  ;;  %v9917_v26 = vadd.f32 %v17029_v17, %v9916_v36  ;;  %v9621_v18 = vpop.f32.mrb[54].mxu0  ;;  %v18104_v11 = vlaneseq  ;;  %v10558_v59 = vpop.permute.xlu0 %10557 }
 0xa0f   : > { %12396 = vpow2.f32 %v11441_v10  ;;  %v9706_v16 = vadd.f32 %v16892_v48, %v9619_v62  ;;  %v11442_v41 = vmul.f32 -1.442695, %v9925_v15  ;;  %v9622_v1 = vadd.f32 %v18099_v61, %v9621_v18  ;;  %v9623_v29 = vpop.f32.mrb[55].mxu0  ;;  %11737 = vmatprep.mubr.bf16.mxu1 %v9804_v22  ;;  %v10568_v15 = vpop.permute.xlu1 %10567 }
 0xa10   : > { %12398 = vpow2.f32 %v11439_v37  ;;  %v11440_v28 = vmul.f32 -1.442695, %v9917_v26  ;;  %v17052_v27 = vand.u32 127, %v18104_v11 }
 0xa11   : > { %12400 = vpow2.f32 %v11442_v41  ;;  %v9707_v14 = vadd.f32 %v16892_v48, %v9622_v1  ;;  %v9770_v53 = vmax.f32 %v9706_v16, 0.0 }
 0xa12   : > { %12402 = vpow2.f32 %v11440_v28  ;;  %vm10554_vm0 = vcmp.lt.s32.totalorder %v17052_v27, 3  ;;  %v10563_v29 = vpop.permute.xlu0 %10562 }
 0xa13   : > { %v9771_v47 = vmax.f32 %v9707_v14, 0.0  ;;  %v10573_v41 = vpop.permute.xlu1 %10572 }
 0xa14   : > { %v9626_v6 = vpop.f32.mrb[56].mxu0 }
 0xa15   : > { %v9805_v51 = vpack.c.bf16 %v9771_v47, %v9770_v53  ;;  %v9627_v63 = vadd.f32 %v9626_v6, %v18100_v34  ;;  %v9628_v43 = vpop.f32.mrb[57].mxu0 }
 0xa16   : > { %v9629_v5 = vpop.f32.mrb[58].mxu0 }
 0xa17   : > { %v9630_v52 = vadd.f32 %v9629_v5, %v18101_v45  ;;  %v9631_v54 = vpop.f32.mrb[59].mxu0  ;;  %11738 = vmatmul.mubr.bf16.gmra.mrb[184].mxu1 %v9805_v51  ;;  %v9708_v4 = vadd.f32 %v16892_v48, %v9627_v63 }
 0xa19   : > { %v12397_v33 = vpop.eup %12396  ;;  %v9709_v42 = vadd.f32 %v16892_v48, %v9630_v52  ;;  %v9772_v12 = vmax.f32 %v9708_v4, 0.0 }
 0xa1a   : > { %v12399_v19 = vpop.eup %12398  ;;  %v10362_v44 = vadd.f32 1.0, %v12397_v33  ;;  %v11687_v23 = vpop.f32.mrb[132].mxu1 }
 0xa1b   : > { %v12401_v46 = vpop.eup %12400  ;;  %v10360_v24 = vadd.f32 1.0, %v12399_v19  ;;  %v9773_v2 = vmax.f32 %v9709_v42, 0.0  ;;  %v9938_v0 = vadd.f32 %v11687_v23, %v17029_v17  ;;  %v9929_v7 = vpop.f32.mrb[133].mxu1 }
 0xa1c   : > { %v12403_v31 = vpop.eup %12402  ;;  %12404 = vrcp.f32 %v10362_v44  ;;  %v10363_v39 = vadd.f32 1.0, %v12401_v46  ;;  %v9930_v49 = vadd.f32 %v17029_v17, %v9929_v7  ;;  %v9634_v40 = vpop.f32.mrb[60].mxu0 }
 0xa1d   : > { %v11688_v20 = vpop.f32.mrb[134].mxu1  ;;  %12406 = vrcp.f32 %v10360_v24  ;;  %v10361_v57 = vadd.f32 1.0, %v12403_v31  ;;  %v11445_v30 = vmul.f32 -1.442695, %v9938_v0  ;;  %v9635_v3 = vadd.f32 %v18102_v50, %v9634_v40  ;;  %v9636_v8 = vpop.f32.mrb[61].mxu0 }
 0xa1e   : > { %v9932_v32 = vpop.f32.mrb[135].mxu1  ;;  %12408 = vrcp.f32 %v10363_v39  ;;  %v11443_v58 = vmul.f32 -1.442695, %v9930_v49  ;;  %v9941_v13 = vadd.f32 %v11688_v20, %v17029_v17  ;;  %v9637_v56 = vpop.f32.mrb[62].mxu0  ;;  %v9806_v21 = vpack.c.bf16 %v9773_v2, %v9772_v12 }
 0xa1f   : > { %v9933_v38 = vadd.f32 %v17029_v17, %v9932_v32  ;;  %12410 = vrcp.f32 %v10361_v57  ;;  %v9710_v25 = vadd.f32 %v16892_v48, %v9635_v3  ;;  %v9638_v55 = vadd.f32 %v18103_v60, %v9637_v56  ;;  %v9639_v35 = vpop.f32.mrb[63].mxu0  ;;  %v10578_v0 = vpop.permute.xlu0 %10577 }
 0xa20   : > { %12412 = vpow2.f32 %v11445_v30  ;;  %v11446_v10 = vmul.f32 -1.442695, %v9941_v13  ;;  %11741 = vmatprep.mubr.bf16.mxu1 %v9806_v21  ;;  %v10583_v7 = vpop.permute.xlu1 %10582 }
 0xa21   : > { %v11444_v9 = vmul.f32 -1.442695, %v9933_v38  ;;  %12414 = vpow2.f32 %v11443_v58  ;;  %v9711_v62 = vadd.f32 %v16892_v48, %v9638_v55  ;;  %v9774_v36 = vmax.f32 %v9710_v25, 0.0 }
 0xa22   : > { %12416 = vpow2.f32 %v11446_v10 }
 0xa23   : > { %12418 = vpow2.f32 %v11444_v9  ;;  %v9775_v22 = vmax.f32 %v9711_v62, 0.0  ;;  %v10588_v39 = vpop.permute.xlu0 %10587 }
 0xa24   : > { %v10593_v20 = vpop.permute.xlu1 %10592 }
 0xa25   : > { %v9807_v48 = vpack.c.bf16 %v9775_v22, %v9774_v36 }
 0xa26   : > { %v12405_v37 = vpop.eup %12404 }
 0xa27   : > { %v12407_v26 = vpop.eup %12406  ;;  %v10877_v18 = vsel %vm10554_vm0, %v12405_v37, %v10568_v15  ;;  %11742 = vmatmul.mubr.bf16.gmra.mrb[188].mxu1 %v9807_v48  ;;  %v10598_v37 = vpop.permute.xlu0 %10597 }
 0xa28   : > { %v12409_v16 = vpop.eup %12408  ;;  %10942 = vst.msk [vmem:[%s17060_s3 + $0x10] sm:$0xff] %vm10939_vm1, %v10877_v18  ;;  %v10875_v61 = vsel %vm10554_vm0, %v12407_v26, %v10558_v59  ;;  %v10603_v26 = vpop.permute.xlu1 %10602 }
 0xa29   : > { %v12411_v1 = vpop.eup %12410  ;;  %10940 = vst.msk [vmem:[%s17060_s3] sm:$0xff] %vm10939_vm1, %v10875_v61  ;;  %v10878_v28 = vsel %vm10554_vm0, %v12409_v16, %v10573_v41 }
 0xa2a   : > { %v12413_v14 = vpop.eup %12412  ;;  %10943 = vst.msk [vmem:[%s17060_s3 + $0x18] sm:$0xff] %vm10939_vm1, %v10878_v28  ;;  %v10876_v53 = vsel %vm10554_vm0, %v12411_v1, %v10563_v29  ;;  %v11691_v47 = vpop.f32.mrb[136].mxu1 }
 0xa2b   : > { %v12415_v6 = vpop.eup %12414  ;;  %10941 = vst.msk [vmem:[%s17060_s3 + $0x8] sm:$0xff] %vm10939_vm1, %v10876_v53  ;;  %v10366_v51 = vadd.f32 1.0, %v12413_v14  ;;  %v9954_v34 = vadd.f32 %v11691_v47, %v17029_v17  ;;  %v9945_v63 = vpop.f32.mrb[137].mxu1 }
 0xa2c   : > { %v12417_v43 = vpop.eup %12416  ;;  %v10364_v5 = vadd.f32 1.0, %v12415_v6  ;;  %v9946_v45 = vadd.f32 %v17029_v17, %v9945_v63  ;;  %v11692_v52 = vpop.f32.mrb[138].mxu1 }
 0xa2d   : > { %v12419_v54 = vpop.eup %12418  ;;  %12420 = vrcp.f32 %v10366_v51  ;;  %v10367_v4 = vadd.f32 1.0, %v12417_v43  ;;  %v11449_v33 = vmul.f32 -1.442695, %v9954_v34  ;;  %v9957_v42 = vadd.f32 %v11692_v52, %v17029_v17  ;;  %v9948_v19 = vpop.f32.mrb[139].mxu1 }
 0xa2e   : > { %12422 = vrcp.f32 %v10364_v5  ;;  %v10365_v44 = vadd.f32 1.0, %v12419_v54  ;;  %v11447_v23 = vmul.f32 -1.442695, %v9946_v45  ;;  %v9949_v46 = vadd.f32 %v17029_v17, %v9948_v19  ;;  %v10608_v16 = vpop.permute.xlu0 %10607  ;;  %v10613_v29 = vpop.permute.xlu1 %10612 }
 0xa2f   : > { %12424 = vrcp.f32 %v10367_v4  ;;  %v11450_v24 = vmul.f32 -1.442695, %v9957_v42 }
 0xa30   : > { %12426 = vrcp.f32 %v10365_v44  ;;  %v11448_v2 = vmul.f32 -1.442695, %v9949_v46 }
 0xa31   : > { %12428 = vpow2.f32 %v11449_v33 }
 0xa32   : > { %12430 = vpow2.f32 %v11447_v23 }
 0xa33   : > { %12432 = vpow2.f32 %v11450_v24 }
 0xa34   : > { %12434 = vpow2.f32 %v11448_v2 }
 0xa37   : > { %v12421_v31 = vpop.eup %12420 }
 0xa38   : > { %v12423_v12 = vpop.eup %12422  ;;  %v10881_v49 = vsel %vm10554_vm0, %v12421_v31, %v10588_v39  ;;  %v10618_v31 = vpop.permute.xlu0 %10617 }
 0xa39   : > { %v12425_v40 = vpop.eup %12424  ;;  %10946 = vst.msk [vmem:[%s17060_s3 + $0x30] sm:$0xff] %vm10939_vm1, %v10881_v49  ;;  %v10879_v57 = vsel %vm10554_vm0, %v12423_v12, %v10578_v0  ;;  %v10623_v39 = vpop.permute.xlu1 %10622 }
 0xa3a   : > { %v12427_v30 = vpop.eup %12426  ;;  %10944 = vst.msk [vmem:[%s17060_s3 + $0x20] sm:$0xff] %vm10939_vm1, %v10879_v57  ;;  %v10882_v50 = vsel %vm10554_vm0, %v12425_v40, %v10593_v20  ;;  %v11695_v3 = vpop.f32.mrb[140].mxu1 }
 0xa3b   : > { %v12429_v8 = vpop.eup %12428  ;;  %10947 = vst.msk [vmem:[%s17060_s3 + $0x38] sm:$0xff] %vm10939_vm1, %v10882_v50  ;;  %v10880_v32 = vsel %vm10554_vm0, %v12427_v30, %v10583_v7  ;;  %v9970_v58 = vadd.f32 %v11695_v3, %v17029_v17  ;;  %v9961_v13 = vpop.f32.mrb[141].mxu1 }
 0xa3c   : > { %v12431_v38 = vpop.eup %12430  ;;  %10945 = vst.msk [vmem:[%s17060_s3 + $0x28] sm:$0xff] %vm10939_vm1, %v10880_v32  ;;  %v10370_v56 = vadd.f32 1.0, %v12429_v8  ;;  %v9962_v25 = vadd.f32 %v17029_v17, %v9961_v13  ;;  %v11696_v60 = vpop.f32.mrb[142].mxu1 }
 0xa3d   : > { %v12433_v55 = vpop.eup %12432  ;;  %v10368_v35 = vadd.f32 1.0, %v12431_v38  ;;  %v9973_v21 = vadd.f32 %v11696_v60, %v17029_v17  ;;  %v9964_v11 = vpop.f32.mrb[143].mxu1  ;;  %v11453_v62 = vmul.f32 -1.442695, %v9970_v58 }
 0xa3e   : > { %v12435_v10 = vpop.eup %12434  ;;  %12436 = vrcp.f32 %v10370_v56  ;;  %v10371_v9 = vadd.f32 1.0, %v12433_v55  ;;  %v9965_v15 = vadd.f32 %v17029_v17, %v9964_v11  ;;  %v11451_v36 = vmul.f32 -1.442695, %v9962_v25  ;;  %v10628_v49 = vpop.permute.xlu0 %10627 }
 0xa3f   : > { %12438 = vrcp.f32 %v10368_v35  ;;  %v10369_v59 = vadd.f32 1.0, %v12435_v10  ;;  %v11454_v22 = vmul.f32 -1.442695, %v9973_v21  ;;  %v10633_v50 = vpop.permute.xlu1 %10632 }
 0xa40   : > { %12440 = vrcp.f32 %v10371_v9  ;;  %v11452_v48 = vmul.f32 -1.442695, %v9965_v15 }
 0xa41   : > { %12442 = vrcp.f32 %v10369_v59 }
 0xa42   : > { %12444 = vpow2.f32 %v11453_v62 }
 0xa43   : > { %12446 = vpow2.f32 %v11451_v36 }
 0xa44   : > { %12448 = vpow2.f32 %v11454_v22 }
 0xa45   : > { %12450 = vpow2.f32 %v11452_v48 }
 0xa48   : > { %v12437_v18 = vpop.eup %12436 }
 0xa49   : > { %v12439_v41 = vpop.eup %12438  ;;  %v10885_v61 = vsel %vm10554_vm0, %v12437_v18, %v10608_v16  ;;  %v10638_v18 = vpop.permute.xlu0 %10637 }
 0xa4a   : > { %v12441_v1 = vpop.eup %12440  ;;  %10950 = vst.msk [vmem:[%s17060_s3 + $0x50] sm:$0xff] %vm10939_vm1, %v10885_v61  ;;  %v10883_v28 = vsel %vm10554_vm0, %v12439_v41, %v10598_v37  ;;  %v11699_v14 = vpop.f32.mrb[144].mxu1 }
 0xa4b   : > { %v12443_v53 = vpop.eup %12442  ;;  %10948 = vst.msk [vmem:[%s17060_s3 + $0x40] sm:$0xff] %vm10939_vm1, %v10883_v28  ;;  %v10886_v47 = vsel %vm10554_vm0, %v12441_v1, %v10613_v29  ;;  %v9986_v6 = vadd.f32 %v11699_v14, %v17029_v17  ;;  %v9977_v51 = vpop.f32.mrb[145].mxu1 }
 0xa4c   : > { %v12445_v34 = vpop.eup %12444  ;;  %10951 = vst.msk [vmem:[%s17060_s3 + $0x58] sm:$0xff] %vm10939_vm1, %v10886_v47  ;;  %v10884_v63 = vsel %vm10554_vm0, %v12443_v53, %v10603_v26  ;;  %v9978_v43 = vadd.f32 %v17029_v17, %v9977_v51  ;;  %v11700_v5 = vpop.f32.mrb[146].mxu1 }
 0xa4d   : > { %v12447_v45 = vpop.eup %12446  ;;  %10949 = vst.msk [vmem:[%s17060_s3 + $0x48] sm:$0xff] %vm10939_vm1, %v10884_v63  ;;  %v10374_v52 = vadd.f32 1.0, %v12445_v34  ;;  %v9989_v54 = vadd.f32 %v11700_v5, %v17029_v17  ;;  %v9980_v4 = vpop.f32.mrb[147].mxu1  ;;  %v11457_v46 = vmul.f32 -1.442695, %v9986_v6 }
 0xa4e   : > { %v12449_v33 = vpop.eup %12448  ;;  %v10372_v42 = vadd.f32 1.0, %v12447_v45  ;;  %v9981_v19 = vadd.f32 %v17029_v17, %v9980_v4  ;;  %v11455_v2 = vmul.f32 -1.442695, %v9978_v43  ;;  %v10643_v16 = vpop.permute.xlu1 %10642 }
 0xa4f   : > { %v12451_v44 = vpop.eup %12450  ;;  %12452 = vrcp.f32 %v10374_v52  ;;  %v10375_v23 = vadd.f32 1.0, %v12449_v33  ;;  %v11458_v0 = vmul.f32 -1.442695, %v9989_v54  ;;  %v10648_v1 = vpop.permute.xlu0 %10647 }
 0xa50   : > { %12454 = vrcp.f32 %v10372_v42  ;;  %v10373_v24 = vadd.f32 1.0, %v12451_v44  ;;  %v11456_v7 = vmul.f32 -1.442695, %v9981_v19 }
 0xa51   : > { %12456 = vrcp.f32 %v10375_v23 }
 0xa52   : > { %12458 = vrcp.f32 %v10373_v24  ;;  %v10653_v34 = vpop.permute.xlu1 %10652 }
 0xa53   : > { %12460 = vpow2.f32 %v11457_v46 }
 0xa54   : > { %12462 = vpow2.f32 %v11455_v2 }
 0xa55   : > { %12464 = vpow2.f32 %v11458_v0 }
 0xa56   : > { %12466 = vpow2.f32 %v11456_v7 }
 0xa59   : > { %v12453_v12 = vpop.eup %12452 }
 0xa5a   : > { %v12455_v40 = vpop.eup %12454  ;;  %v10889_v20 = vsel %vm10554_vm0, %v12453_v12, %v10628_v49  ;;  %v11703_v57 = vpop.f32.mrb[148].mxu1 }
 0xa5b   : > { %v12457_v30 = vpop.eup %12456  ;;  %10954 = vst.msk [vmem:[%s17060_s3 + $0x70] sm:$0xff] %vm10939_vm1, %v10889_v20  ;;  %v10887_v3 = vsel %vm10554_vm0, %v12455_v40, %v10618_v31  ;;  %v10002_v8 = vadd.f32 %v11703_v57, %v17029_v17  ;;  %v9993_v32 = vpop.f32.mrb[149].mxu1 }
 0xa5c   : > { %v12459_v58 = vpop.eup %12458  ;;  %10952 = vst.msk [vmem:[%s17060_s3 + $0x60] sm:$0xff] %vm10939_vm1, %v10887_v3  ;;  %v10890_v13 = vsel %vm10554_vm0, %v12457_v30, %v10633_v50  ;;  %v9994_v38 = vadd.f32 %v17029_v17, %v9993_v32  ;;  %v11704_v56 = vpop.f32.mrb[150].mxu1 }
 0xa5d   : > { %v12461_v25 = vpop.eup %12460  ;;  %10955 = vst.msk [vmem:[%s17060_s3 + $0x78] sm:$0xff] %vm10939_vm1, %v10890_v13  ;;  %v10888_v60 = vsel %vm10554_vm0, %v12459_v58, %v10623_v39  ;;  %v11461_v55 = vmul.f32 -1.442695, %v10002_v8  ;;  %v10005_v35 = vadd.f32 %v11704_v56, %v17029_v17  ;;  %v9996_v21 = vpop.f32.mrb[151].mxu1 }
 0xa5e   : > { %v12463_v11 = vpop.eup %12462  ;;  %10953 = vst.msk [vmem:[%s17060_s3 + $0x68] sm:$0xff] %vm10939_vm1, %v10888_v60  ;;  %v10378_v10 = vadd.f32 1.0, %v12461_v25  ;;  %v9997_v9 = vadd.f32 %v17029_v17, %v9996_v21  ;;  %v11459_v22 = vmul.f32 -1.442695, %v9994_v38  ;;  %v10658_v12 = vpop.permute.xlu0 %10657 }
 0xa5f   : > { %v12465_v62 = vpop.eup %12464  ;;  %v10376_v15 = vadd.f32 1.0, %v12463_v11  ;;  %12468 = vpow2.f32 %v11461_v55  ;;  %v11462_v37 = vmul.f32 -1.442695, %v10005_v35  ;;  %v10663_v57 = vpop.permute.xlu1 %10662 }
 0xa60   : > { %v12467_v59 = vpop.eup %12466  ;;  %12470 = vrcp.f32 %v10378_v10  ;;  %v10379_v36 = vadd.f32 1.0, %v12465_v62  ;;  %v11460_v26 = vmul.f32 -1.442695, %v9997_v9 }
 0xa61   : > { %12472 = vrcp.f32 %v10376_v15  ;;  %v10377_v48 = vadd.f32 1.0, %v12467_v59 }
 0xa62   : > { %12474 = vrcp.f32 %v10379_v36  ;;  %v10668_v40 = vpop.permute.xlu0 %10667 }
 0xa63   : > { %12476 = vrcp.f32 %v10377_v48  ;;  %v10673_v25 = vpop.permute.xlu1 %10672 }
 0xa64   : > { %12478 = vpow2.f32 %v11459_v22 }
 0xa65   : > { %12480 = vpow2.f32 %v11462_v37 }
 0xa66   : > { %12482 = vpow2.f32 %v11460_v26 }
 0xa69   : > { %v12469_v41 = vpop.eup %12468 }
 0xa6a   : > { %v12471_v61 = vpop.eup %12470  ;;  %v10382_v29 = vadd.f32 1.0, %v12469_v41  ;;  %v11707_v28 = vpop.f32.mrb[152].mxu1 }
 0xa6b   : > { %v12473_v14 = vpop.eup %12472  ;;  %v10893_v53 = vsel %vm10554_vm0, %v12471_v61, %v10648_v1  ;;  %v10018_v47 = vadd.f32 %v11707_v28, %v17029_v17  ;;  %v10009_v6 = vpop.f32.mrb[153].mxu1 }
 0xa6c   : > { %v12475_v51 = vpop.eup %12474  ;;  %10958 = vst.msk [vmem:[%s17060_s3 + $0x90] sm:$0xff] %vm10939_vm1, %v10893_v53  ;;  %v10891_v63 = vsel %vm10554_vm0, %v12473_v14, %v10638_v18  ;;  %12484 = vrcp.f32 %v10382_v29  ;;  %v10010_v43 = vadd.f32 %v17029_v17, %v10009_v6  ;;  %v11708_v5 = vpop.f32.mrb[154].mxu1 }
 0xa6d   : > { %v12477_v45 = vpop.eup %12476  ;;  %10956 = vst.msk [vmem:[%s17060_s3 + $0x80] sm:$0xff] %vm10939_vm1, %v10891_v63  ;;  %v10894_v52 = vsel %vm10554_vm0, %v12475_v51, %v10653_v34  ;;  %v11465_v54 = vmul.f32 -1.442695, %v10018_v47  ;;  %v10021_v4 = vadd.f32 %v11708_v5, %v17029_v17  ;;  %v10012_v33 = vpop.f32.mrb[155].mxu1 }
 0xa6e   : > { %v12479_v42 = vpop.eup %12478  ;;  %10959 = vst.msk [vmem:[%s17060_s3 + $0x98] sm:$0xff] %vm10939_vm1, %v10894_v52  ;;  %v10892_v19 = vsel %vm10554_vm0, %v12477_v45, %v10643_v16  ;;  %v11463_v44 = vmul.f32 -1.442695, %v10010_v43  ;;  %v10013_v23 = vadd.f32 %v17029_v17, %v10012_v33  ;;  %v10678_v41 = vpop.permute.xlu0 %10677 }
 0xa6f   : > { %v12481_v46 = vpop.eup %12480  ;;  %10957 = vst.msk [vmem:[%s17060_s3 + $0x88] sm:$0xff] %vm10939_vm1, %v10892_v19  ;;  %v10380_v24 = vadd.f32 1.0, %v12479_v42  ;;  %12486 = vpow2.f32 %v11465_v54  ;;  %v11466_v7 = vmul.f32 -1.442695, %v10021_v4  ;;  %v10683_v28 = vpop.permute.xlu1 %10682 }
 0xa70   : > { %v12483_v2 = vpop.eup %12482  ;;  %v10383_v0 = vadd.f32 1.0, %v12481_v46  ;;  %12488 = vpow2.f32 %v11463_v44  ;;  %v11464_v39 = vmul.f32 -1.442695, %v10013_v23 }
 0xa71   : > { %12490 = vrcp.f32 %v10380_v24  ;;  %v10381_v31 = vadd.f32 1.0, %v12483_v2 }
 0xa72   : > { %12492 = vrcp.f32 %v10383_v0  ;;  %v10688_v1 = vpop.permute.xlu0 %10687 }
 0xa73   : > { %12494 = vrcp.f32 %v10381_v31  ;;  %v10693_v43 = vpop.permute.xlu1 %10692 }
 0xa74   : > { %12496 = vpow2.f32 %v11466_v7 }
 0xa75   : > { %12498 = vpow2.f32 %v11464_v39 }
 0xa76   : > { %v12485_v49 = vpop.eup %12484 }
 0xa77   : > { %v10897_v20 = vsel %vm10554_vm0, %v12485_v49, %v10668_v40  ;;  %v10698_v40 = vpop.permute.xlu0 %10697 }
 0xa78   : > { %10962 = vst.msk [vmem:[%s17060_s3 + $0xb0] sm:$0xff] %vm10939_vm1, %v10897_v20 }
 0xa79   : > { %v12487_v30 = vpop.eup %12486 }
 0xa7a   : > { %v12489_v50 = vpop.eup %12488  ;;  %v10386_v3 = vadd.f32 1.0, %v12487_v30  ;;  %v11711_v8 = vpop.f32.mrb[156].mxu1 }
 0xa7b   : > { %v12491_v32 = vpop.eup %12490  ;;  %v10384_v58 = vadd.f32 1.0, %v12489_v50  ;;  %v10034_v13 = vadd.f32 %v11711_v8, %v17029_v17  ;;  %v10025_v38 = vpop.f32.mrb[157].mxu1 }
 0xa7c   : > { %v12493_v56 = vpop.eup %12492  ;;  %v10895_v60 = vsel %vm10554_vm0, %v12491_v32, %v10658_v12  ;;  %12500 = vrcp.f32 %v10386_v3  ;;  %v10026_v55 = vadd.f32 %v17029_v17, %v10025_v38  ;;  %v11712_v35 = vpop.f32.mrb[158].mxu1 }
 0xa7d   : > { %v12495_v21 = vpop.eup %12494  ;;  %10960 = vst.msk [vmem:[%s17060_s3 + $0xa0] sm:$0xff] %vm10939_vm1, %v10895_v60  ;;  %v10898_v11 = vsel %vm10554_vm0, %v12493_v56, %v10673_v25  ;;  %12502 = vrcp.f32 %v10384_v58  ;;  %v11469_v10 = vmul.f32 -1.442695, %v10034_v13  ;;  %v10037_v9 = vadd.f32 %v11712_v35, %v17029_v17  ;;  %v10028_v62 = vpop.f32.mrb[159].mxu1 }
 0xa7e   : > { %v12497_v15 = vpop.eup %12496  ;;  %10963 = vst.msk [vmem:[%s17060_s3 + $0xb8] sm:$0xff] %vm10939_vm1, %v10898_v11  ;;  %v10896_v59 = vsel %vm10554_vm0, %v12495_v21, %v10663_v57  ;;  %v11467_v36 = vmul.f32 -1.442695, %v10026_v55  ;;  %v10029_v22 = vadd.f32 %v17029_v17, %v10028_v62  ;;  %v10703_v57 = vpop.permute.xlu1 %10702 }
 0xa7f   : > { %v12499_v48 = vpop.eup %12498  ;;  %10961 = vst.msk [vmem:[%s17060_s3 + $0xa8] sm:$0xff] %vm10939_vm1, %v10896_v59  ;;  %v10387_v37 = vadd.f32 1.0, %v12497_v15  ;;  %12504 = vpow2.f32 %v11469_v10  ;;  %v11470_v26 = vmul.f32 -1.442695, %v10037_v9  ;;  %v10708_v30 = vpop.permute.xlu0 %10707 }
 0xa80   : > { %v10385_v18 = vadd.f32 1.0, %v12499_v48  ;;  %12506 = vpow2.f32 %v11467_v36  ;;  %v11468_v16 = vmul.f32 -1.442695, %v10029_v22 }
 0xa81   : > { %12508 = vrcp.f32 %v10387_v37 }
 0xa82   : > { %12510 = vrcp.f32 %v10385_v18  ;;  %v10713_v13 = vpop.permute.xlu1 %10712 }
 0xa83   : > { %12512 = vpow2.f32 %v11470_v26 }
 0xa84   : > { %12514 = vpow2.f32 %v11468_v16 }
 0xa86   : > { %v12501_v61 = vpop.eup %12500 }
 0xa87   : > { %v12503_v29 = vpop.eup %12502  ;;  %v10901_v14 = vsel %vm10554_vm0, %v12501_v61, %v10688_v1  ;;  %v10718_v1 = vpop.permute.xlu0 %10717 }
 0xa88   : > { %10966 = vst.msk [vmem:[%s17060_s3 + $0xd0] sm:$0xff] %vm10939_vm1, %v10901_v14  ;;  %v10899_v53 = vsel %vm10554_vm0, %v12503_v29, %v10678_v41 }
 0xa89   : > { %v12505_v47 = vpop.eup %12504  ;;  %10964 = vst.msk [vmem:[%s17060_s3 + $0xc0] sm:$0xff] %vm10939_vm1, %v10899_v53 }
 0xa8a   : > { %v12507_v6 = vpop.eup %12506  ;;  %v10390_v51 = vadd.f32 1.0, %v12505_v47  ;;  %v11715_v34 = vpop.f32.mrb[160].mxu1 }
 0xa8b   : > { %v12509_v63 = vpop.eup %12508  ;;  %v10388_v5 = vadd.f32 1.0, %v12507_v6  ;;  %v10050_v45 = vadd.f32 %v11715_v34, %v17029_v17  ;;  %v10041_v52 = vpop.f32.mrb[161].mxu1 }
 0xa8c   : > { %v12511_v54 = vpop.eup %12510  ;;  %v10902_v4 = vsel %vm10554_vm0, %v12509_v63, %v10693_v43  ;;  %12516 = vrcp.f32 %v10390_v51  ;;  %v10042_v33 = vadd.f32 %v17029_v17, %v10041_v52  ;;  %v11716_v42 = vpop.f32.mrb[162].mxu1 }
 0xa8d   : > { %v12513_v19 = vpop.eup %12512  ;;  %10967 = vst.msk [vmem:[%s17060_s3 + $0xd8] sm:$0xff] %vm10939_vm1, %v10902_v4  ;;  %v10900_v44 = vsel %vm10554_vm0, %v12511_v54, %v10683_v28  ;;  %12518 = vrcp.f32 %v10388_v5  ;;  %v11473_v23 = vmul.f32 -1.442695, %v10050_v45  ;;  %v10053_v46 = vadd.f32 %v11716_v42, %v17029_v17  ;;  %v10044_v24 = vpop.f32.mrb[163].mxu1 }
 0xa8e   : > { %v12515_v2 = vpop.eup %12514  ;;  %10965 = vst.msk [vmem:[%s17060_s3 + $0xc8] sm:$0xff] %vm10939_vm1, %v10900_v44  ;;  %v10391_v0 = vadd.f32 1.0, %v12513_v19  ;;  %v11471_v7 = vmul.f32 -1.442695, %v10042_v33  ;;  %v10045_v31 = vadd.f32 %v17029_v17, %v10044_v24  ;;  %v10723_v28 = vpop.permute.xlu1 %10722 }
 0xa8f   : > { %v10389_v39 = vadd.f32 1.0, %v12515_v2  ;;  %12520 = vpow2.f32 %v11473_v23  ;;  %v11474_v12 = vmul.f32 -1.442695, %v10053_v46  ;;  %v10728_v14 = vpop.permute.xlu0 %10727 }
 0xa90   : > { %12522 = vrcp.f32 %v10391_v0  ;;  %v11472_v49 = vmul.f32 -1.442695, %v10045_v31 }
 0xa91   : > { %12524 = vrcp.f32 %v10389_v39 }
 0xa92   : > { %12526 = vpow2.f32 %v11471_v7  ;;  %v10733_v51 = vpop.permute.xlu1 %10732 }
 0xa93   : > { %12528 = vpow2.f32 %v11474_v12 }
 0xa94   : > { %12530 = vpow2.f32 %v11472_v49 }
 0xa96   : > { %v12517_v20 = vpop.eup %12516 }
 0xa97   : > { %v12519_v50 = vpop.eup %12518  ;;  %v10905_v3 = vsel %vm10554_vm0, %v12517_v20, %v10708_v30  ;;  %v10743_v30 = vpop.permute.xlu1 %10742 }
 0xa98   : > { %10970 = vst.msk [vmem:[%s17060_s3 + $0xf0] sm:$0xff] %vm10939_vm1, %v10905_v3  ;;  %v10903_v8 = vsel %vm10554_vm0, %v12519_v50, %v10698_v40 }
 0xa99   : > { %v12521_v32 = vpop.eup %12520  ;;  %10968 = vst.msk [vmem:[%s17060_s3 + $0xe0] sm:$0xff] %vm10939_vm1, %v10903_v8 }
 0xa9a   : > { %v12523_v58 = vpop.eup %12522  ;;  %v10394_v38 = vadd.f32 1.0, %v12521_v32  ;;  %v11719_v56 = vpop.f32.mrb[164].mxu1 }
 0xa9b   : > { %v12525_v25 = vpop.eup %12524  ;;  %v10906_v60 = vsel %vm10554_vm0, %v12523_v58, %v10713_v13  ;;  %v10066_v55 = vadd.f32 %v11719_v56, %v17029_v17  ;;  %v10057_v35 = vpop.f32.mrb[165].mxu1 }
 0xa9c   : > { %v12527_v21 = vpop.eup %12526  ;;  %10971 = vst.msk [vmem:[%s17060_s3 + $0xf8] sm:$0xff] %vm10939_vm1, %v10906_v60  ;;  %v10904_v11 = vsel %vm10554_vm0, %v12525_v25, %v10703_v57  ;;  %12532 = vrcp.f32 %v10394_v38  ;;  %v10058_v10 = vadd.f32 %v17029_v17, %v10057_v35  ;;  %v11720_v9 = vpop.f32.mrb[166].mxu1 }
 0xa9d   : > { %v12529_v62 = vpop.eup %12528  ;;  %10969 = vst.msk [vmem:[%s17060_s3 + $0xe8] sm:$0xff] %vm10939_vm1, %v10904_v11  ;;  %v10392_v15 = vadd.f32 1.0, %v12527_v21  ;;  %v10069_v59 = vadd.f32 %v11720_v9, %v17029_v17  ;;  %v10060_v36 = vpop.f32.mrb[167].mxu1  ;;  %v11477_v37 = vmul.f32 -1.442695, %v10066_v55 }
 0xa9e   : > { %v12531_v22 = vpop.eup %12530  ;;  %v10395_v48 = vadd.f32 1.0, %v12529_v62  ;;  %v10061_v26 = vadd.f32 %v17029_v17, %v10060_v36  ;;  %v11475_v16 = vmul.f32 -1.442695, %v10058_v10  ;;  %v10738_v57 = vpop.permute.xlu0 %10737 }
 0xa9f   : > { %12534 = vrcp.f32 %v10392_v15  ;;  %v10393_v18 = vadd.f32 1.0, %v12531_v22  ;;  %v11478_v41 = vmul.f32 -1.442695, %v10069_v59  ;;  %v10753_v38 = vpop.permute.xlu1 %10752 }
 0xaa0   : > { %12536 = vrcp.f32 %v10395_v48  ;;  %v11476_v61 = vmul.f32 -1.442695, %v10061_v26  ;;  %v17264_v48 = vld [vmem:[%s17404_s22] ss:$0 sm:$0xff] }
 0xaa1   : > { %12538 = vrcp.f32 %v10393_v18 }
 0xaa2   : > { %12540 = vpow2.f32 %v11477_v37  ;;  %v10748_v3 = vpop.permute.xlu0 %10747 }
 0xaa3   : > { %12542 = vpow2.f32 %v11475_v16 }
 0xaa4   : > { %12544 = vpow2.f32 %v11478_v41 }
 0xaa5   : > { %12546 = vpow2.f32 %v11476_v61 }
 0xaa6   : > { %v12533_v29 = vpop.eup %12532 }
 0xaa7   : > { %v10909_v53 = vsel %vm10554_vm0, %v12533_v29, %v10728_v14  ;;  %v10763_v14 = vpop.permute.xlu1 %10762 }
 0xaa8   : > { %10974 = vst.msk [vmem:[%s17060_s3 + $0x110] sm:$0xff] %vm10939_vm1, %v10909_v53 }
 0xaa9   : > { %v12535_v47 = vpop.eup %12534 }
 0xaaa   : > { %v12537_v6 = vpop.eup %12536  ;;  %v10907_v34 = vsel %vm10554_vm0, %v12535_v47, %v10718_v1  ;;  %v11723_v63 = vpop.f32.mrb[168].mxu1 }
 0xaab   : > { %v12539_v43 = vpop.eup %12538  ;;  %10972 = vst.msk [vmem:[%s17060_s3 + $0x100] sm:$0xff] %vm10939_vm1, %v10907_v34  ;;  %v10910_v5 = vsel %vm10554_vm0, %v12537_v6, %v10733_v51  ;;  %v10082_v45 = vadd.f32 %v11723_v63, %v17029_v17  ;;  %v10073_v52 = vpop.f32.mrb[169].mxu1 }
 0xaac   : > { %v12541_v54 = vpop.eup %12540  ;;  %10975 = vst.msk [vmem:[%s17060_s3 + $0x118] sm:$0xff] %vm10939_vm1, %v10910_v5  ;;  %v10908_v4 = vsel %vm10554_vm0, %v12539_v43, %v10723_v28  ;;  %v10074_v33 = vadd.f32 %v17029_v17, %v10073_v52  ;;  %v11724_v42 = vpop.f32.mrb[170].mxu1 }
 0xaad   : > { %v12543_v19 = vpop.eup %12542  ;;  %10973 = vst.msk [vmem:[%s17060_s3 + $0x108] sm:$0xff] %vm10939_vm1, %v10908_v4  ;;  %v10398_v44 = vadd.f32 1.0, %v12541_v54  ;;  %v10085_v23 = vadd.f32 %v11724_v42, %v17029_v17  ;;  %v10076_v46 = vpop.f32.mrb[171].mxu1  ;;  %v11481_v39 = vmul.f32 -1.442695, %v10082_v45 }
 0xaae   : > { %v12545_v24 = vpop.eup %12544  ;;  %v10396_v2 = vadd.f32 1.0, %v12543_v19  ;;  %v10077_v0 = vadd.f32 %v17029_v17, %v10076_v46  ;;  %v11479_v49 = vmul.f32 -1.442695, %v10074_v33  ;;  %v10758_v28 = vpop.permute.xlu0 %10757 }
 0xaaf   : > { %v12547_v7 = vpop.eup %12546  ;;  %12548 = vrcp.f32 %v10398_v44  ;;  %v10399_v31 = vadd.f32 1.0, %v12545_v24  ;;  %v11482_v40 = vmul.f32 -1.442695, %v10085_v23  ;;  %v10773_v54 = vpop.permute.xlu1 %10772 }
 0xab0   : > { %12550 = vrcp.f32 %v10396_v2  ;;  %v10397_v12 = vadd.f32 1.0, %v12547_v7  ;;  %v11480_v20 = vmul.f32 -1.442695, %v10077_v0 }
 0xab1   : > { %12552 = vrcp.f32 %v10399_v31 }
 0xab2   : > { %12554 = vrcp.f32 %v10397_v12  ;;  %v10768_v6 = vpop.permute.xlu0 %10767 }
 0xab3   : > { %12556 = vpow2.f32 %v11481_v39 }
 0xab4   : > { %12558 = vpow2.f32 %v11479_v49 }
 0xab5   : > { %12560 = vpow2.f32 %v11482_v40 }
 0xab6   : > { %12562 = vpow2.f32 %v11480_v20 }
 0xab9   : > { %v12549_v50 = vpop.eup %12548 }
 0xaba   : > { %v12551_v8 = vpop.eup %12550  ;;  %v10913_v32 = vsel %vm10554_vm0, %v12549_v50, %v10748_v3  ;;  %v11727_v58 = vpop.f32.mrb[172].mxu1 }
 0xabb   : > { %v12553_v13 = vpop.eup %12552  ;;  %10978 = vst.msk [vmem:[%s17060_s3 + $0x130] sm:$0xff] %vm10939_vm1, %v10913_v32  ;;  %v10911_v56 = vsel %vm10554_vm0, %v12551_v8, %v10738_v57  ;;  %v10098_v25 = vadd.f32 %v11727_v58, %v17029_v17  ;;  %v10089_v60 = vpop.f32.mrb[173].mxu1 }
 0xabc   : > { %v12555_v55 = vpop.eup %12554  ;;  %10976 = vst.msk [vmem:[%s17060_s3 + $0x120] sm:$0xff] %vm10939_vm1, %v10911_v56  ;;  %v10914_v35 = vsel %vm10554_vm0, %v12553_v13, %v10753_v38  ;;  %v10090_v21 = vadd.f32 %v17029_v17, %v10089_v60  ;;  %v11728_v11 = vpop.f32.mrb[174].mxu1 }
 0xabd   : > { %v12557_v10 = vpop.eup %12556  ;;  %10979 = vst.msk [vmem:[%s17060_s3 + $0x138] sm:$0xff] %vm10939_vm1, %v10914_v35  ;;  %v10912_v9 = vsel %vm10554_vm0, %v12555_v55, %v10743_v30  ;;  %v11485_v62 = vmul.f32 -1.442695, %v10098_v25  ;;  %v10101_v15 = vadd.f32 %v11728_v11, %v17029_v17  ;;  %v10092_v59 = vpop.f32.mrb[175].mxu1 }
 0xabe   : > { %v12559_v36 = vpop.eup %12558  ;;  %10977 = vst.msk [vmem:[%s17060_s3 + $0x128] sm:$0xff] %vm10939_vm1, %v10912_v9  ;;  %v10402_v22 = vadd.f32 1.0, %v12557_v10  ;;  %v10093_v37 = vadd.f32 %v17264_v48, %v10092_v59  ;;  %v11483_v61 = vmul.f32 -1.442695, %v10090_v21  ;;  %v10778_v50 = vpop.permute.xlu0 %10777 }
 0xabf   : > { %v12561_v26 = vpop.eup %12560  ;;  %v10400_v18 = vadd.f32 1.0, %v12559_v36  ;;  %12564 = vpow2.f32 %v11485_v62  ;;  %v11486_v1 = vmul.f32 -1.442695, %v10101_v15  ;;  %v10783_v58 = vpop.permute.xlu1 %10782 }
 0xac0   : > { %v12563_v16 = vpop.eup %12562  ;;  %12566 = vrcp.f32 %v10402_v22  ;;  %v10403_v41 = vadd.f32 1.0, %v12561_v26  ;;  %v11484_v29 = vmul.f32 -1.442695, %v10093_v37 }
 0xac1   : > { %12568 = vrcp.f32 %v10400_v18  ;;  %v10401_v17 = vadd.f32 1.0, %v12563_v16 }
 0xac2   : > { %12570 = vrcp.f32 %v10403_v41  ;;  %v10788_v8 = vpop.permute.xlu0 %10787 }
 0xac3   : > { %12572 = vrcp.f32 %v10401_v17  ;;  %v10793_v10 = vpop.permute.xlu1 %10792 }
 0xac4   : > { %12574 = vpow2.f32 %v11483_v61 }
 0xac5   : > { %12576 = vpow2.f32 %v11486_v1 }
 0xac6   : > { %12578 = vpow2.f32 %v11484_v29 }
 0xac9   : > { %v12565_v53 = vpop.eup %12564 }
 0xaca   : > { %v12567_v47 = vpop.eup %12566  ;;  %v10406_v51 = vadd.f32 1.0, %v12565_v53  ;;  %v11731_v34 = vpop.f32.mrb[176].mxu1 }
 0xacb   : > { %v12569_v63 = vpop.eup %12568  ;;  %v10917_v43 = vsel %vm10554_vm0, %v12567_v47, %v10768_v6  ;;  %v10114_v5 = vadd.f32 %v17264_v48, %v11731_v34  ;;  %v10105_v45 = vpop.f32.mrb[177].mxu1 }
 0xacc   : > { %v12571_v52 = vpop.eup %12570  ;;  %10982 = vst.msk [vmem:[%s17060_s3 + $0x150] sm:$0xff] %vm10939_vm1, %v10917_v43  ;;  %v10915_v4 = vsel %vm10554_vm0, %v12569_v63, %v10758_v28  ;;  %12580 = vrcp.f32 %v10406_v51  ;;  %v10106_v33 = vadd.f32 %v17264_v48, %v10105_v45  ;;  %v11732_v42 = vpop.f32.mrb[178].mxu1 }
 0xacd   : > { %v12573_v19 = vpop.eup %12572  ;;  %10980 = vst.msk [vmem:[%s17060_s3 + $0x140] sm:$0xff] %vm10939_vm1, %v10915_v4  ;;  %v10918_v44 = vsel %vm10554_vm0, %v12571_v52, %v10773_v54  ;;  %v11489_v23 = vmul.f32 -1.442695, %v10114_v5  ;;  %v10117_v46 = vadd.f32 %v17264_v48, %v11732_v42  ;;  %v10108_v24 = vpop.f32.mrb[179].mxu1 }
 0xace   : > { %v12575_v2 = vpop.eup %12574  ;;  %10983 = vst.msk [vmem:[%s17060_s3 + $0x158] sm:$0xff] %vm10939_vm1, %v10918_v44  ;;  %v10916_v0 = vsel %vm10554_vm0, %v12573_v19, %v10763_v14  ;;  %v11487_v7 = vmul.f32 -1.442695, %v10106_v33  ;;  %v10109_v31 = vadd.f32 %v17264_v48, %v10108_v24  ;;  %v10798_v53 = vpop.permute.xlu0 %10797 }
 0xacf   : > { %v12577_v39 = vpop.eup %12576  ;;  %10981 = vst.msk [vmem:[%s17060_s3 + $0x148] sm:$0xff] %vm10939_vm1, %v10916_v0  ;;  %v10404_v12 = vadd.f32 1.0, %v12575_v2  ;;  %12582 = vpow2.f32 %v11489_v23  ;;  %v11490_v20 = vmul.f32 -1.442695, %v10117_v46  ;;  %v10803_v34 = vpop.permute.xlu1 %10802 }
 0xad0   : > { %v12579_v49 = vpop.eup %12578  ;;  %v10407_v40 = vadd.f32 1.0, %v12577_v39  ;;  %12584 = vpow2.f32 %v11487_v7  ;;  %v11488_v30 = vmul.f32 -1.442695, %v10109_v31 }
 0xad1   : > { %12586 = vrcp.f32 %v10404_v12  ;;  %v10405_v57 = vadd.f32 1.0, %v12579_v49 }
 0xad2   : > { %12588 = vrcp.f32 %v10407_v40  ;;  %v10808_v6 = vpop.permute.xlu0 %10807 }
 0xad3   : > { %12590 = vrcp.f32 %v10405_v57  ;;  %v10813_v33 = vpop.permute.xlu1 %10812 }
 0xad4   : > { %12592 = vpow2.f32 %v11490_v20 }
 0xad5   : > { %12594 = vpow2.f32 %v11488_v30 }
 0xad6   : > { %v12581_v3 = vpop.eup %12580 }
 0xad7   : > { %v10921_v32 = vsel %vm10554_vm0, %v12581_v3, %v10788_v8  ;;  %v10818_v8 = vpop.permute.xlu0 %10817 }
 0xad8   : > { %10986 = vst.msk [vmem:[%s17060_s3 + $0x170] sm:$0xff] %vm10939_vm1, %v10921_v32 }
 0xad9   : > { %v12583_v13 = vpop.eup %12582 }
 0xada   : > { %v12585_v38 = vpop.eup %12584  ;;  %v10410_v56 = vadd.f32 1.0, %v12583_v13  ;;  %v11735_v25 = vpop.f32.mrb[180].mxu1 }
 0xadb   : > { %v12587_v60 = vpop.eup %12586  ;;  %v10408_v55 = vadd.f32 1.0, %v12585_v38  ;;  %v10130_v35 = vadd.f32 %v17264_v48, %v11735_v25  ;;  %v10121_v21 = vpop.f32.mrb[181].mxu1 }
 0xadc   : > { %v12589_v11 = vpop.eup %12588  ;;  %v10919_v9 = vsel %vm10554_vm0, %v12587_v60, %v10778_v50  ;;  %12596 = vrcp.f32 %v10410_v56  ;;  %v10122_v62 = vadd.f32 %v17264_v48, %v10121_v21  ;;  %v11736_v15 = vpop.f32.mrb[182].mxu1 }
 0xadd   : > { %v12591_v59 = vpop.eup %12590  ;;  %10984 = vst.msk [vmem:[%s17060_s3 + $0x160] sm:$0xff] %vm10939_vm1, %v10919_v9  ;;  %v10922_v36 = vsel %vm10554_vm0, %v12589_v11, %v10793_v10  ;;  %12598 = vrcp.f32 %v10408_v55  ;;  %v11493_v22 = vmul.f32 -1.442695, %v10130_v35  ;;  %v10133_v37 = vadd.f32 %v17264_v48, %v11736_v15  ;;  %v10124_v26 = vpop.f32.mrb[183].mxu1 }
 0xade   : > { %v12593_v18 = vpop.eup %12592  ;;  %10987 = vst.msk [vmem:[%s17060_s3 + $0x178] sm:$0xff] %vm10939_vm1, %v10922_v36  ;;  %v10920_v16 = vsel %vm10554_vm0, %v12591_v59, %v10783_v58  ;;  %v11491_v41 = vmul.f32 -1.442695, %v10122_v62  ;;  %v10125_v61 = vadd.f32 %v17264_v48, %v10124_v26  ;;  %v10823_v58 = vpop.permute.xlu1 %10822 }
 0xadf   : > { %v12595_v17 = vpop.eup %12594  ;;  %10985 = vst.msk [vmem:[%s17060_s3 + $0x168] sm:$0xff] %vm10939_vm1, %v10920_v16  ;;  %v10411_v1 = vadd.f32 1.0, %v12593_v18  ;;  %12600 = vpow2.f32 %v11493_v22  ;;  %v11494_v29 = vmul.f32 -1.442695, %v10133_v37  ;;  %v10828_v13 = vpop.permute.xlu0 %10827 }
 0xae0   : > { %v10409_v28 = vadd.f32 1.0, %v12595_v17  ;;  %12602 = vpow2.f32 %v11491_v41  ;;  %v11492_v14 = vmul.f32 -1.442695, %v10125_v61 }
 0xae1   : > { %12604 = vrcp.f32 %v10411_v1 }
 0xae2   : > { %12606 = vrcp.f32 %v10409_v28  ;;  %v10833_v35 = vpop.permute.xlu1 %10832 }
 0xae3   : > { %12608 = vpow2.f32 %v11494_v29 }
 0xae4   : > { %12610 = vpow2.f32 %v11492_v14 }
 0xae6   : > { %v12597_v47 = vpop.eup %12596 }
 0xae7   : > { %v12599_v51 = vpop.eup %12598  ;;  %v10925_v63 = vsel %vm10554_vm0, %v12597_v47, %v10808_v6  ;;  %v10838_v6 = vpop.permute.xlu0 %10837 }
 0xae8   : > { %10990 = vst.msk [vmem:[%s17060_s3 + $0x190] sm:$0xff] %vm10939_vm1, %v10925_v63  ;;  %v10923_v43 = vsel %vm10554_vm0, %v12599_v51, %v10798_v53 }
 0xae9   : > { %v12601_v5 = vpop.eup %12600  ;;  %10988 = vst.msk [vmem:[%s17060_s3 + $0x180] sm:$0xff] %vm10939_vm1, %v10923_v43 }
 0xaea   : > { %v12603_v45 = vpop.eup %12602  ;;  %v10414_v52 = vadd.f32 1.0, %v12601_v5  ;;  %v11739_v54 = vpop.f32.mrb[184].mxu1 }
 0xaeb   : > { %v12605_v4 = vpop.eup %12604  ;;  %v10412_v42 = vadd.f32 1.0, %v12603_v45  ;;  %v10146_v19 = vadd.f32 %v17264_v48, %v11739_v54  ;;  %v10137_v44 = vpop.f32.mrb[185].mxu1 }
 0xaec   : > { %v12607_v23 = vpop.eup %12606  ;;  %v10926_v46 = vsel %vm10554_vm0, %v12605_v4, %v10813_v33  ;;  %12612 = vrcp.f32 %v10414_v52  ;;  %v10138_v24 = vadd.f32 %v17264_v48, %v10137_v44  ;;  %v11740_v2 = vpop.f32.mrb[186].mxu1 }
 0xaed   : > { %v12609_v0 = vpop.eup %12608  ;;  %10991 = vst.msk [vmem:[%s17060_s3 + $0x198] sm:$0xff] %vm10939_vm1, %v10926_v46  ;;  %v10924_v7 = vsel %vm10554_vm0, %v12607_v23, %v10803_v34  ;;  %12614 = vrcp.f32 %v10412_v42  ;;  %v11497_v31 = vmul.f32 -1.442695, %v10146_v19  ;;  %v10149_v39 = vadd.f32 %v17264_v48, %v11740_v2  ;;  %v10140_v12 = vpop.f32.mrb[187].mxu1 }
 0xaee   : > { %v12611_v49 = vpop.eup %12610  ;;  %10989 = vst.msk [vmem:[%s17060_s3 + $0x188] sm:$0xff] %vm10939_vm1, %v10924_v7  ;;  %v10415_v40 = vadd.f32 1.0, %v12609_v0  ;;  %v11495_v20 = vmul.f32 -1.442695, %v10138_v24  ;;  %v10141_v57 = vadd.f32 %v17264_v48, %v10140_v12  ;;  %v10843_v34 = vpop.permute.xlu1 %10842 }
 0xaef   : > { %v10413_v30 = vadd.f32 1.0, %v12611_v49  ;;  %12616 = vpow2.f32 %v11497_v31  ;;  %v11498_v50 = vmul.f32 -1.442695, %v10149_v39  ;;  %v10848_v63 = vpop.permute.xlu0 %10847 }
 0xaf0   : > { %12618 = vrcp.f32 %v10415_v40  ;;  %v11496_v3 = vmul.f32 -1.442695, %v10141_v57 }
 0xaf1   : > { %12620 = vrcp.f32 %v10413_v30 }
 0xaf2   : > { %12622 = vpow2.f32 %v11495_v20  ;;  %v10853_v45 = vpop.permute.xlu1 %10852 }
 0xaf3   : > { %12624 = vpow2.f32 %v11498_v50  ;;  %v10858_v7 = vpop.permute.xlu0 %10857 }
 0xaf4   : > { %12626 = vpow2.f32 %v11496_v3 }
 0xaf6   : > { %v12613_v32 = vpop.eup %12612  ;;  %v10863_v31 = vpop.permute.xlu1 %10862 }
 0xaf7   : > { %v12615_v38 = vpop.eup %12614  ;;  %v10929_v56 = vsel %vm10554_vm0, %v12613_v32, %v10828_v13  ;;  %v10868_v12 = vpop.permute.xlu0 %10867 }
 0xaf8   : > { %10994 = vst.msk [vmem:[%s17060_s3 + $0x1b0] sm:$0xff] %vm10939_vm1, %v10929_v56  ;;  %v10927_v25 = vsel %vm10554_vm0, %v12615_v38, %v10818_v8 }
 0xaf9   : > { %v12617_v60 = vpop.eup %12616  ;;  %10992 = vst.msk [vmem:[%s17060_s3 + $0x1a0] sm:$0xff] %vm10939_vm1, %v10927_v25 }
 0xafa   : > { %v12619_v55 = vpop.eup %12618  ;;  %v10418_v21 = vadd.f32 1.0, %v12617_v60  ;;  %v11743_v11 = vpop.f32.mrb[188].mxu1 }
 0xafb   : > { %v12621_v10 = vpop.eup %12620  ;;  %v10930_v9 = vsel %vm10554_vm0, %v12619_v55, %v10833_v35  ;;  %v10162_v62 = vadd.f32 %v17264_v48, %v11743_v11  ;;  %v10153_v15 = vpop.f32.mrb[189].mxu1 }
 0xafc   : > { %v12623_v59 = vpop.eup %12622  ;;  %10995 = vst.msk [vmem:[%s17060_s3 + $0x1b8] sm:$0xff] %vm10939_vm1, %v10930_v9  ;;  %v10928_v36 = vsel %vm10554_vm0, %v12621_v10, %v10823_v58  ;;  %12628 = vrcp.f32 %v10418_v21  ;;  %v10154_v22 = vadd.f32 %v17264_v48, %v10153_v15  ;;  %v11744_v37 = vpop.f32.mrb[190].mxu1 }
 0xafd   : > { %v12625_v26 = vpop.eup %12624  ;;  %10993 = vst.msk [vmem:[%s17060_s3 + $0x1a8] sm:$0xff] %vm10939_vm1, %v10928_v36  ;;  %v10416_v18 = vadd.f32 1.0, %v12623_v59  ;;  %v10165_v16 = vadd.f32 %v17264_v48, %v11744_v37  ;;  %v10156_v41 = vpop.f32.mrb[191].mxu1  ;;  %v11501_v1 = vmul.f32 -1.442695, %v10162_v62 }
 0xafe   : > { %v12627_v61 = vpop.eup %12626  ;;  %v10419_v17 = vadd.f32 1.0, %v12625_v26  ;;  %v10157_v29 = vadd.f32 %v17264_v48, %v10156_v41  ;;  %v11499_v14 = vmul.f32 -1.442695, %v10154_v22  ;;  %v10873_v57 = vpop.permute.xlu1 %10872 }
 0xaff   : > { %12630 = vrcp.f32 %v10416_v18  ;;  %v10417_v28 = vadd.f32 1.0, %v12627_v61  ;;  %v11502_v53 = vmul.f32 -1.442695, %v10165_v16 }
 0xb00   : > { %12632 = vrcp.f32 %v10419_v17  ;;  %v11500_v47 = vmul.f32 -1.442695, %v10157_v29 }
 0xb01   : > { %12634 = vrcp.f32 %v10417_v28 }
 0xb02   : > { %12636 = vpow2.f32 %v11501_v1 }
 0xb03   : > { %12638 = vpow2.f32 %v11499_v14 }
 0xb04   : > { %12640 = vpow2.f32 %v11502_v53 }
 0xb05   : > { %12642 = vpow2.f32 %v11500_v47 }
 0xb06   : > { %v12629_v51 = vpop.eup %12628 }
 0xb07   : > { %v10933_v48 = vsel %vm10554_vm0, %v12629_v51, %v10848_v63 }
 0xb08   : > { %10998 = vst.msk [vmem:[%s17060_s3 + $0x1d0] sm:$0xff] %vm10939_vm1, %v10933_v48 }
 0xb09   : > { %v12631_v43 = vpop.eup %12630 }
 0xb0a   : > { %v12633_v5 = vpop.eup %12632  ;;  %v10931_v52 = vsel %vm10554_vm0, %v12631_v43, %v10838_v6 }
 0xb0b   : > { %v12635_v54 = vpop.eup %12634  ;;  %10996 = vst.msk [vmem:[%s17060_s3 + $0x1c0] sm:$0xff] %vm10939_vm1, %v10931_v52  ;;  %v10934_v4 = vsel %vm10554_vm0, %v12633_v5, %v10853_v45 }
 0xb0c   : > { %v12637_v33 = vpop.eup %12636  ;;  %10999 = vst.msk [vmem:[%s17060_s3 + $0x1d8] sm:$0xff] %vm10939_vm1, %v10934_v4  ;;  %v10932_v42 = vsel %vm10554_vm0, %v12635_v54, %v10843_v34 }
 0xb0d   : > { %v12639_v19 = vpop.eup %12638  ;;  %10997 = vst.msk [vmem:[%s17060_s3 + $0x1c8] sm:$0xff] %vm10939_vm1, %v10932_v42  ;;  %v10422_v44 = vadd.f32 1.0, %v12637_v33 }
 0xb0e   : > { %v12641_v23 = vpop.eup %12640  ;;  %v10420_v46 = vadd.f32 1.0, %v12639_v19 }
 0xb0f   : > { %v12643_v24 = vpop.eup %12642  ;;  %12644 = vrcp.f32 %v10422_v44  ;;  %v10423_v2 = vadd.f32 1.0, %v12641_v23 }
 0xb10   : > { %12646 = vrcp.f32 %v10420_v46  ;;  %v10421_v0 = vadd.f32 1.0, %v12643_v24 }
 0xb11   : > { %12648 = vrcp.f32 %v10423_v2 }
 0xb12   : > { %12650 = vrcp.f32 %v10421_v0 }
 0xb19   : > { %v12645_v39 = vpop.eup %12644 }
 0xb1a   : > { %v12647_v49 = vpop.eup %12646  ;;  %v10937_v40 = vsel %vm10554_vm0, %v12645_v39, %v10868_v12 }
 0xb1b   : > { %v12649_v20 = vpop.eup %12648  ;;  %11002 = vst.msk [vmem:[%s17060_s3 + $0x1f0] sm:$0xff] %vm10939_vm1, %v10937_v40  ;;  %v10935_v30 = vsel %vm10554_vm0, %v12647_v49, %v10858_v7 }
 0xb1c   : > { %v12651_v50 = vpop.eup %12650  ;;  %11000 = vst.msk [vmem:[%s17060_s3 + $0x1e0] sm:$0xff] %vm10939_vm1, %v10935_v30  ;;  %v10938_v3 = vsel %vm10554_vm0, %v12649_v20, %v10873_v57 }
 0xb1d   : > { %11003 = vst.msk [vmem:[%s17060_s3 + $0x1f8] sm:$0xff] %vm10939_vm1, %v10938_v3  ;;  %v10936_v8 = vsel %vm10554_vm0, %v12651_v50, %v10863_v31 }
 0xb1e   : > { %11001 = vst.msk [vmem:[%s17060_s3 + $0x1e8] sm:$0xff] %vm10939_vm1, %v10936_v8 }
 0xb1f PF: > { %s18105_s30 = sld [smem:[#allocation2_spill]] }
 0xb25   : > { %s33_s4 = sadd.s32 1, %s18105_s30  }
 0xb26   : > { %p30_p4 = scmp.ge.s32.totalorder %s33_s4, 4  }
 0xb28   :  { %32 = sbr.rel (!%p30_p4) target bundleno = 9 (0x9), region = 142 }

</bundles_post_ra>
